<compile_context>
chip_gen: v7x
topology: tpu7x:2x2x1
jax: 0.10.0
libtpu: 0.0.40
codegen_flags: <defaults>
</compile_context>

<pallas_src>
import functools

import numpy as np
import jax
import jax.numpy as jnp
from jax import lax
from jax.experimental import pallas as pl
from jax.experimental.pallas import tpu as pltpu


def _round_up(x, m):
    return (x + m - 1) // m * m


# ---------------------------------------------------------------------------
# pltpu.roll direction self-check (one tiny kernel, cached).
# _shift_down(x, off) must give out[..., i] = x[..., (i + off) % N] on lanes.
# ---------------------------------------------------------------------------
_ROLL_DIR = None


def _roll_direction():
    global _ROLL_DIR
    if _ROLL_DIR is None:
        try:
            def probe(x_ref, o_ref):
                o_ref[...] = pltpu.roll(x_ref[...], shift=1, axis=1)

            x = jnp.arange(8 * 128, dtype=jnp.float32).reshape(8, 128)
            y = np.asarray(pl.pallas_call(
                probe,
                out_shape=jax.ShapeDtypeStruct((8, 128), jnp.float32))(x))
            xn = np.asarray(x)
            if np.array_equal(y, np.roll(xn, 1, axis=1)):
                _ROLL_DIR = 1          # jnp.roll semantics: out[i] = x[i - s]
            elif np.array_equal(y, np.roll(xn, -1, axis=1)):
                _ROLL_DIR = -1         # opposite convention
            else:
                _ROLL_DIR = 0          # unknown -> slice+concat fallback
        except Exception:
            _ROLL_DIR = 0              # roll unavailable -> slice+concat
    return _ROLL_DIR


# ------------------------------ fused kernel --------------------------------

def _maxpooled_kernel(b0_ref, kmask_ref, feats_ref, rad_ref,
                      w_e0_ref, w_em_ref, b_em_ref,
                      w_r0f_ref, w_r0a_ref, w_rm_ref, b_r_ref,
                      out_ref, *,
                      W, R2, R_OUT, spp, depth_e, depth_r, K,
                      off_f, off_r, eps, roll_dir):
    """One batch element: per-sample embedding chain (max over spp), kernel
    regressor, apply_kernels and the exp/log-sum-exp accumulation, all
    VMEM-resident in a channels-on-sublanes / spatial-on-lanes layout."""
    f32 = jnp.float32
    bf16 = jnp.bfloat16
    C_E = b0_ref.shape[1]
    CP = b_r_ref.shape[1]
    CR = rad_ref.shape[2]

    def shift_down(x, off):
        """out[:, i] = x[:, (i + off) % N] along the lane axis."""
        if off == 0:
            return x
        n = x.shape[-1]
        if roll_dir == 1:
            return pltpu.roll(x, shift=(n - off) % n, axis=1)
        if roll_dir == -1:
            return pltpu.roll(x, shift=off % n, axis=1)
        return jnp.concatenate([x[:, off:], x[:, :off]], axis=1)

    def conv3x3(parts, bias, act):
        # parts: [(x bf16 (Cin_p, N), w bf16 (9*Cout_p, Cin_p))]; one MXU matmul
        # per part, then the 3x3 window is realised as 9 XLU lane shifts.
        y = None
        for xv, wv in parts:
            t = jnp.dot(wv, xv, preferred_element_type=f32)
            y = t if y is None else y + t
        cp = y.shape[0] // 9
        acc = bias                                         # (Cout_p, 1) f32
        for s in range(9):
            dy, dx = divmod(s, 3)
            acc = acc + shift_down(y[s * cp:(s + 1) * cp, :], dy * W + dx)
        if act == "leaky":
            acc = jnp.where(acc >= 0, acc, 0.01 * acc)
        elif act == "relu":
            acc = jnp.maximum(acc, 0.0)
        return acc                                         # (Cout_p, N) f32

    # --------- phase 1: embedding per sample, max-aggregated over spp -------
    def embed(sp):
        x = conv3x3([(feats_ref[0, sp], w_e0_ref[...])], b0_ref[0], "leaky")
        x = x.astype(bf16)

        def mid(l, xc):
            h = conv3x3([(xc, w_em_ref[l])], b_em_ref[l], "leaky")
            return h.astype(bf16)

        x = lax.fori_loop(0, depth_e - 2, mid, x)
        x = conv3x3([(x, w_em_ref[depth_e - 2])], b_em_ref[depth_e - 2], "relu")
        return x[:, :R2].astype(bf16)                      # (C_E, R2)

    agg = lax.fori_loop(
        0, spp, lambda sp, a: jnp.maximum(a, embed(sp)),
        jnp.full((C_E, R2), -jnp.inf, bf16))

    # --------- phase 2: regressor + apply_kernels + running LSE -------------
    kvalid = kmask_ref[...] > 0.5                          # (CP, R2) bool

    def sp_step(sp, carry):
        m_old, unnorm, sumw = carry
        # crop_like(features[:, sp], aggregated) via one lane shift
        f_sl = shift_down(feats_ref[0, sp], off_f)[:, :R2]
        kl = conv3x3([(f_sl, w_r0f_ref[...]), (agg, w_r0a_ref[...])],
                     b_r_ref[0], "leaky" if depth_r > 1 else "linear")
        for l in range(depth_r - 2):
            kl = conv3x3([(kl.astype(bf16), w_rm_ref[l])], b_r_ref[l + 1],
                         "leaky")
        if depth_r > 1:
            kl = conv3x3([(kl.astype(bf16), w_rm_ref[depth_r - 2])],
                         b_r_ref[depth_r - 1], "linear")   # (CP, R2) logits

        masked = jnp.where(kvalid, kl, -jnp.inf)
        cur = jnp.max(jnp.max(masked, axis=1, keepdims=True),
                      axis=0, keepdims=True)               # (1, 1)
        m_new = jnp.maximum(m_old, cur)
        ker = jnp.exp(masked - m_new)                      # 0 at invalid lanes

        rad_sl = shift_down(rad_ref[0, sp], off_r)[:, :R2]  # (CR, R2) f32
        ws = jnp.zeros((CR, R2), f32)
        for q in range(K * K):
            dy, dx = divmod(q, K)
            ws = ws + ker[q:q + 1, :] * shift_down(rad_sl, dy * W + dx)
        ks = jnp.sum(ker, axis=0, keepdims=True)           # (1, R2)

        resc = jnp.exp(m_old - m_new)                      # (1, 1); 0 on sp==0
        return (m_new, unnorm * resc + ws, sumw * resc + ks)

    carry0 = (jnp.full((1, 1), -jnp.inf, f32),
              jnp.zeros((CR, R2), f32),
              jnp.zeros((1, R2), f32))
    _, unnorm, sumw = lax.fori_loop(0, spp, sp_step, carry0)

    out = unnorm * pl.reciprocal(sumw + eps, approx=True)
    out_ref[0] = out[:, :R_OUT]                            # lane-dense write


# ------------------------------ forward wrapper ------------------------------

@functools.partial(jax.jit, static_argnames=("ksize",))
def maxpooled_forward(features, radiance, gfeatures, emb_params, reg_params,
                      ksize):
    bs, spp, nf, h, w = features.shape
    ngf = gfeatures.shape[1]
    cr = radiance.shape[2]
    depth_e, depth_r = len(emb_params), len(reg_params)
    width = emb_params[0][0].shape[3]
    K = ksize
    eps = 1e-8

    assert h == w, "square inputs assumed"
    assert depth_e >= 2 and depth_r >= 2
    kh = h - 2 * (depth_e + depth_r)         # spatial size of predicted kernels
    needed = kh + K - 1
    # TODO(synk): apply_kernels' `needed > h` branch (crop the predicted kernel
    # instead of the radiance) is not implemented; fail loudly if it triggers.
    assert 1 <= kh and needed <= h, "unsupported configuration"
    crop_f = depth_e                          # crop_like(features, aggregated)
    crop_r = (h - needed) // 2                # radiance centre crop

    HW = h * w
    HWp = _round_up(HW, 128)
    row_cost = 2 * w + 2
    r_k = kh * w                              # lanes holding valid kernel logits
    r_agg = r_k + depth_r * row_cost          # embedding lanes the regressor needs
    reach_reg = (kh + 2 * depth_r - 1) * (w + 1) + 1
    reach_rad = (kh + K - 2) * (w + 1) + 1
    R2 = _round_up(max(r_agg, reach_reg, reach_rad), 128)   # phase-2 lane width
    R_OUT = _round_up(r_k, 128)                             # lane-dense output
    F_pad = _round_up(nf, 8)
    C_E = _round_up(width, 8)
    CP = max(C_E, _round_up(K * K, 8))
    off_f = crop_f * (w + 1)
    off_r = crop_r * (w + 1)

    assert R2 <= HWp and R_OUT <= R2
    assert emb_params[0][0].shape[2] == ngf + nf
    assert reg_params[0][0].shape[2] == width + nf
    assert reg_params[-1][0].shape[3] == K * K

    # ---- pack parameters into the lanes-major conv layout ------------------
    def pack_w(wgt, cin_pad, cout_pad):
        cin, cout = wgt.shape[2], wgt.shape[3]
        wt = jnp.transpose(wgt, (0, 1, 3, 2)).reshape(9, cout, cin)
        wt = jnp.pad(wt, ((0, 0), (0, cout_pad - cout), (0, cin_pad - cin)))
        return wt.reshape(9 * cout_pad, cin_pad).astype(jnp.bfloat16)

    def pack_b(b, cout_pad):
        b = b.reshape(-1)
        b = jnp.pad(b, (0, cout_pad - b.shape[0]))
        return b.reshape(cout_pad, 1).astype(jnp.float32)

    w0, b0 = emb_params[0]
    # Fold gfeatures into an effective per-batch layer-0 bias: gf is spatially
    # constant, so its conv contribution is a per-output-channel constant.
    w0_bf = w0.astype(jnp.bfloat16).astype(jnp.float32)
    gf = gfeatures.reshape(bs, ngf).astype(jnp.bfloat16).astype(jnp.float32)
    b0_eff = b0.reshape(1, width) + gf @ jnp.sum(w0_bf[:, :, :ngf, :],
                                                 axis=(0, 1))
    b0_eff = jnp.pad(b0_eff, ((0, 0), (0, C_E - width)))
    b0_eff = b0_eff.reshape(bs, C_E, 1).astype(jnp.float32)

    w_e0 = pack_w(w0[:, :, ngf:, :], F_pad, C_E)           # features part only
    w_em = jnp.stack([pack_w(wl, C_E, C_E) for wl, _ in emb_params[1:]])
    b_em = jnp.stack([pack_b(bl, C_E) for _, bl in emb_params[1:]])

    wr0 = reg_params[0][0]
    w_r0f = pack_w(wr0[:, :, :nf, :], F_pad, CP)            # features part
    w_r0a = pack_w(wr0[:, :, nf:, :], C_E, CP)              # aggregated part
    w_rm = jnp.stack([pack_w(wl, CP, CP) for wl, _ in reg_params[1:]])
    b_r = jnp.stack([pack_b(bl, CP) for _, bl in reg_params])

    # ---- flatten inputs: channels on sublanes, spatial rows on lanes -------
    feats_flat = features.reshape(bs, spp, nf, HW)
    feats_flat = jnp.pad(feats_flat,
                         ((0, 0), (0, 0), (0, F_pad - nf), (0, HWp - HW)))
    feats_flat = feats_flat.astype(jnp.bfloat16)
    rad_flat = jnp.pad(radiance.reshape(bs, spp, cr, HW),
                       ((0, 0), (0, 0), (0, 0), (0, HWp - HW)))

    lane = jnp.arange(R2)
    lane_ok = ((lane // w) < kh) & ((lane % w) < kh)
    kmask = ((jnp.arange(CP)[:, None] < K * K) & lane_ok[None, :])
    kmask = kmask.astype(jnp.float32)

    kern = functools.partial(
        _maxpooled_kernel,
        W=w, R2=R2, R_OUT=R_OUT, spp=spp, depth_e=depth_e, depth_r=depth_r,
        K=K, off_f=off_f, off_r=off_r, eps=eps, roll_dir=_roll_direction())

    out_flat = pl.pallas_call(
        kern,
        out_shape=jax.ShapeDtypeStruct((bs, cr, R_OUT), jnp.float32),
        grid=(bs,),
        in_specs=[
            pl.BlockSpec((1, C_E, 1), lambda b: (b, 0, 0)),               # b0
            pl.BlockSpec((CP, R2), lambda b: (0, 0)),                     # mask
            pl.BlockSpec((1, spp, F_pad, HWp), lambda b: (b, 0, 0, 0)),   # feat
            pl.BlockSpec((1, spp, cr, HWp), lambda b: (b, 0, 0, 0)),      # rad
            pl.BlockSpec((9 * C_E, F_pad), lambda b: (0, 0)),             # w_e0
            pl.BlockSpec((depth_e - 1, 9 * C_E, C_E), lambda b: (0, 0, 0)),
            pl.BlockSpec((depth_e - 1, C_E, 1), lambda b: (0, 0, 0)),
            pl.BlockSpec((9 * CP, F_pad), lambda b: (0, 0)),              # r0f
            pl.BlockSpec((9 * CP, C_E), lambda b: (0, 0)),                # r0a
            pl.BlockSpec((depth_r - 1, 9 * CP, CP), lambda b: (0, 0, 0)),
            pl.BlockSpec((depth_r, CP, 1), lambda b: (0, 0, 0)),          # b_r
        ],
        out_specs=pl.BlockSpec((1, cr, R_OUT), lambda b: (b, 0, 0)),
        compiler_params=pltpu.CompilerParams(
            dimension_semantics=("parallel",),
            vmem_limit_bytes=32 * 1024 * 1024),
    )(b0_eff, kmask, feats_flat, rad_flat, w_e0, w_em, b_em,
      w_r0f, w_r0a, w_rm, b_r)

    out = out_flat[:, :, :r_k].reshape(bs, cr, kh, w)[:, :, :, :kh]
    return {"radiance": out}


# ------------------------- pure-JAX reference --------------------------------

def _reference_forward(features, radiance, gfeatures, emb_params, reg_params,
                       ksize, eps=1e-8):
    """Mirrors the PyTorch module (bf16 weights/activations, f32 accumulation,
    to match the kernel's MXU precision)."""
    bs, spp, nf, h, w = features.shape
    ngf = gfeatures.shape[1]
    K = ksize

    def conv_chain(x, params, output_type):
        n = len(params)
        for i, (wgt, b) in enumerate(params):
            y = lax.conv_general_dilated(
                x.astype(jnp.bfloat16), wgt.astype(jnp.bfloat16),
                window_strides=(1, 1), padding="VALID",
                dimension_numbers=("NCHW", "HWIO", "NCHW"),
                preferred_element_type=jnp.float32)
            y = y + b.reshape(1, -1, 1, 1)
            if i < n - 1:
                y = jnp.where(y >= 0, y, 0.01 * y)
            elif output_type == "relu":
                y = jnp.maximum(y, 0.0)
            x = y
        return x

    gf = jnp.broadcast_to(gfeatures, (bs, ngf, h, w))
    agg = None
    for sp in range(spp):
        e = conv_chain(jnp.concatenate([gf, features[:, sp]], axis=1),
                       emb_params, "relu")
        agg = e if agg is None else jnp.maximum(agg, e)

    ce = (h - agg.shape[2]) // 2
    unnorm = sumw = maxk = None
    for sp in range(spp):
        f = features[:, sp][:, :, ce:h - ce, ce:w - ce]
        kern = conv_chain(jnp.concatenate([f, agg], axis=1), reg_params,
                          "linear")
        cur = jnp.max(kern.reshape(bs, -1), axis=1).reshape(bs, 1, 1, 1)
        if sp == 0:
            maxk = cur
        else:
            oldmax, maxk = maxk, jnp.maximum(maxk, cur)
        kern = jnp.exp(kern - maxk)
        kh_ = kern.shape[2]
        crop = (h - (kh_ + K - 1)) // 2
        noisy = radiance[:, sp][:, :, crop:h - crop, crop:w - crop]
        ws = 0.0
        for q in range(K * K):
            dy, dx = divmod(q, K)
            ws = ws + kern[:, q:q + 1] * noisy[:, :, dy:dy + kh_, dx:dx + kh_]
        ks = jnp.sum(kern, axis=1, keepdims=True)
        if sp == 0:
            unnorm, sumw = ws, ks
        else:
            r = jnp.exp(oldmax - maxk)
            unnorm = unnorm * r + ws
            sumw = sumw * r + ks
    return unnorm / (sumw + eps)


# ------------------------------- parameters ----------------------------------

def init_conv_chain(key, cin, cout, width, depth):
    """ConvChain: `depth` valid 3x3 convs (cin->width->...->width->cout), HWIO."""
    params = []
    keys = jax.random.split(key, 2 * depth)
    for d in range(depth):
        _in = cin if d == 0 else width
        _out = cout if d == depth - 1 else width
        scale = (2.0 / (9.0 * _in)) ** 0.5
        wgt = scale * jax.random.normal(keys[2 * d], (3, 3, _in, _out),
                                        jnp.float32)
        bias = 0.1 * jax.random.normal(keys[2 * d + 1], (1, _out), jnp.float32)
        params.append((wgt, bias))
    return tuple(params)


# ---------------------------------- main --------------------------------------

if __name__ == "__main__":
    key = jax.random.PRNGKey(0)
    k_feat, k_rad, k_gf, k_emb, k_reg = jax.random.split(key, 5)

    bs, spp = 2, 2
    nfeatures, n_gfeatures = 4, 2      # self.pre.nfeatures / n_gfeatures
    h = w = 32
    width = 16                         # MaxPooled(width=16)
    denoise_ksize = 3                  # MaxPooled(ksize=3): 3x3 predicted filters
    rad_ch = 3

    features = jax.random.normal(k_feat, (bs, spp, nfeatures, h, w), jnp.float32)
    radiance = jax.random.uniform(k_rad, (bs, spp, rad_ch, h, w), jnp.float32)
    gfeatures = jax.random.normal(k_gf, (bs, n_gfeatures, 1, 1), jnp.float32)

    # embedding: ConvChain(nfeatures + n_gfeatures -> width, depth=7)
    emb_params = init_conv_chain(k_emb, nfeatures + n_gfeatures, width, width,
                                 depth=7)
    # kernel_regressor: ConvChain(width + nfeatures -> ksize*ksize, depth=3)
    reg_params = init_conv_chain(k_reg, width + nfeatures,
                                 denoise_ksize * denoise_ksize, width, depth=3)

    _roll_direction()                  # warm the pltpu.roll direction probe

    out = maxpooled_forward(features, radiance, gfeatures,
                            emb_params, reg_params, ksize=denoise_ksize)
    out = jax.block_until_ready(out)["radiance"]

    # 7 valid 3x3 convs (-14) then 3 more (-6) -> spatial (h-20, w-20)
    assert out.shape == (bs, rad_ch, h - 20, w - 20), out.shape
    assert bool(jnp.all(jnp.isfinite(out)))

    ref = _reference_forward(features, radiance, gfeatures, emb_params,
                             reg_params, denoise_ksize)
    err = float(jnp.max(jnp.abs(out - ref)))
    assert err < 2e-2, f"kernel vs reference mismatch: max abs err = {err}"
    print("KERNEL_OK")
</pallas_src>

<mosaic_0001>
module attributes {stable_mosaic.version = 11 : i64} {
  func.func @probe(%arg0: memref<8x128xf32, #tpu.memory_space<vmem>>, %arg1: memref<8x128xf32, #tpu.memory_space<vmem>>) attributes {dimension_semantics = [], scalar_prefetch = 0 : i64, scratch_operands = 0 : i64, tpu.core_type = #tpu.core_type<tc>} {
    %c0 = arith.constant 0 : index
    %c0_0 = arith.constant 0 : index
    %0 = vector.load %arg0[%c0, %c0_0] : memref<8x128xf32, #tpu.memory_space<vmem>>, vector<8x128xf32>
    %c1_i32 = arith.constant 1 : i32
    %1 = tpu.dynamic_rotate %0 by %c1_i32 dim 1 : vector<8x128xf32>, i32 -> vector<8x128xf32>
    %c0_1 = arith.constant 0 : index
    %c0_2 = arith.constant 0 : index
    %2 = vector.load %arg1[%c0_1, %c0_2] : memref<8x128xf32, #tpu.memory_space<vmem>>, vector<8x128xf32>
    tpu.vector_store %arg1[%c0_1, %c0_2], %1 {strides = array<i32>} : memref<8x128xf32, #tpu.memory_space<vmem>>, vector<8x128xf32>,
    return
  }
}

module attributes {stable_mosaic.version = 11 : i64} {
  func.func @_maxpooled_kernel(%arg0: i32, %arg1: memref<1x16x1xf32, #tpu.memory_space<vmem>>, %arg2: memref<16x640xf32, #tpu.memory_space<vmem>>, %arg3: memref<1x2x8x1024xbf16, #tpu.memory_space<vmem>>, %arg4: memref<1x2x3x1024xf32, #tpu.memory_space<vmem>>, %arg5: memref<144x8xbf16, #tpu.memory_space<vmem>>, %arg6: memref<6x144x16xbf16, #tpu.memory_space<vmem>>, %arg7: memref<6x16x1xf32, #tpu.memory_space<vmem>>, %arg8: memref<144x8xbf16, #tpu.memory_space<vmem>>, %arg9: memref<144x16xbf16, #tpu.memory_space<vmem>>, %arg10: memref<2x144x16xbf16, #tpu.memory_space<vmem>>, %arg11: memref<3x16x1xf32, #tpu.memory_space<vmem>>, %arg12: memref<1x3x384xf32, #tpu.memory_space<vmem>>) attributes {dimension_semantics = [#tpu.dimension_semantics<parallel>], iteration_bounds = array<i64: 2>, scalar_prefetch = 0 : i64, scratch_operands = 0 : i64, tpu.core_type = #tpu.core_type<tc>, window_params = [{transform_indices = @transform_0, window_bounds = array<i64: 1, 16, 1>}, {pipeline_mode = #tpu.pipeline_mode<synchronous>, transform_indices = @transform_1, window_bounds = array<i64: 16, 640>}, {transform_indices = @transform_2, window_bounds = array<i64: 1, 2, 8, 1024>}, {transform_indices = @transform_3, window_bounds = array<i64: 1, 2, 3, 1024>}, {pipeline_mode = #tpu.pipeline_mode<synchronous>, transform_indices = @transform_4, window_bounds = array<i64: 144, 8>}, {pipeline_mode = #tpu.pipeline_mode<synchronous>, transform_indices = @transform_5, window_bounds = array<i64: 6, 144, 16>}, {pipeline_mode = #tpu.pipeline_mode<synchronous>, transform_indices = @transform_6, window_bounds = array<i64: 6, 16, 1>}, {pipeline_mode = #tpu.pipeline_mode<synchronous>, transform_indices = @transform_7, window_bounds = array<i64: 144, 8>}, {pipeline_mode = #tpu.pipeline_mode<synchronous>, transform_indices = @transform_8, window_bounds = array<i64: 144, 16>}, {pipeline_mode = #tpu.pipeline_mode<synchronous>, transform_indices = @transform_9, window_bounds = array<i64: 2, 144, 16>}, {pipeline_mode = #tpu.pipeline_mode<synchronous>, transform_indices = @transform_10, window_bounds = array<i64: 3, 16, 1>}, {transform_indices = @transform_11, window_bounds = array<i64: 1, 3, 384>}]} {
    %cst = arith.constant 0xFF80 : bf16
    %0 = vector.broadcast %cst : bf16 to vector<16x640xbf16>
    %c0_i32 = arith.constant 0 : i32
    %c2_i32 = arith.constant 2 : i32
    %1 = arith.addi %c0_i32, %c2_i32 : i32
    %c1_i32 = arith.constant 1 : i32
    %2 = scf.for %arg13 = %c0_i32 to %1 step %c1_i32 iter_args(%arg14 = %0) -> (vector<16x640xbf16>)  : i32 {
      %c0_14 = arith.constant 0 : index
      %20 = arith.index_cast %arg13 : i32 to index
      %c0_15 = arith.constant 0 : index
      %c0_16 = arith.constant 0 : index
      %21 = vector.load %arg3[%c0_14, %20, %c0_15, %c0_16] : memref<1x2x8x1024xbf16, #tpu.memory_space<vmem>>, vector<1x1x8x1024xbf16>
      %22 = vector.shape_cast %21 : vector<1x1x8x1024xbf16> to vector<8x1024xbf16>
      %c0_17 = arith.constant 0 : index
      %c0_18 = arith.constant 0 : index
      %23 = vector.load %arg5[%c0_17, %c0_18] : memref<144x8xbf16, #tpu.memory_space<vmem>>, vector<144x8xbf16>
      %c0_19 = arith.constant 0 : index
      %c0_20 = arith.constant 0 : index
      %c0_21 = arith.constant 0 : index
      %24 = vector.load %arg1[%c0_19, %c0_20, %c0_21] : memref<1x16x1xf32, #tpu.memory_space<vmem>>, vector<1x16x1xf32>
      %25 = vector.shape_cast %24 : vector<1x16x1xf32> to vector<16x1xf32>
      %cst_22 = arith.constant dense<0.000000e+00> : vector<144x1024xf32>
      %26 = tpu.matmul %23, %22, %cst_22 {dimension_numbers = #tpu.dot_dimension_numbers<[1], [0], [0], [1], [0, 0, 1, 1], [], []>} : vector<144x8xbf16>, vector<8x1024xbf16>, vector<144x1024xf32> -> vector<144x1024xf32>
      %27 = vector.extract_strided_slice %26 {offsets = [0, 0], sizes = [16, 1024], strides = [1, 1]} : vector<144x1024xf32> to vector<16x1024xf32>
      %28 = vector.broadcast %25 : vector<16x1xf32> to vector<16x1024xf32>
      %29 = arith.addf %28, %27 : vector<16x1024xf32>
      %30 = vector.extract_strided_slice %26 {offsets = [16, 0], sizes = [16, 1024], strides = [1, 1]} : vector<144x1024xf32> to vector<16x1024xf32>
      %31 = vector.extract_strided_slice %30 {offsets = [0, 1], sizes = [16, 1023], strides = [1, 1]} : vector<16x1024xf32> to vector<16x1023xf32>
      %32 = vector.extract_strided_slice %30 {offsets = [0, 0], sizes = [16, 1], strides = [1, 1]} : vector<16x1024xf32> to vector<16x1xf32>
      %33 = tpu.concatenate %31, %32 in 1 : vector<16x1023xf32>, vector<16x1xf32> -> vector<16x1024xf32>
      %34 = arith.addf %29, %33 : vector<16x1024xf32>
      %35 = vector.extract_strided_slice %26 {offsets = [32, 0], sizes = [16, 1024], strides = [1, 1]} : vector<144x1024xf32> to vector<16x1024xf32>
      %36 = vector.extract_strided_slice %35 {offsets = [0, 2], sizes = [16, 1022], strides = [1, 1]} : vector<16x1024xf32> to vector<16x1022xf32>
      %37 = vector.extract_strided_slice %35 {offsets = [0, 0], sizes = [16, 2], strides = [1, 1]} : vector<16x1024xf32> to vector<16x2xf32>
      %38 = tpu.concatenate %36, %37 in 1 : vector<16x1022xf32>, vector<16x2xf32> -> vector<16x1024xf32>
      %39 = arith.addf %34, %38 : vector<16x1024xf32>
      %40 = vector.extract_strided_slice %26 {offsets = [48, 0], sizes = [16, 1024], strides = [1, 1]} : vector<144x1024xf32> to vector<16x1024xf32>
      %41 = vector.extract_strided_slice %40 {offsets = [0, 32], sizes = [16, 992], strides = [1, 1]} : vector<16x1024xf32> to vector<16x992xf32>
      %42 = vector.extract_strided_slice %40 {offsets = [0, 0], sizes = [16, 32], strides = [1, 1]} : vector<16x1024xf32> to vector<16x32xf32>
      %43 = tpu.concatenate %41, %42 in 1 : vector<16x992xf32>, vector<16x32xf32> -> vector<16x1024xf32>
      %44 = arith.addf %39, %43 : vector<16x1024xf32>
      %45 = vector.extract_strided_slice %26 {offsets = [64, 0], sizes = [16, 1024], strides = [1, 1]} : vector<144x1024xf32> to vector<16x1024xf32>
      %46 = vector.extract_strided_slice %45 {offsets = [0, 33], sizes = [16, 991], strides = [1, 1]} : vector<16x1024xf32> to vector<16x991xf32>
      %47 = vector.extract_strided_slice %45 {offsets = [0, 0], sizes = [16, 33], strides = [1, 1]} : vector<16x1024xf32> to vector<16x33xf32>
      %48 = tpu.concatenate %46, %47 in 1 : vector<16x991xf32>, vector<16x33xf32> -> vector<16x1024xf32>
      %49 = arith.addf %44, %48 : vector<16x1024xf32>
      %50 = vector.extract_strided_slice %26 {offsets = [80, 0], sizes = [16, 1024], strides = [1, 1]} : vector<144x1024xf32> to vector<16x1024xf32>
      %51 = vector.extract_strided_slice %50 {offsets = [0, 34], sizes = [16, 990], strides = [1, 1]} : vector<16x1024xf32> to vector<16x990xf32>
      %52 = vector.extract_strided_slice %50 {offsets = [0, 0], sizes = [16, 34], strides = [1, 1]} : vector<16x1024xf32> to vector<16x34xf32>
      %53 = tpu.concatenate %51, %52 in 1 : vector<16x990xf32>, vector<16x34xf32> -> vector<16x1024xf32>
      %54 = arith.addf %49, %53 : vector<16x1024xf32>
      %55 = vector.extract_strided_slice %26 {offsets = [96, 0], sizes = [16, 1024], strides = [1, 1]} : vector<144x1024xf32> to vector<16x1024xf32>
      %56 = vector.extract_strided_slice %55 {offsets = [0, 64], sizes = [16, 960], strides = [1, 1]} : vector<16x1024xf32> to vector<16x960xf32>
      %57 = vector.extract_strided_slice %55 {offsets = [0, 0], sizes = [16, 64], strides = [1, 1]} : vector<16x1024xf32> to vector<16x64xf32>
      %58 = tpu.concatenate %56, %57 in 1 : vector<16x960xf32>, vector<16x64xf32> -> vector<16x1024xf32>
      %59 = arith.addf %54, %58 : vector<16x1024xf32>
      %60 = vector.extract_strided_slice %26 {offsets = [112, 0], sizes = [16, 1024], strides = [1, 1]} : vector<144x1024xf32> to vector<16x1024xf32>
      %61 = vector.extract_strided_slice %60 {offsets = [0, 65], sizes = [16, 959], strides = [1, 1]} : vector<16x1024xf32> to vector<16x959xf32>
      %62 = vector.extract_strided_slice %60 {offsets = [0, 0], sizes = [16, 65], strides = [1, 1]} : vector<16x1024xf32> to vector<16x65xf32>
      %63 = tpu.concatenate %61, %62 in 1 : vector<16x959xf32>, vector<16x65xf32> -> vector<16x1024xf32>
      %64 = arith.addf %59, %63 : vector<16x1024xf32>
      %65 = vector.extract_strided_slice %26 {offsets = [128, 0], sizes = [16, 1024], strides = [1, 1]} : vector<144x1024xf32> to vector<16x1024xf32>
      %66 = vector.extract_strided_slice %65 {offsets = [0, 66], sizes = [16, 958], strides = [1, 1]} : vector<16x1024xf32> to vector<16x958xf32>
      %67 = vector.extract_strided_slice %65 {offsets = [0, 0], sizes = [16, 66], strides = [1, 1]} : vector<16x1024xf32> to vector<16x66xf32>
      %68 = tpu.concatenate %66, %67 in 1 : vector<16x958xf32>, vector<16x66xf32> -> vector<16x1024xf32>
      %69 = arith.addf %64, %68 : vector<16x1024xf32>
      %cst_23 = arith.constant 0.000000e+00 : f32
      %70 = vector.broadcast %cst_23 : f32 to vector<16x1024xf32>
      %71 = arith.cmpf oge, %69, %70 : vector<16x1024xf32>
      %cst_24 = arith.constant 0.00999999977 : f32
      %72 = vector.broadcast %cst_24 : f32 to vector<16x1024xf32>
      %73 = arith.mulf %72, %69 : vector<16x1024xf32>
      %74 = arith.select %71, %69, %73 : vector<16x1024xi1>, vector<16x1024xf32>
      %75 = arith.truncf %74 : vector<16x1024xf32> to vector<16x1024xbf16>
      %c0_i32_25 = arith.constant 0 : i32
      %c5_i32 = arith.constant 5 : i32
      %76 = arith.addi %c0_i32_25, %c5_i32 : i32
      %c1_i32_26 = arith.constant 1 : i32
      %77 = scf.for %arg15 = %c0_i32_25 to %76 step %c1_i32_26 iter_args(%arg16 = %75) -> (vector<16x1024xbf16>)  : i32 {
        %131 = arith.index_cast %arg15 : i32 to index
        %c0_35 = arith.constant 0 : index
        %c0_36 = arith.constant 0 : index
        %132 = vector.load %arg6[%131, %c0_35, %c0_36] : memref<6x144x16xbf16, #tpu.memory_space<vmem>>, vector<1x144x16xbf16>
        %133 = vector.shape_cast %132 : vector<1x144x16xbf16> to vector<144x16xbf16>
        %134 = arith.index_cast %arg15 : i32 to index
        %c0_37 = arith.constant 0 : index
        %c0_38 = arith.constant 0 : index
        %135 = vector.load %arg7[%134, %c0_37, %c0_38] : memref<6x16x1xf32, #tpu.memory_space<vmem>>, vector<1x16x1xf32>
        %136 = vector.shape_cast %135 : vector<1x16x1xf32> to vector<16x1xf32>
        %cst_39 = arith.constant dense<0.000000e+00> : vector<144x1024xf32>
        %137 = tpu.matmul %133, %arg16, %cst_39 {dimension_numbers = #tpu.dot_dimension_numbers<[1], [0], [0], [1], [0, 0, 1, 1], [], []>} : vector<144x16xbf16>, vector<16x1024xbf16>, vector<144x1024xf32> -> vector<144x1024xf32>
        %138 = vector.extract_strided_slice %137 {offsets = [0, 0], sizes = [16, 1024], strides = [1, 1]} : vector<144x1024xf32> to vector<16x1024xf32>
        %139 = vector.broadcast %136 : vector<16x1xf32> to vector<16x1024xf32>
        %140 = arith.addf %139, %138 : vector<16x1024xf32>
        %141 = vector.extract_strided_slice %137 {offsets = [16, 0], sizes = [16, 1024], strides = [1, 1]} : vector<144x1024xf32> to vector<16x1024xf32>
        %142 = vector.extract_strided_slice %141 {offsets = [0, 1], sizes = [16, 1023], strides = [1, 1]} : vector<16x1024xf32> to vector<16x1023xf32>
        %143 = vector.extract_strided_slice %141 {offsets = [0, 0], sizes = [16, 1], strides = [1, 1]} : vector<16x1024xf32> to vector<16x1xf32>
        %144 = tpu.concatenate %142, %143 in 1 : vector<16x1023xf32>, vector<16x1xf32> -> vector<16x1024xf32>
        %145 = arith.addf %140, %144 : vector<16x1024xf32>
        %146 = vector.extract_strided_slice %137 {offsets = [32, 0], sizes = [16, 1024], strides = [1, 1]} : vector<144x1024xf32> to vector<16x1024xf32>
        %147 = vector.extract_strided_slice %146 {offsets = [0, 2], sizes = [16, 1022], strides = [1, 1]} : vector<16x1024xf32> to vector<16x1022xf32>
        %148 = vector.extract_strided_slice %146 {offsets = [0, 0], sizes = [16, 2], strides = [1, 1]} : vector<16x1024xf32> to vector<16x2xf32>
        %149 = tpu.concatenate %147, %148 in 1 : vector<16x1022xf32>, vector<16x2xf32> -> vector<16x1024xf32>
        %150 = arith.addf %145, %149 : vector<16x1024xf32>
        %151 = vector.extract_strided_slice %137 {offsets = [48, 0], sizes = [16, 1024], strides = [1, 1]} : vector<144x1024xf32> to vector<16x1024xf32>
        %152 = vector.extract_strided_slice %151 {offsets = [0, 32], sizes = [16, 992], strides = [1, 1]} : vector<16x1024xf32> to vector<16x992xf32>
        %153 = vector.extract_strided_slice %151 {offsets = [0, 0], sizes = [16, 32], strides = [1, 1]} : vector<16x1024xf32> to vector<16x32xf32>
        %154 = tpu.concatenate %152, %153 in 1 : vector<16x992xf32>, vector<16x32xf32> -> vector<16x1024xf32>
        %155 = arith.addf %150, %154 : vector<16x1024xf32>
        %156 = vector.extract_strided_slice %137 {offsets = [64, 0], sizes = [16, 1024], strides = [1, 1]} : vector<144x1024xf32> to vector<16x1024xf32>
        %157 = vector.extract_strided_slice %156 {offsets = [0, 33], sizes = [16, 991], strides = [1, 1]} : vector<16x1024xf32> to vector<16x991xf32>
        %158 = vector.extract_strided_slice %156 {offsets = [0, 0], sizes = [16, 33], strides = [1, 1]} : vector<16x1024xf32> to vector<16x33xf32>
        %159 = tpu.concatenate %157, %158 in 1 : vector<16x991xf32>, vector<16x33xf32> -> vector<16x1024xf32>
        %160 = arith.addf %155, %159 : vector<16x1024xf32>
        %161 = vector.extract_strided_slice %137 {offsets = [80, 0], sizes = [16, 1024], strides = [1, 1]} : vector<144x1024xf32> to vector<16x1024xf32>
        %162 = vector.extract_strided_slice %161 {offsets = [0, 34], sizes = [16, 990], strides = [1, 1]} : vector<16x1024xf32> to vector<16x990xf32>
        %163 = vector.extract_strided_slice %161 {offsets = [0, 0], sizes = [16, 34], strides = [1, 1]} : vector<16x1024xf32> to vector<16x34xf32>
        %164 = tpu.concatenate %162, %163 in 1 : vector<16x990xf32>, vector<16x34xf32> -> vector<16x1024xf32>
        %165 = arith.addf %160, %164 : vector<16x1024xf32>
        %166 = vector.extract_strided_slice %137 {offsets = [96, 0], sizes = [16, 1024], strides = [1, 1]} : vector<144x1024xf32> to vector<16x1024xf32>
        %167 = vector.extract_strided_slice %166 {offsets = [0, 64], sizes = [16, 960], strides = [1, 1]} : vector<16x1024xf32> to vector<16x960xf32>
        %168 = vector.extract_strided_slice %166 {offsets = [0, 0], sizes = [16, 64], strides = [1, 1]} : vector<16x1024xf32> to vector<16x64xf32>
        %169 = tpu.concatenate %167, %168 in 1 : vector<16x960xf32>, vector<16x64xf32> -> vector<16x1024xf32>
        %170 = arith.addf %165, %169 : vector<16x1024xf32>
        %171 = vector.extract_strided_slice %137 {offsets = [112, 0], sizes = [16, 1024], strides = [1, 1]} : vector<144x1024xf32> to vector<16x1024xf32>
        %172 = vector.extract_strided_slice %171 {offsets = [0, 65], sizes = [16, 959], strides = [1, 1]} : vector<16x1024xf32> to vector<16x959xf32>
        %173 = vector.extract_strided_slice %171 {offsets = [0, 0], sizes = [16, 65], strides = [1, 1]} : vector<16x1024xf32> to vector<16x65xf32>
        %174 = tpu.concatenate %172, %173 in 1 : vector<16x959xf32>, vector<16x65xf32> -> vector<16x1024xf32>
        %175 = arith.addf %170, %174 : vector<16x1024xf32>
        %176 = vector.extract_strided_slice %137 {offsets = [128, 0], sizes = [16, 1024], strides = [1, 1]} : vector<144x1024xf32> to vector<16x1024xf32>
        %177 = vector.extract_strided_slice %176 {offsets = [0, 66], sizes = [16, 958], strides = [1, 1]} : vector<16x1024xf32> to vector<16x958xf32>
        %178 = vector.extract_strided_slice %176 {offsets = [0, 0], sizes = [16, 66], strides = [1, 1]} : vector<16x1024xf32> to vector<16x66xf32>
        %179 = tpu.concatenate %177, %178 in 1 : vector<16x958xf32>, vector<16x66xf32> -> vector<16x1024xf32>
        %180 = arith.addf %175, %179 : vector<16x1024xf32>
        %cst_40 = arith.constant 0.000000e+00 : f32
        %181 = vector.broadcast %cst_40 : f32 to vector<16x1024xf32>
        %182 = arith.cmpf oge, %180, %181 : vector<16x1024xf32>
        %cst_41 = arith.constant 0.00999999977 : f32
        %183 = vector.broadcast %cst_41 : f32 to vector<16x1024xf32>
        %184 = arith.mulf %183, %180 : vector<16x1024xf32>
        %185 = arith.select %182, %180, %184 : vector<16x1024xi1>, vector<16x1024xf32>
        %186 = arith.truncf %185 : vector<16x1024xf32> to vector<16x1024xbf16>
        scf.yield %186 : vector<16x1024xbf16>
      }
      %c5_i32_27 = arith.constant 5 : i32
      %c5 = arith.constant 5 : index
      %c0_28 = arith.constant 0 : index
      %c0_29 = arith.constant 0 : index
      %78 = vector.load %arg6[%c5, %c0_28, %c0_29] : memref<6x144x16xbf16, #tpu.memory_space<vmem>>, vector<1x144x16xbf16>
      %79 = vector.shape_cast %78 : vector<1x144x16xbf16> to vector<144x16xbf16>
      %c5_30 = arith.constant 5 : index
      %c0_31 = arith.constant 0 : index
      %c0_32 = arith.constant 0 : index
      %80 = vector.load %arg7[%c5_30, %c0_31, %c0_32] : memref<6x16x1xf32, #tpu.memory_space<vmem>>, vector<1x16x1xf32>
      %81 = vector.shape_cast %80 : vector<1x16x1xf32> to vector<16x1xf32>
      %cst_33 = arith.constant dense<0.000000e+00> : vector<144x1024xf32>
      %82 = tpu.matmul %79, %77, %cst_33 {dimension_numbers = #tpu.dot_dimension_numbers<[1], [0], [0], [1], [0, 0, 1, 1], [], []>} : vector<144x16xbf16>, vector<16x1024xbf16>, vector<144x1024xf32> -> vector<144x1024xf32>
      %83 = vector.extract_strided_slice %82 {offsets = [0, 0], sizes = [16, 1024], strides = [1, 1]} : vector<144x1024xf32> to vector<16x1024xf32>
      %84 = vector.broadcast %81 : vector<16x1xf32> to vector<16x1024xf32>
      %85 = arith.addf %84, %83 : vector<16x1024xf32>
      %86 = vector.extract_strided_slice %82 {offsets = [16, 0], sizes = [16, 1024], strides = [1, 1]} : vector<144x1024xf32> to vector<16x1024xf32>
      %87 = vector.extract_strided_slice %86 {offsets = [0, 1], sizes = [16, 1023], strides = [1, 1]} : vector<16x1024xf32> to vector<16x1023xf32>
      %88 = vector.extract_strided_slice %86 {offsets = [0, 0], sizes = [16, 1], strides = [1, 1]} : vector<16x1024xf32> to vector<16x1xf32>
      %89 = tpu.concatenate %87, %88 in 1 : vector<16x1023xf32>, vector<16x1xf32> -> vector<16x1024xf32>
      %90 = arith.addf %85, %89 : vector<16x1024xf32>
      %91 = vector.extract_strided_slice %82 {offsets = [32, 0], sizes = [16, 1024], strides = [1, 1]} : vector<144x1024xf32> to vector<16x1024xf32>
      %92 = vector.extract_strided_slice %91 {offsets = [0, 2], sizes = [16, 1022], strides = [1, 1]} : vector<16x1024xf32> to vector<16x1022xf32>
      %93 = vector.extract_strided_slice %91 {offsets = [0, 0], sizes = [16, 2], strides = [1, 1]} : vector<16x1024xf32> to vector<16x2xf32>
      %94 = tpu.concatenate %92, %93 in 1 : vector<16x1022xf32>, vector<16x2xf32> -> vector<16x1024xf32>
      %95 = arith.addf %90, %94 : vector<16x1024xf32>
      %96 = vector.extract_strided_slice %82 {offsets = [48, 0], sizes = [16, 1024], strides = [1, 1]} : vector<144x1024xf32> to vector<16x1024xf32>
      %97 = vector.extract_strided_slice %96 {offsets = [0, 32], sizes = [16, 992], strides = [1, 1]} : vector<16x1024xf32> to vector<16x992xf32>
      %98 = vector.extract_strided_slice %96 {offsets = [0, 0], sizes = [16, 32], strides = [1, 1]} : vector<16x1024xf32> to vector<16x32xf32>
      %99 = tpu.concatenate %97, %98 in 1 : vector<16x992xf32>, vector<16x32xf32> -> vector<16x1024xf32>
      %100 = arith.addf %95, %99 : vector<16x1024xf32>
      %101 = vector.extract_strided_slice %82 {offsets = [64, 0], sizes = [16, 1024], strides = [1, 1]} : vector<144x1024xf32> to vector<16x1024xf32>
      %102 = vector.extract_strided_slice %101 {offsets = [0, 33], sizes = [16, 991], strides = [1, 1]} : vector<16x1024xf32> to vector<16x991xf32>
      %103 = vector.extract_strided_slice %101 {offsets = [0, 0], sizes = [16, 33], strides = [1, 1]} : vector<16x1024xf32> to vector<16x33xf32>
      %104 = tpu.concatenate %102, %103 in 1 : vector<16x991xf32>, vector<16x33xf32> -> vector<16x1024xf32>
      %105 = arith.addf %100, %104 : vector<16x1024xf32>
      %106 = vector.extract_strided_slice %82 {offsets = [80, 0], sizes = [16, 1024], strides = [1, 1]} : vector<144x1024xf32> to vector<16x1024xf32>
      %107 = vector.extract_strided_slice %106 {offsets = [0, 34], sizes = [16, 990], strides = [1, 1]} : vector<16x1024xf32> to vector<16x990xf32>
      %108 = vector.extract_strided_slice %106 {offsets = [0, 0], sizes = [16, 34], strides = [1, 1]} : vector<16x1024xf32> to vector<16x34xf32>
      %109 = tpu.concatenate %107, %108 in 1 : vector<16x990xf32>, vector<16x34xf32> -> vector<16x1024xf32>
      %110 = arith.addf %105, %109 : vector<16x1024xf32>
      %111 = vector.extract_strided_slice %82 {offsets = [96, 0], sizes = [16, 1024], strides = [1, 1]} : vector<144x1024xf32> to vector<16x1024xf32>
      %112 = vector.extract_strided_slice %111 {offsets = [0, 64], sizes = [16, 960], strides = [1, 1]} : vector<16x1024xf32> to vector<16x960xf32>
      %113 = vector.extract_strided_slice %111 {offsets = [0, 0], sizes = [16, 64], strides = [1, 1]} : vector<16x1024xf32> to vector<16x64xf32>
      %114 = tpu.concatenate %112, %113 in 1 : vector<16x960xf32>, vector<16x64xf32> -> vector<16x1024xf32>
      %115 = arith.addf %110, %114 : vector<16x1024xf32>
      %116 = vector.extract_strided_slice %82 {offsets = [112, 0], sizes = [16, 1024], strides = [1, 1]} : vector<144x1024xf32> to vector<16x1024xf32>
      %117 = vector.extract_strided_slice %116 {offsets = [0, 65], sizes = [16, 959], strides = [1, 1]} : vector<16x1024xf32> to vector<16x959xf32>
      %118 = vector.extract_strided_slice %116 {offsets = [0, 0], sizes = [16, 65], strides = [1, 1]} : vector<16x1024xf32> to vector<16x65xf32>
      %119 = tpu.concatenate %117, %118 in 1 : vector<16x959xf32>, vector<16x65xf32> -> vector<16x1024xf32>
      %120 = arith.addf %115, %119 : vector<16x1024xf32>
      %121 = vector.extract_strided_slice %82 {offsets = [128, 0], sizes = [16, 1024], strides = [1, 1]} : vector<144x1024xf32> to vector<16x1024xf32>
      %122 = vector.extract_strided_slice %121 {offsets = [0, 66], sizes = [16, 958], strides = [1, 1]} : vector<16x1024xf32> to vector<16x958xf32>
      %123 = vector.extract_strided_slice %121 {offsets = [0, 0], sizes = [16, 66], strides = [1, 1]} : vector<16x1024xf32> to vector<16x66xf32>
      %124 = tpu.concatenate %122, %123 in 1 : vector<16x958xf32>, vector<16x66xf32> -> vector<16x1024xf32>
      %125 = arith.addf %120, %124 : vector<16x1024xf32>
      %cst_34 = arith.constant 0.000000e+00 : f32
      %126 = vector.broadcast %cst_34 : f32 to vector<16x1024xf32>
      %127 = arith.maximumf %125, %126 : vector<16x1024xf32>
      %128 = vector.extract_strided_slice %127 {offsets = [0, 0], sizes = [16, 640], strides = [1, 1]} : vector<16x1024xf32> to vector<16x640xf32>
      %129 = arith.truncf %128 : vector<16x640xf32> to vector<16x640xbf16>
      %130 = arith.maximumf %arg14, %129 : vector<16x640xbf16>
      scf.yield %130 : vector<16x640xbf16>
    }
    %c2_i32_0 = arith.constant 2 : i32
    %c0 = arith.constant 0 : index
    %c0_1 = arith.constant 0 : index
    %3 = vector.load %arg2[%c0, %c0_1] : memref<16x640xf32, #tpu.memory_space<vmem>>, vector<16x640xf32>
    %cst_2 = arith.constant 5.000000e-01 : f32
    %4 = vector.broadcast %cst_2 : f32 to vector<16x640xf32>
    %5 = arith.cmpf ogt, %3, %4 : vector<16x640xf32>
    %cst_3 = arith.constant 0xFF800000 : f32
    %6 = vector.broadcast %cst_3 : f32 to vector<1x1xf32>
    %cst_4 = arith.constant 0.000000e+00 : f32
    %7 = vector.broadcast %cst_4 : f32 to vector<3x640xf32>
    %cst_5 = arith.constant 0.000000e+00 : f32
    %8 = vector.broadcast %cst_5 : f32 to vector<1x640xf32>
    %c0_i32_6 = arith.constant 0 : i32
    %c2_i32_7 = arith.constant 2 : i32
    %9 = arith.addi %c0_i32_6, %c2_i32_7 : i32
    %c1_i32_8 = arith.constant 1 : i32
    %10:3 = scf.for %arg13 = %c0_i32_6 to %9 step %c1_i32_8 iter_args(%arg14 = %6, %arg15 = %7, %arg16 = %8) -> (vector<1x1xf32>, vector<3x640xf32>, vector<1x640xf32>)  : i32 {
      %c0_14 = arith.constant 0 : index
      %20 = arith.index_cast %arg13 : i32 to index
      %c0_15 = arith.constant 0 : index
      %c0_16 = arith.constant 0 : index
      %21 = vector.load %arg3[%c0_14, %20, %c0_15, %c0_16] : memref<1x2x8x1024xbf16, #tpu.memory_space<vmem>>, vector<1x1x8x1024xbf16>
      %22 = vector.shape_cast %21 : vector<1x1x8x1024xbf16> to vector<8x1024xbf16>
      %23 = vector.extract_strided_slice %22 {offsets = [0, 231], sizes = [8, 793], strides = [1, 1]} : vector<8x1024xbf16> to vector<8x793xbf16>
      %24 = vector.extract_strided_slice %22 {offsets = [0, 0], sizes = [8, 231], strides = [1, 1]} : vector<8x1024xbf16> to vector<8x231xbf16>
      %25 = tpu.concatenate %23, %24 in 1 : vector<8x793xbf16>, vector<8x231xbf16> -> vector<8x1024xbf16>
      %26 = vector.extract_strided_slice %25 {offsets = [0, 0], sizes = [8, 640], strides = [1, 1]} : vector<8x1024xbf16> to vector<8x640xbf16>
      %c0_17 = arith.constant 0 : index
      %c0_18 = arith.constant 0 : index
      %27 = vector.load %arg8[%c0_17, %c0_18] : memref<144x8xbf16, #tpu.memory_space<vmem>>, vector<144x8xbf16>
      %c0_19 = arith.constant 0 : index
      %c0_20 = arith.constant 0 : index
      %28 = vector.load %arg9[%c0_19, %c0_20] : memref<144x16xbf16, #tpu.memory_space<vmem>>, vector<144x16xbf16>
      %c0_21 = arith.constant 0 : index
      %c0_22 = arith.constant 0 : index
      %c0_23 = arith.constant 0 : index
      %29 = vector.load %arg11[%c0_21, %c0_22, %c0_23] : memref<3x16x1xf32, #tpu.memory_space<vmem>>, vector<1x16x1xf32>
      %30 = vector.shape_cast %29 : vector<1x16x1xf32> to vector<16x1xf32>
      %cst_24 = arith.constant dense<0.000000e+00> : vector<144x640xf32>
      %31 = tpu.matmul %27, %26, %cst_24 {dimension_numbers = #tpu.dot_dimension_numbers<[1], [0], [0], [1], [0, 0, 1, 1], [], []>} : vector<144x8xbf16>, vector<8x640xbf16>, vector<144x640xf32> -> vector<144x640xf32>
      %cst_25 = arith.constant dense<0.000000e+00> : vector<144x640xf32>
      %32 = tpu.matmul %28, %2, %cst_25 {dimension_numbers = #tpu.dot_dimension_numbers<[1], [0], [0], [1], [0, 0, 1, 1], [], []>} : vector<144x16xbf16>, vector<16x640xbf16>, vector<144x640xf32> -> vector<144x640xf32>
      %33 = arith.addf %31, %32 : vector<144x640xf32>
      %34 = vector.extract_strided_slice %33 {offsets = [0, 0], sizes = [16, 640], strides = [1, 1]} : vector<144x640xf32> to vector<16x640xf32>
      %35 = vector.broadcast %30 : vector<16x1xf32> to vector<16x640xf32>
      %36 = arith.addf %35, %34 : vector<16x640xf32>
      %37 = vector.extract_strided_slice %33 {offsets = [16, 0], sizes = [16, 640], strides = [1, 1]} : vector<144x640xf32> to vector<16x640xf32>
      %38 = vector.extract_strided_slice %37 {offsets = [0, 1], sizes = [16, 639], strides = [1, 1]} : vector<16x640xf32> to vector<16x639xf32>
      %39 = vector.extract_strided_slice %37 {offsets = [0, 0], sizes = [16, 1], strides = [1, 1]} : vector<16x640xf32> to vector<16x1xf32>
      %40 = tpu.concatenate %38, %39 in 1 : vector<16x639xf32>, vector<16x1xf32> -> vector<16x640xf32>
      %41 = arith.addf %36, %40 : vector<16x640xf32>
      %42 = vector.extract_strided_slice %33 {offsets = [32, 0], sizes = [16, 640], strides = [1, 1]} : vector<144x640xf32> to vector<16x640xf32>
      %43 = vector.extract_strided_slice %42 {offsets = [0, 2], sizes = [16, 638], strides = [1, 1]} : vector<16x640xf32> to vector<16x638xf32>
      %44 = vector.extract_strided_slice %42 {offsets = [0, 0], sizes = [16, 2], strides = [1, 1]} : vector<16x640xf32> to vector<16x2xf32>
      %45 = tpu.concatenate %43, %44 in 1 : vector<16x638xf32>, vector<16x2xf32> -> vector<16x640xf32>
      %46 = arith.addf %41, %45 : vector<16x640xf32>
      %47 = vector.extract_strided_slice %33 {offsets = [48, 0], sizes = [16, 640], strides = [1, 1]} : vector<144x640xf32> to vector<16x640xf32>
      %48 = vector.extract_strided_slice %47 {offsets = [0, 32], sizes = [16, 608], strides = [1, 1]} : vector<16x640xf32> to vector<16x608xf32>
      %49 = vector.extract_strided_slice %47 {offsets = [0, 0], sizes = [16, 32], strides = [1, 1]} : vector<16x640xf32> to vector<16x32xf32>
      %50 = tpu.concatenate %48, %49 in 1 : vector<16x608xf32>, vector<16x32xf32> -> vector<16x640xf32>
      %51 = arith.addf %46, %50 : vector<16x640xf32>
      %52 = vector.extract_strided_slice %33 {offsets = [64, 0], sizes = [16, 640], strides = [1, 1]} : vector<144x640xf32> to vector<16x640xf32>
      %53 = vector.extract_strided_slice %52 {offsets = [0, 33], sizes = [16, 607], strides = [1, 1]} : vector<16x640xf32> to vector<16x607xf32>
      %54 = vector.extract_strided_slice %52 {offsets = [0, 0], sizes = [16, 33], strides = [1, 1]} : vector<16x640xf32> to vector<16x33xf32>
      %55 = tpu.concatenate %53, %54 in 1 : vector<16x607xf32>, vector<16x33xf32> -> vector<16x640xf32>
      %56 = arith.addf %51, %55 : vector<16x640xf32>
      %57 = vector.extract_strided_slice %33 {offsets = [80, 0], sizes = [16, 640], strides = [1, 1]} : vector<144x640xf32> to vector<16x640xf32>
      %58 = vector.extract_strided_slice %57 {offsets = [0, 34], sizes = [16, 606], strides = [1, 1]} : vector<16x640xf32> to vector<16x606xf32>
      %59 = vector.extract_strided_slice %57 {offsets = [0, 0], sizes = [16, 34], strides = [1, 1]} : vector<16x640xf32> to vector<16x34xf32>
      %60 = tpu.concatenate %58, %59 in 1 : vector<16x606xf32>, vector<16x34xf32> -> vector<16x640xf32>
      %61 = arith.addf %56, %60 : vector<16x640xf32>
      %62 = vector.extract_strided_slice %33 {offsets = [96, 0], sizes = [16, 640], strides = [1, 1]} : vector<144x640xf32> to vector<16x640xf32>
      %63 = vector.extract_strided_slice %62 {offsets = [0, 64], sizes = [16, 576], strides = [1, 1]} : vector<16x640xf32> to vector<16x576xf32>
      %64 = vector.extract_strided_slice %62 {offsets = [0, 0], sizes = [16, 64], strides = [1, 1]} : vector<16x640xf32> to vector<16x64xf32>
      %65 = tpu.concatenate %63, %64 in 1 : vector<16x576xf32>, vector<16x64xf32> -> vector<16x640xf32>
      %66 = arith.addf %61, %65 : vector<16x640xf32>
      %67 = vector.extract_strided_slice %33 {offsets = [112, 0], sizes = [16, 640], strides = [1, 1]} : vector<144x640xf32> to vector<16x640xf32>
      %68 = vector.extract_strided_slice %67 {offsets = [0, 65], sizes = [16, 575], strides = [1, 1]} : vector<16x640xf32> to vector<16x575xf32>
      %69 = vector.extract_strided_slice %67 {offsets = [0, 0], sizes = [16, 65], strides = [1, 1]} : vector<16x640xf32> to vector<16x65xf32>
      %70 = tpu.concatenate %68, %69 in 1 : vector<16x575xf32>, vector<16x65xf32> -> vector<16x640xf32>
      %71 = arith.addf %66, %70 : vector<16x640xf32>
      %72 = vector.extract_strided_slice %33 {offsets = [128, 0], sizes = [16, 640], strides = [1, 1]} : vector<144x640xf32> to vector<16x640xf32>
      %73 = vector.extract_strided_slice %72 {offsets = [0, 66], sizes = [16, 574], strides = [1, 1]} : vector<16x640xf32> to vector<16x574xf32>
      %74 = vector.extract_strided_slice %72 {offsets = [0, 0], sizes = [16, 66], strides = [1, 1]} : vector<16x640xf32> to vector<16x66xf32>
      %75 = tpu.concatenate %73, %74 in 1 : vector<16x574xf32>, vector<16x66xf32> -> vector<16x640xf32>
      %76 = arith.addf %71, %75 : vector<16x640xf32>
      %cst_26 = arith.constant 0.000000e+00 : f32
      %77 = vector.broadcast %cst_26 : f32 to vector<16x640xf32>
      %78 = arith.cmpf oge, %76, %77 : vector<16x640xf32>
      %cst_27 = arith.constant 0.00999999977 : f32
      %79 = vector.broadcast %cst_27 : f32 to vector<16x640xf32>
      %80 = arith.mulf %79, %76 : vector<16x640xf32>
      %81 = arith.select %78, %76, %80 : vector<16x640xi1>, vector<16x640xf32>
      %82 = arith.truncf %81 : vector<16x640xf32> to vector<16x640xbf16>
      %c0_28 = arith.constant 0 : index
      %c0_29 = arith.constant 0 : index
      %c0_30 = arith.constant 0 : index
      %83 = vector.load %arg10[%c0_28, %c0_29, %c0_30] : memref<2x144x16xbf16, #tpu.memory_space<vmem>>, vector<1x144x16xbf16>
      %84 = vector.shape_cast %83 : vector<1x144x16xbf16> to vector<144x16xbf16>
      %c1 = arith.constant 1 : index
      %c0_31 = arith.constant 0 : index
      %c0_32 = arith.constant 0 : index
      %85 = vector.load %arg11[%c1, %c0_31, %c0_32] : memref<3x16x1xf32, #tpu.memory_space<vmem>>, vector<1x16x1xf32>
      %86 = vector.shape_cast %85 : vector<1x16x1xf32> to vector<16x1xf32>
      %cst_33 = arith.constant dense<0.000000e+00> : vector<144x640xf32>
      %87 = tpu.matmul %84, %82, %cst_33 {dimension_numbers = #tpu.dot_dimension_numbers<[1], [0], [0], [1], [0, 0, 1, 1], [], []>} : vector<144x16xbf16>, vector<16x640xbf16>, vector<144x640xf32> -> vector<144x640xf32>
      %88 = vector.extract_strided_slice %87 {offsets = [0, 0], sizes = [16, 640], strides = [1, 1]} : vector<144x640xf32> to vector<16x640xf32>
      %89 = vector.broadcast %86 : vector<16x1xf32> to vector<16x640xf32>
      %90 = arith.addf %89, %88 : vector<16x640xf32>
      %91 = vector.extract_strided_slice %87 {offsets = [16, 0], sizes = [16, 640], strides = [1, 1]} : vector<144x640xf32> to vector<16x640xf32>
      %92 = vector.extract_strided_slice %91 {offsets = [0, 1], sizes = [16, 639], strides = [1, 1]} : vector<16x640xf32> to vector<16x639xf32>
      %93 = vector.extract_strided_slice %91 {offsets = [0, 0], sizes = [16, 1], strides = [1, 1]} : vector<16x640xf32> to vector<16x1xf32>
      %94 = tpu.concatenate %92, %93 in 1 : vector<16x639xf32>, vector<16x1xf32> -> vector<16x640xf32>
      %95 = arith.addf %90, %94 : vector<16x640xf32>
      %96 = vector.extract_strided_slice %87 {offsets = [32, 0], sizes = [16, 640], strides = [1, 1]} : vector<144x640xf32> to vector<16x640xf32>
      %97 = vector.extract_strided_slice %96 {offsets = [0, 2], sizes = [16, 638], strides = [1, 1]} : vector<16x640xf32> to vector<16x638xf32>
      %98 = vector.extract_strided_slice %96 {offsets = [0, 0], sizes = [16, 2], strides = [1, 1]} : vector<16x640xf32> to vector<16x2xf32>
      %99 = tpu.concatenate %97, %98 in 1 : vector<16x638xf32>, vector<16x2xf32> -> vector<16x640xf32>
      %100 = arith.addf %95, %99 : vector<16x640xf32>
      %101 = vector.extract_strided_slice %87 {offsets = [48, 0], sizes = [16, 640], strides = [1, 1]} : vector<144x640xf32> to vector<16x640xf32>
      %102 = vector.extract_strided_slice %101 {offsets = [0, 32], sizes = [16, 608], strides = [1, 1]} : vector<16x640xf32> to vector<16x608xf32>
      %103 = vector.extract_strided_slice %101 {offsets = [0, 0], sizes = [16, 32], strides = [1, 1]} : vector<16x640xf32> to vector<16x32xf32>
      %104 = tpu.concatenate %102, %103 in 1 : vector<16x608xf32>, vector<16x32xf32> -> vector<16x640xf32>
      %105 = arith.addf %100, %104 : vector<16x640xf32>
      %106 = vector.extract_strided_slice %87 {offsets = [64, 0], sizes = [16, 640], strides = [1, 1]} : vector<144x640xf32> to vector<16x640xf32>
      %107 = vector.extract_strided_slice %106 {offsets = [0, 33], sizes = [16, 607], strides = [1, 1]} : vector<16x640xf32> to vector<16x607xf32>
      %108 = vector.extract_strided_slice %106 {offsets = [0, 0], sizes = [16, 33], strides = [1, 1]} : vector<16x640xf32> to vector<16x33xf32>
      %109 = tpu.concatenate %107, %108 in 1 : vector<16x607xf32>, vector<16x33xf32> -> vector<16x640xf32>
      %110 = arith.addf %105, %109 : vector<16x640xf32>
      %111 = vector.extract_strided_slice %87 {offsets = [80, 0], sizes = [16, 640], strides = [1, 1]} : vector<144x640xf32> to vector<16x640xf32>
      %112 = vector.extract_strided_slice %111 {offsets = [0, 34], sizes = [16, 606], strides = [1, 1]} : vector<16x640xf32> to vector<16x606xf32>
      %113 = vector.extract_strided_slice %111 {offsets = [0, 0], sizes = [16, 34], strides = [1, 1]} : vector<16x640xf32> to vector<16x34xf32>
      %114 = tpu.concatenate %112, %113 in 1 : vector<16x606xf32>, vector<16x34xf32> -> vector<16x640xf32>
      %115 = arith.addf %110, %114 : vector<16x640xf32>
      %116 = vector.extract_strided_slice %87 {offsets = [96, 0], sizes = [16, 640], strides = [1, 1]} : vector<144x640xf32> to vector<16x640xf32>
      %117 = vector.extract_strided_slice %116 {offsets = [0, 64], sizes = [16, 576], strides = [1, 1]} : vector<16x640xf32> to vector<16x576xf32>
      %118 = vector.extract_strided_slice %116 {offsets = [0, 0], sizes = [16, 64], strides = [1, 1]} : vector<16x640xf32> to vector<16x64xf32>
      %119 = tpu.concatenate %117, %118 in 1 : vector<16x576xf32>, vector<16x64xf32> -> vector<16x640xf32>
      %120 = arith.addf %115, %119 : vector<16x640xf32>
      %121 = vector.extract_strided_slice %87 {offsets = [112, 0], sizes = [16, 640], strides = [1, 1]} : vector<144x640xf32> to vector<16x640xf32>
      %122 = vector.extract_strided_slice %121 {offsets = [0, 65], sizes = [16, 575], strides = [1, 1]} : vector<16x640xf32> to vector<16x575xf32>
      %123 = vector.extract_strided_slice %121 {offsets = [0, 0], sizes = [16, 65], strides = [1, 1]} : vector<16x640xf32> to vector<16x65xf32>
      %124 = tpu.concatenate %122, %123 in 1 : vector<16x575xf32>, vector<16x65xf32> -> vector<16x640xf32>
      %125 = arith.addf %120, %124 : vector<16x640xf32>
      %126 = vector.extract_strided_slice %87 {offsets = [128, 0], sizes = [16, 640], strides = [1, 1]} : vector<144x640xf32> to vector<16x640xf32>
      %127 = vector.extract_strided_slice %126 {offsets = [0, 66], sizes = [16, 574], strides = [1, 1]} : vector<16x640xf32> to vector<16x574xf32>
      %128 = vector.extract_strided_slice %126 {offsets = [0, 0], sizes = [16, 66], strides = [1, 1]} : vector<16x640xf32> to vector<16x66xf32>
      %129 = tpu.concatenate %127, %128 in 1 : vector<16x574xf32>, vector<16x66xf32> -> vector<16x640xf32>
      %130 = arith.addf %125, %129 : vector<16x640xf32>
      %cst_34 = arith.constant 0.000000e+00 : f32
      %131 = vector.broadcast %cst_34 : f32 to vector<16x640xf32>
      %132 = arith.cmpf oge, %130, %131 : vector<16x640xf32>
      %cst_35 = arith.constant 0.00999999977 : f32
      %133 = vector.broadcast %cst_35 : f32 to vector<16x640xf32>
      %134 = arith.mulf %133, %130 : vector<16x640xf32>
      %135 = arith.select %132, %130, %134 : vector<16x640xi1>, vector<16x640xf32>
      %136 = arith.truncf %135 : vector<16x640xf32> to vector<16x640xbf16>
      %c1_36 = arith.constant 1 : index
      %c0_37 = arith.constant 0 : index
      %c0_38 = arith.constant 0 : index
      %137 = vector.load %arg10[%c1_36, %c0_37, %c0_38] : memref<2x144x16xbf16, #tpu.memory_space<vmem>>, vector<1x144x16xbf16>
      %138 = vector.shape_cast %137 : vector<1x144x16xbf16> to vector<144x16xbf16>
      %c2 = arith.constant 2 : index
      %c0_39 = arith.constant 0 : index
      %c0_40 = arith.constant 0 : index
      %139 = vector.load %arg11[%c2, %c0_39, %c0_40] : memref<3x16x1xf32, #tpu.memory_space<vmem>>, vector<1x16x1xf32>
      %140 = vector.shape_cast %139 : vector<1x16x1xf32> to vector<16x1xf32>
      %cst_41 = arith.constant dense<0.000000e+00> : vector<144x640xf32>
      %141 = tpu.matmul %138, %136, %cst_41 {dimension_numbers = #tpu.dot_dimension_numbers<[1], [0], [0], [1], [0, 0, 1, 1], [], []>} : vector<144x16xbf16>, vector<16x640xbf16>, vector<144x640xf32> -> vector<144x640xf32>
      %142 = vector.extract_strided_slice %141 {offsets = [0, 0], sizes = [16, 640], strides = [1, 1]} : vector<144x640xf32> to vector<16x640xf32>
      %143 = vector.broadcast %140 : vector<16x1xf32> to vector<16x640xf32>
      %144 = arith.addf %143, %142 : vector<16x640xf32>
      %145 = vector.extract_strided_slice %141 {offsets = [16, 0], sizes = [16, 640], strides = [1, 1]} : vector<144x640xf32> to vector<16x640xf32>
      %146 = vector.extract_strided_slice %145 {offsets = [0, 1], sizes = [16, 639], strides = [1, 1]} : vector<16x640xf32> to vector<16x639xf32>
      %147 = vector.extract_strided_slice %145 {offsets = [0, 0], sizes = [16, 1], strides = [1, 1]} : vector<16x640xf32> to vector<16x1xf32>
      %148 = tpu.concatenate %146, %147 in 1 : vector<16x639xf32>, vector<16x1xf32> -> vector<16x640xf32>
      %149 = arith.addf %144, %148 : vector<16x640xf32>
      %150 = vector.extract_strided_slice %141 {offsets = [32, 0], sizes = [16, 640], strides = [1, 1]} : vector<144x640xf32> to vector<16x640xf32>
      %151 = vector.extract_strided_slice %150 {offsets = [0, 2], sizes = [16, 638], strides = [1, 1]} : vector<16x640xf32> to vector<16x638xf32>
      %152 = vector.extract_strided_slice %150 {offsets = [0, 0], sizes = [16, 2], strides = [1, 1]} : vector<16x640xf32> to vector<16x2xf32>
      %153 = tpu.concatenate %151, %152 in 1 : vector<16x638xf32>, vector<16x2xf32> -> vector<16x640xf32>
      %154 = arith.addf %149, %153 : vector<16x640xf32>
      %155 = vector.extract_strided_slice %141 {offsets = [48, 0], sizes = [16, 640], strides = [1, 1]} : vector<144x640xf32> to vector<16x640xf32>
      %156 = vector.extract_strided_slice %155 {offsets = [0, 32], sizes = [16, 608], strides = [1, 1]} : vector<16x640xf32> to vector<16x608xf32>
      %157 = vector.extract_strided_slice %155 {offsets = [0, 0], sizes = [16, 32], strides = [1, 1]} : vector<16x640xf32> to vector<16x32xf32>
      %158 = tpu.concatenate %156, %157 in 1 : vector<16x608xf32>, vector<16x32xf32> -> vector<16x640xf32>
      %159 = arith.addf %154, %158 : vector<16x640xf32>
      %160 = vector.extract_strided_slice %141 {offsets = [64, 0], sizes = [16, 640], strides = [1, 1]} : vector<144x640xf32> to vector<16x640xf32>
      %161 = vector.extract_strided_slice %160 {offsets = [0, 33], sizes = [16, 607], strides = [1, 1]} : vector<16x640xf32> to vector<16x607xf32>
      %162 = vector.extract_strided_slice %160 {offsets = [0, 0], sizes = [16, 33], strides = [1, 1]} : vector<16x640xf32> to vector<16x33xf32>
      %163 = tpu.concatenate %161, %162 in 1 : vector<16x607xf32>, vector<16x33xf32> -> vector<16x640xf32>
      %164 = arith.addf %159, %163 : vector<16x640xf32>
      %165 = vector.extract_strided_slice %141 {offsets = [80, 0], sizes = [16, 640], strides = [1, 1]} : vector<144x640xf32> to vector<16x640xf32>
      %166 = vector.extract_strided_slice %165 {offsets = [0, 34], sizes = [16, 606], strides = [1, 1]} : vector<16x640xf32> to vector<16x606xf32>
      %167 = vector.extract_strided_slice %165 {offsets = [0, 0], sizes = [16, 34], strides = [1, 1]} : vector<16x640xf32> to vector<16x34xf32>
      %168 = tpu.concatenate %166, %167 in 1 : vector<16x606xf32>, vector<16x34xf32> -> vector<16x640xf32>
      %169 = arith.addf %164, %168 : vector<16x640xf32>
      %170 = vector.extract_strided_slice %141 {offsets = [96, 0], sizes = [16, 640], strides = [1, 1]} : vector<144x640xf32> to vector<16x640xf32>
      %171 = vector.extract_strided_slice %170 {offsets = [0, 64], sizes = [16, 576], strides = [1, 1]} : vector<16x640xf32> to vector<16x576xf32>
      %172 = vector.extract_strided_slice %170 {offsets = [0, 0], sizes = [16, 64], strides = [1, 1]} : vector<16x640xf32> to vector<16x64xf32>
      %173 = tpu.concatenate %171, %172 in 1 : vector<16x576xf32>, vector<16x64xf32> -> vector<16x640xf32>
      %174 = arith.addf %169, %173 : vector<16x640xf32>
      %175 = vector.extract_strided_slice %141 {offsets = [112, 0], sizes = [16, 640], strides = [1, 1]} : vector<144x640xf32> to vector<16x640xf32>
      %176 = vector.extract_strided_slice %175 {offsets = [0, 65], sizes = [16, 575], strides = [1, 1]} : vector<16x640xf32> to vector<16x575xf32>
      %177 = vector.extract_strided_slice %175 {offsets = [0, 0], sizes = [16, 65], strides = [1, 1]} : vector<16x640xf32> to vector<16x65xf32>
      %178 = tpu.concatenate %176, %177 in 1 : vector<16x575xf32>, vector<16x65xf32> -> vector<16x640xf32>
      %179 = arith.addf %174, %178 : vector<16x640xf32>
      %180 = vector.extract_strided_slice %141 {offsets = [128, 0], sizes = [16, 640], strides = [1, 1]} : vector<144x640xf32> to vector<16x640xf32>
      %181 = vector.extract_strided_slice %180 {offsets = [0, 66], sizes = [16, 574], strides = [1, 1]} : vector<16x640xf32> to vector<16x574xf32>
      %182 = vector.extract_strided_slice %180 {offsets = [0, 0], sizes = [16, 66], strides = [1, 1]} : vector<16x640xf32> to vector<16x66xf32>
      %183 = tpu.concatenate %181, %182 in 1 : vector<16x574xf32>, vector<16x66xf32> -> vector<16x640xf32>
      %184 = arith.addf %179, %183 : vector<16x640xf32>
      %cst_42 = arith.constant 0xFF800000 : f32
      %185 = vector.broadcast %cst_42 : f32 to vector<16x640xf32>
      %186 = arith.select %5, %184, %185 : vector<16x640xi1>, vector<16x640xf32>
      %cst_43 = arith.constant dense<0xFF800000> : vector<16xf32>
      %187 = vector.multi_reduction <maximumf>, %186, %cst_43 [1] : vector<16x640xf32> to vector<16xf32>
      %188 = vector.shape_cast %187 : vector<16xf32> to vector<16x1xf32>
      %cst_44 = arith.constant dense<0xFF800000> : vector<1xf32>
      %189 = vector.multi_reduction <maximumf>, %188, %cst_44 [0] : vector<16x1xf32> to vector<1xf32>
      %190 = vector.shape_cast %189 : vector<1xf32> to vector<1x1xf32>
      %191 = arith.maximumf %arg14, %190 : vector<1x1xf32>
      %192 = vector.broadcast %191 : vector<1x1xf32> to vector<16x640xf32>
      %193 = arith.subf %186, %192 : vector<16x640xf32>
      %194 = math.exp %193 : vector<16x640xf32>
      %c0_45 = arith.constant 0 : index
      %195 = arith.index_cast %arg13 : i32 to index
      %c0_46 = arith.constant 0 : index
      %c0_47 = arith.constant 0 : index
      %196 = vector.load %arg4[%c0_45, %195, %c0_46, %c0_47] : memref<1x2x3x1024xf32, #tpu.memory_space<vmem>>, vector<1x1x3x1024xf32>
      %197 = vector.shape_cast %196 : vector<1x1x3x1024xf32> to vector<3x1024xf32>
      %198 = vector.extract_strided_slice %197 {offsets = [0, 297], sizes = [3, 727], strides = [1, 1]} : vector<3x1024xf32> to vector<3x727xf32>
      %199 = vector.extract_strided_slice %197 {offsets = [0, 0], sizes = [3, 297], strides = [1, 1]} : vector<3x1024xf32> to vector<3x297xf32>
      %200 = tpu.concatenate %198, %199 in 1 : vector<3x727xf32>, vector<3x297xf32> -> vector<3x1024xf32>
      %201 = vector.extract_strided_slice %200 {offsets = [0, 0], sizes = [3, 640], strides = [1, 1]} : vector<3x1024xf32> to vector<3x640xf32>
      %cst_48 = arith.constant 0.000000e+00 : f32
      %202 = vector.broadcast %cst_48 : f32 to vector<3x640xf32>
      %203 = vector.extract_strided_slice %194 {offsets = [0, 0], sizes = [1, 640], strides = [1, 1]} : vector<16x640xf32> to vector<1x640xf32>
      %204 = vector.broadcast %203 : vector<1x640xf32> to vector<3x640xf32>
      %205 = arith.mulf %204, %201 : vector<3x640xf32>
      %206 = arith.addf %202, %205 : vector<3x640xf32>
      %207 = vector.extract_strided_slice %194 {offsets = [1, 0], sizes = [1, 640], strides = [1, 1]} : vector<16x640xf32> to vector<1x640xf32>
      %208 = vector.extract_strided_slice %201 {offsets = [0, 1], sizes = [3, 639], strides = [1, 1]} : vector<3x640xf32> to vector<3x639xf32>
      %209 = vector.extract_strided_slice %201 {offsets = [0, 0], sizes = [3, 1], strides = [1, 1]} : vector<3x640xf32> to vector<3x1xf32>
      %210 = tpu.concatenate %208, %209 in 1 : vector<3x639xf32>, vector<3x1xf32> -> vector<3x640xf32>
      %211 = vector.broadcast %207 : vector<1x640xf32> to vector<3x640xf32>
      %212 = arith.mulf %211, %210 : vector<3x640xf32>
      %213 = arith.addf %206, %212 : vector<3x640xf32>
      %214 = vector.extract_strided_slice %194 {offsets = [2, 0], sizes = [1, 640], strides = [1, 1]} : vector<16x640xf32> to vector<1x640xf32>
      %215 = vector.extract_strided_slice %201 {offsets = [0, 2], sizes = [3, 638], strides = [1, 1]} : vector<3x640xf32> to vector<3x638xf32>
      %216 = vector.extract_strided_slice %201 {offsets = [0, 0], sizes = [3, 2], strides = [1, 1]} : vector<3x640xf32> to vector<3x2xf32>
      %217 = tpu.concatenate %215, %216 in 1 : vector<3x638xf32>, vector<3x2xf32> -> vector<3x640xf32>
      %218 = vector.broadcast %214 : vector<1x640xf32> to vector<3x640xf32>
      %219 = arith.mulf %218, %217 : vector<3x640xf32>
      %220 = arith.addf %213, %219 : vector<3x640xf32>
      %221 = vector.extract_strided_slice %194 {offsets = [3, 0], sizes = [1, 640], strides = [1, 1]} : vector<16x640xf32> to vector<1x640xf32>
      %222 = vector.extract_strided_slice %201 {offsets = [0, 32], sizes = [3, 608], strides = [1, 1]} : vector<3x640xf32> to vector<3x608xf32>
      %223 = vector.extract_strided_slice %201 {offsets = [0, 0], sizes = [3, 32], strides = [1, 1]} : vector<3x640xf32> to vector<3x32xf32>
      %224 = tpu.concatenate %222, %223 in 1 : vector<3x608xf32>, vector<3x32xf32> -> vector<3x640xf32>
      %225 = vector.broadcast %221 : vector<1x640xf32> to vector<3x640xf32>
      %226 = arith.mulf %225, %224 : vector<3x640xf32>
      %227 = arith.addf %220, %226 : vector<3x640xf32>
      %228 = vector.extract_strided_slice %194 {offsets = [4, 0], sizes = [1, 640], strides = [1, 1]} : vector<16x640xf32> to vector<1x640xf32>
      %229 = vector.extract_strided_slice %201 {offsets = [0, 33], sizes = [3, 607], strides = [1, 1]} : vector<3x640xf32> to vector<3x607xf32>
      %230 = vector.extract_strided_slice %201 {offsets = [0, 0], sizes = [3, 33], strides = [1, 1]} : vector<3x640xf32> to vector<3x33xf32>
      %231 = tpu.concatenate %229, %230 in 1 : vector<3x607xf32>, vector<3x33xf32> -> vector<3x640xf32>
      %232 = vector.broadcast %228 : vector<1x640xf32> to vector<3x640xf32>
      %233 = arith.mulf %232, %231 : vector<3x640xf32>
      %234 = arith.addf %227, %233 : vector<3x640xf32>
      %235 = vector.extract_strided_slice %194 {offsets = [5, 0], sizes = [1, 640], strides = [1, 1]} : vector<16x640xf32> to vector<1x640xf32>
      %236 = vector.extract_strided_slice %201 {offsets = [0, 34], sizes = [3, 606], strides = [1, 1]} : vector<3x640xf32> to vector<3x606xf32>
      %237 = vector.extract_strided_slice %201 {offsets = [0, 0], sizes = [3, 34], strides = [1, 1]} : vector<3x640xf32> to vector<3x34xf32>
      %238 = tpu.concatenate %236, %237 in 1 : vector<3x606xf32>, vector<3x34xf32> -> vector<3x640xf32>
      %239 = vector.broadcast %235 : vector<1x640xf32> to vector<3x640xf32>
      %240 = arith.mulf %239, %238 : vector<3x640xf32>
      %241 = arith.addf %234, %240 : vector<3x640xf32>
      %242 = vector.extract_strided_slice %194 {offsets = [6, 0], sizes = [1, 640], strides = [1, 1]} : vector<16x640xf32> to vector<1x640xf32>
      %243 = vector.extract_strided_slice %201 {offsets = [0, 64], sizes = [3, 576], strides = [1, 1]} : vector<3x640xf32> to vector<3x576xf32>
      %244 = vector.extract_strided_slice %201 {offsets = [0, 0], sizes = [3, 64], strides = [1, 1]} : vector<3x640xf32> to vector<3x64xf32>
      %245 = tpu.concatenate %243, %244 in 1 : vector<3x576xf32>, vector<3x64xf32> -> vector<3x640xf32>
      %246 = vector.broadcast %242 : vector<1x640xf32> to vector<3x640xf32>
      %247 = arith.mulf %246, %245 : vector<3x640xf32>
      %248 = arith.addf %241, %247 : vector<3x640xf32>
      %249 = vector.extract_strided_slice %194 {offsets = [7, 0], sizes = [1, 640], strides = [1, 1]} : vector<16x640xf32> to vector<1x640xf32>
      %250 = vector.extract_strided_slice %201 {offsets = [0, 65], sizes = [3, 575], strides = [1, 1]} : vector<3x640xf32> to vector<3x575xf32>
      %251 = vector.extract_strided_slice %201 {offsets = [0, 0], sizes = [3, 65], strides = [1, 1]} : vector<3x640xf32> to vector<3x65xf32>
      %252 = tpu.concatenate %250, %251 in 1 : vector<3x575xf32>, vector<3x65xf32> -> vector<3x640xf32>
      %253 = vector.broadcast %249 : vector<1x640xf32> to vector<3x640xf32>
      %254 = arith.mulf %253, %252 : vector<3x640xf32>
      %255 = arith.addf %248, %254 : vector<3x640xf32>
      %256 = vector.extract_strided_slice %194 {offsets = [8, 0], sizes = [1, 640], strides = [1, 1]} : vector<16x640xf32> to vector<1x640xf32>
      %257 = vector.extract_strided_slice %201 {offsets = [0, 66], sizes = [3, 574], strides = [1, 1]} : vector<3x640xf32> to vector<3x574xf32>
      %258 = vector.extract_strided_slice %201 {offsets = [0, 0], sizes = [3, 66], strides = [1, 1]} : vector<3x640xf32> to vector<3x66xf32>
      %259 = tpu.concatenate %257, %258 in 1 : vector<3x574xf32>, vector<3x66xf32> -> vector<3x640xf32>
      %260 = vector.broadcast %256 : vector<1x640xf32> to vector<3x640xf32>
      %261 = arith.mulf %260, %259 : vector<3x640xf32>
      %262 = arith.addf %255, %261 : vector<3x640xf32>
      %cst_49 = arith.constant dense<0.000000e+00> : vector<640xf32>
      %263 = vector.multi_reduction <add>, %194, %cst_49 [0] : vector<16x640xf32> to vector<640xf32>
      %264 = vector.shape_cast %263 : vector<640xf32> to vector<1x640xf32>
      %265 = arith.subf %arg14, %191 : vector<1x1xf32>
      %266 = math.exp %265 : vector<1x1xf32>
      %267 = vector.broadcast %266 : vector<1x1xf32> to vector<3x640xf32>
      %268 = arith.mulf %arg15, %267 : vector<3x640xf32>
      %269 = arith.addf %268, %262 : vector<3x640xf32>
      %270 = vector.broadcast %266 : vector<1x1xf32> to vector<1x640xf32>
      %271 = arith.mulf %arg16, %270 : vector<1x640xf32>
      %272 = arith.addf %271, %264 : vector<1x640xf32>
      scf.yield %191, %269, %272 : vector<1x1xf32>, vector<3x640xf32>, vector<1x640xf32>
    }
    %c2_i32_9 = arith.constant 2 : i32
    %cst_10 = arith.constant 9.99999993E-9 : f32
    %11 = vector.broadcast %cst_10 : f32 to vector<1x640xf32>
    %12 = arith.addf %10#2, %11 : vector<1x640xf32>
    %13 = tpu.reciprocal %12 {approx = true} : vector<1x640xf32> -> vector<1x640xf32>
    %14 = vector.broadcast %13 : vector<1x640xf32> to vector<3x640xf32>
    %15 = arith.mulf %10#1, %14 : vector<3x640xf32>
    %16 = vector.extract_strided_slice %15 {offsets = [0, 0], sizes = [3, 384], strides = [1, 1]} : vector<3x640xf32> to vector<3x384xf32>
    %c0_11 = arith.constant 0 : index
    %c0_12 = arith.constant 0 : index
    %c0_13 = arith.constant 0 : index
    %17 = vector.load %arg12[%c0_11, %c0_12, %c0_13] : memref<1x3x384xf32, #tpu.memory_space<vmem>>, vector<1x3x384xf32>
    %18 = vector.shape_cast %17 : vector<1x3x384xf32> to vector<3x384xf32>
    %19 = vector.shape_cast %16 : vector<3x384xf32> to vector<1x3x384xf32>
    tpu.vector_store %arg12[%c0_11, %c0_12, %c0_13], %19 {strides = array<i32>} : memref<1x3x384xf32, #tpu.memory_space<vmem>>, vector<1x3x384xf32>,
    return
  }
  func.func @transform_0(%arg0: i32) -> (i32, i32, i32) {
    %c0_i32 = arith.constant 0 : i32
    %c0_i32_0 = arith.constant 0 : i32
    %c0_i32_1 = arith.constant 0 : i32
    return %arg0, %c0_i32, %c0_i32_0 : i32, i32, i32
  }
  func.func @transform_1(%arg0: i32) -> (i32, i32) {
    %c0_i32 = arith.constant 0 : i32
    %c0_i32_0 = arith.constant 0 : i32
    %c0_i32_1 = arith.constant 0 : i32
    return %c0_i32, %c0_i32_0 : i32, i32
  }
  func.func @transform_2(%arg0: i32) -> (i32, i32, i32, i32) {
    %c0_i32 = arith.constant 0 : i32
    %c0_i32_0 = arith.constant 0 : i32
    %c0_i32_1 = arith.constant 0 : i32
    %c0_i32_2 = arith.constant 0 : i32
    return %arg0, %c0_i32, %c0_i32_0, %c0_i32_1 : i32, i32, i32, i32
  }
  func.func @transform_3(%arg0: i32) -> (i32, i32, i32, i32) {
    %c0_i32 = arith.constant 0 : i32
    %c0_i32_0 = arith.constant 0 : i32
    %c0_i32_1 = arith.constant 0 : i32
    %c0_i32_2 = arith.constant 0 : i32
    return %arg0, %c0_i32, %c0_i32_0, %c0_i32_1 : i32, i32, i32, i32
  }
  func.func @transform_4(%arg0: i32) -> (i32, i32) {
    %c0_i32 = arith.constant 0 : i32
    %c0_i32_0 = arith.constant 0 : i32
    %c0_i32_1 = arith.constant 0 : i32
    return %c0_i32, %c0_i32_0 : i32, i32
  }
  func.func @transform_5(%arg0: i32) -> (i32, i32, i32) {
    %c0_i32 = arith.constant 0 : i32
    %c0_i32_0 = arith.constant 0 : i32
    %c0_i32_1 = arith.constant 0 : i32
    %c0_i32_2 = arith.constant 0 : i32
    return %c0_i32, %c0_i32_0, %c0_i32_1 : i32, i32, i32
  }
  func.func @transform_6(%arg0: i32) -> (i32, i32, i32) {
    %c0_i32 = arith.constant 0 : i32
    %c0_i32_0 = arith.constant 0 : i32
    %c0_i32_1 = arith.constant 0 : i32
    %c0_i32_2 = arith.constant 0 : i32
    return %c0_i32, %c0_i32_0, %c0_i32_1 : i32, i32, i32
  }
  func.func @transform_7(%arg0: i32) -> (i32, i32) {
    %c0_i32 = arith.constant 0 : i32
    %c0_i32_0 = arith.constant 0 : i32
    %c0_i32_1 = arith.constant 0 : i32
    return %c0_i32, %c0_i32_0 : i32, i32
  }
  func.func @transform_8(%arg0: i32) -> (i32, i32) {
    %c0_i32 = arith.constant 0 : i32
    %c0_i32_0 = arith.constant 0 : i32
    %c0_i32_1 = arith.constant 0 : i32
    return %c0_i32, %c0_i32_0 : i32, i32
  }
  func.func @transform_9(%arg0: i32) -> (i32, i32, i32) {
    %c0_i32 = arith.constant 0 : i32
    %c0_i32_0 = arith.constant 0 : i32
    %c0_i32_1 = arith.constant 0 : i32
    %c0_i32_2 = arith.constant 0 : i32
    return %c0_i32, %c0_i32_0, %c0_i32_1 : i32, i32, i32
  }
  func.func @transform_10(%arg0: i32) -> (i32, i32, i32) {
    %c0_i32 = arith.constant 0 : i32
    %c0_i32_0 = arith.constant 0 : i32
    %c0_i32_1 = arith.constant 0 : i32
    %c0_i32_2 = arith.constant 0 : i32
    return %c0_i32, %c0_i32_0, %c0_i32_1 : i32, i32, i32
  }
  func.func @transform_11(%arg0: i32) -> (i32, i32, i32) {
    %c0_i32 = arith.constant 0 : i32
    %c0_i32_0 = arith.constant 0 : i32
    %c0_i32_1 = arith.constant 0 : i32
    return %arg0, %c0_i32, %c0_i32_0 : i32, i32, i32
  }
}

</mosaic_0001>

<bundles_post_ra>
// kernel: tpu_custom_call.1
= control target key start
LH: loop header
LB: loop body
LE: loop exit
PB: predicated region body
PF: predicated region fallthrough
CT: control target
= control target key end

     0   :  { %6 = vsyncpa [#allocation3], 0  ;;  %s128_s0 = inlined_call_operand.hbm [shape: f32[8,128], index: 0, kind: input, shape index: {}]   ;;  %s129_s1 = inlined_call_operand.hbm [shape: f32[8,128], index: 1, kind: output, shape index: {}]  }
   0x1   :  { %7 = vsyncpa [#allocation4], 0  ;;  %s91_s6 = smov [#allocation2]   ;;  %s43_s10 = scalar_lea.hbm %s128_s0, 128 }
   0x2   :  { %s14_s7 = sshll.u32 %s91_s6, 4  ;;  %p44_p0 = scmp.ne.s32.totalorder %s128_s0, %s43_s10  ;;  %s15_s7 = int_to_ptr.vmem [resolvable:$true] %s14_s7 }
   0x3   :  { %p47_p1 = scmp.lt.u32.totalorder %s43_s10, %s128_s0 }
   0x5   :  { %p49_p2 = pnand %p47_p1, %p44_p0 }
   0x7   :  { %52 = shalt.err (!%p49_p2)
}
   0x8   :  { %s53_s15 = scalar_lea.vmem %s15_s7, 128  ;;  %p58_p4 = scmp.lt.s32.totalorder %s15_s7, %s15_s7 }
   0x9   :  { %p54_p3 = scmp.ne.s32.totalorder %s15_s7, %s53_s15  ;;  %p59_p5 = scmp.lt.s32.totalorder %s53_s15, %s53_s15 }
   0xb   :  { %p60_p6 = por %p59_p5, %p58_p4 }
   0xd   :  { %p61_p7 = pnand %p60_p6, %p54_p3 }
   0xf   :  { %64 = shalt.err (!%p61_p7)
}
  0x10   :  { %17 = dma.hbm_to_vmem [thread:$0]  %s128_s0, 128, %s15_s7, [#allocation3]  }
  0x11   :  { %87 = dma.done.wait [#allocation3], 128  }
  0x12   :  { %88 = vsyncadd [#allocation3], 4294967168  ;;  %v21_v0 = vld [vmem:[#allocation2] sm:$0xff]  ;;  %s92_s18 = smov 1   ;;  %s93_s19 = smov [#allocation5]  }
  0x13   :  { %22 = vrot.lane.b32.xlu0 %v21_v0, %s92_s18  ;;  %s31_s20 = sshll.u32 %s93_s19, 4  ;;  %s32_s20 = int_to_ptr.vmem [resolvable:$true] %s31_s20 }
  0x14   :  { %s65_s21 = scalar_lea.vmem %s32_s20, 128  ;;  %p70_p9 = scmp.lt.s32.totalorder %s32_s20, %s32_s20 }
  0x15   :  { %p66_p8 = scmp.ne.s32.totalorder %s32_s20, %s65_s21  ;;  %p71_p10 = scmp.lt.s32.totalorder %s65_s21, %s65_s21 }
  0x17   :  { %p72_p11 = por %p71_p10, %p70_p9 }
  0x19   :  { %p73_p12 = pnand %p72_p11, %p66_p8 }
  0x85   :  { %v23_v1 = vpop.permute.xlu0 %22 }
  0x86   :  { %24 = vst [vmem:[#allocation5] sm:$0xff] %v23_v1 }
  0x87   :  { %76 = shalt.err (!%p73_p12)
}
  0x88   :  { %s77_s0 = scalar_lea.hbm %s129_s1, 128 }
  0x89   :  { %p78_p13 = scmp.ne.s32.totalorder %s129_s1, %s77_s0  ;;  %p81_p0 = scmp.lt.u32.totalorder %s77_s0, %s129_s1 }
  0x8b   :  { %p83_p1 = pnand %p81_p0, %p78_p13 }
  0x8d   :  { %86 = shalt.err (!%p83_p1)
}
  0x8e   :  { %34 = dma.vmem_to_hbm [thread:$0]  %s32_s20, 128, %s129_s1, [#allocation4]  }
  0x8f   :  { %89 = dma.done.wait [#allocation4], 128  }
  0x90   :  { %90 = vsyncadd [#allocation4], 4294967168 }
  0x91   :  { %38 = vsyncpa [#allocation3], 1 }
  0x92   :  { %39 = vsyncpa [#allocation4], 1 }

// kernel: maxpooled_forward.1
= control target key start
LH: loop header
LB: loop body
LE: loop exit
PB: predicated region body
PF: predicated region fallthrough
CT: control target
= control target key end

     0   :  { %s9984_s17 = smov 0   ;;  %s14952_s0 = inlined_call_operand.vmem [shape: f32[2,16,1], index: 0, kind: input, shape index: {}]   ;;  %s14953_s1 = inlined_call_operand.vmem [shape: f32[16,640], index: 1, kind: input, shape index: {}]   ;;  %s14954_s2 = inlined_call_operand.vmem [shape: bf16[2,2,8,1024], index: 2, kind: input, shape index: {}]   ;;  %s14955_s3 = inlined_call_operand.vmem [shape: f32[2,2,3,1024], index: 3, kind: input, shape index: {}]   ;;  %s14956_s4 = inlined_call_operand.vmem [shape: bf16[144,8], index: 4, kind: input, shape index: {}]   ;;  %s14957_s5 = inlined_call_operand.vmem [shape: bf16[6,144,16], index: 5, kind: input, shape index: {}]   ;;  %s14958_s6 = inlined_call_operand.vmem [shape: f32[6,16,1], index: 6, kind: input, shape index: {}]   ;;  %s14959_s7 = inlined_call_operand.vmem [shape: bf16[144,8], index: 7, kind: input, shape index: {}]   ;;  %s14960_s8 = inlined_call_operand.vmem [shape: bf16[144,16], index: 8, kind: input, shape index: {}]   ;;  %s14961_s9 = inlined_call_operand.vmem [shape: bf16[2,144,16], index: 9, kind: input, shape index: {}]   ;;  %s14962_s10 = inlined_call_operand.vmem [shape: f32[3,16,1], index: 10, kind: input, shape index: {}]   ;;  %s14963_s11 = inlined_call_operand.vmem [shape: f32[2,3,384], index: 11, kind: output, shape index: {}]  }
   0x1 LB: > { %s8715_s18 = sadd.s32 4294967295, %s9799_s17   ;;  %p8719_p0 = scmp.ge.s32.totalorder %s9799_s17, 1  ;;  %s9799_s17 = sphi %s9984_s17, %s21_s17  }
   0x2   : > { %p357_p1 = scmp.lt.s32.totalorder %s9799_s17, 3 }
   0x4   : > { %p358_p2 = pnand %p8719_p0, %p357_p1 }
   0x6   : > { %361 = sbr.rel (%p358_p2) target bundleno = 3683 (0xe63), region = 64 }
   0xd   : > { %p407_p3 = scmp.lt.s32.totalorder %s8715_s18, 1  ;;  %v10012_v0 = vmov 4286644096   ;;  %v10014_v1 = vmov 4286644096   ;;  %s10022_s15 = smov 0  }
   0xe   : > { %v10016_v2 = vmov 4286644096   ;;  %v10018_v3 = vmov 4286644096   ;;  %v10020_v4 = vmov 4286644096  }
   0xf   : > { %s15385_s18 = smov (!%p407_p3, %s8715_s18), 1 }
  0x10   : > { %s9068_s19 = sshll.u32 %s15385_s18, 4  ;;  %s9069_s20 = sshll.u32 %s15385_s18, 6 }
  0x11   : > { %s9995_s23 = scalar_lea.vmem %s14952_s0, %s9068_s19  ;;  %s10000_s26 = scalar_lea.vmem %s14954_s2, %s9069_s20 }
  0x12   : > { %s10005_s29 = scalar_lea.vmem %s14955_s3, %s9069_s20  ;;  %s9373_s30 = smul.u32 12, %s15385_s18 }
  0x14   : > { %s10010_s14 = scalar_lea.vmem %s14963_s11, %s9373_s30 }
  0x15 LB: >> { %15030 = vst [vmem:[#allocation2_spill] sm:$0xff] %v9803_v0  ;;  %15031 = vst [vmem:[#allocation3_spill] sm:$0xff] %v9807_v1  ;;  %s9071_s16 = sshll.u32 %s9823_s15, 5  ;;  %v14964_v5 = vmov 0   ;;  %vm14988_vm0 = vcmask 1043456   ;;  %v10054_v16 = vld [vmem:[%s14956_s4] sm:$0xff]   ;;  %s9823_s15 = sphi %s10022_s15, %s434_s15   ;;  %v9819_v4 = vphi %v10020_v4, %v15231_v4   ;;  %v9815_v3 = vphi %v10018_v3, %v15230_v3   ;;  %v9811_v2 = vphi %v10016_v2, %v15228_v2   ;;  %v9807_v1 = vphi %v10014_v1, %v15227_v1   ;;  %v9803_v0 = vphi %v10012_v0, %v15225_v0  }
  0x16   : >> { %15032 = vst [vmem:[#allocation4_spill] sm:$0xff] %v9811_v2  ;;  %15033 = vst [vmem:[#allocation5_spill] sm:$0xff] %v9815_v3  ;;  %s442_s18 = scalar_lea.vmem %s10000_s26, %s9071_s16  ;;  %617 = vmatprep.mubr.bf16.mxu0 %v14964_v5  ;;  %740 = vmatprep.mubr.bf16.mxu1 %v14964_v5  ;;  %v465_v19 = vld [vmem:[%s9995_s23] sm:$0xff]  ;;  %vm14986_vm1 = vcmask 64512   ;;  %v466_v24 = vld [vmem:[%s9995_s23 + $0x8] sm:$0xff]  ;;  %s9894_s25 = smov 127  }
  0x17   : >> { %15034 = vst [vmem:[#allocation6_spill] sm:$0xff] %v9819_v4  ;;  %v443_v6 = vld [vmem:[%s442_s18] sm:$0xff]  ;;  %v444_v7 = vld [vmem:[%s442_s18 + $0x8] sm:$0xff]  ;;  %9597 = vset.pattern.permute.xlu0 %v14964_v5  ;;  %v445_v12 = vld [vmem:[%s442_s18 + $0x10] sm:$0xff]  ;;  %s9895_s27 = smov 126   ;;  %s14977_s28 = smov 96  }
  0x18   : >> { %v8739_v8 = vcombine.high %v443_v6, %v443_v6  ;;  %v8741_v9 = vcombine.high %v444_v7, %v444_v7  ;;  %v8738_v10 = vcombine.low %v443_v6, %v443_v6  ;;  %v8740_v11 = vcombine.low %v444_v7, %v444_v7  ;;  %v446_v13 = vld [vmem:[%s442_s18 + $0x18] sm:$0xff]  ;;  %1079 = vperm.xlu0 %9597, %v465_v19   ;;  %v9603_v25 = vld [vmem:[%s14956_s4 + $0x8] sm:$0xff]   ;;  %v9604_v26 = vld [vmem:[%s14956_s4 + $0x10] sm:$0xff]   ;;  %s14973_s30 = smov 95   ;;  %s9898_s12 = smov 94  }
  0x19   : >> { %v8743_v17 = vcombine.high %v445_v12, %v445_v12  ;;  %v8742_v18 = vcombine.low %v445_v12, %v445_v12  ;;  %v8745_v20 = vcombine.high %v446_v13, %v446_v13  ;;  %v8744_v21 = vcombine.low %v446_v13, %v446_v13  ;;  %v9605_v27 = vld [vmem:[%s14956_s4 + $0x18] sm:$0xff]   ;;  %v9606_v28 = vld [vmem:[%s14956_s4 + $0x20] sm:$0xff]   ;;  %v9611_v29 = vld [vmem:[%s14956_s4 + $0x28] sm:$0xff]   ;;  %s9899_s13 = smov 64   ;;  %s14979_s16 = smov 63  }
  0x1a   : >> { %8746 = vmatprep.subr.msk.bf16.mxu0 %vm14988_vm0, %v8739_v8  ;;  %8756 = vmatprep.subr.msk.bf16.mxu1 %vm14988_vm0, %v8741_v9  ;;  %v562_v14 = vsel %vm14988_vm0, %v8738_v10, 0  ;;  %v568_v15 = vsel %vm14988_vm0, %v8740_v11, 0  ;;  %v9612_v30 = vld [vmem:[%s14956_s4 + $0x30] sm:$0xff]   ;;  %v9613_v31 = vld [vmem:[%s14956_s4 + $0x38] sm:$0xff]   ;;  %v9614_v32 = vld [vmem:[%s14956_s4 + $0x40] sm:$0xff]   ;;  %s14975_s18 = smov 62  }
  0x1b   : >> { %586 = vmatpush1.bf16.msra.mxu0 %v562_v14  ;;  %709 = vmatpush1.bf16.msra.mxu1 %v568_v15  ;;  %v574_v22 = vsel %vm14988_vm0, %v8742_v18, 0  ;;  %v580_v23 = vsel %vm14988_vm0, %v8744_v21, 0  ;;  %vm1151_vm2 = vcmask 1039360   ;;  %vm1250_vm3 = vcmask 1031168   ;;  %s10983_s19 = smov 0  }
  0x1c   : >> { %8766 = vmatprep.subr.msk.bf16.mxu0 %vm14988_vm0, %v8743_v17  ;;  %8776 = vmatprep.subr.msk.bf16.mxu1 %vm14988_vm0, %v8745_v20  ;;  %vm1349_vm4 = vcmask 785408   ;;  %vm1448_vm5 = vcmask 777216   ;;  %vm1547_vm6 = vcmask 769024   ;;  %vm1646_vm7 = vcmask 523264  }
  0x1d   : >> { %1084 = vperm.xlu0 %9597, %v466_v24   ;;  %vm1745_vm8 = vcmask 515072   ;;  %vm14987_vm9 = vcmask 506880  }
  0x1e   : >> { %8747 = vmatmul.mubr.msk.bf16.vlgmr.msra.gmra.mrb[0].mxu0 %vm14986_vm1, %v10054_v16  ;;  %8757 = vmatmul.mubr.msk.bf16.vlgmr.msra.gmra.mrb[0].mxu1 %vm14986_vm1, %v10054_v16 }
  0x1f   : >> { %627 = vmatprep.mubr.bf16.mxu0 %v14964_v5  ;;  %750 = vmatprep.mubr.bf16.mxu1 %v14964_v5 }
  0x20   : >> { %832 = vmatpush1.bf16.msra.mxu0 %v574_v22  ;;  %955 = vmatpush1.bf16.msra.mxu1 %v580_v23 }
  0x26   : >> { %8748 = vmatmul.mubr.msk.bf16.gmra.mrb[4].mxu0 %vm14986_vm1, %v9603_v25  ;;  %8758 = vmatmul.mubr.msk.bf16.gmra.mrb[4].mxu1 %vm14986_vm1, %v9603_v25 }
  0x27   : >> { %637 = vmatprep.mubr.bf16.mxu0 %v14964_v5  ;;  %760 = vmatprep.mubr.bf16.mxu1 %v14964_v5 }
  0x2e   : >> { %8749 = vmatmul.mubr.msk.bf16.gmra.mrb[8].mxu0 %vm14986_vm1, %v9604_v26  ;;  %8759 = vmatmul.mubr.msk.bf16.gmra.mrb[8].mxu1 %vm14986_vm1, %v9604_v26 }
  0x2f   : >> { %647 = vmatprep.mubr.bf16.mxu0 %v14964_v5  ;;  %770 = vmatprep.mubr.bf16.mxu1 %v14964_v5 }
  0x36   : >> { %8750 = vmatmul.mubr.msk.bf16.gmra.mrb[12].mxu0 %vm14986_vm1, %v9605_v27  ;;  %8760 = vmatmul.mubr.msk.bf16.gmra.mrb[12].mxu1 %vm14986_vm1, %v9605_v27 }
  0x37   : >> { %657 = vmatprep.mubr.bf16.mxu0 %v14964_v5  ;;  %780 = vmatprep.mubr.bf16.mxu1 %v14964_v5 }
  0x3e   : >> { %8751 = vmatmul.mubr.msk.bf16.gmra.mrb[16].mxu0 %vm14986_vm1, %v9606_v28  ;;  %8761 = vmatmul.mubr.msk.bf16.gmra.mrb[16].mxu1 %vm14986_vm1, %v9606_v28 }
  0x3f   : >> { %667 = vmatprep.mubr.bf16.mxu0 %v14964_v5  ;;  %790 = vmatprep.mubr.bf16.mxu1 %v14964_v5 }
  0x46   : >> { %8752 = vmatmul.mubr.msk.bf16.gmra.mrb[20].mxu0 %vm14986_vm1, %v9611_v29  ;;  %8762 = vmatmul.mubr.msk.bf16.gmra.mrb[20].mxu1 %vm14986_vm1, %v9611_v29 }
  0x47   : >> { %677 = vmatprep.mubr.bf16.mxu0 %v14964_v5  ;;  %800 = vmatprep.mubr.bf16.mxu1 %v14964_v5 }
  0x4e   : >> { %8753 = vmatmul.mubr.msk.bf16.gmra.mrb[24].mxu0 %vm14986_vm1, %v9612_v30  ;;  %8763 = vmatmul.mubr.msk.bf16.gmra.mrb[24].mxu1 %vm14986_vm1, %v9612_v30 }
  0x4f   : >> { %687 = vmatprep.mubr.bf16.mxu0 %v14964_v5  ;;  %810 = vmatprep.mubr.bf16.mxu1 %v14964_v5 }
  0x56   : >> { %8754 = vmatmul.mubr.msk.bf16.gmra.mrb[28].mxu0 %vm14986_vm1, %v9613_v31  ;;  %8764 = vmatmul.mubr.msk.bf16.gmra.mrb[28].mxu1 %vm14986_vm1, %v9613_v31 }
  0x57   : >> { %697 = vmatprep.mubr.bf16.mxu0 %v14964_v5  ;;  %820 = vmatprep.mubr.bf16.mxu1 %v14964_v5 }
  0x5e   : >> { %8755 = vmatmul.mubr.msk.bf16.gmra.mrb[32].mxu0 %vm14986_vm1, %v9614_v32  ;;  %8765 = vmatmul.mubr.msk.bf16.gmra.mrb[32].mxu1 %vm14986_vm1, %v9614_v32 }
  0x5f   : >> { %863 = vmatprep.mubr.bf16.mxu0 %v14964_v5  ;;  %986 = vmatprep.mubr.bf16.mxu1 %v14964_v5 }
  0x66   : >> { %8767 = vmatmul.mubr.msk.bf16.vlgmr.msra.gmra.mrb[36].mxu0 %vm14986_vm1, %v10054_v16  ;;  %8777 = vmatmul.mubr.msk.bf16.vlgmr.msra.gmra.mrb[36].mxu1 %vm14986_vm1, %v10054_v16 }
  0x67   : >> { %873 = vmatprep.mubr.bf16.mxu0 %v14964_v5  ;;  %996 = vmatprep.mubr.bf16.mxu1 %v14964_v5 }
  0x6e   : >> { %8768 = vmatmul.mubr.msk.bf16.gmra.mrb[40].mxu0 %vm14986_vm1, %v9603_v25  ;;  %8778 = vmatmul.mubr.msk.bf16.gmra.mrb[40].mxu1 %vm14986_vm1, %v9603_v25 }
  0x6f   : >> { %883 = vmatprep.mubr.bf16.mxu0 %v14964_v5  ;;  %1006 = vmatprep.mubr.bf16.mxu1 %v14964_v5 }
  0x76   : >> { %8769 = vmatmul.mubr.msk.bf16.gmra.mrb[44].mxu0 %vm14986_vm1, %v9604_v26  ;;  %8779 = vmatmul.mubr.msk.bf16.gmra.mrb[44].mxu1 %vm14986_vm1, %v9604_v26 }
  0x77   : >> { %893 = vmatprep.mubr.bf16.mxu0 %v14964_v5  ;;  %1016 = vmatprep.mubr.bf16.mxu1 %v14964_v5 }
  0x7e   : >> { %8770 = vmatmul.mubr.msk.bf16.gmra.mrb[48].mxu0 %vm14986_vm1, %v9605_v27  ;;  %8780 = vmatmul.mubr.msk.bf16.gmra.mrb[48].mxu1 %vm14986_vm1, %v9605_v27 }
  0x7f   : >> { %903 = vmatprep.mubr.bf16.mxu0 %v14964_v5  ;;  %1026 = vmatprep.mubr.bf16.mxu1 %v14964_v5 }
  0x86   : >> { %8771 = vmatmul.mubr.msk.bf16.gmra.mrb[52].mxu0 %vm14986_vm1, %v9606_v28  ;;  %8781 = vmatmul.mubr.msk.bf16.gmra.mrb[52].mxu1 %vm14986_vm1, %v9606_v28 }
  0x87   : >> { %913 = vmatprep.mubr.bf16.mxu0 %v14964_v5  ;;  %1036 = vmatprep.mubr.bf16.mxu1 %v14964_v5 }
  0x8e   : >> { %8772 = vmatmul.mubr.msk.bf16.gmra.mrb[56].mxu0 %vm14986_vm1, %v9611_v29  ;;  %8782 = vmatmul.mubr.msk.bf16.gmra.mrb[56].mxu1 %vm14986_vm1, %v9611_v29 }
  0x8f   : >> { %923 = vmatprep.mubr.bf16.mxu0 %v14964_v5  ;;  %1046 = vmatprep.mubr.bf16.mxu1 %v14964_v5 }
  0x96   : >> { %8773 = vmatmul.mubr.msk.bf16.gmra.mrb[60].mxu0 %vm14986_vm1, %v9612_v30  ;;  %8783 = vmatmul.mubr.msk.bf16.gmra.mrb[60].mxu1 %vm14986_vm1, %v9612_v30 }
  0x97   : >> { %933 = vmatprep.mubr.bf16.mxu0 %v14964_v5  ;;  %1056 = vmatprep.mubr.bf16.mxu1 %v14964_v5 }
  0x9e   : >> { %8774 = vmatmul.mubr.msk.bf16.gmra.mrb[64].mxu0 %vm14986_vm1, %v9613_v31  ;;  %8784 = vmatmul.mubr.msk.bf16.gmra.mrb[64].mxu1 %vm14986_vm1, %v9613_v31 }
  0x9f   : >> { %943 = vmatprep.mubr.bf16.mxu0 %v14964_v5  ;;  %1066 = vmatprep.mubr.bf16.mxu1 %v14964_v5 }
  0xa6   : >> { %8775 = vmatmul.mubr.msk.bf16.gmra.mrb[68].mxu0 %vm14986_vm1, %v9614_v32  ;;  %8785 = vmatmul.mubr.msk.bf16.gmra.mrb[68].mxu1 %vm14986_vm1, %v9614_v32 }
  0xf1   : >> { %v10160_v33 = vpop.f32.mrb[0].mxu0  ;;  %v10162_v34 = vpop.f32.mrb[0].mxu1 }
  0xf2   : >> { %v10164_v35 = vpop.f32.mrb[1].mxu0  ;;  %v10166_v36 = vpop.f32.mrb[1].mxu1 }
  0xf3   : >> { %15035 = vst [vmem:[#allocation7_spill] sm:$0xff] %v10166_v36  ;;  %v10168_v37 = vpop.f32.mrb[2].mxu0  ;;  %v10170_v38 = vpop.f32.mrb[2].mxu1 }
  0xf4   : >> { %v10172_v39 = vpop.f32.mrb[3].mxu0  ;;  %v10174_v40 = vpop.f32.mrb[3].mxu1 }
  0xf5   : >> { %15036 = vst [vmem:[#allocation8_spill] sm:$0xff] %v10174_v40 }
  0xf9   : >> { %v629_v41 = vpop.f32.mrb[4].mxu0  ;;  %v752_v42 = vpop.f32.mrb[4].mxu1 }
  0xfa   : >> { %1123 = vrot.lane.b32.xlu0 %v752_v42, %s9894_s25  ;;  %1119 = vrot.lane.b32.xlu1 %v629_v41, %s9894_s25  ;;  %v631_v43 = vpop.f32.mrb[5].mxu0  ;;  %v754_v44 = vpop.f32.mrb[5].mxu1 }
  0xfb   : >> { %v633_v45 = vpop.f32.mrb[6].mxu0  ;;  %v756_v46 = vpop.f32.mrb[6].mxu1 }
  0xfc   : >> { %v635_v47 = vpop.f32.mrb[7].mxu0  ;;  %v758_v48 = vpop.f32.mrb[7].mxu1 }
  0xfe   : >> { %1121 = vrot.lane.b32.xlu1 %v631_v43, %s9894_s25  ;;  %1135 = vrot.lane.b32.xlu0 %v633_v45, %s9894_s25 }
 0x101   : >> { %v639_v49 = vpop.f32.mrb[8].mxu0  ;;  %v762_v50 = vpop.f32.mrb[8].mxu1 }
 0x102   : >> { %1125 = vrot.lane.b32.xlu1 %v754_v44, %s9894_s25  ;;  %1139 = vrot.lane.b32.xlu0 %v756_v46, %s9894_s25  ;;  %v641_v51 = vpop.f32.mrb[9].mxu0  ;;  %v764_v52 = vpop.f32.mrb[9].mxu1 }
 0x103   : >> { %v643_v53 = vpop.f32.mrb[10].mxu0  ;;  %v766_v54 = vpop.f32.mrb[10].mxu1 }
 0x104   : >> { %v645_v55 = vpop.f32.mrb[11].mxu0  ;;  %v768_v56 = vpop.f32.mrb[11].mxu1 }
 0x106   : >> { %1137 = vrot.lane.b32.xlu1 %v635_v47, %s9894_s25  ;;  %1218 = vrot.lane.b32.xlu0 %v639_v49, %s9895_s27 }
 0x109   : >> { %v649_v57 = vpop.f32.mrb[12].mxu0  ;;  %v772_v58 = vpop.f32.mrb[12].mxu1 }
 0x10a   : >> { %1141 = vrot.lane.b32.xlu1 %v758_v48, %s9894_s25  ;;  %1222 = vrot.lane.b32.xlu0 %v762_v50, %s9895_s27  ;;  %v651_v59 = vpop.f32.mrb[13].mxu0  ;;  %v774_v60 = vpop.f32.mrb[13].mxu1 }
 0x10b   : >> { %v653_v61 = vpop.f32.mrb[14].mxu0  ;;  %v776_v62 = vpop.f32.mrb[14].mxu1 }
 0x10c   : >> { %v655_v63 = vpop.f32.mrb[15].mxu0  ;;  %v778_v6 = vpop.f32.mrb[15].mxu1 }
 0x10e   : >> { %1220 = vrot.lane.b32.xlu1 %v641_v51, %s9895_s27  ;;  %1234 = vrot.lane.b32.xlu0 %v643_v53, %s9895_s27 }
 0x111   : >> { %v659_v7 = vpop.f32.mrb[16].mxu0  ;;  %v782_v8 = vpop.f32.mrb[16].mxu1 }
 0x112   : >> { %1224 = vrot.lane.b32.xlu1 %v764_v52, %s9895_s27  ;;  %1238 = vrot.lane.b32.xlu0 %v766_v54, %s9895_s27  ;;  %v661_v9 = vpop.f32.mrb[17].mxu0  ;;  %v784_v10 = vpop.f32.mrb[17].mxu1 }
 0x113   : >> { %v663_v11 = vpop.f32.mrb[18].mxu0  ;;  %v786_v12 = vpop.f32.mrb[18].mxu1 }
 0x114   : >> { %v665_v13 = vpop.f32.mrb[19].mxu0  ;;  %v788_v14 = vpop.f32.mrb[19].mxu1 }
 0x116   : >> { %1236 = vrot.lane.b32.xlu1 %v645_v55, %s9895_s27  ;;  %1317 = vrot.lane.b32.xlu0 %v649_v57, %s14977_s28 }
 0x119   : >> { %v669_v15 = vpop.f32.mrb[20].mxu0  ;;  %v792_v16 = vpop.f32.mrb[20].mxu1 }
 0x11a   : >> { %1240 = vrot.lane.b32.xlu1 %v768_v56, %s9895_s27  ;;  %1321 = vrot.lane.b32.xlu0 %v772_v58, %s14977_s28  ;;  %v671_v17 = vpop.f32.mrb[21].mxu0  ;;  %v794_v18 = vpop.f32.mrb[21].mxu1 }
 0x11b   : >> { %v673_v19 = vpop.f32.mrb[22].mxu0  ;;  %v796_v20 = vpop.f32.mrb[22].mxu1 }
 0x11c   : >> { %v10194_v21 = vpop.f32.mrb[23].mxu0  ;;  %v10196_v22 = vpop.f32.mrb[23].mxu1 }
 0x11e   : >> { %1319 = vrot.lane.b32.xlu1 %v651_v59, %s14977_s28  ;;  %1333 = vrot.lane.b32.xlu0 %v653_v61, %s14977_s28 }
 0x121   : >> { %v679_v23 = vpop.f32.mrb[24].mxu0  ;;  %v10200_v24 = vpop.f32.mrb[24].mxu1 }
 0x122   : >> { %1323 = vrot.lane.b32.xlu1 %v774_v60, %s14977_s28  ;;  %1337 = vrot.lane.b32.xlu0 %v776_v62, %s14977_s28  ;;  %v10204_v25 = vpop.f32.mrb[25].mxu0  ;;  %v10206_v26 = vpop.f32.mrb[25].mxu1 }
 0x123   : >> { %v10208_v27 = vpop.f32.mrb[26].mxu0  ;;  %v10210_v28 = vpop.f32.mrb[26].mxu1 }
 0x124   : >> { %v10212_v29 = vpop.f32.mrb[27].mxu0  ;;  %v10214_v30 = vpop.f32.mrb[27].mxu1 }
 0x126   : >> { %1335 = vrot.lane.b32.xlu1 %v655_v63, %s14977_s28  ;;  %1416 = vrot.lane.b32.xlu0 %v659_v7, %s14973_s30 }
 0x129   : >> { %v10218_v31 = vpop.f32.mrb[28].mxu0  ;;  %v10220_v32 = vpop.f32.mrb[28].mxu1 }
 0x12a   : >> { %1339 = vrot.lane.b32.xlu1 %v778_v6, %s14977_s28  ;;  %1420 = vrot.lane.b32.xlu0 %v782_v8, %s14973_s30  ;;  %v10224_v41 = vpop.f32.mrb[29].mxu0  ;;  %v10226_v42 = vpop.f32.mrb[29].mxu1 }
 0x12b   : >> { %v10228_v43 = vpop.f32.mrb[30].mxu0  ;;  %v10230_v44 = vpop.f32.mrb[30].mxu1 }
 0x12c   : >> { %v10232_v45 = vpop.f32.mrb[31].mxu0  ;;  %v10234_v46 = vpop.f32.mrb[31].mxu1 }
 0x12e   : >> { %1418 = vrot.lane.b32.xlu1 %v661_v9, %s14973_s30  ;;  %1432 = vrot.lane.b32.xlu0 %v663_v11, %s14973_s30 }
 0x131   : >> { %v10238_v47 = vpop.f32.mrb[32].mxu0  ;;  %v10240_v48 = vpop.f32.mrb[32].mxu1 }
 0x132   : >> { %1422 = vrot.lane.b32.xlu1 %v784_v10, %s14973_s30  ;;  %1436 = vrot.lane.b32.xlu0 %v786_v12, %s14973_s30  ;;  %v10244_v49 = vpop.f32.mrb[33].mxu1  ;;  %v10246_v50 = vpop.f32.mrb[33].mxu0 }
 0x133   : >> { %v10248_v51 = vpop.f32.mrb[34].mxu0  ;;  %v10250_v52 = vpop.f32.mrb[34].mxu1 }
 0x134   : >> { %v10252_v53 = vpop.f32.mrb[35].mxu0  ;;  %v10254_v54 = vpop.f32.mrb[35].mxu1 }
 0x136   : >> { %1434 = vrot.lane.b32.xlu1 %v665_v13, %s14973_s30  ;;  %1515 = vrot.lane.b32.xlu0 %v669_v15, %s9898_s12 }
 0x139   : >> { %v10258_v55 = vpop.f32.mrb[36].mxu0  ;;  %v10260_v56 = vpop.f32.mrb[36].mxu1 }
 0x13a   : >> { %15037 = vst [vmem:[#allocation9_spill] sm:$0xff] %v10258_v55  ;;  %15038 = vst [vmem:[#allocation10_spill] sm:$0xff] %v10260_v56  ;;  %1438 = vrot.lane.b32.xlu1 %v788_v14, %s14973_s30  ;;  %1519 = vrot.lane.b32.xlu0 %v792_v16, %s9898_s12  ;;  %v10264_v57 = vpop.f32.mrb[37].mxu1  ;;  %v10266_v58 = vpop.f32.mrb[37].mxu0 }
 0x13b   : >> { %15039 = vst [vmem:[#allocation11_spill] sm:$0xff] %v10264_v57  ;;  %15040 = vst [vmem:[#allocation12_spill] sm:$0xff] %v10266_v58  ;;  %v10268_v59 = vpop.f32.mrb[38].mxu0  ;;  %v10270_v60 = vpop.f32.mrb[38].mxu1 }
 0x13c   : >> { %15041 = vst [vmem:[#allocation13_spill] sm:$0xff] %v10268_v59  ;;  %15042 = vst [vmem:[#allocation14_spill] sm:$0xff] %v10270_v60  ;;  %v10272_v61 = vpop.f32.mrb[39].mxu1  ;;  %v10274_v62 = vpop.f32.mrb[39].mxu0 }
 0x13d   : >> { %15043 = vst [vmem:[#allocation15_spill] sm:$0xff] %v10272_v61  ;;  %15044 = vst [vmem:[#allocation16_spill] sm:$0xff] %v10274_v62 }
 0x13e   : >> { %1517 = vrot.lane.b32.xlu1 %v671_v17, %s9898_s12  ;;  %1531 = vrot.lane.b32.xlu0 %v673_v19, %s9898_s12 }
 0x141   : >> { %v10278_v63 = vpop.f32.mrb[40].mxu0  ;;  %v10280_v6 = vpop.f32.mrb[40].mxu1 }
 0x142   : >> { %1521 = vrot.lane.b32.xlu1 %v794_v18, %s9898_s12  ;;  %1535 = vrot.lane.b32.xlu0 %v796_v20, %s9898_s12  ;;  %v10284_v7 = vpop.f32.mrb[41].mxu0  ;;  %v10286_v8 = vpop.f32.mrb[41].mxu1 }
 0x143   : >> { %v10288_v9 = vpop.f32.mrb[42].mxu0  ;;  %v10290_v10 = vpop.f32.mrb[42].mxu1 }
 0x144   : >> { %v10292_v11 = vpop.f32.mrb[43].mxu0  ;;  %v10294_v12 = vpop.f32.mrb[43].mxu1 }
 0x146   : >> { %1533 = vrot.lane.b32.xlu1 %v10194_v21, %s9898_s12  ;;  %1614 = vrot.lane.b32.xlu0 %v679_v23, %s9899_s13 }
 0x149   : >> { %v10299_v13 = vpop.f32.mrb[44].mxu0  ;;  %v10301_v14 = vpop.f32.mrb[44].mxu1 }
 0x14a   : >> { %1537 = vrot.lane.b32.xlu1 %v10196_v22, %s9898_s12  ;;  %1618 = vrot.lane.b32.xlu0 %v10200_v24, %s9899_s13  ;;  %v10307_v15 = vpop.f32.mrb[45].mxu0  ;;  %v10309_v16 = vpop.f32.mrb[45].mxu1 }
 0x14b   : >> { %v10311_v17 = vpop.f32.mrb[46].mxu0  ;;  %v10313_v18 = vpop.f32.mrb[46].mxu1 }
 0x14c   : >> { %v10315_v19 = vpop.f32.mrb[47].mxu0  ;;  %v10317_v20 = vpop.f32.mrb[47].mxu1 }
 0x14e   : >> { %1616 = vrot.lane.b32.xlu1 %v10204_v25, %s9899_s13  ;;  %1630 = vrot.lane.b32.xlu0 %v10208_v27, %s9899_s13 }
 0x151   : >> { %v10323_v21 = vpop.f32.mrb[48].mxu0  ;;  %v10325_v22 = vpop.f32.mrb[48].mxu1 }
 0x152   : >> { %1620 = vrot.lane.b32.xlu1 %v10206_v26, %s9899_s13  ;;  %1634 = vrot.lane.b32.xlu0 %v10210_v28, %s9899_s13  ;;  %v10331_v23 = vpop.f32.mrb[49].mxu0  ;;  %v10333_v24 = vpop.f32.mrb[49].mxu1 }
 0x153   : >> { %v10335_v5 = vpop.f32.mrb[50].mxu0  ;;  %v10337_v25 = vpop.f32.mrb[50].mxu1 }
 0x154   : >> { %v10339_v0 = vpop.f32.mrb[51].mxu0  ;;  %v10341_v27 = vpop.f32.mrb[51].mxu1 }
 0x156   : >> { %1632 = vrot.lane.b32.xlu1 %v10212_v29, %s9899_s13  ;;  %1713 = vrot.lane.b32.xlu0 %v10218_v31, %s14979_s16 }
 0x159   : >> { %v10347_v26 = vpop.f32.mrb[52].mxu0  ;;  %v10349_v28 = vpop.f32.mrb[52].mxu1 }
 0x15a   : >> { %1636 = vrot.lane.b32.xlu1 %v10214_v30, %s9899_s13  ;;  %1717 = vrot.lane.b32.xlu0 %v10220_v32, %s14979_s16  ;;  %v10355_v1 = vpop.f32.mrb[53].mxu0  ;;  %v10357_v2 = vpop.f32.mrb[53].mxu1 }
 0x15b   : >> { %v10359_v3 = vpop.f32.mrb[54].mxu0  ;;  %v10361_v29 = vpop.f32.mrb[54].mxu1 }
 0x15c   : >> { %v10363_v4 = vpop.f32.mrb[55].mxu0  ;;  %v10365_v31 = vpop.f32.mrb[55].mxu1 }
 0x15d   : >> { %v10371_v30 = vpop.permute.xlu0 %1079 }
 0x15e   : >> { %1715 = vrot.lane.b32.xlu1 %v10224_v41, %s14979_s16  ;;  %1729 = vrot.lane.b32.xlu0 %v10228_v43, %s14979_s16 }
 0x161   : >> { %v10373_v32 = vpop.f32.mrb[56].mxu0  ;;  %v10375_v61 = vpop.f32.mrb[56].mxu1 }
 0x162   : >> { %1719 = vrot.lane.b32.xlu1 %v10226_v42, %s14979_s16  ;;  %1733 = vrot.lane.b32.xlu0 %v10230_v44, %s14979_s16  ;;  %v10381_v60 = vpop.f32.mrb[57].mxu0  ;;  %v10383_v62 = vpop.f32.mrb[57].mxu1 }
 0x163   : >> { %v10385_v41 = vpop.f32.mrb[58].mxu0  ;;  %v10387_v59 = vpop.f32.mrb[58].mxu1 }
 0x164   : >> { %v10389_v43 = vpop.f32.mrb[59].mxu0  ;;  %v10391_v57 = vpop.f32.mrb[59].mxu1 }
 0x165   : >> { %15045 = vst [vmem:[#allocation17_spill] sm:$0xff] %v10391_v57  ;;  %v10397_v42 = vpop.permute.xlu0 %1084 }
 0x166   : >> { %1731 = vrot.lane.b32.xlu1 %v10232_v45, %s14979_s16  ;;  %1812 = vrot.lane.b32.xlu0 %v10238_v47, %s14975_s18 }
 0x169   : >> { %v10399_v44 = vpop.f32.mrb[60].mxu0  ;;  %v10401_v56 = vpop.f32.mrb[60].mxu1 }
 0x16a   : >> { %15046 = vst [vmem:[#allocation18_spill] sm:$0xff] %v10401_v56  ;;  %1735 = vrot.lane.b32.xlu1 %v10234_v46, %s14979_s16  ;;  %1816 = vrot.lane.b32.xlu0 %v10240_v48, %s14975_s18  ;;  %v10407_v58 = vpop.f32.mrb[61].mxu0  ;;  %v10409_v55 = vpop.f32.mrb[61].mxu1 }
 0x16b   : >> { %15047 = vst [vmem:[#allocation19_spill] sm:$0xff] %v10407_v58  ;;  %15048 = vst [vmem:[#allocation20_spill] sm:$0xff] %v10409_v55  ;;  %v10411_v45 = vpop.f32.mrb[62].mxu0  ;;  %v10413_v40 = vpop.f32.mrb[62].mxu1 }
 0x16c   : >> { %15049 = vst [vmem:[#allocation21_spill] sm:$0xff] %v10411_v45  ;;  %15050 = vst [vmem:[#allocation22_spill] sm:$0xff] %v10413_v40  ;;  %v10415_v47 = vpop.permute.xlu0 %1123  ;;  %v10417_v36 = vpop.permute.xlu1 %1119 }
 0x16d   : >> { %15051 = vst [vmem:[#allocation23_spill] sm:$0xff] %v10417_v36  ;;  %v10419_v57 = vpop.f32.mrb[63].mxu0  ;;  %v10421_v56 = vpop.f32.mrb[63].mxu1 }
 0x16e   : >> { %15052 = vst [vmem:[#allocation24_spill] sm:$0xff] %v10419_v57  ;;  %15053 = vst [vmem:[#allocation25_spill] sm:$0xff] %v10421_v56  ;;  %1814 = vrot.lane.b32.xlu1 %v10246_v50, %s14975_s18  ;;  %1828 = vrot.lane.b32.xlu0 %v10248_v51, %s14975_s18 }
 0x170   : >> { %v10427_v46 = vpop.permute.xlu1 %1121  ;;  %v10429_v48 = vpop.permute.xlu0 %1135 }
 0x171   : >> { %v10431_v55 = vpop.f32.mrb[64].mxu0  ;;  %v10433_v40 = vpop.f32.mrb[64].mxu1 }
 0x172   : >> { %15054 = vst [vmem:[#allocation26_spill] sm:$0xff] %v10431_v55  ;;  %15055 = vst [vmem:[#allocation27_spill] sm:$0xff] %v10433_v40  ;;  %1818 = vrot.lane.b32.xlu1 %v10244_v49, %s14975_s18  ;;  %1832 = vrot.lane.b32.xlu0 %v10250_v52, %s14975_s18  ;;  %v10439_v56 = vpop.f32.mrb[65].mxu0  ;;  %v10441_v50 = vpop.f32.mrb[65].mxu1 }
 0x173   : >> { %15056 = vst [vmem:[#allocation28_spill] sm:$0xff] %v10439_v56  ;;  %15057 = vst [vmem:[#allocation29_spill] sm:$0xff] %v10441_v50  ;;  %v10443_v57 = vpop.f32.mrb[66].mxu0  ;;  %v10445_v51 = vpop.f32.mrb[66].mxu1 }
 0x174   : >> { %15058 = vst [vmem:[#allocation30_spill] sm:$0xff] %v10443_v57  ;;  %15059 = vst [vmem:[#allocation31_spill] sm:$0xff] %v10445_v51  ;;  %v10447_v45 = vpop.permute.xlu1 %1125  ;;  %v10449_v58 = vpop.permute.xlu0 %1139 }
 0x175   : >> { %v10451_v55 = vpop.f32.mrb[67].mxu0  ;;  %v10453_v40 = vpop.f32.mrb[67].mxu1 }
 0x176   : >> { %15060 = vst [vmem:[#allocation32_spill] sm:$0xff] %v10451_v55  ;;  %15061 = vst [vmem:[#allocation33_spill] sm:$0xff] %v10453_v40  ;;  %1830 = vrot.lane.b32.xlu1 %v10252_v53, %s14975_s18  ;;  %1127 = vrot.lane.b32.xlu0 %v10278_v63, %s9894_s25 }
 0x178   : >> { %v10459_v49 = vpop.permute.xlu1 %1137  ;;  %v10461_v52 = vpop.permute.xlu0 %1218 }
 0x179   : >> { %v10463_v50 = vpop.f32.mrb[68].mxu0  ;;  %v10465_v51 = vpop.f32.mrb[68].mxu1 }
 0x17a   : >> { %15062 = vst [vmem:[#allocation34_spill] sm:$0xff] %v10463_v50  ;;  %15063 = vst [vmem:[#allocation35_spill] sm:$0xff] %v10465_v51  ;;  %1834 = vrot.lane.b32.xlu1 %v10254_v54, %s14975_s18  ;;  %1131 = vrot.lane.b32.xlu0 %v10280_v6, %s9894_s25  ;;  %v10471_v40 = vpop.f32.mrb[69].mxu0  ;;  %v10473_v53 = vpop.f32.mrb[69].mxu1 }
 0x17b   : >> { %15064 = vst [vmem:[#allocation36_spill] sm:$0xff] %v10471_v40  ;;  %15065 = vst [vmem:[#allocation37_spill] sm:$0xff] %v10473_v53  ;;  %v10475_v55 = vpop.f32.mrb[70].mxu0  ;;  %v10477_v63 = vpop.f32.mrb[70].mxu1 }
 0x17c   : >> { %15066 = vst [vmem:[#allocation38_spill] sm:$0xff] %v10475_v55  ;;  %15067 = vst [vmem:[#allocation39_spill] sm:$0xff] %v10477_v63  ;;  %v10479_v57 = vpop.permute.xlu1 %1141  ;;  %v10481_v56 = vpop.permute.xlu0 %1222  ;;  %v1087_v55 = vadd.f32 %v10371_v30, %v10160_v33  ;;  %v1088_v33 = vadd.f32 %v10371_v30, %v10164_v35 }
 0x17d   : >> { %v10483_v50 = vpop.f32.mrb[71].mxu0  ;;  %v10485_v51 = vpop.f32.mrb[71].mxu1 }
 0x17e   : >> { %15068 = vst [vmem:[#allocation40_spill] sm:$0xff] %v10483_v50  ;;  %15069 = vst [vmem:[#allocation41_spill] sm:$0xff] %v10485_v51  ;;  %1129 = vrot.lane.b32.xlu1 %v10284_v7, %s9894_s25  ;;  %1143 = vrot.lane.b32.xlu0 %v10288_v9, %s9894_s25 }
 0x180   : >> { %v10491_v54 = vpop.permute.xlu1 %1220  ;;  %v10493_v6 = vpop.permute.xlu0 %1234 }
 0x181   : >> { %v1251_v35 = vsel %vm1250_vm3, %v10461_v52, %v10491_v54 }
 0x182   : >> { %1133 = vrot.lane.b32.xlu1 %v10286_v8, %s9894_s25  ;;  %1147 = vrot.lane.b32.xlu0 %v10290_v10, %s9894_s25 }
 0x184   : >> { %v10499_v63 = vpop.permute.xlu1 %1224  ;;  %v1239_v50 = vpop.permute.xlu0 %1238 }
 0x186   : >> { %1145 = vrot.lane.b32.xlu1 %v10292_v11, %s9894_s25  ;;  %1226 = vrot.lane.b32.xlu0 %v10299_v13, %s9895_s27 }
 0x188   : >> { %v10505_v7 = vpop.permute.xlu1 %1236  ;;  %v10507_v9 = vpop.permute.xlu0 %1317 }
 0x18a   : >> { %1149 = vrot.lane.b32.xlu1 %v10294_v12, %s9894_s25  ;;  %1230 = vrot.lane.b32.xlu0 %v10301_v14, %s9895_s27 }
 0x18c   : >> { %v10513_v8 = vpop.permute.xlu1 %1240  ;;  %v10515_v10 = vpop.permute.xlu0 %1321 }
 0x18e   : >> { %1228 = vrot.lane.b32.xlu1 %v10307_v15, %s9895_s27  ;;  %1242 = vrot.lane.b32.xlu0 %v10311_v17, %s9895_s27 }
 0x190   : >> { %v1320_v11 = vpop.permute.xlu1 %1319  ;;  %v10521_v13 = vpop.permute.xlu0 %1333 }
 0x192   : >> { %1232 = vrot.lane.b32.xlu1 %v10309_v16, %s9895_s27  ;;  %1246 = vrot.lane.b32.xlu0 %v10313_v18, %s9895_s27 }
 0x194   : >> { %v10527_v12 = vpop.permute.xlu1 %1323  ;;  %v1338_v14 = vpop.permute.xlu0 %1337 }
 0x196   : >> { %1244 = vrot.lane.b32.xlu1 %v10315_v19, %s9895_s27  ;;  %1325 = vrot.lane.b32.xlu0 %v10323_v21, %s14977_s28 }
 0x198   : >> { %v10533_v15 = vpop.permute.xlu1 %1335  ;;  %v10535_v17 = vpop.permute.xlu0 %1416 }
 0x19a   : >> { %1248 = vrot.lane.b32.xlu1 %v10317_v20, %s9895_s27  ;;  %1329 = vrot.lane.b32.xlu0 %v10325_v22, %s14977_s28  ;;  %v1160_v20 = vsel %vm1151_vm2, %v10459_v49, %v10449_v58  ;;  %v1096_v22 = vadd.f32 %v10397_v42, %v10172_v39  ;;  %v1152_v39 = vsel %vm1151_vm2, %v10417_v36, %v10427_v46 }
 0x19b   : >> { %v1186_v36 = vadd.f32 %v1152_v39, %v1087_v55 }
 0x19c   : >> { %v10541_v16 = vpop.permute.xlu1 %1339  ;;  %v10543_v18 = vpop.permute.xlu0 %1420 }
 0x19d   : >> { %v1359_v55 = vsel %vm1349_vm4, %v1338_v14, %v10541_v16 }
 0x19e   : >> { %1327 = vrot.lane.b32.xlu1 %v10331_v23, %s14977_s28  ;;  %1341 = vrot.lane.b32.xlu0 %v10335_v5, %s14977_s28  ;;  %v1259_v5 = vsel %vm1250_vm3, %v10505_v7, %v1239_v50  ;;  %v1195_v23 = vadd.f32 %v1160_v20, %v1096_v22  ;;  %v1089_v20 = vadd.f32 %v10371_v30, %v10162_v34 }
 0x19f   : >> { %v1097_v22 = vadd.f32 %v10397_v42, %v10170_v38  ;;  %v1260_v34 = vsel %vm1250_vm3, %v1239_v50, %v10513_v8  ;;  %v1154_v38 = vsel %vm1151_vm2, %v10415_v47, %v10447_v45 }
 0x1a0   : >> { %v1419_v19 = vpop.permute.xlu1 %1418  ;;  %v10549_v21 = vpop.permute.xlu0 %1432  ;;  %v1294_v40 = vadd.f32 %v1259_v5, %v1195_v23 }
 0x1a2   : >> { %1331 = vrot.lane.b32.xlu1 %v10333_v24, %s14977_s28  ;;  %1345 = vrot.lane.b32.xlu0 %v10337_v25, %s14977_s28  ;;  %v1161_v24 = vsel %vm1151_vm2, %v10449_v58, %v10479_v57  ;;  %v1358_v25 = vsel %vm1349_vm4, %v10533_v15, %v1338_v14  ;;  %v1153_v58 = vsel %vm1151_vm2, %v10427_v46, %v10415_v47 }
 0x1a3   : >> { %v1393_v5 = vadd.f32 %v1358_v25, %v1294_v40  ;;  %v1252_v46 = vsel %vm1250_vm3, %v10491_v54, %v10481_v56  ;;  %v1187_v39 = vadd.f32 %v1153_v58, %v1088_v33  ;;  %v1095_v40 = vadd.f32 %v10397_v42, %v10168_v37 }
 0x1a4   : >> { %v10562_v51 = vpop.permute.xlu1 %1422  ;;  %v1437_v53 = vpop.permute.xlu0 %1436  ;;  %v1188_v25 = vadd.f32 %v1154_v38, %v1089_v20  ;;  %v1350_v54 = vsel %vm1349_vm4, %v10507_v9, %v1320_v11  ;;  %v1351_v14 = vsel %vm1349_vm4, %v1320_v11, %v10515_v10  ;;  %v1285_v33 = vadd.f32 %v1251_v35, %v1186_v36 }
 0x1a5   : >> { %v1286_v58 = vadd.f32 %v1252_v46, %v1187_v39  ;;  %v1253_v37 = vsel %vm1250_vm3, %v10481_v56, %v10499_v63  ;;  %v1449_v20 = vsel %vm1448_vm5, %v10535_v17, %v1419_v19  ;;  %v1450_v11 = vsel %vm1448_vm5, %v1419_v19, %v10543_v18 }
 0x1a6   : >> { %1343 = vrot.lane.b32.xlu1 %v10339_v0, %s14977_s28  ;;  %1424 = vrot.lane.b32.xlu0 %v10347_v26, %s14973_s30  ;;  %v1196_v0 = vadd.f32 %v1161_v24, %v1097_v22  ;;  %v1159_v22 = vsel %vm1151_vm2, %v10429_v48, %v10459_v49  ;;  %v1384_v49 = vadd.f32 %v1350_v54, %v1285_v33 }
 0x1a7   : >> { %v1385_v36 = vadd.f32 %v1351_v14, %v1286_v58  ;;  %v1352_v56 = vsel %vm1349_vm4, %v10515_v10, %v10527_v12  ;;  %v1287_v35 = vadd.f32 %v1253_v37, %v1188_v25 }
 0x1a8   : >> { %v1435_v23 = vpop.permute.xlu1 %1434  ;;  %v10592_v26 = vpop.permute.xlu0 %1515  ;;  %v1295_v47 = vadd.f32 %v1260_v34, %v1196_v0  ;;  %v1483_v19 = vadd.f32 %v1449_v20, %v1384_v49 }
 0x1a9   : >> { %v1457_v50 = vsel %vm1448_vm5, %v1435_v23, %v1437_v53  ;;  %v1484_v46 = vadd.f32 %v1450_v11, %v1385_v36  ;;  %v1386_v39 = vadd.f32 %v1352_v56, %v1287_v35 }
 0x1aa   : >> { %v1492_v24 = vadd.f32 %v1457_v50, %v1393_v5  ;;  %1347 = vrot.lane.b32.xlu1 %v10341_v27, %s14977_s28  ;;  %1428 = vrot.lane.b32.xlu0 %v10349_v28, %s14973_s30  ;;  %v1394_v27 = vadd.f32 %v1359_v55, %v1295_v47  ;;  %v1194_v5 = vadd.f32 %v1159_v22, %v1095_v40 }
 0x1ab   : >> { %v1258_v50 = vsel %vm1250_vm3, %v10493_v6, %v10505_v7  ;;  %v1357_v7 = vsel %vm1349_vm4, %v10521_v13, %v10533_v15  ;;  %v1456_v22 = vsel %vm1448_vm5, %v10549_v21, %v1435_v23 }
 0x1ac   : >> { %v10616_v34 = vpop.permute.xlu1 %1438  ;;  %v1520_v28 = vpop.permute.xlu0 %1519  ;;  %v1293_v25 = vadd.f32 %v1258_v50, %v1194_v5  ;;  %v15070_v50 = vld [vmem:[#allocation17_spill] sm:$0xff] }
 0x1ad   : >> { %v1458_v38 = vsel %vm1448_vm5, %v1437_v53, %v10616_v34 }
 0x1ae   : >> { %v1493_v0 = vadd.f32 %v1458_v38, %v1394_v27  ;;  %1426 = vrot.lane.b32.xlu1 %v10355_v1, %s14973_s30  ;;  %1440 = vrot.lane.b32.xlu0 %v10359_v3, %s14973_s30  ;;  %v1451_v1 = vsel %vm1448_vm5, %v10543_v18, %v10562_v51  ;;  %v1392_v58 = vadd.f32 %v1357_v7, %v1293_v25 }
 0x1af   : >> { %v1485_v18 = vadd.f32 %v1451_v1, %v1386_v39  ;;  %v15071_v1 = vld [vmem:[#allocation18_spill] sm:$0xff]  ;;  %v15072_v39 = vld [vmem:[#allocation19_spill] sm:$0xff] }
 0x1b0   : >> { %v1518_v55 = vpop.permute.xlu1 %1517  ;;  %v10634_v53 = vpop.permute.xlu0 %1531 }
 0x1b1   : >> { %v1548_v3 = vsel %vm1547_vm6, %v10592_v26, %v1518_v55  ;;  %v1549_v10 = vsel %vm1547_vm6, %v1518_v55, %v1520_v28 }
 0x1b2   : >> { %v1582_v47 = vadd.f32 %v1548_v3, %v1483_v19  ;;  %v1583_v40 = vadd.f32 %v1549_v10, %v1484_v46  ;;  %1430 = vrot.lane.b32.xlu1 %v10357_v2, %s14973_s30  ;;  %1444 = vrot.lane.b32.xlu0 %v10361_v29, %s14973_s30  ;;  %v1491_v29 = vadd.f32 %v1456_v22, %v1392_v58  ;;  %v15075_v58 = vld [vmem:[#allocation22_spill] sm:$0xff] }
 0x1b4   : >> { %v10652_v54 = vpop.permute.xlu1 %1521  ;;  %v1536_v14 = vpop.permute.xlu0 %1535 }
 0x1b5   : >> { %v1550_v33 = vsel %vm1547_vm6, %v1520_v28, %v10652_v54 }
 0x1b6   : >> { %v1584_v2 = vadd.f32 %v1550_v33, %v1485_v18  ;;  %1442 = vrot.lane.b32.xlu1 %v10363_v4, %s14973_s30  ;;  %1523 = vrot.lane.b32.xlu0 %v10373_v32, %s9898_s12  ;;  %v15074_v33 = vld [vmem:[#allocation20_spill] sm:$0xff] }
 0x1b8   : >> { %v1534_v15 = vpop.permute.xlu1 %1533  ;;  %v10662_v27 = vpop.permute.xlu0 %1614 }
 0x1b9   : >> { %v1555_v37 = vsel %vm1547_vm6, %v10634_v53, %v1534_v15  ;;  %v1556_v23 = vsel %vm1547_vm6, %v1534_v15, %v1536_v14 }
 0x1ba   : >> { %v1590_v20 = vadd.f32 %v1555_v37, %v1491_v29  ;;  %v1591_v11 = vadd.f32 %v1556_v23, %v1492_v24  ;;  %1446 = vrot.lane.b32.xlu1 %v10365_v31, %s14973_s30  ;;  %1527 = vrot.lane.b32.xlu0 %v10375_v61, %s9898_s12  ;;  %v15076_v23 = vld [vmem:[#allocation24_spill] sm:$0xff] }
 0x1bc   : >> { %v10671_v4 = vpop.permute.xlu1 %1537  ;;  %v1619_v32 = vpop.permute.xlu0 %1618 }
 0x1bd   : >> { %v1557_v28 = vsel %vm1547_vm6, %v1536_v14, %v10671_v4 }
 0x1be   : >> { %v1592_v38 = vadd.f32 %v1557_v28, %v1493_v0  ;;  %1525 = vrot.lane.b32.xlu1 %v10381_v60, %s9898_s12  ;;  %1539 = vrot.lane.b32.xlu0 %v10385_v41, %s9898_s12 }
 0x1c0   : >> { %v1617_v24 = vpop.permute.xlu1 %1616  ;;  %v10679_v49 = vpop.permute.xlu0 %1630 }
 0x1c1   : >> { %v1647_v61 = vsel %vm1646_vm7, %v10662_v27, %v1617_v24  ;;  %v1648_v31 = vsel %vm1646_vm7, %v1617_v24, %v1619_v32 }
 0x1c2   : >> { %v1681_v36 = vadd.f32 %v1647_v61, %v1582_v47  ;;  %v1682_v56 = vadd.f32 %v1648_v31, %v1583_v40  ;;  %1529 = vrot.lane.b32.xlu1 %v10383_v62, %s9898_s12  ;;  %1543 = vrot.lane.b32.xlu0 %v10387_v59, %s9898_s12  ;;  %v15073_v47 = vld [vmem:[#allocation21_spill] sm:$0xff] }
 0x1c3   : >> { %v15078_v31 = vld [vmem:[#allocation25_spill] sm:$0xff] }
 0x1c4   : >> { %v10688_v60 = vpop.permute.xlu1 %1620  ;;  %v1635_v41 = vpop.permute.xlu0 %1634 }
 0x1c5   : >> { %v1649_v0 = vsel %vm1646_vm7, %v1619_v32, %v10688_v60 }
 0x1c6   : >> { %v1683_v5 = vadd.f32 %v1649_v0, %v1584_v2  ;;  %1541 = vrot.lane.b32.xlu1 %v10389_v43, %s9898_s12  ;;  %1622 = vrot.lane.b32.xlu0 %v10399_v44, %s9899_s13 }
 0x1c8   : >> { %v1633_v35 = vpop.permute.xlu1 %1632  ;;  %v10696_v19 = vpop.permute.xlu0 %1713 }
 0x1c9   : >> { %v1654_v62 = vsel %vm1646_vm7, %v10679_v49, %v1633_v35  ;;  %v1655_v59 = vsel %vm1646_vm7, %v1633_v35, %v1635_v41  ;;  %v15080_v35 = vld [vmem:[#allocation28_spill] sm:$0xff] }
 0x1ca   : >> { %v1689_v46 = vadd.f32 %v1654_v62, %v1590_v20  ;;  %v1690_v55 = vadd.f32 %v1655_v59, %v1591_v11  ;;  %1545 = vrot.lane.b32.xlu1 %v15070_v50, %s9898_s12  ;;  %1626 = vrot.lane.b32.xlu0 %v15071_v1, %s9899_s13  ;;  %v15077_v20 = vld [vmem:[#allocation26_spill] sm:$0xff] }
 0x1cb   : >> { %v15081_v62 = vld [vmem:[#allocation30_spill] sm:$0xff] }
 0x1cc   : >> { %v10705_v43 = vpop.permute.xlu1 %1636  ;;  %v1718_v3 = vpop.permute.xlu0 %1717 }
 0x1cd   : >> { %v1656_v44 = vsel %vm1646_vm7, %v1635_v41, %v10705_v43 }
 0x1ce   : >> { %v1691_v10 = vadd.f32 %v1656_v44, %v1592_v38  ;;  %1624 = vrot.lane.b32.xlu1 %v15072_v39, %s9899_s13  ;;  %1638 = vrot.lane.b32.xlu0 %v15073_v47, %s9899_s13  ;;  %v15082_v44 = vld [vmem:[#allocation29_spill] sm:$0xff] }
 0x1d0   : >> { %v1716_v40 = vpop.permute.xlu1 %1715  ;;  %v10713_v7 = vpop.permute.xlu0 %1729 }
 0x1d1   : >> { %v1746_v25 = vsel %vm1745_vm8, %v10696_v19, %v1716_v40  ;;  %v1747_v18 = vsel %vm1745_vm8, %v1716_v40, %v1718_v3 }
 0x1d2   : >> { %v1780_v14 = vadd.f32 %v1746_v25, %v1681_v36  ;;  %v1781_v22 = vadd.f32 %v1747_v18, %v1682_v56  ;;  %1628 = vrot.lane.b32.xlu1 %v15074_v33, %s9899_s13  ;;  %1642 = vrot.lane.b32.xlu0 %v15075_v58, %s9899_s13  ;;  %v15079_v36 = vld [vmem:[#allocation27_spill] sm:$0xff]  ;;  %v15084_v18 = vld [vmem:[#allocation32_spill] sm:$0xff]  ;;  %v15085_v33 = vld [vmem:[#allocation34_spill] sm:$0xff] }
 0x1d4   : >> { %v10722_v2 = vpop.permute.xlu1 %1719  ;;  %v1734_v29 = vpop.permute.xlu0 %1733 }
 0x1d5   : >> { %v1748_v15 = vsel %vm1745_vm8, %v1718_v3, %v10722_v2 }
 0x1d6   : >> { %v1782_v37 = vadd.f32 %v1748_v15, %v1683_v5  ;;  %1640 = vrot.lane.b32.xlu1 %v15076_v23, %s9899_s13  ;;  %1721 = vrot.lane.b32.xlu0 %v15077_v20, %s14979_s16 }
 0x1d8   : >> { %v1732_v11 = vpop.permute.xlu1 %1731  ;;  %v10730_v32 = vpop.permute.xlu0 %1812 }
 0x1d9   : >> { %v1753_v28 = vsel %vm1745_vm8, %v10713_v7, %v1732_v11  ;;  %v1754_v38 = vsel %vm1745_vm8, %v1732_v11, %v1734_v29 }
 0x1da   : >> { %v1788_v24 = vadd.f32 %v1753_v28, %v1689_v46  ;;  %v1789_v61 = vadd.f32 %v1754_v38, %v1690_v55  ;;  %1644 = vrot.lane.b32.xlu1 %v15078_v31, %s9899_s13  ;;  %1725 = vrot.lane.b32.xlu0 %v15079_v36, %s14979_s16  ;;  %v15087_v36 = vld [vmem:[#allocation33_spill] sm:$0xff] }
 0x1dc   : >> { %v10739_v56 = vpop.permute.xlu1 %1735  ;;  %v1817_v41 = vpop.permute.xlu0 %1816 }
 0x1dd   : >> { %v1755_v0 = vsel %vm1745_vm8, %v1734_v29, %v10739_v56 }
 0x1de   : >> { %v1790_v5 = vadd.f32 %v1755_v0, %v1691_v10  ;;  %1723 = vrot.lane.b32.xlu1 %v15080_v35, %s14979_s16  ;;  %1737 = vrot.lane.b32.xlu0 %v15081_v62, %s14979_s16  ;;  %v15083_v10 = vld [vmem:[#allocation31_spill] sm:$0xff] }
 0x1e0   : >> { %v1815_v59 = vpop.permute.xlu1 %1814  ;;  %v10747_v46 = vpop.permute.xlu0 %1828 }
 0x1e1   : >> { %v1845_v55 = vsel %vm14987_vm9, %v10730_v32, %v1815_v59  ;;  %v1846_v50 = vsel %vm14987_vm9, %v1815_v59, %v1817_v41 }
 0x1e2   : >> { %v1879_v1 = vadd.f32 %v1845_v55, %v1780_v14  ;;  %v1880_v3 = vadd.f32 %v1846_v50, %v1781_v22  ;;  %1727 = vrot.lane.b32.xlu1 %v15082_v44, %s14979_s16  ;;  %1741 = vrot.lane.b32.xlu0 %v15083_v10, %s14979_s16  ;;  %v15086_v14 = vld [vmem:[#allocation7_spill] sm:$0xff] }
 0x1e3   : >> { %v1090_v22 = vadd.f32 %v10371_v30, %v15086_v14  ;;  %v15096_v14 = vld [vmem:[#allocation9_spill] sm:$0xff] }
 0x1e4   : >> { %v10756_v39 = vpop.permute.xlu1 %1818  ;;  %v1833_v47 = vpop.permute.xlu0 %1832  ;;  %vm1895_vm10 = vcmp.ge.f32.partialorder %v1879_v1, 0.0  ;;  %v1911_v58 = vmul.f32 0.01, %v1879_v1  ;;  %v1912_v23 = vmul.f32 0.01, %v1880_v3  ;;  %vm1896_vm11 = vcmp.ge.f32.partialorder %v1880_v3, 0.0 }
 0x1e5   : >> { %v1847_v40 = vsel %vm14987_vm9, %v1817_v41, %v10756_v39  ;;  %v15088_v41 = vld [vmem:[#allocation35_spill] sm:$0xff] }
 0x1e6   : >> { %v1881_v25 = vadd.f32 %v1847_v40, %v1782_v37  ;;  %1739 = vrot.lane.b32.xlu1 %v15084_v18, %s14979_s16  ;;  %1820 = vrot.lane.b32.xlu0 %v15085_v33, %s14975_s18  ;;  %v10778_v55 = vsel %vm1895_vm10, %v1879_v1, %v1911_v58  ;;  %v15093_v40 = vld [vmem:[#allocation36_spill] sm:$0xff] }
 0x1e7   : >> { %15089 = vst [vmem:[#allocation17_spill] sm:$0xff] %v10778_v55  ;;  %v15094_v18 = vld [vmem:[#allocation8_spill] sm:$0xff] }
 0x1e8   : >> { %v1831_v29 = vpop.permute.xlu1 %1830  ;;  %v1128_v15 = vpop.permute.xlu0 %1127  ;;  %vm1897_vm14 = vcmp.ge.f32.partialorder %v1881_v25, 0.0  ;;  %v1098_v33 = vadd.f32 %v10397_v42, %v15094_v18  ;;  %v15097_v58 = vld [vmem:[#allocation12_spill] sm:$0xff]  ;;  %v15103_v18 = vld [vmem:[#allocation11_spill] sm:$0xff] }
 0x1e9   : >> { %v1852_v20 = vsel %vm14987_vm9, %v10747_v46, %v1831_v29  ;;  %v1853_v11 = vsel %vm14987_vm9, %v1831_v29, %v1833_v47  ;;  %v1155_v37 = vsel %vm1151_vm2, %v10447_v45, %v1128_v15  ;;  %v10780_v45 = vsel %vm1896_vm11, %v1880_v3, %v1912_v23 }
 0x1ea   : >> { %v1887_v28 = vadd.f32 %v1852_v20, %v1788_v24  ;;  %v1888_v38 = vadd.f32 %v1853_v11, %v1789_v61  ;;  %v1189_v31 = vadd.f32 %v1155_v37, %v1090_v22  ;;  %1743 = vrot.lane.b32.xlu1 %v15087_v36, %s14979_s16  ;;  %1824 = vrot.lane.b32.xlu0 %v15088_v41, %s14975_s18  ;;  %v1913_v24 = vmul.f32 0.01, %v1881_v25 }
 0x1eb   : >> { %15090 = vst [vmem:[#allocation18_spill] sm:$0xff] %v10780_v45  ;;  %v1091_v22 = vadd.f32 %v10371_v30, %v15096_v14 }
 0x1ec   : >> { %vm1903_vm12 = vcmp.ge.f32.partialorder %v1887_v28, 0.0  ;;  %vm1904_vm13 = vcmp.ge.f32.partialorder %v1888_v38, 0.0  ;;  %v1919_v0 = vmul.f32 0.01, %v1887_v28  ;;  %v1920_v35 = vmul.f32 0.01, %v1888_v38  ;;  %v10775_v62 = vpop.permute.xlu1 %1834  ;;  %v1132_v59 = vpop.permute.xlu0 %1131 }
 0x1ed   : >> { %v1854_v61 = vsel %vm14987_vm9, %v1833_v47, %v10775_v62  ;;  %v15095_v47 = vld [vmem:[#allocation38_spill] sm:$0xff]  ;;  %v10802_v11 = vsel %vm1897_vm14, %v1881_v25, %v1913_v24  ;;  %v15101_v25 = vld [vmem:[#allocation39_spill] sm:$0xff] }
 0x1ee   : >> { %v10784_v50 = vsel %vm1903_vm12, %v1887_v28, %v1919_v0  ;;  %v10786_v44 = vsel %vm1904_vm13, %v1888_v38, %v1920_v35  ;;  %v1889_v10 = vadd.f32 %v1854_v61, %v1790_v5  ;;  %1822 = vrot.lane.b32.xlu1 %v15093_v40, %s14975_s18  ;;  %1836 = vrot.lane.b32.xlu0 %v15095_v47, %s14975_s18  ;;  %v15100_v61 = vld [vmem:[#allocation37_spill] sm:$0xff] }
 0x1ef   : >> { %15091 = vst [vmem:[#allocation19_spill] sm:$0xff] %v10784_v50  ;;  %15092 = vst [vmem:[#allocation21_spill] sm:$0xff] %v10786_v44  ;;  %v1092_v5 = vadd.f32 %v10371_v30, %v15097_v58 }
 0x1f0   : >> { %vm1905_vm15 = vcmp.ge.f32.partialorder %v1889_v10, 0.0  ;;  %v1921_v29 = vmul.f32 0.01, %v1889_v10  ;;  %v1130_v23 = vpop.permute.xlu1 %1129  ;;  %v1144_v20 = vpop.permute.xlu0 %1143  ;;  %15098 = vst [vmem:[#allocation20_spill] sm:$0xff] %v10802_v11 }
 0x1f1   : >> { %v1156_v37 = vsel %vm1151_vm2, %v1128_v15, %v1130_v23  ;;  %v1157_v28 = vsel %vm1151_vm2, %v1130_v23, %v1132_v59  ;;  %v1162_v38 = vsel %vm1151_vm2, %v10479_v57, %v1144_v20  ;;  %v15102_v15 = vld [vmem:[#allocation10_spill] sm:$0xff]  ;;  %v1094_v57 = vadd.f32 %v10371_v30, %v15103_v18  ;;  %v15106_v23 = vld [vmem:[#allocation13_spill] sm:$0xff] }
 0x1f2   : >> { %v10808_v36 = vsel %vm1905_vm15, %v1889_v10, %v1921_v29  ;;  %v1190_v41 = vadd.f32 %v1156_v37, %v1091_v22  ;;  %v1191_v0 = vadd.f32 %v1157_v28, %v1092_v5  ;;  %v1197_v35 = vadd.f32 %v1162_v38, %v1098_v33  ;;  %1826 = vrot.lane.b32.xlu1 %v15100_v61, %s14975_s18  ;;  %v15104_v33 = vld [vmem:[#allocation23_spill] sm:$0xff]  ;;  %v15105_v29 = vld [vmem:[#allocation40_spill] sm:$0xff] }
 0x1f3   : >> { %15099 = vst [vmem:[#allocation22_spill] sm:$0xff] %v10808_v36  ;;  %1840 = vrot.lane.b32.xlu0 %v15101_v25, %s14975_s18  ;;  %v1093_v24 = vadd.f32 %v10371_v30, %v15102_v15  ;;  %v1099_v37 = vadd.f32 %v10397_v42, %v15106_v23  ;;  %v15107_v28 = vld [vmem:[#allocation16_spill] sm:$0xff] }
 0x1f4   : >> { %v1134_v10 = vpop.permute.xlu1 %1133  ;;  %v1148_v47 = vpop.permute.xlu0 %1147  ;;  %v1100_v38 = vadd.f32 %v10397_v42, %v15107_v28 }
 0x1f5   : >> { %v1158_v14 = vsel %vm1151_vm2, %v1132_v59, %v1134_v10  ;;  %v1184_v22 = vsel %vm1151_vm2, %v1134_v10, %v15104_v33  ;;  %v15108_v10 = vld [vmem:[#allocation41_spill] sm:$0xff] }
 0x1f6   : >> { %v1192_v58 = vadd.f32 %v1158_v14, %v1093_v24  ;;  %v1193_v5 = vadd.f32 %v1184_v22, %v1094_v57  ;;  %1838 = vrot.lane.b32.xlu1 %v15105_v29, %s14975_s18  ;;  %v15109_v14 = vld [vmem:[#allocation14_spill] sm:$0xff]  ;;  %v15110_v22 = vld [vmem:[#allocation15_spill] sm:$0xff] }
 0x1f7   : >> { %v1101_v33 = vadd.f32 %v10397_v42, %v15109_v14  ;;  %v1102_v29 = vadd.f32 %v10397_v42, %v15110_v22 }
 0x1f8   : >> { %v1146_v61 = vpop.permute.xlu1 %1145  ;;  %v1227_v30 = vpop.permute.xlu0 %1226 }
 0x1f9   : >> { %v1163_v25 = vsel %vm1151_vm2, %v1144_v20, %v1146_v61  ;;  %v1164_v59 = vsel %vm1151_vm2, %v1146_v61, %v1148_v47  ;;  %v1254_v15 = vsel %vm1250_vm3, %v10499_v63, %v1227_v30 }
 0x1fa   : >> { %v1198_v24 = vadd.f32 %v1163_v25, %v1099_v37  ;;  %v1199_v18 = vadd.f32 %v1164_v59, %v1100_v38  ;;  %v1288_v57 = vadd.f32 %v1254_v15, %v1189_v31  ;;  %1842 = vrot.lane.b32.xlu1 %v15108_v10, %s14975_s18 }
 0x1fc   : >> { %v1150_v23 = vpop.permute.xlu1 %1149  ;;  %v1231_v28 = vpop.permute.xlu0 %1230 }
 0x1fd   : >> { %v1165_v20 = vsel %vm1151_vm2, %v1148_v47, %v1150_v23  ;;  %v1185_v61 = vsel %vm1151_vm2, %v1150_v23, %v10429_v48 }
 0x1fe   : >> { %v1200_v63 = vadd.f32 %v1165_v20, %v1101_v33  ;;  %v1201_v37 = vadd.f32 %v1185_v61, %v1102_v29 }
 0x200   : >> { %v1229_v38 = vpop.permute.xlu1 %1228  ;;  %v1243_v31 = vpop.permute.xlu0 %1242 }
 0x201   : >> { %v1255_v25 = vsel %vm1250_vm3, %v1227_v30, %v1229_v38  ;;  %v1256_v59 = vsel %vm1250_vm3, %v1229_v38, %v1231_v28  ;;  %v1261_v15 = vsel %vm1250_vm3, %v10513_v8, %v1243_v31 }
 0x202   : >> { %v1289_v10 = vadd.f32 %v1255_v25, %v1190_v41  ;;  %v1290_v42 = vadd.f32 %v1256_v59, %v1191_v0  ;;  %v1296_v14 = vadd.f32 %v1261_v15, %v1197_v35 }
 0x204   : >> { %v1233_v22 = vpop.permute.xlu1 %1232  ;;  %v1247_v1 = vpop.permute.xlu0 %1246 }
 0x205   : >> { %v1257_v47 = vsel %vm1250_vm3, %v1231_v28, %v1233_v22  ;;  %v1283_v48 = vsel %vm1250_vm3, %v1233_v22, %v10461_v52 }
 0x206   : >> { %v1291_v33 = vadd.f32 %v1257_v47, %v1192_v58  ;;  %v1292_v29 = vadd.f32 %v1283_v48, %v1193_v5 }
 0x208   : >> { %v1245_v23 = vpop.permute.xlu1 %1244  ;;  %v1326_v20 = vpop.permute.xlu0 %1325 }
 0x209   : >> { %v1262_v30 = vsel %vm1250_vm3, %v1243_v31, %v1245_v23  ;;  %v1263_v61 = vsel %vm1250_vm3, %v1245_v23, %v1247_v1  ;;  %v1353_v8 = vsel %vm1349_vm4, %v10527_v12, %v1326_v20 }
 0x20a   : >> { %v1297_v41 = vadd.f32 %v1262_v30, %v1198_v24  ;;  %v1298_v0 = vadd.f32 %v1263_v61, %v1199_v18  ;;  %v1387_v35 = vadd.f32 %v1353_v8, %v1288_v57 }
 0x20c   : >> { %v1249_v38 = vpop.permute.xlu1 %1248  ;;  %v1330_v25 = vpop.permute.xlu0 %1329 }
 0x20d   : >> { %v1264_v28 = vsel %vm1250_vm3, %v1247_v1, %v1249_v38  ;;  %v1284_v52 = vsel %vm1250_vm3, %v1249_v38, %v10493_v6 }
 0x20e   : >> { %v1299_v58 = vadd.f32 %v1264_v28, %v1200_v63  ;;  %v1300_v5 = vadd.f32 %v1284_v52, %v1201_v37 }
 0x210   : >> { %v1328_v59 = vpop.permute.xlu1 %1327  ;;  %v1342_v15 = vpop.permute.xlu0 %1341 }
 0x211   : >> { %v1354_v31 = vsel %vm1349_vm4, %v1326_v20, %v1328_v59  ;;  %v1355_v22 = vsel %vm1349_vm4, %v1328_v59, %v1330_v25  ;;  %v1360_v12 = vsel %vm1349_vm4, %v10541_v16, %v1342_v15 }
 0x212   : >> { %v1388_v24 = vadd.f32 %v1354_v31, %v1289_v10  ;;  %v1389_v18 = vadd.f32 %v1355_v22, %v1290_v42  ;;  %v1395_v57 = vadd.f32 %v1360_v12, %v1296_v14 }
 0x214   : >> { %v1332_v47 = vpop.permute.xlu1 %1331  ;;  %v1346_v48 = vpop.permute.xlu0 %1345 }
 0x215   : >> { %v1356_v1 = vsel %vm1349_vm4, %v1330_v25, %v1332_v47  ;;  %v1382_v6 = vsel %vm1349_vm4, %v1332_v47, %v10507_v9 }
 0x216   : >> { %v1390_v63 = vadd.f32 %v1356_v1, %v1291_v33  ;;  %v1391_v37 = vadd.f32 %v1382_v6, %v1292_v29 }
 0x218   : >> { %v1344_v23 = vpop.permute.xlu1 %1343  ;;  %v1425_v30 = vpop.permute.xlu0 %1424 }
 0x219   : >> { %v1361_v20 = vsel %vm1349_vm4, %v1342_v15, %v1344_v23  ;;  %v1362_v61 = vsel %vm1349_vm4, %v1344_v23, %v1346_v48  ;;  %v1452_v16 = vsel %vm1448_vm5, %v10562_v51, %v1425_v30 }
 0x21a   : >> { %v1396_v10 = vadd.f32 %v1361_v20, %v1297_v41  ;;  %v1397_v42 = vadd.f32 %v1362_v61, %v1298_v0  ;;  %v1486_v14 = vadd.f32 %v1452_v16, %v1387_v35 }
 0x21c   : >> { %v1348_v8 = vpop.permute.xlu1 %1347  ;;  %v1429_v38 = vpop.permute.xlu0 %1428 }
 0x21d   : >> { %v1363_v25 = vsel %vm1349_vm4, %v1346_v48, %v1348_v8  ;;  %v1383_v9 = vsel %vm1349_vm4, %v1348_v8, %v10521_v13 }
 0x21e   : >> { %v1398_v33 = vadd.f32 %v1363_v25, %v1299_v58  ;;  %v1399_v29 = vadd.f32 %v1383_v9, %v1300_v5 }
 0x220   : >> { %v1427_v28 = vpop.permute.xlu1 %1426  ;;  %v1441_v52 = vpop.permute.xlu0 %1440 }
 0x221   : >> { %v1453_v59 = vsel %vm1448_vm5, %v1425_v30, %v1427_v28  ;;  %v1454_v15 = vsel %vm1448_vm5, %v1427_v28, %v1429_v38  ;;  %v1459_v28 = vsel %vm1448_vm5, %v10616_v34, %v1441_v52 }
 0x222   : >> { %v1487_v31 = vadd.f32 %v1453_v59, %v1388_v24  ;;  %v1488_v51 = vadd.f32 %v1454_v15, %v1389_v18  ;;  %v1494_v3 = vadd.f32 %v1459_v28, %v1395_v57 }
 0x224   : >> { %v1431_v41 = vpop.permute.xlu1 %1430  ;;  %v1445_v0 = vpop.permute.xlu0 %1444 }
 0x225   : >> { %v1455_v35 = vsel %vm1448_vm5, %v1429_v38, %v1431_v41  ;;  %v1481_v22 = vsel %vm1448_vm5, %v1431_v41, %v10535_v17 }
 0x226   : >> { %v1489_v12 = vadd.f32 %v1455_v35, %v1390_v63  ;;  %v1490_v47 = vadd.f32 %v1481_v22, %v1391_v37 }
 0x228   : >> { %v1443_v13 = vpop.permute.xlu1 %1442  ;;  %v1524_v58 = vpop.permute.xlu0 %1523 }
 0x229   : >> { %v1460_v41 = vsel %vm1448_vm5, %v1441_v52, %v1443_v13  ;;  %v1461_v35 = vsel %vm1448_vm5, %v1443_v13, %v1445_v0  ;;  %v1551_v22 = vsel %vm1547_vm6, %v10652_v54, %v1524_v58 }
 0x22a   : >> { %v1495_v40 = vadd.f32 %v1460_v41, %v1396_v10  ;;  %v1496_v55 = vadd.f32 %v1461_v35, %v1397_v42  ;;  %v1585_v11 = vadd.f32 %v1551_v22, %v1486_v14 }
 0x22c   : >> { %v1447_v5 = vpop.permute.xlu1 %1446  ;;  %v1528_v48 = vpop.permute.xlu0 %1527 }
 0x22d   : >> { %v1462_v50 = vsel %vm1448_vm5, %v1445_v0, %v1447_v5  ;;  %v1482_v45 = vsel %vm1448_vm5, %v1447_v5, %v10549_v21 }
 0x22e   : >> { %v1497_v42 = vadd.f32 %v1462_v50, %v1398_v33  ;;  %v1498_v0 = vadd.f32 %v1482_v45, %v1399_v29 }
 0x230   : >> { %v1526_v1 = vpop.permute.xlu1 %1525  ;;  %v1540_v6 = vpop.permute.xlu0 %1539 }
 0x231   : >> { %v1552_v36 = vsel %vm1547_vm6, %v1524_v58, %v1526_v1  ;;  %v1553_v52 = vsel %vm1547_vm6, %v1526_v1, %v1528_v48  ;;  %v1558_v13 = vsel %vm1547_vm6, %v10671_v4, %v1540_v6 }
 0x232   : >> { %v1586_v5 = vadd.f32 %v1552_v36, %v1487_v31  ;;  %v1587_v1 = vadd.f32 %v1553_v52, %v1488_v51  ;;  %v1593_v28 = vadd.f32 %v1558_v13, %v1494_v3 }
 0x234   : >> { %v1530_v23 = vpop.permute.xlu1 %1529  ;;  %v1544_v30 = vpop.permute.xlu0 %1543 }
 0x235   : >> { %v1554_v54 = vsel %vm1547_vm6, %v1528_v48, %v1530_v23  ;;  %v1580_v57 = vsel %vm1547_vm6, %v1530_v23, %v10592_v26 }
 0x236   : >> { %v1588_v26 = vadd.f32 %v1554_v54, %v1489_v12  ;;  %v1589_v23 = vadd.f32 %v1580_v57, %v1490_v47 }
 0x238   : >> { %v1542_v20 = vpop.permute.xlu1 %1541  ;;  %v1623_v24 = vpop.permute.xlu0 %1622 }
 0x239   : >> { %v1559_v10 = vsel %vm1547_vm6, %v1540_v6, %v1542_v20  ;;  %v1560_v21 = vsel %vm1547_vm6, %v1542_v20, %v1544_v30  ;;  %v1650_v14 = vsel %vm1646_vm7, %v10688_v60, %v1623_v24 }
 0x23a   : >> { %v1594_v6 = vadd.f32 %v1559_v10, %v1495_v40  ;;  %v1595_v35 = vadd.f32 %v1560_v21, %v1496_v55  ;;  %v1684_v20 = vadd.f32 %v1650_v14, %v1585_v11 }
 0x23c   : >> { %v1546_v18 = vpop.permute.xlu1 %1545  ;;  %v1627_v61 = vpop.permute.xlu0 %1626 }
 0x23d   : >> { %v1561_v58 = vsel %vm1547_vm6, %v1544_v30, %v1546_v18  ;;  %v1581_v4 = vsel %vm1547_vm6, %v1546_v18, %v10634_v53 }
 0x23e   : >> { %v1596_v50 = vadd.f32 %v1561_v58, %v1497_v42  ;;  %v1597_v33 = vadd.f32 %v1581_v4, %v1498_v0 }
 0x240   : >> { %v1625_v16 = vpop.permute.xlu1 %1624  ;;  %v1639_v8 = vpop.permute.xlu0 %1638 }
 0x241   : >> { %v1651_v45 = vsel %vm1646_vm7, %v1623_v24, %v1625_v16  ;;  %v1652_v36 = vsel %vm1646_vm7, %v1625_v16, %v1627_v61  ;;  %v1657_v3 = vsel %vm1646_vm7, %v10705_v43, %v1639_v8 }
 0x242   : >> { %v1685_v31 = vadd.f32 %v1651_v45, %v1586_v5  ;;  %v1686_v30 = vadd.f32 %v1652_v36, %v1587_v1  ;;  %v1692_v24 = vadd.f32 %v1657_v3, %v1593_v28 }
 0x244   : >> { %v1629_v38 = vpop.permute.xlu1 %1628  ;;  %v10875_v25 = vpop.permute.xlu0 %1642 }
 0x245   : >> { %v1653_v53 = vsel %vm1646_vm7, %v1627_v61, %v1629_v38  ;;  %v1679_v29 = vsel %vm1646_vm7, %v1629_v38, %v10662_v27 }
 0x246   : >> { %v1687_v27 = vadd.f32 %v1653_v53, %v1588_v26  ;;  %v1688_v61 = vadd.f32 %v1679_v29, %v1589_v23 }
 0x248   : >> { %v1641_v17 = vpop.permute.xlu1 %1640  ;;  %v1722_v63 = vpop.permute.xlu0 %1721 }
 0x249   : >> { %v1749_v60 = vsel %vm1745_vm8, %v10722_v2, %v1722_v63  ;;  %v1658_v55 = vsel %vm1646_vm7, %v1639_v8, %v1641_v17  ;;  %v1659_v11 = vsel %vm1646_vm7, %v1641_v17, %v10875_v25 }
 0x24a   : >> { %v1783_v51 = vadd.f32 %v1749_v60, %v1684_v20  ;;  %v1693_v16 = vadd.f32 %v1658_v55, %v1594_v6  ;;  %v1694_v8 = vadd.f32 %v1659_v11, %v1595_v35 }
 0x24c   : >> { %v10877_v37 = vpop.permute.xlu1 %1644  ;;  %v10879_v9 = vpop.permute.xlu0 %1725 }
 0x24d   : >> { %v1660_v38 = vsel %vm1646_vm7, %v10875_v25, %v10877_v37  ;;  %v1680_v17 = vsel %vm1646_vm7, %v10877_v37, %v10679_v49 }
 0x24e   : >> { %v1695_v14 = vadd.f32 %v1660_v38, %v1596_v50  ;;  %v1696_v58 = vadd.f32 %v1680_v17, %v1597_v33 }
 0x250   : >> { %v1724_v59 = vpop.permute.xlu1 %1723  ;;  %v10883_v15 = vpop.permute.xlu0 %1737 }
 0x251   : >> { %v1750_v12 = vsel %vm1745_vm8, %v1722_v63, %v1724_v59  ;;  %v1751_v43 = vsel %vm1745_vm8, %v1724_v59, %v10879_v9  ;;  %v1756_v18 = vsel %vm1745_vm8, %v10739_v56, %v10883_v15 }
 0x252   : >> { %v1784_v63 = vadd.f32 %v1750_v12, %v1685_v31  ;;  %v1785_v59 = vadd.f32 %v1751_v43, %v1686_v30  ;;  %v1791_v52 = vadd.f32 %v1756_v18, %v1692_v24 }
 0x254   : >> { %v1728_v44 = vpop.permute.xlu1 %1727  ;;  %v10892_v34 = vpop.permute.xlu0 %1741 }
 0x255   : >> { %v1752_v13 = vsel %vm1745_vm8, %v10879_v9, %v1728_v44  ;;  %v1778_v10 = vsel %vm1745_vm8, %v1728_v44, %v10696_v19 }
 0x256   : >> { %v1786_v5 = vadd.f32 %v1752_v13, %v1687_v27  ;;  %v1787_v28 = vadd.f32 %v1778_v10, %v1688_v61  ;;  %v15117_v10 = vld [vmem:[#allocation19_spill] sm:$0xff] }
 0x258   : >> { %v1740_v48 = vpop.permute.xlu1 %1739  ;;  %v1821_v41 = vpop.permute.xlu0 %1820 }
 0x259   : >> { %v1848_v40 = vsel %vm14987_vm9, %v10756_v39, %v1821_v41  ;;  %v1757_v25 = vsel %vm1745_vm8, %v10883_v15, %v1740_v48  ;;  %v1758_v49 = vsel %vm1745_vm8, %v1740_v48, %v10892_v34 }
 0x25a   : >> { %v1882_v39 = vadd.f32 %v1848_v40, %v1783_v51  ;;  %v1792_v19 = vadd.f32 %v1757_v25, %v1693_v16  ;;  %v1793_v15 = vadd.f32 %v1758_v49, %v1694_v8  ;;  %v15118_v25 = vld [vmem:[#allocation17_spill] sm:$0xff] }
 0x25b   : >> { %v15119_v49 = vpack.c.bf16 %v15117_v10, %v15118_v25  }
 0x25c   : >> { %v1744_v2 = vpop.permute.xlu1 %1743  ;;  %v1825_v47 = vpop.permute.xlu0 %1824  ;;  %v1914_v21 = vmul.f32 0.01, %v1882_v39  ;;  %vm1898_vm10 = vcmp.ge.f32.partialorder %v1882_v39, 0.0 }
 0x25d   : >> { %v1759_v4 = vsel %vm1745_vm8, %v10892_v34, %v1744_v2  ;;  %v1779_v35 = vsel %vm1745_vm8, %v1744_v2, %v10713_v7 }
 0x25e   : >> { %v1794_v53 = vadd.f32 %v1759_v4, %v1695_v14  ;;  %v1795_v29 = vadd.f32 %v1779_v35, %v1696_v58 }
 0x260   : >> { %v1823_v22 = vpop.permute.xlu1 %1822  ;;  %v1837_v57 = vpop.permute.xlu0 %1836 }
 0x261   : >> { %v1849_v56 = vsel %vm14987_vm9, %v1821_v41, %v1823_v22  ;;  %v1850_v54 = vsel %vm14987_vm9, %v1823_v22, %v1825_v47  ;;  %v1855_v37 = vsel %vm14987_vm9, %v10775_v62, %v1837_v57  ;;  %v1930_v41 = vsel %vm1898_vm10, %v1882_v39, %v1914_v21 }
 0x262   : >> { %v1883_v42 = vadd.f32 %v1849_v56, %v1784_v63  ;;  %v1884_v9 = vadd.f32 %v1850_v54, %v1785_v59  ;;  %v1890_v0 = vadd.f32 %v1855_v37, %v1791_v52  ;;  %v15112_v52 = vld [vmem:[#allocation20_spill] sm:$0xff]  ;;  %v15114_v56 = vld [vmem:[#allocation21_spill] sm:$0xff]  ;;  %v15115_v54 = vld [vmem:[#allocation18_spill] sm:$0xff] }
 0x264   : >> { %v1827_v1 = vpop.permute.xlu1 %1826  ;;  %vm1906_vm11 = vcmp.ge.f32.partialorder %v1890_v0, 0.0  ;;  %v1922_v44 = vmul.f32 0.01, %v1890_v0  ;;  %v1915_v26 = vmul.f32 0.01, %v1883_v42  ;;  %vm1899_vm12 = vcmp.ge.f32.partialorder %v1883_v42, 0.0 }
 0x265   : >> { %v1851_v48 = vsel %vm14987_vm9, %v1825_v47, %v1827_v1  ;;  %v1877_v62 = vsel %vm14987_vm9, %v1827_v1, %v10730_v32  ;;  %v1916_v23 = vmul.f32 0.01, %v1884_v9  ;;  %vm1900_vm13 = vcmp.ge.f32.partialorder %v1884_v9, 0.0  ;;  %v1841_v50 = vpop.permute.xlu0 %1840 }
 0x266   : >> { %v1938_v6 = vsel %vm1906_vm11, %v1890_v0, %v1922_v44  ;;  %v1885_v60 = vadd.f32 %v1851_v48, %v1786_v5  ;;  %v1886_v33 = vadd.f32 %v1877_v62, %v1787_v28  ;;  %v1931_v55 = vsel %vm1899_vm12, %v1883_v42, %v1915_v26 }
 0x267   : >> { %v1946_v20 = vpack.c.bf16 %v1938_v6, %v1930_v41   ;;  %v1932_v11 = vsel %vm1900_vm13, %v1884_v9, %v1916_v23 }
 0x268   : >> { %v1839_v45 = vpop.permute.xlu1 %1838  ;;  %v1917_v31 = vmul.f32 0.01, %v1885_v60  ;;  %v1918_v51 = vmul.f32 0.01, %v1886_v33  ;;  %vm1901_vm10 = vcmp.ge.f32.partialorder %v1885_v60, 0.0  ;;  %vm1902_vm11 = vcmp.ge.f32.partialorder %v1886_v33, 0.0 }
 0x269   : >> { %v1856_v34 = vsel %vm14987_vm9, %v1837_v57, %v1839_v45  ;;  %v1857_v36 = vsel %vm14987_vm9, %v1839_v45, %v1841_v50  ;;  %v15116_v57 = vpack.c.bf16 %v15114_v56, %v15115_v54  }
 0x26a   : >> { %v1891_v3 = vadd.f32 %v1856_v34, %v1792_v19  ;;  %v1892_v32 = vadd.f32 %v1857_v36, %v1793_v15  ;;  %v1933_v39 = vsel %vm1901_vm10, %v1885_v60, %v1917_v31  ;;  %v1934_v38 = vsel %vm1902_vm11, %v1886_v33, %v1918_v51 }
 0x26c   : >> { %vm1907_vm14 = vcmp.ge.f32.partialorder %v1891_v3, 0.0  ;;  %vm1908_vm15 = vcmp.ge.f32.partialorder %v1892_v32, 0.0  ;;  %v1923_v7 = vmul.f32 0.01, %v1891_v3  ;;  %v1924_v40 = vmul.f32 0.01, %v1892_v32  ;;  %v1843_v2 = vpop.permute.xlu1 %1842 }
 0x26d   : >> { %v1858_v12 = vsel %vm14987_vm9, %v1841_v50, %v1843_v2  ;;  %v1878_v43 = vsel %vm14987_vm9, %v1843_v2, %v10747_v46  ;;  %v15111_v46 = vld [vmem:[#allocation22_spill] sm:$0xff] }
 0x26e   : >> { %v1939_v47 = vsel %vm1907_vm14, %v1891_v3, %v1923_v7  ;;  %v1940_v30 = vsel %vm1908_vm15, %v1892_v32, %v1924_v40  ;;  %v1893_v24 = vadd.f32 %v1858_v12, %v1794_v53  ;;  %v1894_v27 = vadd.f32 %v1878_v43, %v1795_v29 }
 0x26f   : >> { %v1947_v18 = vpack.c.bf16 %v1939_v47, %v1931_v55   ;;  %v1948_v61 = vpack.c.bf16 %v1940_v30, %v1932_v11   ;;  %v15113_v13 = vpack.c.bf16 %v15111_v46, %v15112_v52  }
 0x270   : >> { %vm1909_vm12 = vcmp.ge.f32.partialorder %v1893_v24, 0.0  ;;  %vm1910_vm13 = vcmp.ge.f32.partialorder %v1894_v27, 0.0  ;;  %v1925_v16 = vmul.f32 0.01, %v1893_v24  ;;  %v1926_v8 = vmul.f32 0.01, %v1894_v27 }
 0x272   : >> { %v1941_v17 = vsel %vm1909_vm12, %v1893_v24, %v1925_v16  ;;  %v1942_v63 = vsel %vm1910_vm13, %v1894_v27, %v1926_v8 }
 0x273   : >> { %v1949_v59 = vpack.c.bf16 %v1941_v17, %v1933_v39   ;;  %v1950_v22 = vpack.c.bf16 %v1942_v63, %v1934_v38  }
 0x274 LB: >>> { %2063 = vmatprep.subr.bf16.mxu0 %v9851_v57  ;;  %2186 = vmatprep.subr.bf16.mxu1 %v9843_v20  ;;  %s9072_s20 = smul.u32 72, %s9859_s19  ;;  %s8787_s21 = sshll.u32 %s9859_s19, 4  ;;  %v9902_v37 = vmov 0   ;;  %vm2035_vm14 = vcmask 130048   ;;  %s9859_s19 = sphi %s10983_s19, %s1956_s19   ;;  %v9855_v49 = vphi %v15119_v49, %v15202_v49   ;;  %v9851_v57 = vphi %v15116_v57, %v15201_v57   ;;  %v9847_v13 = vphi %v15113_v13, %v15200_v13   ;;  %v9843_v20 = vphi %v1946_v20, %v15199_v20   ;;  %v9839_v18 = vphi %v1947_v18, %v15198_v18   ;;  %v9835_v61 = vphi %v1948_v61, %v15197_v61   ;;  %v9831_v59 = vphi %v1949_v59, %v3419_v59   ;;  %v9827_v22 = vphi %v1950_v22, %v3420_v22  }
 0x275   : >>> { %2064 = vmatpush1.bf16.msra.mxu0 %v9855_v49  ;;  %2187 = vmatpush1.bf16.msra.mxu1 %v9847_v13  ;;  %s1987_s16 = scalar_lea.vmem %s14958_s6, %s8787_s21  ;;  %s9903_s28 = smov 127  }
 0x276   : >>> { %2095 = vmatprep.mubr.bf16.mxu0 %v9902_v37  ;;  %2218 = vmatprep.mubr.bf16.mxu1 %v9902_v37  ;;  %s11003_s30 = scalar_lea.vmem %s14957_s5, %s9072_s20  ;;  %v1988_v42 = vld [vmem:[%s1987_s16] sm:$0xff]  ;;  %v1989_v9 = vld [vmem:[%s1987_s16 + $0x8] sm:$0xff]  ;;  %s9905_s16 = smov 96  }
 0x277   : >>> { %v9616_v21 = vld [vmem:[%s11003_s30] sm:$0xff]   ;;  %2309 = vmatprep.subr.bf16.mxu0 %v9835_v61  ;;  %2432 = vmatprep.subr.bf16.mxu1 %v9827_v22  ;;  %v9617_v0 = vld [vmem:[%s11003_s30 + $0x8] sm:$0xff]   ;;  %v9618_v14 = vld [vmem:[%s11003_s30 + $0x10] sm:$0xff]   ;;  %s9906_s18 = smov 95   ;;  %s9907_s20 = smov 94  }
 0x278   : >>> { %9615 = vset.pattern.permute.xlu0 %v9902_v37  ;;  %8797 = vmatmul.mubr.msk.bf16.vlgmr.msra.gmra.mrb[0].mxu0 %vm2035_vm14, %v9616_v21  ;;  %v9619_v58 = vld [vmem:[%s11003_s30 + $0x18] sm:$0xff]   ;;  %v9620_v5 = vld [vmem:[%s11003_s30 + $0x20] sm:$0xff]   ;;  %v9621_v1 = vld [vmem:[%s11003_s30 + $0x28] sm:$0xff]   ;;  %s9908_s21 = smov 64   ;;  %s9909_s22 = smov 63  }
 0x279   : >>> { %8806 = vmatmul.mubr.msk.bf16.vlgmr.msra.gmra.mrb[0].mxu1 %vm2035_vm14, %v9616_v21  ;;  %2105 = vmatprep.mubr.bf16.mxu0 %v9902_v37  ;;  %v9622_v28 = vld [vmem:[%s11003_s30 + $0x30] sm:$0xff]   ;;  %v9623_v19 = vld [vmem:[%s11003_s30 + $0x38] sm:$0xff]   ;;  %v9624_v44 = vld [vmem:[%s11003_s30 + $0x40] sm:$0xff]   ;;  %s9904_s30 = smov 126   ;;  %s9910_s24 = smov 62  }
 0x27a   : >>> { %2228 = vmatprep.mubr.bf16.mxu1 %v9902_v37  ;;  %2310 = vmatpush1.bf16.msra.mxu0 %v9839_v18  ;;  %s1956_s19 = sadd.s32 1, %s9859_s19  }
 0x27b   : >>> { %2433 = vmatpush1.bf16.msra.mxu1 %v9831_v59  ;;  %2557 = vperm.xlu0 %9615, %v1988_v42   ;;  %p1953_p4 = scmp.ge.s32.totalorder %s1956_s19, 5  }
 0x27c   : >> { %s15207_s19 = smov (%p1953_p4), 63   ;;  %s434_s15 = sadd.s32 (%p1953_p4), 1, %s9823_s15  }
 0x27d   : >> { %p431_p5 = scmp.ge.s32.totalorder (%p1953_p4), %s434_s15, 2  }
 0x27f   : >>> { %2562 = vperm.xlu0 %9615, %v1989_v9  }
 0x280   : >>> { %8798 = vmatmul.mubr.msk.bf16.gmra.mrb[4].mxu0 %vm2035_vm14, %v9617_v0 }
 0x281   : >>> { %8807 = vmatmul.mubr.msk.bf16.gmra.mrb[4].mxu1 %vm2035_vm14, %v9617_v0  ;;  %2115 = vmatprep.mubr.bf16.mxu0 %v9902_v37 }
 0x282   : >>> { %2238 = vmatprep.mubr.bf16.mxu1 %v9902_v37 }
 0x288   : >>> { %8799 = vmatmul.mubr.msk.bf16.gmra.mrb[8].mxu0 %vm2035_vm14, %v9618_v14 }
 0x289   : >>> { %8808 = vmatmul.mubr.msk.bf16.gmra.mrb[8].mxu1 %vm2035_vm14, %v9618_v14  ;;  %2125 = vmatprep.mubr.bf16.mxu0 %v9902_v37 }
 0x28a   : >>> { %2248 = vmatprep.mubr.bf16.mxu1 %v9902_v37 }
 0x290   : >>> { %8800 = vmatmul.mubr.msk.bf16.gmra.mrb[12].mxu0 %vm2035_vm14, %v9619_v58 }
 0x291   : >>> { %8809 = vmatmul.mubr.msk.bf16.gmra.mrb[12].mxu1 %vm2035_vm14, %v9619_v58  ;;  %2135 = vmatprep.mubr.bf16.mxu0 %v9902_v37 }
 0x292   : >>> { %2258 = vmatprep.mubr.bf16.mxu1 %v9902_v37 }
 0x298   : >>> { %8801 = vmatmul.mubr.msk.bf16.gmra.mrb[16].mxu0 %vm2035_vm14, %v9620_v5 }
 0x299   : >>> { %8810 = vmatmul.mubr.msk.bf16.gmra.mrb[16].mxu1 %vm2035_vm14, %v9620_v5  ;;  %2145 = vmatprep.mubr.bf16.mxu0 %v9902_v37 }
 0x29a   : >>> { %2268 = vmatprep.mubr.bf16.mxu1 %v9902_v37 }
 0x2a0   : >>> { %8802 = vmatmul.mubr.msk.bf16.gmra.mrb[20].mxu0 %vm2035_vm14, %v9621_v1 }
 0x2a1   : >>> { %8811 = vmatmul.mubr.msk.bf16.gmra.mrb[20].mxu1 %vm2035_vm14, %v9621_v1  ;;  %2155 = vmatprep.mubr.bf16.mxu0 %v9902_v37 }
 0x2a2   : >>> { %2278 = vmatprep.mubr.bf16.mxu1 %v9902_v37 }
 0x2a8   : >>> { %8803 = vmatmul.mubr.msk.bf16.gmra.mrb[24].mxu0 %vm2035_vm14, %v9622_v28 }
 0x2a9   : >>> { %8812 = vmatmul.mubr.msk.bf16.gmra.mrb[24].mxu1 %vm2035_vm14, %v9622_v28  ;;  %2165 = vmatprep.mubr.bf16.mxu0 %v9902_v37 }
 0x2aa   : >>> { %2288 = vmatprep.mubr.bf16.mxu1 %v9902_v37 }
 0x2b0   : >>> { %8804 = vmatmul.mubr.msk.bf16.gmra.mrb[28].mxu0 %vm2035_vm14, %v9623_v19 }
 0x2b1   : >>> { %8813 = vmatmul.mubr.msk.bf16.gmra.mrb[28].mxu1 %vm2035_vm14, %v9623_v19  ;;  %2175 = vmatprep.mubr.bf16.mxu0 %v9902_v37 }
 0x2b2   : >>> { %2298 = vmatprep.mubr.bf16.mxu1 %v9902_v37 }
 0x2b8   : >>> { %8805 = vmatmul.mubr.msk.bf16.gmra.mrb[32].mxu0 %vm2035_vm14, %v9624_v44 }
 0x2b9   : >>> { %8814 = vmatmul.mubr.msk.bf16.gmra.mrb[32].mxu1 %vm2035_vm14, %v9624_v44  ;;  %2341 = vmatprep.mubr.bf16.mxu0 %v9902_v37 }
 0x2ba   : >>> { %2464 = vmatprep.mubr.bf16.mxu1 %v9902_v37 }
 0x2c0   : >>> { %8815 = vmatmul.mubr.msk.bf16.vlgmr.msra.gmra.mrb[36].mxu0 %vm2035_vm14, %v9616_v21 }
 0x2c1   : >>> { %8824 = vmatmul.mubr.msk.bf16.vlgmr.msra.gmra.mrb[36].mxu1 %vm2035_vm14, %v9616_v21  ;;  %2351 = vmatprep.mubr.bf16.mxu0 %v9902_v37 }
 0x2c2   : >>> { %2474 = vmatprep.mubr.bf16.mxu1 %v9902_v37 }
 0x2c8   : >>> { %8816 = vmatmul.mubr.msk.bf16.gmra.mrb[40].mxu0 %vm2035_vm14, %v9617_v0 }
 0x2c9   : >>> { %8825 = vmatmul.mubr.msk.bf16.gmra.mrb[40].mxu1 %vm2035_vm14, %v9617_v0  ;;  %2361 = vmatprep.mubr.bf16.mxu0 %v9902_v37 }
 0x2ca   : >>> { %2484 = vmatprep.mubr.bf16.mxu1 %v9902_v37 }
 0x2d0   : >>> { %8817 = vmatmul.mubr.msk.bf16.gmra.mrb[44].mxu0 %vm2035_vm14, %v9618_v14 }
 0x2d1   : >>> { %8826 = vmatmul.mubr.msk.bf16.gmra.mrb[44].mxu1 %vm2035_vm14, %v9618_v14  ;;  %2371 = vmatprep.mubr.bf16.mxu0 %v9902_v37 }
 0x2d2   : >>> { %2494 = vmatprep.mubr.bf16.mxu1 %v9902_v37 }
 0x2d8   : >>> { %8818 = vmatmul.mubr.msk.bf16.gmra.mrb[48].mxu0 %vm2035_vm14, %v9619_v58 }
 0x2d9   : >>> { %8827 = vmatmul.mubr.msk.bf16.gmra.mrb[48].mxu1 %vm2035_vm14, %v9619_v58  ;;  %2381 = vmatprep.mubr.bf16.mxu0 %v9902_v37 }
 0x2da   : >>> { %2504 = vmatprep.mubr.bf16.mxu1 %v9902_v37 }
 0x2e0   : >>> { %8819 = vmatmul.mubr.msk.bf16.gmra.mrb[52].mxu0 %vm2035_vm14, %v9620_v5 }
 0x2e1   : >>> { %8828 = vmatmul.mubr.msk.bf16.gmra.mrb[52].mxu1 %vm2035_vm14, %v9620_v5  ;;  %2391 = vmatprep.mubr.bf16.mxu0 %v9902_v37 }
 0x2e2   : >>> { %2514 = vmatprep.mubr.bf16.mxu1 %v9902_v37 }
 0x2e8   : >>> { %8820 = vmatmul.mubr.msk.bf16.gmra.mrb[56].mxu0 %vm2035_vm14, %v9621_v1 }
 0x2e9   : >>> { %8829 = vmatmul.mubr.msk.bf16.gmra.mrb[56].mxu1 %vm2035_vm14, %v9621_v1  ;;  %2401 = vmatprep.mubr.bf16.mxu0 %v9902_v37 }
 0x2ea   : >>> { %2524 = vmatprep.mubr.bf16.mxu1 %v9902_v37 }
 0x2f0   : >>> { %8821 = vmatmul.mubr.msk.bf16.gmra.mrb[60].mxu0 %vm2035_vm14, %v9622_v28 }
 0x2f1   : >>> { %8830 = vmatmul.mubr.msk.bf16.gmra.mrb[60].mxu1 %vm2035_vm14, %v9622_v28  ;;  %2411 = vmatprep.mubr.bf16.mxu0 %v9902_v37 }
 0x2f2   : >>> { %2534 = vmatprep.mubr.bf16.mxu1 %v9902_v37 }
 0x2f8   : >>> { %8822 = vmatmul.mubr.msk.bf16.gmra.mrb[64].mxu0 %vm2035_vm14, %v9623_v19 }
 0x2f9   : >>> { %8831 = vmatmul.mubr.msk.bf16.gmra.mrb[64].mxu1 %vm2035_vm14, %v9623_v19  ;;  %2421 = vmatprep.mubr.bf16.mxu0 %v9902_v37 }
 0x2fa   : >>> { %2544 = vmatprep.mubr.bf16.mxu1 %v9902_v37 }
 0x300   : >>> { %8823 = vmatmul.mubr.msk.bf16.gmra.mrb[68].mxu0 %vm2035_vm14, %v9624_v44 }
 0x301   : >>> { %8832 = vmatmul.mubr.msk.bf16.gmra.mrb[68].mxu1 %vm2035_vm14, %v9624_v44 }
 0x34b   : >>> { %v11088_v15 = vpop.f32.mrb[0].mxu0 }
 0x34c   : >>> { %v11090_v4 = vpop.f32.mrb[0].mxu1  ;;  %v11092_v48 = vpop.f32.mrb[1].mxu0 }
 0x34d   : >>> { %v11094_v62 = vpop.f32.mrb[1].mxu1  ;;  %v11096_v41 = vpop.f32.mrb[2].mxu0 }
 0x34e   : >>> { %15120 = vst [vmem:[#allocation42_spill] sm:$0xff] %v11094_v62  ;;  %v11098_v26 = vpop.f32.mrb[2].mxu1  ;;  %v11100_v23 = vpop.f32.mrb[3].mxu0 }
 0x34f   : >>> { %v11102_v6 = vpop.f32.mrb[3].mxu1 }
 0x350   : >>> { %15121 = vst [vmem:[#allocation43_spill] sm:$0xff] %v11102_v6 }
 0x353   : >>> { %v2107_v35 = vpop.f32.mrb[4].mxu0 }
 0x354   : >>> { %v2230_v20 = vpop.f32.mrb[4].mxu1  ;;  %2597 = vrot.lane.b32.xlu1 %v2107_v35, %s9903_s28  ;;  %v2109_v50 = vpop.f32.mrb[5].mxu0 }
 0x355   : >>> { %2601 = vrot.lane.b32.xlu0 %v2230_v20, %s9903_s28  ;;  %v2232_v45 = vpop.f32.mrb[5].mxu1  ;;  %v2111_v60 = vpop.f32.mrb[6].mxu0 }
 0x356   : >>> { %v2234_v33 = vpop.f32.mrb[6].mxu1  ;;  %v2113_v34 = vpop.f32.mrb[7].mxu0 }
 0x357   : >>> { %v2236_v36 = vpop.f32.mrb[7].mxu1 }
 0x358   : >>> { %2599 = vrot.lane.b32.xlu1 %v2109_v50, %s9903_s28 }
 0x359   : >>> { %2613 = vrot.lane.b32.xlu0 %v2111_v60, %s9903_s28 }
 0x35b   : >>> { %v2117_v3 = vpop.f32.mrb[8].mxu0 }
 0x35c   : >>> { %v2240_v32 = vpop.f32.mrb[8].mxu1  ;;  %2603 = vrot.lane.b32.xlu1 %v2232_v45, %s9903_s28  ;;  %v2119_v53 = vpop.f32.mrb[9].mxu0 }
 0x35d   : >>> { %2617 = vrot.lane.b32.xlu0 %v2234_v33, %s9903_s28  ;;  %v2242_v29 = vpop.f32.mrb[9].mxu1  ;;  %v2121_v55 = vpop.f32.mrb[10].mxu0 }
 0x35e   : >>> { %v2244_v11 = vpop.f32.mrb[10].mxu1  ;;  %v2123_v7 = vpop.f32.mrb[11].mxu0 }
 0x35f   : >>> { %v2246_v40 = vpop.f32.mrb[11].mxu1 }
 0x360   : >>> { %2615 = vrot.lane.b32.xlu1 %v2113_v34, %s9903_s28 }
 0x361   : >>> { %2695 = vrot.lane.b32.xlu0 %v2117_v3, %s9904_s30 }
 0x363   : >>> { %v2127_v2 = vpop.f32.mrb[12].mxu0 }
 0x364   : >>> { %v2250_v31 = vpop.f32.mrb[12].mxu1  ;;  %2619 = vrot.lane.b32.xlu1 %v2236_v36, %s9903_s28  ;;  %v2129_v51 = vpop.f32.mrb[13].mxu0 }
 0x365   : >>> { %2699 = vrot.lane.b32.xlu0 %v2240_v32, %s9904_s30  ;;  %v2252_v12 = vpop.f32.mrb[13].mxu1  ;;  %v2131_v43 = vpop.f32.mrb[14].mxu0 }
 0x366   : >>> { %v2254_v47 = vpop.f32.mrb[14].mxu1  ;;  %v2133_v30 = vpop.f32.mrb[15].mxu0 }
 0x367   : >>> { %v2256_v24 = vpop.f32.mrb[15].mxu1 }
 0x368   : >>> { %2697 = vrot.lane.b32.xlu1 %v2119_v53, %s9904_s30 }
 0x369   : >>> { %2711 = vrot.lane.b32.xlu0 %v2121_v55, %s9904_s30 }
 0x36b   : >>> { %v2137_v27 = vpop.f32.mrb[16].mxu0 }
 0x36c   : >>> { %v2260_v18 = vpop.f32.mrb[16].mxu1  ;;  %2701 = vrot.lane.b32.xlu1 %v2242_v29, %s9904_s30  ;;  %v2139_v61 = vpop.f32.mrb[17].mxu0 }
 0x36d   : >>> { %2715 = vrot.lane.b32.xlu0 %v2244_v11, %s9904_s30  ;;  %v2262_v16 = vpop.f32.mrb[17].mxu1  ;;  %v2141_v8 = vpop.f32.mrb[18].mxu0 }
 0x36e   : >>> { %v2264_v39 = vpop.f32.mrb[18].mxu1  ;;  %v2143_v38 = vpop.f32.mrb[19].mxu0 }
 0x36f   : >>> { %v2266_v17 = vpop.f32.mrb[19].mxu1 }
 0x370   : >>> { %2713 = vrot.lane.b32.xlu1 %v2123_v7, %s9904_s30 }
 0x371   : >>> { %2793 = vrot.lane.b32.xlu0 %v2127_v2, %s9905_s16 }
 0x373   : >>> { %v2147_v63 = vpop.f32.mrb[20].mxu0 }
 0x374   : >>> { %v2270_v59 = vpop.f32.mrb[20].mxu1  ;;  %2717 = vrot.lane.b32.xlu1 %v2246_v40, %s9904_s30  ;;  %v2149_v22 = vpop.f32.mrb[21].mxu0 }
 0x375   : >>> { %2797 = vrot.lane.b32.xlu0 %v2250_v31, %s9905_s16  ;;  %v2272_v46 = vpop.f32.mrb[21].mxu1  ;;  %v2151_v52 = vpop.f32.mrb[22].mxu0 }
 0x376   : >>> { %v2274_v13 = vpop.f32.mrb[22].mxu1  ;;  %v11122_v56 = vpop.f32.mrb[23].mxu0 }
 0x377   : >>> { %v11124_v54 = vpop.f32.mrb[23].mxu1 }
 0x378   : >>> { %2795 = vrot.lane.b32.xlu1 %v2129_v51, %s9905_s16 }
 0x379   : >>> { %2809 = vrot.lane.b32.xlu0 %v2131_v43, %s9905_s16 }
 0x37b   : >>> { %v2157_v57 = vpop.f32.mrb[24].mxu0 }
 0x37c   : >>> { %v11128_v10 = vpop.f32.mrb[24].mxu1  ;;  %2799 = vrot.lane.b32.xlu1 %v2252_v12, %s9905_s16  ;;  %v11132_v25 = vpop.f32.mrb[25].mxu0 }
 0x37d   : >>> { %2813 = vrot.lane.b32.xlu0 %v2254_v47, %s9905_s16  ;;  %v11134_v49 = vpop.f32.mrb[25].mxu1  ;;  %v11136_v37 = vpop.f32.mrb[26].mxu0 }
 0x37e   : >>> { %v11138_v21 = vpop.f32.mrb[26].mxu1  ;;  %v11140_v42 = vpop.f32.mrb[27].mxu0 }
 0x37f   : >>> { %v11142_v9 = vpop.f32.mrb[27].mxu1 }
 0x380   : >>> { %2811 = vrot.lane.b32.xlu1 %v2133_v30, %s9905_s16 }
 0x381   : >>> { %2891 = vrot.lane.b32.xlu0 %v2137_v27, %s9906_s18 }
 0x383   : >>> { %v11146_v0 = vpop.f32.mrb[28].mxu0 }
 0x384   : >>> { %v11148_v14 = vpop.f32.mrb[28].mxu1  ;;  %2815 = vrot.lane.b32.xlu1 %v2256_v24, %s9905_s16  ;;  %v11152_v58 = vpop.f32.mrb[29].mxu0 }
 0x385   : >>> { %2895 = vrot.lane.b32.xlu0 %v2260_v18, %s9906_s18  ;;  %v11154_v5 = vpop.f32.mrb[29].mxu1  ;;  %v11156_v1 = vpop.f32.mrb[30].mxu0 }
 0x386   : >>> { %v11158_v28 = vpop.f32.mrb[30].mxu1  ;;  %v11160_v19 = vpop.f32.mrb[31].mxu0 }
 0x387   : >>> { %v11162_v44 = vpop.f32.mrb[31].mxu1 }
 0x388   : >>> { %2893 = vrot.lane.b32.xlu1 %v2139_v61, %s9906_s18 }
 0x389   : >>> { %2907 = vrot.lane.b32.xlu0 %v2141_v8, %s9906_s18 }
 0x38b   : >>> { %v11166_v35 = vpop.f32.mrb[32].mxu0 }
 0x38c   : >>> { %v11168_v20 = vpop.f32.mrb[32].mxu1  ;;  %2897 = vrot.lane.b32.xlu1 %v2262_v16, %s9906_s18  ;;  %v11172_v50 = vpop.f32.mrb[33].mxu0 }
 0x38d   : >>> { %2911 = vrot.lane.b32.xlu0 %v2264_v39, %s9906_s18  ;;  %v11174_v45 = vpop.f32.mrb[33].mxu1  ;;  %v11176_v60 = vpop.f32.mrb[34].mxu0 }
 0x38e   : >>> { %v11178_v33 = vpop.f32.mrb[34].mxu1  ;;  %v11180_v34 = vpop.f32.mrb[35].mxu0 }
 0x38f   : >>> { %v11182_v36 = vpop.f32.mrb[35].mxu1 }
 0x390   : >>> { %2909 = vrot.lane.b32.xlu1 %v2143_v38, %s9906_s18 }
 0x391   : >>> { %2989 = vrot.lane.b32.xlu0 %v2147_v63, %s9907_s20 }
 0x393   : >>> { %v11186_v3 = vpop.f32.mrb[36].mxu0 }
 0x394   : >>> { %15122 = vst [vmem:[#allocation44_spill] sm:$0xff] %v11186_v3  ;;  %v11188_v32 = vpop.f32.mrb[36].mxu1  ;;  %2913 = vrot.lane.b32.xlu1 %v2266_v17, %s9906_s18  ;;  %v11192_v53 = vpop.f32.mrb[37].mxu0 }
 0x395   : >>> { %15123 = vst [vmem:[#allocation45_spill] sm:$0xff] %v11188_v32  ;;  %2993 = vrot.lane.b32.xlu0 %v2270_v59, %s9907_s20  ;;  %15124 = vst [vmem:[#allocation46_spill] sm:$0xff] %v11192_v53  ;;  %v11194_v29 = vpop.f32.mrb[37].mxu1  ;;  %v11196_v55 = vpop.f32.mrb[38].mxu0 }
 0x396   : >>> { %15125 = vst [vmem:[#allocation47_spill] sm:$0xff] %v11194_v29  ;;  %15126 = vst [vmem:[#allocation48_spill] sm:$0xff] %v11196_v55  ;;  %v11198_v11 = vpop.f32.mrb[38].mxu1  ;;  %v11200_v7 = vpop.f32.mrb[39].mxu0 }
 0x397   : >>> { %15127 = vst [vmem:[#allocation49_spill] sm:$0xff] %v11198_v11  ;;  %15128 = vst [vmem:[#allocation50_spill] sm:$0xff] %v11200_v7  ;;  %v11202_v40 = vpop.f32.mrb[39].mxu1 }
 0x398   : >>> { %15129 = vst [vmem:[#allocation51_spill] sm:$0xff] %v11202_v40  ;;  %2991 = vrot.lane.b32.xlu1 %v2149_v22, %s9907_s20 }
 0x399   : >>> { %3005 = vrot.lane.b32.xlu0 %v2151_v52, %s9907_s20 }
 0x39b   : >>> { %v11206_v2 = vpop.f32.mrb[40].mxu0 }
 0x39c   : >>> { %v11208_v31 = vpop.f32.mrb[40].mxu1  ;;  %2995 = vrot.lane.b32.xlu1 %v2272_v46, %s9907_s20  ;;  %v11212_v51 = vpop.f32.mrb[41].mxu0 }
 0x39d   : >>> { %3009 = vrot.lane.b32.xlu0 %v2274_v13, %s9907_s20  ;;  %v11214_v12 = vpop.f32.mrb[41].mxu1  ;;  %v11216_v43 = vpop.f32.mrb[42].mxu0 }
 0x39e   : >>> { %v11218_v47 = vpop.f32.mrb[42].mxu1  ;;  %v11220_v30 = vpop.f32.mrb[43].mxu0 }
 0x39f   : >>> { %v11222_v24 = vpop.f32.mrb[43].mxu1 }
 0x3a0   : >>> { %3007 = vrot.lane.b32.xlu1 %v11122_v56, %s9907_s20 }
 0x3a1   : >>> { %3087 = vrot.lane.b32.xlu0 %v2157_v57, %s9908_s21 }
 0x3a3   : >>> { %v11227_v27 = vpop.f32.mrb[44].mxu0 }
 0x3a4   : >>> { %v11229_v18 = vpop.f32.mrb[44].mxu1  ;;  %3011 = vrot.lane.b32.xlu1 %v11124_v54, %s9907_s20  ;;  %v11235_v61 = vpop.f32.mrb[45].mxu0 }
 0x3a5   : >>> { %3091 = vrot.lane.b32.xlu0 %v11128_v10, %s9908_s21  ;;  %v11237_v16 = vpop.f32.mrb[45].mxu1  ;;  %v11239_v8 = vpop.f32.mrb[46].mxu0 }
 0x3a6   : >>> { %v11241_v39 = vpop.f32.mrb[46].mxu1  ;;  %v11243_v38 = vpop.f32.mrb[47].mxu0 }
 0x3a7   : >>> { %v11245_v17 = vpop.f32.mrb[47].mxu1 }
 0x3a8   : >>> { %3089 = vrot.lane.b32.xlu1 %v11132_v25, %s9908_s21 }
 0x3a9   : >>> { %3103 = vrot.lane.b32.xlu0 %v11136_v37, %s9908_s21 }
 0x3ab   : >>> { %v11251_v63 = vpop.f32.mrb[48].mxu0 }
 0x3ac   : >>> { %v11253_v59 = vpop.f32.mrb[48].mxu1  ;;  %3093 = vrot.lane.b32.xlu1 %v11134_v49, %s9908_s21  ;;  %v11259_v22 = vpop.f32.mrb[49].mxu0 }
 0x3ad   : >>> { %3107 = vrot.lane.b32.xlu0 %v11138_v21, %s9908_s21  ;;  %v11261_v46 = vpop.f32.mrb[49].mxu1  ;;  %v11263_v52 = vpop.f32.mrb[50].mxu0 }
 0x3ae   : >>> { %v11265_v13 = vpop.f32.mrb[50].mxu1  ;;  %v11267_v56 = vpop.f32.mrb[51].mxu0 }
 0x3af   : >>> { %v11269_v54 = vpop.f32.mrb[51].mxu1 }
 0x3b0   : >>> { %3105 = vrot.lane.b32.xlu1 %v11140_v42, %s9908_s21 }
 0x3b1   : >>> { %3185 = vrot.lane.b32.xlu0 %v11146_v0, %s9909_s22 }
 0x3b3   : >>> { %v11275_v57 = vpop.f32.mrb[52].mxu0 }
 0x3b4   : >>> { %v11277_v10 = vpop.f32.mrb[52].mxu1  ;;  %3109 = vrot.lane.b32.xlu1 %v11142_v9, %s9908_s21  ;;  %v11283_v25 = vpop.f32.mrb[53].mxu0 }
 0x3b5   : >>> { %3189 = vrot.lane.b32.xlu0 %v11148_v14, %s9909_s22  ;;  %v11285_v49 = vpop.f32.mrb[53].mxu1  ;;  %v11287_v37 = vpop.f32.mrb[54].mxu0 }
 0x3b6   : >>> { %v11289_v21 = vpop.f32.mrb[54].mxu1  ;;  %v11291_v42 = vpop.f32.mrb[55].mxu0 }
 0x3b7   : >>> { %v11293_v0 = vpop.f32.mrb[55].mxu1  ;;  %v11299_v9 = vpop.permute.xlu0 %2557 }
 0x3b8   : >>> { %3187 = vrot.lane.b32.xlu1 %v11152_v58, %s9909_s22 }
 0x3b9   : >>> { %3201 = vrot.lane.b32.xlu0 %v11156_v1, %s9909_s22 }
 0x3bb   : >>> { %v11301_v14 = vpop.f32.mrb[56].mxu0 }
 0x3bc   : >>> { %v11303_v40 = vpop.f32.mrb[56].mxu1  ;;  %3191 = vrot.lane.b32.xlu1 %v11154_v5, %s9909_s22  ;;  %v11309_v11 = vpop.f32.mrb[57].mxu0 }
 0x3bd   : >>> { %3205 = vrot.lane.b32.xlu0 %v11158_v28, %s9909_s22  ;;  %v11311_v7 = vpop.f32.mrb[57].mxu1  ;;  %v11313_v58 = vpop.f32.mrb[58].mxu0 }
 0x3be   : >>> { %v11315_v55 = vpop.f32.mrb[58].mxu1  ;;  %v11317_v1 = vpop.f32.mrb[59].mxu0 }
 0x3bf   : >>> { %v11319_v29 = vpop.f32.mrb[59].mxu1  ;;  %v11325_v5 = vpop.permute.xlu0 %2562 }
 0x3c0   : >>> { %15130 = vst [vmem:[#allocation52_spill] sm:$0xff] %v11319_v29  ;;  %3203 = vrot.lane.b32.xlu1 %v11160_v19, %s9909_s22 }
 0x3c1   : >>> { %3283 = vrot.lane.b32.xlu0 %v11166_v35, %s9910_s24 }
 0x3c3   : >>> { %v11327_v28 = vpop.f32.mrb[60].mxu0 }
 0x3c4   : >>> { %v11329_v32 = vpop.f32.mrb[60].mxu1  ;;  %3207 = vrot.lane.b32.xlu1 %v11162_v44, %s9909_s22  ;;  %v11335_v53 = vpop.f32.mrb[61].mxu0 }
 0x3c5   : >>> { %15131 = vst [vmem:[#allocation53_spill] sm:$0xff] %v11329_v32  ;;  %3287 = vrot.lane.b32.xlu0 %v11168_v20, %s9910_s24  ;;  %15132 = vst [vmem:[#allocation54_spill] sm:$0xff] %v11335_v53  ;;  %v11337_v3 = vpop.f32.mrb[61].mxu1  ;;  %v11339_v19 = vpop.f32.mrb[62].mxu0 }
 0x3c6   : >>> { %15133 = vst [vmem:[#allocation55_spill] sm:$0xff] %v11337_v3  ;;  %15134 = vst [vmem:[#allocation56_spill] sm:$0xff] %v11339_v19  ;;  %v11341_v6 = vpop.f32.mrb[62].mxu1  ;;  %v11343_v35 = vpop.permute.xlu1 %2597 }
 0x3c7   : >>> { %15135 = vst [vmem:[#allocation57_spill] sm:$0xff] %v11341_v6  ;;  %15136 = vst [vmem:[#allocation58_spill] sm:$0xff] %v11343_v35  ;;  %v11345_v62 = vpop.permute.xlu0 %2601  ;;  %v11347_v29 = vpop.f32.mrb[63].mxu0 }
 0x3c8   : >>> { %15137 = vst [vmem:[#allocation59_spill] sm:$0xff] %v11347_v29  ;;  %v11349_v32 = vpop.f32.mrb[63].mxu1  ;;  %3285 = vrot.lane.b32.xlu1 %v11172_v50, %s9910_s24 }
 0x3c9   : >>> { %15138 = vst [vmem:[#allocation60_spill] sm:$0xff] %v11349_v32  ;;  %3299 = vrot.lane.b32.xlu0 %v11176_v60, %s9910_s24 }
 0x3ca   : >>> { %v11355_v44 = vpop.permute.xlu1 %2599 }
 0x3cb   : >>> { %v11357_v20 = vpop.permute.xlu0 %2613  ;;  %v11359_v3 = vpop.f32.mrb[64].mxu0 }
 0x3cc   : >>> { %15139 = vst [vmem:[#allocation61_spill] sm:$0xff] %v11359_v3  ;;  %v11361_v6 = vpop.f32.mrb[64].mxu1  ;;  %3289 = vrot.lane.b32.xlu1 %v11174_v45, %s9910_s24  ;;  %v11367_v32 = vpop.f32.mrb[65].mxu0 }
 0x3cd   : >>> { %15140 = vst [vmem:[#allocation62_spill] sm:$0xff] %v11361_v6  ;;  %3303 = vrot.lane.b32.xlu0 %v11178_v33, %s9910_s24  ;;  %15141 = vst [vmem:[#allocation63_spill] sm:$0xff] %v11367_v32  ;;  %v11369_v50 = vpop.f32.mrb[65].mxu1  ;;  %v11371_v29 = vpop.f32.mrb[66].mxu0 }
 0x3ce   : >>> { %15142 = vst [vmem:[#allocation64_spill] sm:$0xff] %v11369_v50  ;;  %15143 = vst [vmem:[#allocation65_spill] sm:$0xff] %v11371_v29  ;;  %v11373_v60 = vpop.f32.mrb[66].mxu1  ;;  %v11375_v19 = vpop.permute.xlu1 %2603 }
 0x3cf   : >>> { %15144 = vst [vmem:[#allocation66_spill] sm:$0xff] %v11373_v60  ;;  %v11377_v53 = vpop.permute.xlu0 %2617  ;;  %v11379_v3 = vpop.f32.mrb[67].mxu0 }
 0x3d0   : >>> { %15145 = vst [vmem:[#allocation67_spill] sm:$0xff] %v11379_v3  ;;  %v11381_v6 = vpop.f32.mrb[67].mxu1  ;;  %3301 = vrot.lane.b32.xlu1 %v11180_v34, %s9910_s24 }
 0x3d1   : >>> { %15146 = vst [vmem:[#allocation68_spill] sm:$0xff] %v11381_v6  ;;  %2605 = vrot.lane.b32.xlu0 %v11206_v2, %s9903_s28 }
 0x3d2   : >>> { %v11387_v45 = vpop.permute.xlu1 %2615 }
 0x3d3   : >>> { %v11389_v33 = vpop.permute.xlu0 %2695  ;;  %v11391_v50 = vpop.f32.mrb[68].mxu0 }
 0x3d4   : >>> { %15147 = vst [vmem:[#allocation69_spill] sm:$0xff] %v11391_v50  ;;  %v11393_v60 = vpop.f32.mrb[68].mxu1  ;;  %3305 = vrot.lane.b32.xlu1 %v11182_v36, %s9910_s24  ;;  %v11399_v6 = vpop.f32.mrb[69].mxu0 }
 0x3d5   : >>> { %15148 = vst [vmem:[#allocation70_spill] sm:$0xff] %v11393_v60  ;;  %2609 = vrot.lane.b32.xlu0 %v11208_v31, %s9903_s28  ;;  %15149 = vst [vmem:[#allocation71_spill] sm:$0xff] %v11399_v6  ;;  %v11401_v34 = vpop.f32.mrb[69].mxu1  ;;  %v11403_v3 = vpop.f32.mrb[70].mxu0 }
 0x3d6   : >>> { %15150 = vst [vmem:[#allocation72_spill] sm:$0xff] %v11401_v34  ;;  %15151 = vst [vmem:[#allocation73_spill] sm:$0xff] %v11403_v3  ;;  %v11405_v2 = vpop.f32.mrb[70].mxu1  ;;  %v11407_v29 = vpop.permute.xlu1 %2619  ;;  %v2629_v3 = vsel %vm1151_vm2, %v11343_v35, %v11355_v44  ;;  %v2566_v35 = vadd.f32 %v11299_v9, %v11092_v48 }
 0x3d7   : >>> { %15152 = vst [vmem:[#allocation74_spill] sm:$0xff] %v11405_v2  ;;  %15153 = vst [vmem:[#allocation75_spill] sm:$0xff] %v11407_v29  ;;  %v11409_v32 = vpop.permute.xlu0 %2699  ;;  %v11411_v50 = vpop.f32.mrb[71].mxu0 }
 0x3d8   : >>> { %15154 = vst [vmem:[#allocation76_spill] sm:$0xff] %v11411_v50  ;;  %v11413_v60 = vpop.f32.mrb[71].mxu1  ;;  %2607 = vrot.lane.b32.xlu1 %v11212_v51, %s9903_s28 }
 0x3d9   : >>> { %15155 = vst [vmem:[#allocation77_spill] sm:$0xff] %v11413_v60  ;;  %2621 = vrot.lane.b32.xlu0 %v11216_v43, %s9903_s28 }
 0x3da   : >>> { %v2698_v36 = vpop.permute.xlu1 %2697 }
 0x3db   : >>> { %v11419_v31 = vpop.permute.xlu0 %2711  ;;  %v2728_v48 = vsel %vm1250_vm3, %v2698_v36, %v11409_v32 }
 0x3dc   : >>> { %2611 = vrot.lane.b32.xlu1 %v11214_v12, %s9903_s28 }
 0x3dd   : >>> { %2625 = vrot.lane.b32.xlu0 %v11218_v47, %s9903_s28 }
 0x3de   : >>> { %v11425_v2 = vpop.permute.xlu1 %2701 }
 0x3df   : >>> { %v2716_v50 = vpop.permute.xlu0 %2715 }
 0x3e0   : >>> { %2623 = vrot.lane.b32.xlu1 %v11220_v30, %s9903_s28 }
 0x3e1   : >>> { %2703 = vrot.lane.b32.xlu0 %v11227_v27, %s9904_s30 }
 0x3e2   : >>> { %v11431_v51 = vpop.permute.xlu1 %2713 }
 0x3e3   : >>> { %v11433_v43 = vpop.permute.xlu0 %2793 }
 0x3e4   : >>> { %2627 = vrot.lane.b32.xlu1 %v11222_v24, %s9903_s28 }
 0x3e5   : >>> { %2707 = vrot.lane.b32.xlu0 %v11229_v18, %s9904_s30 }
 0x3e6   : >>> { %v11439_v12 = vpop.permute.xlu1 %2717 }
 0x3e7   : >>> { %15156 = vst [vmem:[#allocation78_spill] sm:$0xff] %v11439_v12  ;;  %v11441_v47 = vpop.permute.xlu0 %2797 }
 0x3e8   : >>> { %2705 = vrot.lane.b32.xlu1 %v11235_v61, %s9904_s30 }
 0x3e9   : >>> { %2719 = vrot.lane.b32.xlu0 %v11239_v8, %s9904_s30 }
 0x3ea   : >>> { %v2796_v30 = vpop.permute.xlu1 %2795 }
 0x3eb   : >>> { %v11447_v27 = vpop.permute.xlu0 %2809 }
 0x3ec   : >>> { %2709 = vrot.lane.b32.xlu1 %v11237_v16, %s9904_s30 }
 0x3ed   : >>> { %2723 = vrot.lane.b32.xlu0 %v11241_v39, %s9904_s30 }
 0x3ee   : >>> { %v11453_v24 = vpop.permute.xlu1 %2799 }
 0x3ef   : >>> { %v2814_v18 = vpop.permute.xlu0 %2813 }
 0x3f0   : >>> { %2721 = vrot.lane.b32.xlu1 %v11243_v38, %s9904_s30 }
 0x3f1   : >>> { %2801 = vrot.lane.b32.xlu0 %v11251_v63, %s9905_s16 }
 0x3f2   : >>> { %v11459_v61 = vpop.permute.xlu1 %2811 }
 0x3f3   : >>> { %v11461_v8 = vpop.permute.xlu0 %2891 }
 0x3f4   : >>> { %2725 = vrot.lane.b32.xlu1 %v11245_v17, %s9904_s30  ;;  %v2637_v17 = vsel %vm1151_vm2, %v11387_v45, %v11377_v53 }
 0x3f5   : >>> { %2805 = vrot.lane.b32.xlu0 %v11253_v59, %s9905_s16  ;;  %v2574_v59 = vadd.f32 %v11325_v5, %v11100_v23  ;;  %v2638_v23 = vsel %vm1151_vm2, %v11377_v53, %v11407_v29  ;;  %v2567_v53 = vadd.f32 %v11299_v9, %v11090_v4  ;;  %v2727_v4 = vsel %vm1250_vm3, %v11389_v33, %v2698_v36 }
 0x3f6   : >>> { %v11467_v16 = vpop.permute.xlu1 %2815  ;;  %v2825_v36 = vsel %vm1349_vm4, %v11433_v43, %v2796_v30 }
 0x3f7   : >>> { %v11469_v39 = vpop.permute.xlu0 %2895 }
 0x3f8   : >>> { %2803 = vrot.lane.b32.xlu1 %v11259_v22, %s9905_s16  ;;  %v2735_v22 = vsel %vm1250_vm3, %v11431_v51, %v2716_v50 }
 0x3f9   : >>> { %2817 = vrot.lane.b32.xlu0 %v11263_v52, %s9905_s16  ;;  %v2672_v52 = vadd.f32 %v2637_v17, %v2574_v59  ;;  %v2575_v17 = vadd.f32 %v11325_v5, %v11098_v26  ;;  %v2736_v26 = vsel %vm1250_vm3, %v2716_v50, %v11439_v12 }
 0x3fa   : >>> { %v2894_v38 = vpop.permute.xlu1 %2893 }
 0x3fb   : >>> { %v11475_v63 = vpop.permute.xlu0 %2907  ;;  %v2770_v59 = vadd.f32 %v2735_v22, %v2672_v52  ;;  %v2673_v52 = vadd.f32 %v2638_v23, %v2575_v17 }
 0x3fc   : >>> { %2807 = vrot.lane.b32.xlu1 %v11261_v46, %s9905_s16  ;;  %v2833_v46 = vsel %vm1349_vm4, %v11459_v61, %v2814_v18 }
 0x3fd   : >>> { %2821 = vrot.lane.b32.xlu0 %v11265_v13, %s9905_s16  ;;  %v2565_v13 = vadd.f32 %v11299_v9, %v11088_v15  ;;  %v2630_v15 = vsel %vm1151_vm2, %v11355_v44, %v11345_v62  ;;  %v2834_v44 = vsel %vm1349_vm4, %v2814_v18, %v11467_v16  ;;  %v2826_v18 = vsel %vm1349_vm4, %v2796_v30, %v11441_v47 }
 0x3fe   : >>> { %v11488_v60 = vpop.permute.xlu1 %2897  ;;  %v2664_v50 = vadd.f32 %v2630_v15, %v2566_v35  ;;  %v2636_v35 = vsel %vm1151_vm2, %v11357_v20, %v11387_v45  ;;  %v2924_v30 = vsel %vm1448_vm5, %v2894_v38, %v11469_v39 }
 0x3ff   : >>> { %v2912_v34 = vpop.permute.xlu0 %2911  ;;  %v2663_v22 = vadd.f32 %v2629_v3, %v2565_v13  ;;  %v2771_v13 = vadd.f32 %v2736_v26, %v2673_v52 }
 0x400   : >>> { %2819 = vrot.lane.b32.xlu1 %v11267_v56, %s9905_s16  ;;  %v2631_v56 = vsel %vm1151_vm2, %v11345_v62, %v11375_v19  ;;  %v2573_v62 = vadd.f32 %v11325_v5, %v11096_v41  ;;  %v2762_v17 = vadd.f32 %v2728_v48, %v2664_v50  ;;  %v2729_v41 = vsel %vm1250_vm3, %v11409_v32, %v11425_v2 }
 0x401   : >>> { %2899 = vrot.lane.b32.xlu0 %v11275_v57, %s9906_s18  ;;  %v2868_v57 = vadd.f32 %v2833_v46, %v2770_v59  ;;  %v2665_v23 = vadd.f32 %v2631_v56, %v2567_v53  ;;  %v2761_v46 = vadd.f32 %v2727_v4, %v2663_v22  ;;  %v2923_v53 = vsel %vm1448_vm5, %v11461_v8, %v2894_v38 }
 0x402   : >>> { %v2910_v29 = vpop.permute.xlu1 %2909  ;;  %v2860_v26 = vadd.f32 %v2826_v18, %v2762_v17  ;;  %v2827_v32 = vsel %vm1349_vm4, %v11441_v47, %v11453_v24  ;;  %v2671_v56 = vadd.f32 %v2636_v35, %v2573_v62 }
 0x403   : >>> { %v11518_v6 = vpop.permute.xlu0 %2989  ;;  %v2931_v3 = vsel %vm1448_vm5, %v2910_v29, %v2912_v34  ;;  %v2859_v45 = vadd.f32 %v2825_v36, %v2761_v46  ;;  %v2763_v52 = vadd.f32 %v2729_v41, %v2665_v23  ;;  %v2930_v36 = vsel %vm1448_vm5, %v11475_v63, %v2910_v29 }
 0x404   : >>> { %v2966_v12 = vadd.f32 %v2931_v3, %v2868_v57  ;;  %2823 = vrot.lane.b32.xlu1 %v11269_v54, %s9905_s16  ;;  %v2869_v54 = vadd.f32 %v2834_v44, %v2771_v13  ;;  %v2958_v38 = vadd.f32 %v2924_v30, %v2860_v26 }
 0x405   : >>> { %2903 = vrot.lane.b32.xlu0 %v11277_v10, %s9906_s18  ;;  %v2957_v57 = vadd.f32 %v2923_v53, %v2859_v45  ;;  %v2861_v44 = vadd.f32 %v2827_v32, %v2763_v52 }
 0x406   : >>> { %v11540_v59 = vpop.permute.xlu1 %2913 }
 0x407   : >>> { %v2994_v10 = vpop.permute.xlu0 %2993  ;;  %v2932_v15 = vsel %vm1448_vm5, %v2912_v34, %v11540_v59  ;;  %v2734_v34 = vsel %vm1250_vm3, %v11419_v31, %v11431_v51  ;;  %v2832_v51 = vsel %vm1349_vm4, %v11447_v27, %v11459_v61 }
 0x408   : >>> { %v2967_v22 = vadd.f32 %v2932_v15, %v2869_v54  ;;  %2901 = vrot.lane.b32.xlu1 %v11283_v25, %s9906_s18  ;;  %v2925_v25 = vsel %vm1448_vm5, %v11469_v39, %v11488_v60  ;;  %v2769_v13 = vadd.f32 %v2734_v34, %v2671_v56 }
 0x409   : >>> { %2915 = vrot.lane.b32.xlu0 %v11287_v37, %s9906_s18  ;;  %v2959_v39 = vadd.f32 %v2925_v25, %v2861_v44 }
 0x40a   : >>> { %v2992_v4 = vpop.permute.xlu1 %2991  ;;  %v2867_v35 = vadd.f32 %v2832_v51, %v2769_v13 }
 0x40b   : >>> { %v11558_v48 = vpop.permute.xlu0 %3005  ;;  %v3021_v37 = vsel %vm1547_vm6, %v11518_v6, %v2992_v4  ;;  %v3022_v47 = vsel %vm1547_vm6, %v2992_v4, %v2994_v10  ;;  %v15158_v4 = vld [vmem:[#allocation53_spill] sm:$0xff] }
 0x40c   : >>> { %v3055_v3 = vadd.f32 %v3021_v37, %v2957_v57  ;;  %v3056_v50 = vadd.f32 %v3022_v47, %v2958_v38  ;;  %2905 = vrot.lane.b32.xlu1 %v11285_v49, %s9906_s18  ;;  %v15157_v38 = vld [vmem:[#allocation52_spill] sm:$0xff]  ;;  %v15159_v37 = vld [vmem:[#allocation54_spill] sm:$0xff] }
 0x40d   : >>> { %2919 = vrot.lane.b32.xlu0 %v11289_v21, %s9906_s18  ;;  %v2965_v21 = vadd.f32 %v2930_v36, %v2867_v35  ;;  %v15160_v47 = vld [vmem:[#allocation56_spill] sm:$0xff]  ;;  %v15162_v36 = vld [vmem:[#allocation57_spill] sm:$0xff] }
 0x40e   : >>> { %v11576_v62 = vpop.permute.xlu1 %2995 }
 0x40f   : >>> { %v3010_v23 = vpop.permute.xlu0 %3009  ;;  %v3023_v18 = vsel %vm1547_vm6, %v2994_v10, %v11576_v62 }
 0x410   : >>> { %v3057_v49 = vadd.f32 %v3023_v18, %v2959_v39  ;;  %2917 = vrot.lane.b32.xlu1 %v11291_v42, %s9906_s18 }
 0x411   : >>> { %2997 = vrot.lane.b32.xlu0 %v11301_v14, %s9907_s20 }
 0x412   : >>> { %v3008_v61 = vpop.permute.xlu1 %3007 }
 0x413   : >>> { %v11586_v46 = vpop.permute.xlu0 %3087  ;;  %v3028_v17 = vsel %vm1547_vm6, %v11558_v48, %v3008_v61  ;;  %v3029_v29 = vsel %vm1547_vm6, %v3008_v61, %v3010_v23  ;;  %v15163_v61 = vld [vmem:[#allocation59_spill] sm:$0xff] }
 0x414   : >>> { %v3063_v54 = vadd.f32 %v3028_v17, %v2965_v21  ;;  %v3064_v41 = vadd.f32 %v3029_v29, %v2966_v12  ;;  %2921 = vrot.lane.b32.xlu1 %v11293_v0, %s9906_s18  ;;  %v15164_v17 = vld [vmem:[#allocation61_spill] sm:$0xff] }
 0x415   : >>> { %3001 = vrot.lane.b32.xlu0 %v11303_v40, %s9907_s20 }
 0x416   : >>> { %v11595_v42 = vpop.permute.xlu1 %3011 }
 0x417   : >>> { %v3092_v14 = vpop.permute.xlu0 %3091  ;;  %v3030_v10 = vsel %vm1547_vm6, %v3010_v23, %v11595_v42  ;;  %v15161_v23 = vld [vmem:[#allocation55_spill] sm:$0xff] }
 0x418   : >>> { %v3065_v53 = vadd.f32 %v3030_v10, %v2967_v22  ;;  %2999 = vrot.lane.b32.xlu1 %v11309_v11, %s9907_s20 }
 0x419   : >>> { %3013 = vrot.lane.b32.xlu0 %v11313_v58, %s9907_s20 }
 0x41a   : >>> { %v3090_v12 = vpop.permute.xlu1 %3089 }
 0x41b   : >>> { %v11603_v30 = vpop.permute.xlu0 %3103  ;;  %v3119_v0 = vsel %vm1646_vm7, %v11586_v46, %v3090_v12  ;;  %v3120_v40 = vsel %vm1646_vm7, %v3090_v12, %v3092_v14  ;;  %v15165_v12 = vld [vmem:[#allocation60_spill] sm:$0xff] }
 0x41c   : >>> { %v3153_v15 = vadd.f32 %v3119_v0, %v3055_v3  ;;  %v3154_v45 = vadd.f32 %v3120_v40, %v3056_v50  ;;  %3003 = vrot.lane.b32.xlu1 %v11311_v7, %s9907_s20  ;;  %v15166_v0 = vld [vmem:[#allocation62_spill] sm:$0xff] }
 0x41d   : >>> { %3017 = vrot.lane.b32.xlu0 %v11315_v55, %s9907_s20 }
 0x41e   : >>> { %v11612_v11 = vpop.permute.xlu1 %3093 }
 0x41f   : >>> { %v3108_v26 = vpop.permute.xlu0 %3107  ;;  %v3121_v58 = vsel %vm1646_vm7, %v3092_v14, %v11612_v11 }
 0x420   : >>> { %v3155_v22 = vadd.f32 %v3121_v58, %v3057_v49  ;;  %3015 = vrot.lane.b32.xlu1 %v11317_v1, %s9907_s20  ;;  %v15167_v58 = vld [vmem:[#allocation63_spill] sm:$0xff] }
 0x421   : >>> { %3095 = vrot.lane.b32.xlu0 %v11327_v28, %s9908_s21 }
 0x422   : >>> { %v3106_v32 = vpop.permute.xlu1 %3105 }
 0x423   : >>> { %v11620_v56 = vpop.permute.xlu0 %3185  ;;  %v3126_v7 = vsel %vm1646_vm7, %v11603_v30, %v3106_v32  ;;  %v3127_v55 = vsel %vm1646_vm7, %v3106_v32, %v3108_v26 }
 0x424   : >>> { %v3161_v52 = vadd.f32 %v3126_v7, %v3063_v54  ;;  %v3162_v57 = vadd.f32 %v3127_v55, %v3064_v41  ;;  %3019 = vrot.lane.b32.xlu1 %v15157_v38, %s9907_s20  ;;  %s15208_s20 = smov (%p1953_p4), 96  }
 0x425   : >>> { %3099 = vrot.lane.b32.xlu0 %v15158_v4, %s9908_s21  ;;  %v15169_v4 = vld [vmem:[#allocation64_spill] sm:$0xff] }
 0x426   : >>> { %v11629_v1 = vpop.permute.xlu1 %3109 }
 0x427   : >>> { %v3190_v34 = vpop.permute.xlu0 %3189  ;;  %v3128_v28 = vsel %vm1646_vm7, %v3108_v26, %v11629_v1 }
 0x428   : >>> { %v3163_v25 = vadd.f32 %v3128_v28, %v3065_v53  ;;  %3097 = vrot.lane.b32.xlu1 %v15159_v37, %s9908_s21 }
 0x429   : >>> { %3111 = vrot.lane.b32.xlu0 %v15160_v47, %s9908_s21 }
 0x42a   : >>> { %v3188_v44 = vpop.permute.xlu1 %3187 }
 0x42b   : >>> { %v11637_v3 = vpop.permute.xlu0 %3201  ;;  %v3217_v50 = vsel %vm1745_vm8, %v11620_v56, %v3188_v44  ;;  %v3218_v51 = vsel %vm1745_vm8, %v3188_v44, %v3190_v34  ;;  %v15171_v44 = vld [vmem:[#allocation67_spill] sm:$0xff] }
 0x42c   : >>> { %v3251_v13 = vadd.f32 %v3217_v50, %v3153_v15  ;;  %v3252_v39 = vadd.f32 %v3218_v51, %v3154_v45  ;;  %3101 = vrot.lane.b32.xlu1 %v15161_v23, %s9908_s21  ;;  %v15172_v50 = vld [vmem:[#allocation69_spill] sm:$0xff]  ;;  %v15173_v51 = vld [vmem:[#allocation42_spill] sm:$0xff] }
 0x42d   : >>> { %3115 = vrot.lane.b32.xlu0 %v15162_v36, %s9908_s21 }
 0x42e   : >>> { %v11646_v18 = vpop.permute.xlu1 %3191 }
 0x42f   : >>> { %v3206_v35 = vpop.permute.xlu0 %3205  ;;  %v3219_v49 = vsel %vm1745_vm8, %v3190_v34, %v11646_v18  ;;  %v15170_v34 = vld [vmem:[#allocation66_spill] sm:$0xff] }
 0x430   : >>> { %v3253_v21 = vadd.f32 %v3219_v49, %v3155_v22  ;;  %3113 = vrot.lane.b32.xlu1 %v15163_v61, %s9908_s21  ;;  %v15168_v22 = vld [vmem:[#allocation65_spill] sm:$0xff] }
 0x431   : >>> { %3193 = vrot.lane.b32.xlu0 %v15164_v17, %s9909_s22 }
 0x432   : >>> { %v3204_v29 = vpop.permute.xlu1 %3203 }
 0x433   : >>> { %v11654_v54 = vpop.permute.xlu0 %3283  ;;  %v3224_v41 = vsel %vm1745_vm8, %v11637_v3, %v3204_v29  ;;  %v3225_v14 = vsel %vm1745_vm8, %v3204_v29, %v3206_v35 }
 0x434   : >>> { %v3259_v10 = vadd.f32 %v3224_v41, %v3161_v52  ;;  %v3260_v53 = vadd.f32 %v3225_v14, %v3162_v57  ;;  %3117 = vrot.lane.b32.xlu1 %v15165_v12, %s9908_s21  ;;  %v15174_v14 = vld [vmem:[#allocation68_spill] sm:$0xff]  ;;  %v15175_v12 = vld [vmem:[#allocation70_spill] sm:$0xff]  ;;  %s15209_s21 = smov (%p1953_p4), 62  }
 0x435   : >>> { %3197 = vrot.lane.b32.xlu0 %v15166_v0, %s9909_s22 }
 0x436   : >>> { %v11663_v40 = vpop.permute.xlu1 %3207 }
 0x437   : >>> { %v3288_v15 = vpop.permute.xlu0 %3287  ;;  %v3226_v45 = vsel %vm1745_vm8, %v3206_v35, %v11663_v40 }
 0x438   : >>> { %v3261_v26 = vadd.f32 %v3226_v45, %v3163_v25  ;;  %3195 = vrot.lane.b32.xlu1 %v15167_v58, %s9909_s22 }
 0x439   : >>> { %3209 = vrot.lane.b32.xlu0 %v15168_v22, %s9909_s22 }
 0x43a   : >>> { %v3286_v32 = vpop.permute.xlu1 %3285 }
 0x43b   : >>> { %v11671_v7 = vpop.permute.xlu0 %3299  ;;  %v3315_v55 = vsel %vm14987_vm9, %v11654_v54, %v3286_v32  ;;  %v3316_v52 = vsel %vm14987_vm9, %v3286_v32, %v3288_v15 }
 0x43c   : >>> { %v3349_v57 = vadd.f32 %v3315_v55, %v3251_v13  ;;  %v3350_v38 = vadd.f32 %v3316_v52, %v3252_v39  ;;  %3199 = vrot.lane.b32.xlu1 %v15169_v4, %s9909_s22  ;;  %v2568_v13 = vadd.f32 %v11299_v9, %v15173_v51  ;;  %v15176_v4 = vld [vmem:[#allocation71_spill] sm:$0xff]  ;;  %v15181_v51 = vld [vmem:[#allocation44_spill] sm:$0xff] }
 0x43d   : >>> { %3213 = vrot.lane.b32.xlu0 %v15170_v34, %s9909_s22  ;;  %v15177_v34 = vld [vmem:[#allocation43_spill] sm:$0xff] }
 0x43e   : >>> { %v11680_v28 = vpop.permute.xlu1 %3289  ;;  %vm3365_vm15 = vcmp.ge.f32.partialorder %v3349_v57, 0.0  ;;  %v3381_v39 = vmul.f32 0.01, %v3349_v57  ;;  %v3382_v35 = vmul.f32 0.01, %v3350_v38  ;;  %vm3366_vm10 = vcmp.ge.f32.partialorder %v3350_v38, 0.0 }
 0x43f   : >>> { %v3304_v25 = vpop.permute.xlu0 %3303  ;;  %v3317_v37 = vsel %vm14987_vm9, %v3288_v15, %v11680_v28 }
 0x440   : >>> { %v3351_v47 = vadd.f32 %v3317_v37, %v3253_v21  ;;  %3211 = vrot.lane.b32.xlu1 %v15171_v44, %s9909_s22  ;;  %v3397_v22 = vsel %vm3365_vm15, %v3349_v57, %v3381_v39  ;;  %v2576_v37 = vadd.f32 %v11325_v5, %v15177_v34 }
 0x441   : >>> { %3291 = vrot.lane.b32.xlu0 %v15172_v50, %s9910_s24 }
 0x442   : >>> { %v3302_v23 = vpop.permute.xlu1 %3301  ;;  %v3383_v32 = vmul.f32 0.01, %v3351_v47  ;;  %vm3367_vm13 = vcmp.ge.f32.partialorder %v3351_v47, 0.0 }
 0x443   : >>> { %v2606_v36 = vpop.permute.xlu0 %2605  ;;  %v3322_v49 = vsel %vm14987_vm9, %v11671_v7, %v3302_v23  ;;  %v3323_v61 = vsel %vm14987_vm9, %v3302_v23, %v3304_v25 }
 0x444   : >>> { %v2632_v21 = vsel %vm1151_vm2, %v11375_v19, %v2606_v36  ;;  %v3357_v17 = vadd.f32 %v3322_v49, %v3259_v10  ;;  %v3358_v29 = vadd.f32 %v3323_v61, %v3260_v53  ;;  %3215 = vrot.lane.b32.xlu1 %v15174_v14, %s9909_s22  ;;  %v3398_v19 = vsel %vm3366_vm10, %v3350_v38, %v3382_v35  ;;  %v15180_v38 = vld [vmem:[#allocation73_spill] sm:$0xff]  ;;  %s15210_s22 = smov (%p1953_p4), 95  }
 0x445   : >>> { %v2666_v41 = vadd.f32 %v2632_v21, %v2568_v13  ;;  %3295 = vrot.lane.b32.xlu0 %v15175_v12, %s9910_s24  ;;  %v15182_v13 = vld [vmem:[#allocation46_spill] sm:$0xff]  ;;  %v3399_v61 = vsel %vm3367_vm13, %v3351_v47, %v3383_v32  ;;  %v15187_v47 = vld [vmem:[#allocation45_spill] sm:$0xff]  ;;  %v15188_v32 = vld [vmem:[#allocation47_spill] sm:$0xff] }
 0x446   : >>> { %vm3373_vm11 = vcmp.ge.f32.partialorder %v3357_v17, 0.0  ;;  %vm3374_vm12 = vcmp.ge.f32.partialorder %v3358_v29, 0.0  ;;  %v3389_v0 = vmul.f32 0.01, %v3357_v17  ;;  %v3390_v15 = vmul.f32 0.01, %v3358_v29  ;;  %v11699_v45 = vpop.permute.xlu1 %3305 }
 0x447   : >>> { %v2610_v58 = vpop.permute.xlu0 %2609  ;;  %v3324_v10 = vsel %vm14987_vm9, %v3304_v25, %v11699_v45  ;;  %v2569_v25 = vadd.f32 %v11299_v9, %v15181_v51  ;;  %v2570_v39 = vadd.f32 %v11299_v9, %v15182_v13  ;;  %v15190_v51 = vld [vmem:[#allocation76_spill] sm:$0xff] }
 0x448   : >>> { %v3405_v53 = vsel %vm3373_vm11, %v3357_v17, %v3389_v0  ;;  %v3406_v55 = vsel %vm3374_vm12, %v3358_v29, %v3390_v15  ;;  %v3359_v52 = vadd.f32 %v3324_v10, %v3261_v26  ;;  %3293 = vrot.lane.b32.xlu1 %v15176_v4, %s9910_s24  ;;  %v15183_v17 = vld [vmem:[#allocation75_spill] sm:$0xff]  ;;  %v15184_v15 = vld [vmem:[#allocation72_spill] sm:$0xff]  ;;  %v2572_v10 = vadd.f32 %v11299_v9, %v15188_v32  ;;  %v15189_v4 = vld [vmem:[#allocation58_spill] sm:$0xff] }
 0x449   : >>> { %v11708_v49 = vpack.c.bf16 %v3405_v53, %v3397_v22   ;;  %v11710_v57 = vpack.c.bf16 %v3406_v55, %v3398_v19   ;;  %3307 = vrot.lane.b32.xlu0 %v15180_v38, %s9910_s24  ;;  %v15186_v22 = vld [vmem:[#allocation74_spill] sm:$0xff] }
 0x44a   : >>> { %vm3375_vm15 = vcmp.ge.f32.partialorder %v3359_v52, 0.0  ;;  %v3391_v26 = vmul.f32 0.01, %v3359_v52  ;;  %v2608_v23 = vpop.permute.xlu1 %2607 }
 0x44b   : >>> { %15178 = vst [vmem:[#allocation24_spill] sm:$0xff] %v11708_v49  ;;  %15179 = vst [vmem:[#allocation26_spill] sm:$0xff] %v11710_v57  ;;  %v2622_v35 = vpop.permute.xlu0 %2621  ;;  %v2633_v21 = vsel %vm1151_vm2, %v2606_v36, %v2608_v23  ;;  %v2634_v49 = vsel %vm1151_vm2, %v2608_v23, %v2610_v58  ;;  %v2571_v36 = vadd.f32 %v11299_v9, %v15187_v47  ;;  %v15195_v47 = vld [vmem:[#allocation51_spill] sm:$0xff] }
 0x44c   : >>> { %v2639_v57 = vsel %vm1151_vm2, %v15183_v17, %v2622_v35  ;;  %v3407_v29 = vsel %vm3375_vm15, %v3359_v52, %v3391_v26  ;;  %v2667_v14 = vadd.f32 %v2633_v21, %v2569_v25  ;;  %v2668_v12 = vadd.f32 %v2634_v49, %v2570_v39  ;;  %3297 = vrot.lane.b32.xlu1 %v15184_v15, %s9910_s24  ;;  %v15191_v25 = vld [vmem:[#allocation48_spill] sm:$0xff]  ;;  %v15192_v39 = vld [vmem:[#allocation50_spill] sm:$0xff]  ;;  %v15194_v15 = vld [vmem:[#allocation49_spill] sm:$0xff] }
 0x44d   : >>> { %v2674_v0 = vadd.f32 %v2639_v57, %v2576_v37  ;;  %v11724_v13 = vpack.c.bf16 %v3407_v29, %v3399_v61   ;;  %3311 = vrot.lane.b32.xlu0 %v15186_v22, %s9910_s24  ;;  %v2578_v26 = vadd.f32 %v11325_v5, %v15192_v39  ;;  %v15193_v29 = vld [vmem:[#allocation77_spill] sm:$0xff]  ;;  %v2579_v22 = vadd.f32 %v11325_v5, %v15194_v15 }
 0x44e   : >>> { %v2612_v53 = vpop.permute.xlu1 %2611 }
 0x44f   : >>> { %15185 = vst [vmem:[#allocation25_spill] sm:$0xff] %v11724_v13  ;;  %v2626_v55 = vpop.permute.xlu0 %2625  ;;  %v2635_v52 = vsel %vm1151_vm2, %v2610_v58, %v2612_v53  ;;  %v2661_v34 = vsel %vm1151_vm2, %v2612_v53, %v15189_v4  ;;  %v2577_v13 = vadd.f32 %v11325_v5, %v15191_v25  ;;  %v15196_v25 = vld [vmem:[#allocation78_spill] sm:$0xff] }
 0x450   : >>> { %v2669_v37 = vadd.f32 %v2635_v52, %v2571_v36  ;;  %v2670_v38 = vadd.f32 %v2661_v34, %v2572_v10  ;;  %3309 = vrot.lane.b32.xlu1 %v15190_v51, %s9910_s24  ;;  %v2580_v36 = vadd.f32 %v11325_v5, %v15195_v47 }
 0x452   : >>> { %v2624_v23 = vpop.permute.xlu1 %2623 }
 0x453   : >>> { %v2704_v9 = vpop.permute.xlu0 %2703  ;;  %v2640_v61 = vsel %vm1151_vm2, %v2622_v35, %v2624_v23  ;;  %v2641_v58 = vsel %vm1151_vm2, %v2624_v23, %v2626_v55 }
 0x454   : >>> { %v2730_v21 = vsel %vm1250_vm3, %v11425_v2, %v2704_v9  ;;  %v2675_v49 = vadd.f32 %v2640_v61, %v2577_v13  ;;  %v2676_v17 = vadd.f32 %v2641_v58, %v2578_v26  ;;  %3313 = vrot.lane.b32.xlu1 %v15193_v29, %s9910_s24 }
 0x455   : >>> { %v2764_v57 = vadd.f32 %v2730_v21, %v2666_v41 }
 0x456   : >>> { %v2628_v32 = vpop.permute.xlu1 %2627 }
 0x457   : >>> { %v2708_v10 = vpop.permute.xlu0 %2707  ;;  %v2642_v35 = vsel %vm1151_vm2, %v2626_v55, %v2628_v32  ;;  %v2662_v53 = vsel %vm1151_vm2, %v2628_v32, %v11357_v20 }
 0x458   : >>> { %v2677_v2 = vadd.f32 %v2642_v35, %v2579_v22  ;;  %v2678_v52 = vadd.f32 %v2662_v53, %v2580_v36 }
 0x45a   : >>> { %v2706_v4 = vpop.permute.xlu1 %2705 }
 0x45b   : >>> { %v2720_v41 = vpop.permute.xlu0 %2719  ;;  %v2731_v34 = vsel %vm1250_vm3, %v2704_v9, %v2706_v4  ;;  %v2732_v51 = vsel %vm1250_vm3, %v2706_v4, %v2708_v10 }
 0x45c   : >>> { %v2737_v13 = vsel %vm1250_vm3, %v15196_v25, %v2720_v41  ;;  %v2765_v39 = vadd.f32 %v2731_v34, %v2667_v14  ;;  %v2766_v5 = vadd.f32 %v2732_v51, %v2668_v12 }
 0x45d   : >>> { %v2772_v26 = vadd.f32 %v2737_v13, %v2674_v0 }
 0x45e   : >>> { %v2710_v23 = vpop.permute.xlu1 %2709 }
 0x45f   : >>> { %v2724_v61 = vpop.permute.xlu0 %2723  ;;  %v2733_v55 = vsel %vm1250_vm3, %v2708_v10, %v2710_v23  ;;  %v2759_v20 = vsel %vm1250_vm3, %v2710_v23, %v11389_v33 }
 0x460   : >>> { %v2767_v58 = vadd.f32 %v2733_v55, %v2669_v37  ;;  %v2768_v21 = vadd.f32 %v2759_v20, %v2670_v38 }
 0x462   : >>> { %v2722_v29 = vpop.permute.xlu1 %2721 }
 0x463   : >>> { %v2802_v15 = vpop.permute.xlu0 %2801  ;;  %v2738_v9 = vsel %vm1250_vm3, %v2720_v41, %v2722_v29  ;;  %v2739_v22 = vsel %vm1250_vm3, %v2722_v29, %v2724_v61 }
 0x464   : >>> { %v2828_v14 = vsel %vm1349_vm4, %v11453_v24, %v2802_v15  ;;  %v2773_v12 = vadd.f32 %v2738_v9, %v2675_v49  ;;  %v2774_v0 = vadd.f32 %v2739_v22, %v2676_v17 }
 0x465   : >>> { %v2862_v47 = vadd.f32 %v2828_v14, %v2764_v57 }
 0x466   : >>> { %v2726_v36 = vpop.permute.xlu1 %2725 }
 0x467   : >>> { %v2806_v32 = vpop.permute.xlu0 %2805  ;;  %v2740_v10 = vsel %vm1250_vm3, %v2724_v61, %v2726_v36  ;;  %v2760_v33 = vsel %vm1250_vm3, %v2726_v36, %v11419_v31 }
 0x468   : >>> { %v2775_v37 = vadd.f32 %v2740_v10, %v2677_v2  ;;  %v2776_v38 = vadd.f32 %v2760_v33, %v2678_v52 }
 0x46a   : >>> { %v2804_v35 = vpop.permute.xlu1 %2803 }
 0x46b   : >>> { %v2818_v53 = vpop.permute.xlu0 %2817  ;;  %v2829_v4 = vsel %vm1349_vm4, %v2802_v15, %v2804_v35  ;;  %v2830_v41 = vsel %vm1349_vm4, %v2804_v35, %v2806_v32 }
 0x46c   : >>> { %v2835_v24 = vsel %vm1349_vm4, %v11467_v16, %v2818_v53  ;;  %v2863_v49 = vadd.f32 %v2829_v4, %v2765_v39  ;;  %v2864_v17 = vadd.f32 %v2830_v41, %v2766_v5 }
 0x46d   : >>> { %v2870_v57 = vadd.f32 %v2835_v24, %v2772_v26 }
 0x46e   : >>> { %v2808_v34 = vpop.permute.xlu1 %2807 }
 0x46f   : >>> { %v2822_v51 = vpop.permute.xlu0 %2821  ;;  %v2831_v25 = vsel %vm1349_vm4, %v2806_v32, %v2808_v34  ;;  %v2857_v31 = vsel %vm1349_vm4, %v2808_v34, %v11433_v43 }
 0x470   : >>> { %v2865_v2 = vadd.f32 %v2831_v25, %v2767_v58  ;;  %v2866_v52 = vadd.f32 %v2857_v31, %v2768_v21 }
 0x472   : >>> { %v2820_v13 = vpop.permute.xlu1 %2819 }
 0x473   : >>> { %v2900_v23 = vpop.permute.xlu0 %2899  ;;  %v2836_v61 = vsel %vm1349_vm4, %v2818_v53, %v2820_v13  ;;  %v2837_v55 = vsel %vm1349_vm4, %v2820_v13, %v2822_v51 }
 0x474   : >>> { %v2926_v16 = vsel %vm1448_vm5, %v11488_v60, %v2900_v23  ;;  %v2871_v39 = vadd.f32 %v2836_v61, %v2773_v12  ;;  %v2872_v5 = vadd.f32 %v2837_v55, %v2774_v0 }
 0x475   : >>> { %v2960_v26 = vadd.f32 %v2926_v16, %v2862_v47 }
 0x476   : >>> { %v2824_v20 = vpop.permute.xlu1 %2823 }
 0x477   : >>> { %v2904_v29 = vpop.permute.xlu0 %2903  ;;  %v2838_v15 = vsel %vm1349_vm4, %v2822_v51, %v2824_v20  ;;  %v2858_v43 = vsel %vm1349_vm4, %v2824_v20, %v11447_v27 }
 0x478   : >>> { %v2873_v58 = vadd.f32 %v2838_v15, %v2775_v37  ;;  %v2874_v21 = vadd.f32 %v2858_v43, %v2776_v38 }
 0x47a   : >>> { %v2902_v9 = vpop.permute.xlu1 %2901 }
 0x47b   : >>> { %v2916_v22 = vpop.permute.xlu0 %2915  ;;  %v2927_v14 = vsel %vm1448_vm5, %v2900_v23, %v2902_v9  ;;  %v2928_v36 = vsel %vm1448_vm5, %v2902_v9, %v2904_v29 }
 0x47c   : >>> { %v2961_v32 = vadd.f32 %v2927_v14, %v2863_v49  ;;  %v2962_v60 = vadd.f32 %v2928_v36, %v2864_v17  ;;  %v2933_v16 = vsel %vm1448_vm5, %v11540_v59, %v2916_v22 }
 0x47d   : >>> { %v2968_v14 = vadd.f32 %v2933_v16, %v2870_v57 }
 0x47e   : >>> { %v2906_v12 = vpop.permute.xlu1 %2905 }
 0x47f   : >>> { %v2920_v0 = vpop.permute.xlu0 %2919  ;;  %v2929_v47 = vsel %vm1448_vm5, %v2904_v29, %v2906_v12  ;;  %v2955_v10 = vsel %vm1448_vm5, %v2906_v12, %v11461_v8 }
 0x480   : >>> { %v2963_v33 = vadd.f32 %v2929_v47, %v2865_v2  ;;  %v2964_v35 = vadd.f32 %v2955_v10, %v2866_v52 }
 0x482   : >>> { %v2918_v27 = vpop.permute.xlu1 %2917 }
 0x483   : >>> { %v2998_v37 = vpop.permute.xlu0 %2997  ;;  %v2934_v15 = vsel %vm1448_vm5, %v2916_v22, %v2918_v27  ;;  %v2935_v43 = vsel %vm1448_vm5, %v2918_v27, %v2920_v0 }
 0x484   : >>> { %v3024_v9 = vsel %vm1547_vm6, %v11576_v62, %v2998_v37  ;;  %v2969_v36 = vadd.f32 %v2934_v15, %v2871_v39  ;;  %v2970_v12 = vadd.f32 %v2935_v43, %v2872_v5 }
 0x485   : >>> { %v3058_v50 = vadd.f32 %v3024_v9, %v2960_v26 }
 0x486   : >>> { %v2922_v38 = vpop.permute.xlu1 %2921 }
 0x487   : >>> { %v3002_v53 = vpop.permute.xlu0 %3001  ;;  %v2936_v47 = vsel %vm1448_vm5, %v2920_v0, %v2922_v38  ;;  %v2956_v10 = vsel %vm1448_vm5, %v2922_v38, %v11475_v63 }
 0x488   : >>> { %v2971_v5 = vadd.f32 %v2936_v47, %v2873_v58  ;;  %v2972_v0 = vadd.f32 %v2956_v10, %v2874_v21 }
 0x48a   : >>> { %v3000_v4 = vpop.permute.xlu1 %2999 }
 0x48b   : >>> { %v3014_v41 = vpop.permute.xlu0 %3013  ;;  %v3025_v19 = vsel %vm1547_vm6, %v2998_v37, %v3000_v4  ;;  %v3026_v22 = vsel %vm1547_vm6, %v3000_v4, %v3002_v53 }
 0x48c   : >>> { %v3031_v27 = vsel %vm1547_vm6, %v11595_v42, %v3014_v41  ;;  %v3059_v38 = vadd.f32 %v3025_v19, %v2961_v32  ;;  %v3060_v4 = vadd.f32 %v3026_v22, %v2962_v60 }
 0x48d   : >>> { %v3066_v16 = vadd.f32 %v3031_v27, %v2968_v14 }
 0x48e   : >>> { %v3004_v24 = vpop.permute.xlu1 %3003 }
 0x48f   : >>> { %v3018_v34 = vpop.permute.xlu0 %3017  ;;  %v3027_v62 = vsel %vm1547_vm6, %v3002_v53, %v3004_v24  ;;  %v3053_v57 = vsel %vm1547_vm6, %v3004_v24, %v11518_v6 }
 0x490   : >>> { %v3061_v6 = vadd.f32 %v3027_v62, %v2963_v33  ;;  %v3062_v24 = vadd.f32 %v3053_v57, %v2964_v35 }
 0x492   : >>> { %v3016_v51 = vpop.permute.xlu1 %3015 }
 0x493   : >>> { %v3096_v49 = vpop.permute.xlu0 %3095  ;;  %v3032_v39 = vsel %vm1547_vm6, %v3014_v41, %v3016_v51  ;;  %v3033_v63 = vsel %vm1547_vm6, %v3016_v51, %v3018_v34 }
 0x494   : >>> { %v3122_v26 = vsel %vm1646_vm7, %v11612_v11, %v3096_v49  ;;  %v3067_v41 = vadd.f32 %v3032_v39, %v2969_v36  ;;  %v3068_v43 = vadd.f32 %v3033_v63, %v2970_v12 }
 0x495   : >>> { %v3156_v51 = vadd.f32 %v3122_v26, %v3058_v50 }
 0x496   : >>> { %v3020_v17 = vpop.permute.xlu1 %3019 }
 0x497   : >>> { %v3100_v25 = vpop.permute.xlu0 %3099  ;;  %v3034_v37 = vsel %vm1547_vm6, %v3018_v34, %v3020_v17  ;;  %v3054_v42 = vsel %vm1547_vm6, %v3020_v17, %v11558_v48 }
 0x498   : >>> { %v3069_v58 = vadd.f32 %v3034_v37, %v2971_v5  ;;  %v3070_v34 = vadd.f32 %v3054_v42, %v2972_v0 }
 0x49a   : >>> { %v3098_v31 = vpop.permute.xlu1 %3097 }
 0x49b   : >>> { %v3112_v13 = vpop.permute.xlu0 %3111  ;;  %v3123_v21 = vsel %vm1646_vm7, %v3096_v49, %v3098_v31  ;;  %v3124_v19 = vsel %vm1646_vm7, %v3098_v31, %v3100_v25 }
 0x49c   : >>> { %v3129_v32 = vsel %vm1646_vm7, %v11629_v1, %v3112_v13  ;;  %v3157_v49 = vadd.f32 %v3123_v21, %v3059_v38  ;;  %v3158_v9 = vadd.f32 %v3124_v19, %v3060_v4 }
 0x49d   : >>> { %v3164_v14 = vadd.f32 %v3129_v32, %v3066_v16 }
 0x49e   : >>> { %v3102_v23 = vpop.permute.xlu1 %3101 }
 0x49f   : >>> { %v11787_v61 = vpop.permute.xlu0 %3115  ;;  %v3125_v48 = vsel %vm1646_vm7, %v3100_v25, %v3102_v23  ;;  %v3151_v60 = vsel %vm1646_vm7, %v3102_v23, %v11586_v46 }
 0x4a0   : >>> { %v3159_v46 = vadd.f32 %v3125_v48, %v3061_v6  ;;  %v3160_v23 = vadd.f32 %v3151_v60, %v3062_v24 }
 0x4a2   : >>> { %v3114_v8 = vpop.permute.xlu1 %3113 }
 0x4a3   : >>> { %v3194_v2 = vpop.permute.xlu0 %3193  ;;  %v3130_v33 = vsel %vm1646_vm7, %v3112_v13, %v3114_v8  ;;  %v3131_v50 = vsel %vm1646_vm7, %v3114_v8, %v11787_v61 }
 0x4a4   : >>> { %v3220_v11 = vsel %vm1745_vm8, %v11646_v18, %v3194_v2  ;;  %v3165_v8 = vadd.f32 %v3130_v33, %v3067_v41  ;;  %v3166_v36 = vadd.f32 %v3131_v50, %v3068_v43 }
 0x4a5   : >>> { %v3254_v17 = vadd.f32 %v3220_v11, %v3156_v51 }
 0x4a6   : >>> { %v11789_v52 = vpop.permute.xlu1 %3117 }
 0x4a7   : >>> { %v11791_v55 = vpop.permute.xlu0 %3197  ;;  %v3132_v12 = vsel %vm1646_vm7, %v11787_v61, %v11789_v52 }
 0x4a8   : >>> { %v3167_v26 = vadd.f32 %v3132_v12, %v3069_v58 }
 0x4aa   : >>> { %v3196_v20 = vpop.permute.xlu1 %3195 }
 0x4ab   : >>> { %v11795_v29 = vpop.permute.xlu0 %3209  ;;  %v3221_v31 = vsel %vm1745_vm8, %v3194_v2, %v3196_v20  ;;  %v3222_v1 = vsel %vm1745_vm8, %v3196_v20, %v11791_v55  ;;  %v3152_v2 = vsel %vm1646_vm7, %v11789_v52, %v11603_v30 }
 0x4ac   : >>> { %v3227_v13 = vsel %vm1745_vm8, %v11663_v40, %v11795_v29  ;;  %v3255_v20 = vadd.f32 %v3221_v31, %v3157_v49  ;;  %v3256_v47 = vadd.f32 %v3222_v1, %v3158_v9  ;;  %v3168_v37 = vadd.f32 %v3152_v2, %v3070_v34 }
 0x4ad   : >>> { %v3262_v22 = vadd.f32 %v3227_v13, %v3164_v14 }
 0x4ae   : >>> { %v3200_v44 = vpop.permute.xlu1 %3199 }
 0x4af   : >>> { %v11804_v59 = vpop.permute.xlu0 %3213  ;;  %v3223_v27 = vsel %vm1745_vm8, %v11791_v55, %v3200_v44  ;;  %v3249_v39 = vsel %vm1745_vm8, %v3200_v44, %v11620_v56 }
 0x4b0   : >>> { %v3257_v38 = vadd.f32 %v3223_v27, %v3159_v46  ;;  %v3258_v16 = vadd.f32 %v3249_v39, %v3160_v23  ;;  %v9627_v27 = vld [vmem:[%s14957_s5 + $0x190] sm:$0xff] (%p1953_p4)  }
 0x4b1   : >> { %v8851_v39 = vld [vmem:[%s14958_s6 + $0x50] sm:$0xff] (%p1953_p4) }
 0x4b2   : >>> { %v3212_v53 = vpop.permute.xlu1 %3211 }
 0x4b3   : >>> { %v3292_v15 = vpop.permute.xlu0 %3291  ;;  %v3228_v61 = vsel %vm1745_vm8, %v11795_v29, %v3212_v53  ;;  %v3229_v30 = vsel %vm1745_vm8, %v3212_v53, %v11804_v59 }
 0x4b4   : >>> { %v3318_v35 = vsel %vm14987_vm9, %v11680_v28, %v3292_v15  ;;  %v3263_v56 = vadd.f32 %v3228_v61, %v3165_v8  ;;  %v3264_v29 = vadd.f32 %v3229_v30, %v3166_v36  ;;  %v9630_v30 = vld [vmem:[%s14957_s5 + $0x178] sm:$0xff] (%p1953_p4)  }
 0x4b5   : >>> { %v3352_v28 = vadd.f32 %v3318_v35, %v3254_v17 }
 0x4b6   : >>> { %v3216_v18 = vpop.permute.xlu1 %3215 }
 0x4b7   : >>> { %v3296_v25 = vpop.permute.xlu0 %3295  ;;  %v3384_v63 = vmul.f32 0.01, %v3352_v28  ;;  %vm3368_vm10 = vcmp.ge.f32.partialorder %v3352_v28, 0.0  ;;  %v3230_v42 = vsel %vm1745_vm8, %v11804_v59, %v3216_v18  ;;  %v3250_v43 = vsel %vm1745_vm8, %v3216_v18, %v11637_v3 }
 0x4b8   : >>> { %v3265_v48 = vadd.f32 %v3230_v42, %v3167_v26  ;;  %v3266_v60 = vadd.f32 %v3250_v43, %v3168_v37 }
 0x4ba   : >>> { %v3294_v10 = vpop.permute.xlu1 %3293 }
 0x4bb   : >>> { %v3319_v40 = vsel %vm14987_vm9, %v3292_v15, %v3294_v10  ;;  %v3320_v62 = vsel %vm14987_vm9, %v3294_v10, %v3296_v25  ;;  %v3308_v57 = vpop.permute.xlu0 %3307  ;;  %v3400_v15 = vsel %vm3368_vm10, %v3352_v28, %v3384_v63  ;;  %v15204_v10 = vld [vmem:[#allocation24_spill] sm:$0xff] (%p1953_p4)  ;;  %v9632_v63 = vld [vmem:[%s14957_s5 + $0x180] sm:$0xff] (%p1953_p4)  }
 0x4bc   : >>> { %v3325_v52 = vsel %vm14987_vm9, %v11699_v45, %v3308_v57  ;;  %v3353_v5 = vadd.f32 %v3319_v40, %v3255_v20  ;;  %v3354_v55 = vadd.f32 %v3320_v62, %v3256_v47  ;;  %v9626_v47 = vld [vmem:[%s14957_s5 + $0x168] sm:$0xff] (%p1953_p4)   ;;  %v15205_v40 = vmov (%p1953_p4), 0   ;;  %v9628_v62 = vld [vmem:[%s14957_s5 + $0x170] sm:$0xff] (%p1953_p4)  }
 0x4bd   : >>> { %v3360_v0 = vadd.f32 %v3325_v52, %v3262_v22  ;;  %3548 = vmatprep.mubr.bf16.mxu0 (%p1953_p4), %v15205_v40  ;;  %3598 = vmatprep.mubr.bf16.mxu1 (%p1953_p4), %v15205_v40  ;;  %v9631_v52 = vld [vmem:[%s14957_s5 + $0x1a0] sm:$0xff] (%p1953_p4)  }
 0x4be   : >>> { %v3298_v4 = vpop.permute.xlu1 %3297  ;;  %v3385_v6 = vmul.f32 0.01, %v3353_v5  ;;  %v3386_v24 = vmul.f32 0.01, %v3354_v55  ;;  %vm3369_vm12 = vcmp.ge.f32.partialorder %v3353_v5, 0.0  ;;  %vm3370_vm13 = vcmp.ge.f32.partialorder %v3354_v55, 0.0  ;;  %9625 = vset.pattern.permute.xlu0 (%p1953_p4), %v15205_v40 }
 0x4bf   : >>> { %vm3376_vm11 = vcmp.ge.f32.partialorder %v3360_v0, 0.0  ;;  %v3392_v44 = vmul.f32 0.01, %v3360_v0  ;;  %v3321_v53 = vsel %vm14987_vm9, %v3296_v25, %v3298_v4  ;;  %v3347_v45 = vsel %vm14987_vm9, %v3298_v4, %v11654_v54  ;;  %v3312_v58 = vpop.permute.xlu0 %3311  ;;  %3885 = vperm.xlu0 (%p1953_p4), %9625, %v8851_v39  }
 0x4c0   : >>> { %v3355_v11 = vadd.f32 %v3321_v53, %v3257_v38  ;;  %v3356_v34 = vadd.f32 %v3347_v45, %v3258_v16  ;;  %v3401_v33 = vsel %vm3369_vm12, %v3353_v5, %v3385_v6  ;;  %v3402_v50 = vsel %vm3370_vm13, %v3354_v55, %v3386_v24  ;;  %v9633_v5 = vld [vmem:[%s14957_s5 + $0x1a8] sm:$0xff] (%p1953_p4)  }
 0x4c1   : >>> { %v3408_v41 = vsel %vm3376_vm11, %v3360_v0, %v3392_v44  ;;  %v9634_v55 = vld [vmem:[%s14957_s5 + $0x188] sm:$0xff] (%p1953_p4)  }
 0x4c2   : >>> { %v3416_v51 = vpack.c.bf16 %v3408_v41, %v3400_v15   ;;  %v3310_v21 = vpop.permute.xlu1 %3309  ;;  %v3387_v49 = vmul.f32 0.01, %v3355_v11  ;;  %v3388_v17 = vmul.f32 0.01, %v3356_v34  ;;  %vm3371_vm11 = vcmp.ge.f32.partialorder %v3355_v11, 0.0 }
 0x4c3   : >>> { %v3326_v59 = vsel %vm14987_vm9, %v3308_v57, %v3310_v21  ;;  %v3327_v19 = vsel %vm14987_vm9, %v3310_v21, %v3312_v58  ;;  %vm3372_vm1 = vcmp.ge.f32.partialorder %v3356_v34, 0.0  ;;  %v15201_v57 = vld [vmem:[#allocation26_spill] sm:$0xff] }
 0x4c4   : >>> { %v3361_v32 = vadd.f32 %v3326_v59, %v3263_v56  ;;  %v3362_v54 = vadd.f32 %v3327_v19, %v3264_v29  ;;  %v3403_v28 = vsel %vm3371_vm11, %v3355_v11, %v3387_v49  ;;  %v3404_v12 = vsel %vm3372_vm1, %v3356_v34, %v3388_v17  ;;  %v15202_v49 = vld [vmem:[#allocation24_spill] sm:$0xff]  ;;  %v9629_v57 = vld [vmem:[%s14957_s5 + $0x198] sm:$0xff] (%p1953_p4)  }
 0x4c6   : >>> { %vm3377_vm15 = vcmp.ge.f32.partialorder %v3361_v32, 0.0  ;;  %vm3378_vm10 = vcmp.ge.f32.partialorder %v3362_v54, 0.0  ;;  %v3393_v3 = vmul.f32 0.01, %v3361_v32  ;;  %v3394_v35 = vmul.f32 0.01, %v3362_v54  ;;  %v3314_v18 = vpop.permute.xlu1 %3313 }
 0x4c7   : >>> { %v3328_v31 = vsel %vm14987_vm9, %v3312_v58, %v3314_v18  ;;  %v3348_v1 = vsel %vm14987_vm9, %v3314_v18, %v11671_v7  ;;  %1955 = sbr.rel (!%p1953_p4) target bundleno = 628 (0x274), region = 131  ;;  %v15203_v7 = vld [vmem:[#allocation26_spill] sm:$0xff] (%p1953_p4) }
 0x4c8   : >>> { %v3409_v25 = vsel %vm3377_vm15, %v3361_v32, %v3393_v3  ;;  %v3410_v9 = vsel %vm3378_vm10, %v3362_v54, %v3394_v35  ;;  %v3363_v14 = vadd.f32 %v3328_v31, %v3265_v48  ;;  %v3364_v46 = vadd.f32 %v3348_v1, %v3266_v60  ;;  %3516 = vmatprep.subr.bf16.mxu0 (%p1953_p4), %v15203_v7 }
 0x4c9   : >>> { %v3417_v23 = vpack.c.bf16 %v3409_v25, %v3401_v33   ;;  %v3418_v8 = vpack.c.bf16 %v3410_v9, %v3402_v50   ;;  %9267 = vmatprep.subr.bf16.mxu1 (%p1953_p4), %v15203_v7  ;;  %3517 = vmatpush1.bf16.msra.mxu0 (%p1953_p4), %v15204_v10 }
 0x4ca   : >>> { %vm3379_vm12 = vcmp.ge.f32.partialorder %v3363_v14, 0.0  ;;  %vm3380_vm13 = vcmp.ge.f32.partialorder %v3364_v46, 0.0  ;;  %v3395_v13 = vmul.f32 0.01, %v3363_v14  ;;  %v3396_v36 = vmul.f32 0.01, %v3364_v46  ;;  %9268 = vmatpush1.bf16.msra.mxu1 (%p1953_p4), %v15204_v10 }
 0x4cb   : >>> { %v15197_v61 = vmov %v3418_v8  ;;  %v15198_v18 = vmov %v3417_v23  ;;  %3639 = vmatprep.subr.bf16.mxu1 (%p1953_p4), %v3416_v51  ;;  %3762 = vmatprep.subr.bf16.mxu0 (%p1953_p4), %v3418_v8 }
 0x4cc   : >>> { %v3411_v2 = vsel %vm3379_vm12, %v3363_v14, %v3395_v13  ;;  %v3412_v20 = vsel %vm3380_vm13, %v3364_v46, %v3396_v36  ;;  %v15200_v13 = vld [vmem:[#allocation25_spill] sm:$0xff]  ;;  %8862 = vmatmul.mubr.msk.bf16.vlgmr.msra.gmra.mrb[0].mxu0 (%p1953_p4), %vm2035_vm14, %v9626_v47  ;;  %v8852_v61 = vld [vmem:[%s14958_s6 + $0x58] sm:$0xff] (%p1953_p4) }
 0x4cd   : >>> { %v3419_v59 = vpack.c.bf16 %v3411_v2, %v3403_v28   ;;  %v3420_v22 = vpack.c.bf16 %v3412_v20, %v3404_v12   ;;  %v15199_v20 = vmov %v3416_v51  ;;  %8867 = vmatmul.mubr.msk.bf16.vlgmr.msra.gmra.mrb[0].mxu1 (%p1953_p4), %vm2035_vm14, %v9627_v27  ;;  %3558 = vmatprep.mubr.bf16.mxu0 (%p1953_p4), %v15205_v40 }
 0x4ce   : >> { %3608 = vmatprep.mubr.bf16.mxu1 %v15205_v40  ;;  %v15206_v22 = vld [vmem:[#allocation25_spill] sm:$0xff]  ;;  %3763 = vmatpush1.bf16.msra.mxu0 %v3417_v23  ;;  %s12546_s28 = smov (%p431_p5), 0  }
 0x4cf   : >> { %3640 = vmatpush1.bf16.msra.mxu1 %v15206_v22  ;;  %3890 = vperm.xlu0 %9625, %v8852_v61  }
 0x4d4   : >> { %8863 = vmatmul.mubr.msk.bf16.gmra.mrb[4].mxu0 %vm2035_vm14, %v9628_v62 }
 0x4d5   : >> { %8868 = vmatmul.mubr.msk.bf16.gmra.mrb[4].mxu1 %vm2035_vm14, %v9629_v57  ;;  %3568 = vmatprep.mubr.bf16.mxu0 %v15205_v40 }
 0x4d6   : >> { %3618 = vmatprep.mubr.bf16.mxu1 %v15205_v40 }
 0x4dc   : >> { %8864 = vmatmul.mubr.msk.bf16.gmra.mrb[8].mxu0 %vm2035_vm14, %v9630_v30 }
 0x4dd   : >> { %8869 = vmatmul.mubr.msk.bf16.gmra.mrb[8].mxu1 %vm2035_vm14, %v9631_v52  ;;  %3578 = vmatprep.mubr.bf16.mxu0 %v15205_v40 }
 0x4de   : >> { %3628 = vmatprep.mubr.bf16.mxu1 %v15205_v40 }
 0x4e4   : >> { %8865 = vmatmul.mubr.msk.bf16.gmra.mrb[12].mxu0 %vm2035_vm14, %v9632_v63 }
 0x4e5   : >> { %8870 = vmatmul.mubr.msk.bf16.gmra.mrb[12].mxu1 %vm2035_vm14, %v9633_v5  ;;  %3588 = vmatprep.mubr.bf16.mxu0 %v15205_v40 }
 0x4e6   : >> { %3671 = vmatprep.mubr.bf16.mxu1 %v15205_v40 }
 0x4ec   : >> { %8866 = vmatmul.mubr.msk.bf16.gmra.mrb[16].mxu0 %vm2035_vm14, %v9634_v55 }
 0x4ed   : >> { %8871 = vmatmul.mubr.msk.bf16.vlgmr.msra.gmra.mrb[16].mxu1 %vm2035_vm14, %v9626_v47  ;;  %3794 = vmatprep.mubr.bf16.mxu0 %v15205_v40 }
 0x4ee   : >> { %3681 = vmatprep.mubr.bf16.mxu1 %v15205_v40 }
 0x4f4   : >> { %8880 = vmatmul.mubr.msk.bf16.vlgmr.msra.gmra.mrb[20].mxu0 %vm2035_vm14, %v9626_v47 }
 0x4f5   : >> { %8872 = vmatmul.mubr.msk.bf16.gmra.mrb[20].mxu1 %vm2035_vm14, %v9628_v62  ;;  %3802 = vmatprep.mubr.bf16.mxu0 %v15205_v40 }
 0x4f6   : >> { %3691 = vmatprep.mubr.bf16.mxu1 %v15205_v40 }
 0x4fc   : >> { %8881 = vmatmul.mubr.msk.bf16.gmra.mrb[24].mxu0 %vm2035_vm14, %v9628_v62 }
 0x4fd   : >> { %8873 = vmatmul.mubr.msk.bf16.gmra.mrb[24].mxu1 %vm2035_vm14, %v9630_v30  ;;  %3812 = vmatprep.mubr.bf16.mxu0 %v15205_v40 }
 0x4fe   : >> { %3701 = vmatprep.mubr.bf16.mxu1 %v15205_v40 }
 0x504   : >> { %8882 = vmatmul.mubr.msk.bf16.gmra.mrb[28].mxu0 %vm2035_vm14, %v9630_v30 }
 0x505   : >> { %8874 = vmatmul.mubr.msk.bf16.gmra.mrb[28].mxu1 %vm2035_vm14, %v9632_v63  ;;  %3822 = vmatprep.mubr.bf16.mxu0 %v15205_v40 }
 0x506   : >> { %3711 = vmatprep.mubr.bf16.mxu1 %v15205_v40 }
 0x50c   : >> { %8883 = vmatmul.mubr.msk.bf16.gmra.mrb[32].mxu0 %vm2035_vm14, %v9632_v63 }
 0x50d   : >> { %8875 = vmatmul.mubr.msk.bf16.gmra.mrb[32].mxu1 %vm2035_vm14, %v9634_v55  ;;  %3832 = vmatprep.mubr.bf16.mxu0 %v15205_v40 }
 0x50e   : >> { %3721 = vmatprep.mubr.bf16.mxu1 %v15205_v40 }
 0x514   : >> { %8884 = vmatmul.mubr.msk.bf16.gmra.mrb[36].mxu0 %vm2035_vm14, %v9634_v55 }
 0x515   : >> { %8876 = vmatmul.mubr.msk.bf16.gmra.mrb[36].mxu1 %vm2035_vm14, %v9627_v27  ;;  %3842 = vmatprep.mubr.bf16.mxu0 %v15205_v40 }
 0x516   : >> { %3731 = vmatprep.mubr.bf16.mxu1 %v15205_v40 }
 0x51c   : >> { %8885 = vmatmul.mubr.msk.bf16.gmra.mrb[40].mxu0 %vm2035_vm14, %v9627_v27 }
 0x51d   : >> { %8877 = vmatmul.mubr.msk.bf16.gmra.mrb[40].mxu1 %vm2035_vm14, %v9629_v57  ;;  %3852 = vmatprep.mubr.bf16.mxu0 %v15205_v40 }
 0x51e   : >> { %3741 = vmatprep.mubr.bf16.mxu1 %v15205_v40 }
 0x524   : >> { %8886 = vmatmul.mubr.msk.bf16.gmra.mrb[44].mxu0 %vm2035_vm14, %v9629_v57 }
 0x525   : >> { %8878 = vmatmul.mubr.msk.bf16.gmra.mrb[44].mxu1 %vm2035_vm14, %v9631_v52  ;;  %3862 = vmatprep.mubr.bf16.mxu0 %v15205_v40 }
 0x526   : >> { %3751 = vmatprep.mubr.bf16.mxu1 %v15205_v40 }
 0x52c   : >> { %8887 = vmatmul.mubr.msk.bf16.gmra.mrb[48].mxu0 %vm2035_vm14, %v9631_v52 }
 0x52d   : >> { %8879 = vmatmul.mubr.msk.bf16.gmra.mrb[48].mxu1 %vm2035_vm14, %v9633_v5  ;;  %3872 = vmatprep.mubr.bf16.mxu0 %v15205_v40 }
 0x534   : >> { %8888 = vmatmul.mubr.msk.bf16.gmra.mrb[52].mxu0 %vm2035_vm14, %v9633_v5 }
 0x59f   : >> { %v11985_v0 = vpop.f32.mrb[0].mxu0 }
 0x5a0   : >> { %v3600_v26 = vpop.f32.mrb[0].mxu1  ;;  %v11988_v37 = vpop.f32.mrb[1].mxu0 }
 0x5a1   : >> { %4179 = vrot.lane.b32.xlu0 %v3600_v26, %s9898_s12  ;;  %v3602_v38 = vpop.f32.mrb[1].mxu1  ;;  %v11991_v4 = vpop.f32.mrb[2].mxu0 }
 0x5a2   : >> { %4181 = vrot.lane.b32.xlu1 %v3602_v38, %s9898_s12  ;;  %v3604_v16 = vpop.f32.mrb[2].mxu1  ;;  %v11993_v56 = vpop.f32.mrb[3].mxu0 }
 0x5a3   : >> { %v3606_v44 = vpop.f32.mrb[3].mxu1 }
 0x5a5   : >> { %4191 = vrot.lane.b32.xlu0 %v3604_v16, %s9898_s12 }
 0x5a6   : >> { %4193 = vrot.lane.b32.xlu1 %v3606_v44, %s9898_s12 }
 0x5a7   : >> { %v3560_v29 = vpop.f32.mrb[4].mxu0 }
 0x5a8   : >> { %v3610_v42 = vpop.f32.mrb[4].mxu1  ;;  %v3562_v53 = vpop.f32.mrb[5].mxu0 }
 0x5a9   : >> { %4245 = vrot.lane.b32.xlu0 %v3610_v42, %s9899_s13  ;;  %v3612_v45 = vpop.f32.mrb[5].mxu1  ;;  %v3564_v15 = vpop.f32.mrb[6].mxu0 }
 0x5aa   : >> { %3915 = vrot.lane.b32.xlu1 %v3560_v29, %s9894_s25  ;;  %v3614_v6 = vpop.f32.mrb[6].mxu1  ;;  %v3566_v24 = vpop.f32.mrb[7].mxu0 }
 0x5ab   : >> { %v3616_v41 = vpop.f32.mrb[7].mxu1 }
 0x5ad   : >> { %3927 = vrot.lane.b32.xlu0 %v3564_v15, %s9894_s25 }
 0x5ae   : >> { %3917 = vrot.lane.b32.xlu1 %v3562_v53, %s9894_s25 }
 0x5af   : >> { %v3570_v43 = vpop.f32.mrb[8].mxu0 }
 0x5b0   : >> { %v3620_v51 = vpop.f32.mrb[8].mxu1  ;;  %v3572_v58 = vpop.f32.mrb[9].mxu0 }
 0x5b1   : >> { %4257 = vrot.lane.b32.xlu0 %v3614_v6, %s9899_s13  ;;  %v3622_v21 = vpop.f32.mrb[9].mxu1  ;;  %v3574_v11 = vpop.f32.mrb[10].mxu0 }
 0x5b2   : >> { %4247 = vrot.lane.b32.xlu1 %v3612_v45, %s9899_s13  ;;  %v3624_v34 = vpop.f32.mrb[10].mxu1  ;;  %v3576_v59 = vpop.f32.mrb[11].mxu0 }
 0x5b3   : >> { %v3626_v19 = vpop.f32.mrb[11].mxu1 }
 0x5b5   : >> { %3981 = vrot.lane.b32.xlu0 %v3570_v43, %s9895_s27 }
 0x5b6   : >> { %3929 = vrot.lane.b32.xlu1 %v3566_v24, %s9894_s25 }
 0x5b7   : >> { %v3580_v32 = vpop.f32.mrb[12].mxu0 }
 0x5b8   : >> { %v3630_v54 = vpop.f32.mrb[12].mxu1  ;;  %v3582_v48 = vpop.f32.mrb[13].mxu0 }
 0x5b9   : >> { %4311 = vrot.lane.b32.xlu0 %v3620_v51, %s15207_s19  ;;  %v3632_v60 = vpop.f32.mrb[13].mxu1  ;;  %v3584_v33 = vpop.f32.mrb[14].mxu0 }
 0x5ba   : >> { %4259 = vrot.lane.b32.xlu1 %v3616_v41, %s9899_s13  ;;  %v3634_v50 = vpop.f32.mrb[14].mxu1  ;;  %v3586_v3 = vpop.f32.mrb[15].mxu0 }
 0x5bb   : >> { %v3636_v35 = vpop.f32.mrb[15].mxu1 }
 0x5bd   : >> { %3993 = vrot.lane.b32.xlu0 %v3574_v11, %s9895_s27 }
 0x5be   : >> { %3983 = vrot.lane.b32.xlu1 %v3572_v58, %s9895_s27 }
 0x5bf   : >> { %v3590_v18 = vpop.f32.mrb[16].mxu0 }
 0x5c0   : >> { %v12009_v49 = vpop.f32.mrb[16].mxu1  ;;  %v3592_v17 = vpop.f32.mrb[17].mxu0 }
 0x5c1   : >> { %4323 = vrot.lane.b32.xlu0 %v3624_v34, %s15207_s19  ;;  %v12012_v31 = vpop.f32.mrb[17].mxu1  ;;  %v3594_v1 = vpop.f32.mrb[18].mxu0 }
 0x5c2   : >> { %4313 = vrot.lane.b32.xlu1 %v3622_v21, %s15207_s19  ;;  %v12015_v25 = vpop.f32.mrb[18].mxu1  ;;  %v3596_v14 = vpop.f32.mrb[19].mxu0 }
 0x5c3   : >> { %v12017_v9 = vpop.f32.mrb[19].mxu1 }
 0x5c5   : >> { %4047 = vrot.lane.b32.xlu0 %v3580_v32, %s15208_s20 }
 0x5c6   : >> { %3995 = vrot.lane.b32.xlu1 %v3576_v59, %s9895_s27 }
 0x5c7   : >> { %v12021_v23 = vpop.f32.mrb[20].mxu0 }
 0x5c8   : >> { %v3683_v46 = vpop.f32.mrb[20].mxu1  ;;  %v3798_v13 = vpop.f32.mrb[21].mxu0 }
 0x5c9   : >> { %4377 = vrot.lane.b32.xlu0 %v3630_v54, %s15209_s21  ;;  %v3685_v8 = vpop.f32.mrb[21].mxu1  ;;  %v12025_v28 = vpop.f32.mrb[22].mxu0 }
 0x5ca   : >> { %4325 = vrot.lane.b32.xlu1 %v3626_v19, %s15207_s19  ;;  %v3687_v36 = vpop.f32.mrb[22].mxu1  ;;  %v3801_v12 = vpop.f32.mrb[23].mxu0 }
 0x5cb   : >> { %v3689_v2 = vpop.f32.mrb[23].mxu1 }
 0x5cd   : >> { %4059 = vrot.lane.b32.xlu0 %v3584_v33, %s15208_s20 }
 0x5ce   : >> { %4049 = vrot.lane.b32.xlu1 %v3582_v48, %s15208_s20 }
 0x5cf   : >> { %v3804_v20 = vpop.f32.mrb[24].mxu0 }
 0x5d0   : >> { %v3693_v7 = vpop.f32.mrb[24].mxu1  ;;  %v3806_v47 = vpop.f32.mrb[25].mxu0 }
 0x5d1   : >> { %4389 = vrot.lane.b32.xlu0 %v3634_v50, %s15209_s21  ;;  %v3695_v10 = vpop.f32.mrb[25].mxu1  ;;  %v3808_v27 = vpop.f32.mrb[26].mxu0 }
 0x5d2   : >> { %4379 = vrot.lane.b32.xlu1 %v3632_v60, %s15209_s21  ;;  %v3697_v40 = vpop.f32.mrb[26].mxu1  ;;  %v3810_v22 = vpop.f32.mrb[27].mxu0 }
 0x5d3   : >> { %v3699_v62 = vpop.f32.mrb[27].mxu1 }
 0x5d5   : >> { %4113 = vrot.lane.b32.xlu0 %v3590_v18, %s15210_s22 }
 0x5d6   : >> { %4061 = vrot.lane.b32.xlu1 %v3586_v3, %s15208_s20 }
 0x5d7   : >> { %v3814_v57 = vpop.f32.mrb[28].mxu0 }
 0x5d8   : >> { %v3703_v39 = vpop.f32.mrb[28].mxu1  ;;  %v3816_v61 = vpop.f32.mrb[29].mxu0 }
 0x5d9   : >> { %4125 = vrot.lane.b32.xlu0 %v3594_v1, %s15210_s22  ;;  %v3705_v30 = vpop.f32.mrb[29].mxu1  ;;  %v3818_v52 = vpop.f32.mrb[30].mxu0 }
 0x5da   : >> { %4391 = vrot.lane.b32.xlu1 %v3636_v35, %s15209_s21  ;;  %v3707_v63 = vpop.f32.mrb[30].mxu1  ;;  %v3820_v5 = vpop.f32.mrb[31].mxu0 }
 0x5db   : >> { %v12035_v55 = vpop.f32.mrb[31].mxu1 }
 0x5dd   : >> { %3919 = vrot.lane.b32.xlu0 %v3683_v46, %s9894_s25 }
 0x5de   : >> { %4115 = vrot.lane.b32.xlu1 %v3592_v17, %s15210_s22 }
 0x5df   : >> { %v3824_v26 = vpop.f32.mrb[32].mxu0 }
 0x5e0   : >> { %v3713_v38 = vpop.f32.mrb[32].mxu1  ;;  %v12040_v16 = vpop.f32.mrb[33].mxu0 }
 0x5e1   : >> { %3931 = vrot.lane.b32.xlu0 %v3687_v36, %s9894_s25  ;;  %v12042_v44 = vpop.f32.mrb[33].mxu1  ;;  %v3828_v29 = vpop.f32.mrb[34].mxu0 }
 0x5e2   : >> { %4127 = vrot.lane.b32.xlu1 %v3596_v14, %s15210_s22  ;;  %v3717_v42 = vpop.f32.mrb[34].mxu1  ;;  %v12045_v53 = vpop.f32.mrb[35].mxu0 }
 0x5e3   : >> { %v12047_v45 = vpop.f32.mrb[35].mxu1 }
 0x5e5   : >> { %3923 = vrot.lane.b32.xlu0 %v3804_v20, %s9894_s25 }
 0x5e6   : >> { %3921 = vrot.lane.b32.xlu1 %v3685_v8, %s9894_s25 }
 0x5e7   : >> { %v3834_v15 = vpop.f32.mrb[36].mxu0 }
 0x5e8   : >> { %v12051_v6 = vpop.f32.mrb[36].mxu1  ;;  %v12054_v24 = vpop.f32.mrb[37].mxu0 }
 0x5e9   : >> { %3985 = vrot.lane.b32.xlu0 %v3693_v7, %s9895_s27  ;;  %v12056_v41 = vpop.f32.mrb[37].mxu1  ;;  %v12059_v43 = vpop.f32.mrb[38].mxu0 }
 0x5ea   : >> { %3933 = vrot.lane.b32.xlu1 %v3689_v2, %s9894_s25  ;;  %v12061_v51 = vpop.f32.mrb[38].mxu1  ;;  %v12063_v58 = vpop.f32.mrb[39].mxu0 }
 0x5eb   : >> { %v12065_v21 = vpop.f32.mrb[39].mxu1 }
 0x5ed   : >> { %3935 = vrot.lane.b32.xlu0 %v3808_v27, %s9894_s25 }
 0x5ee   : >> { %3925 = vrot.lane.b32.xlu1 %v3806_v47, %s9894_s25 }
 0x5ef   : >> { %v12069_v11 = vpop.f32.mrb[40].mxu0 }
 0x5f0   : >> { %v12071_v34 = vpop.f32.mrb[40].mxu1  ;;  %v12074_v59 = vpop.f32.mrb[41].mxu0 }
 0x5f1   : >> { %3997 = vrot.lane.b32.xlu0 %v3697_v40, %s9895_s27  ;;  %v12076_v19 = vpop.f32.mrb[41].mxu1  ;;  %v12079_v32 = vpop.f32.mrb[42].mxu0 }
 0x5f2   : >> { %3987 = vrot.lane.b32.xlu1 %v3695_v10, %s9895_s27  ;;  %v12081_v54 = vpop.f32.mrb[42].mxu1  ;;  %v12083_v48 = vpop.f32.mrb[43].mxu0 }
 0x5f3   : >> { %v12085_v60 = vpop.f32.mrb[43].mxu1  ;;  %v12131_v10 = vpop.permute.xlu0 %3885 }
 0x5f5   : >> { %3989 = vrot.lane.b32.xlu0 %v3814_v57, %s9895_s27 }
 0x5f6   : >> { %3937 = vrot.lane.b32.xlu1 %v3810_v22, %s9894_s25 }
 0x5f7   : >> { %v12089_v33 = vpop.f32.mrb[44].mxu0 }
 0x5f8   : >> { %v12091_v50 = vpop.f32.mrb[44].mxu1  ;;  %v12094_v3 = vpop.f32.mrb[45].mxu0 }
 0x5f9   : >> { %4051 = vrot.lane.b32.xlu0 %v3703_v39, %s15208_s20  ;;  %v12096_v35 = vpop.f32.mrb[45].mxu1  ;;  %v12099_v18 = vpop.f32.mrb[46].mxu0 }
 0x5fa   : >> { %3999 = vrot.lane.b32.xlu1 %v3699_v62, %s9895_s27  ;;  %v12101_v17 = vpop.f32.mrb[46].mxu1  ;;  %v12103_v1 = vpop.f32.mrb[47].mxu0 }
 0x5fb   : >> { %v12105_v14 = vpop.f32.mrb[47].mxu1  ;;  %v12145_v62 = vpop.permute.xlu0 %3890 }
 0x5fd   : >> { %4001 = vrot.lane.b32.xlu0 %v3818_v52, %s9895_s27 }
 0x5fe   : >> { %3991 = vrot.lane.b32.xlu1 %v3816_v61, %s9895_s27 }
 0x5ff   : >> { %v12109_v46 = vpop.f32.mrb[48].mxu0 }
 0x600   : >> { %v12111_v8 = vpop.f32.mrb[48].mxu1  ;;  %v12114_v13 = vpop.f32.mrb[49].mxu0 }
 0x601   : >> { %4063 = vrot.lane.b32.xlu0 %v3707_v63, %s15208_s20  ;;  %v12116_v36 = vpop.f32.mrb[49].mxu1  ;;  %v12119_v12 = vpop.f32.mrb[50].mxu0 }
 0x602   : >> { %4053 = vrot.lane.b32.xlu1 %v3705_v30, %s15208_s20  ;;  %v12121_v2 = vpop.f32.mrb[50].mxu1  ;;  %v12123_v20 = vpop.f32.mrb[51].mxu0 }
 0x603   : >> { %v12125_v7 = vpop.f32.mrb[51].mxu1 }
 0x605   : >> { %4055 = vrot.lane.b32.xlu0 %v3824_v26, %s15208_s20 }
 0x606   : >> { %4003 = vrot.lane.b32.xlu1 %v3820_v5, %s9895_s27 }
 0x607   : >> { %v12129_v47 = vpop.f32.mrb[52].mxu0 }
 0x608   : >> { %v12134_v27 = vpop.f32.mrb[53].mxu0 }
 0x609   : >> { %4117 = vrot.lane.b32.xlu0 %v3713_v38, %s15210_s22  ;;  %v12138_v40 = vpop.f32.mrb[54].mxu0 }
 0x60a   : >> { %4065 = vrot.lane.b32.xlu1 %v12035_v55, %s15208_s20  ;;  %v12140_v22 = vpop.f32.mrb[55].mxu0  ;;  %v3893_v55 = vadd.f32 %v12131_v10, %v11985_v0 }
 0x60d   : >> { %4067 = vrot.lane.b32.xlu0 %v3828_v29, %s15208_s20 }
 0x60e   : >> { %4057 = vrot.lane.b32.xlu1 %v12040_v16, %s15208_s20 }
 0x611   : >> { %4129 = vrot.lane.b32.xlu0 %v3717_v42, %s15210_s22  ;;  %v3898_v42 = vadd.f32 %v12145_v62, %v11991_v4 }
 0x612   : >> { %4119 = vrot.lane.b32.xlu1 %v12042_v44, %s15210_s22 }
 0x613   : >> { %v12150_v57 = vpop.permute.xlu0 %4179 }
 0x614   : >> { %v12152_v39 = vpop.permute.xlu1 %4181 }
 0x615   : >> { %4121 = vrot.lane.b32.xlu0 %v3834_v15, %s15210_s22 }
 0x616   : >> { %4069 = vrot.lane.b32.xlu1 %v12045_v53, %s15208_s20 }
 0x617   : >> { %v12157_v61 = vpop.permute.xlu0 %4191 }
 0x618   : >> { %v12159_v30 = vpop.permute.xlu1 %4193 }
 0x619   : >> { %4183 = vrot.lane.b32.xlu0 %v12051_v6, %s9898_s12 }
 0x61a   : >> { %4131 = vrot.lane.b32.xlu1 %v12047_v45, %s15210_s22 }
 0x61b   : >> { %v12165_v52 = vpop.permute.xlu0 %4245 }
 0x61c   : >> { %v3916_v63 = vpop.permute.xlu1 %3915 }
 0x61d   : >> { %4133 = vrot.lane.b32.xlu0 %v12059_v43, %s15210_s22 }
 0x61e   : >> { %4123 = vrot.lane.b32.xlu1 %v12054_v24, %s15210_s22 }
 0x61f   : >> { %v3928_v5 = vpop.permute.xlu0 %3927 }
 0x620   : >> { %v12173_v26 = vpop.permute.xlu1 %3917 }
 0x621   : >> { %v3939_v38 = vsel %vm1151_vm2, %v3916_v63, %v12173_v26  ;;  %4195 = vrot.lane.b32.xlu0 %v12061_v51, %s9898_s12 }
 0x622   : >> { %v3959_v16 = vadd.f32 %v3939_v38, %v3893_v55  ;;  %4185 = vrot.lane.b32.xlu1 %v12056_v41, %s9898_s12 }
 0x623   : >> { %v12181_v44 = vpop.permute.xlu0 %4257 }
 0x624   : >> { %v12183_v29 = vpop.permute.xlu1 %4247 }
 0x625   : >> { %4187 = vrot.lane.b32.xlu0 %v12069_v11, %s9898_s12 }
 0x626   : >> { %4135 = vrot.lane.b32.xlu1 %v12063_v58, %s15210_s22 }
 0x627   : >> { %v3982_v0 = vpop.permute.xlu0 %3981 }
 0x628   : >> { %v12191_v53 = vpop.permute.xlu1 %3929 }
 0x629   : >> { %v3944_v45 = vsel %vm1151_vm2, %v3928_v5, %v12191_v53  ;;  %4249 = vrot.lane.b32.xlu0 %v12071_v34, %s9899_s13 }
 0x62a   : >> { %v3964_v15 = vadd.f32 %v3944_v45, %v3898_v42  ;;  %4197 = vrot.lane.b32.xlu1 %v12065_v21, %s9898_s12 }
 0x62b   : >> { %v12199_v6 = vpop.permute.xlu0 %4311 }
 0x62c   : >> { %v12201_v24 = vpop.permute.xlu1 %4259 }
 0x62d   : >> { %4199 = vrot.lane.b32.xlu0 %v12079_v32, %s9898_s12 }
 0x62e   : >> { %4189 = vrot.lane.b32.xlu1 %v12074_v59, %s9898_s12 }
 0x62f   : >> { %v3994_v4 = vpop.permute.xlu0 %3993 }
 0x630   : >> { %v12207_v41 = vpop.permute.xlu1 %3983 }
 0x631   : >> { %v4005_v43 = vsel %vm1250_vm3, %v3982_v0, %v12207_v41  ;;  %4261 = vrot.lane.b32.xlu0 %v12081_v54, %s9899_s13 }
 0x632   : >> { %v4025_v51 = vadd.f32 %v4005_v43, %v3959_v16  ;;  %4251 = vrot.lane.b32.xlu1 %v12076_v19, %s9899_s13 }
 0x633   : >> { %v12215_v58 = vpop.permute.xlu0 %4323 }
 0x634   : >> { %v12217_v21 = vpop.permute.xlu1 %4313 }
 0x635   : >> { %4253 = vrot.lane.b32.xlu0 %v12089_v33, %s9899_s13 }
 0x636   : >> { %4201 = vrot.lane.b32.xlu1 %v12083_v48, %s9898_s12 }
 0x637   : >> { %v4048_v11 = vpop.permute.xlu0 %4047 }
 0x638   : >> { %v12223_v34 = vpop.permute.xlu1 %3995 }
 0x639   : >> { %v4010_v59 = vsel %vm1250_vm3, %v3994_v4, %v12223_v34  ;;  %4315 = vrot.lane.b32.xlu0 %v12091_v50, %s15207_s19 }
 0x63a   : >> { %v4030_v19 = vadd.f32 %v4010_v59, %v3964_v15  ;;  %4263 = vrot.lane.b32.xlu1 %v12085_v60, %s9899_s13 }
 0x63b   : >> { %v4378_v32 = vpop.permute.xlu0 %4377 }
 0x63c   : >> { %v12231_v54 = vpop.permute.xlu1 %4325 }
 0x63d   : >> { %4265 = vrot.lane.b32.xlu0 %v12099_v18, %s9899_s13 }
 0x63e   : >> { %4255 = vrot.lane.b32.xlu1 %v12094_v3, %s9899_s13 }
 0x63f   : >> { %v4060_v48 = vpop.permute.xlu0 %4059 }
 0x640   : >> { %v12237_v33 = vpop.permute.xlu1 %4049 }
 0x641   : >> { %v4071_v63 = vsel %vm1349_vm4, %v4048_v11, %v12237_v33  ;;  %4327 = vrot.lane.b32.xlu0 %v12101_v17, %s15207_s19 }
 0x642   : >> { %v4091_v50 = vadd.f32 %v4071_v63, %v4025_v51  ;;  %4317 = vrot.lane.b32.xlu1 %v12096_v35, %s15207_s19  ;;  %v3895_v51 = vadd.f32 %v12131_v10, %v12009_v49 }
 0x643   : >> { %v4390_v60 = vpop.permute.xlu0 %4389 }
 0x644   : >> { %v12245_v5 = vpop.permute.xlu1 %4379 }
 0x645   : >> { %4319 = vrot.lane.b32.xlu0 %v12109_v46, %s15207_s19 }
 0x646   : >> { %4267 = vrot.lane.b32.xlu1 %v12103_v1, %s9899_s13  ;;  %v3894_v1 = vadd.f32 %v12131_v10, %v11988_v37  ;;  %v3899_v37 = vadd.f32 %v12145_v62, %v11993_v56 }
 0x647   : >> { %v4114_v3 = vpop.permute.xlu0 %4113 }
 0x648   : >> { %v12251_v18 = vpop.permute.xlu1 %4061 }
 0x649   : >> { %v4076_v55 = vsel %vm1349_vm4, %v4060_v48, %v12251_v18  ;;  %4381 = vrot.lane.b32.xlu0 %v12111_v8, %s15209_s21 }
 0x64a   : >> { %v4096_v17 = vadd.f32 %v4076_v55, %v4030_v19  ;;  %4329 = vrot.lane.b32.xlu1 %v12105_v14, %s15207_s19 }
 0x64b   : >> { %v4126_v35 = vpop.permute.xlu0 %4125 }
 0x64c   : >> { %v12259_v38 = vpop.permute.xlu1 %4391 }
 0x64d   : >> { %4331 = vrot.lane.b32.xlu0 %v12119_v12, %s15207_s19 }
 0x64e   : >> { %4321 = vrot.lane.b32.xlu1 %v12114_v13, %s15207_s19  ;;  %v4203_v13 = vsel %vm1547_vm6, %v12150_v57, %v12152_v39 }
 0x64f   : >> { %v3920_v46 = vpop.permute.xlu0 %3919 }
 0x650   : >> { %v3940_v8 = vsel %vm1151_vm2, %v12173_v26, %v3920_v46  ;;  %v12269_v16 = vpop.permute.xlu1 %4115 }
 0x651   : >> { %v3960_v0 = vadd.f32 %v3940_v8, %v3894_v1  ;;  %v4137_v14 = vsel %vm1448_vm5, %v4114_v3, %v12269_v16  ;;  %4393 = vrot.lane.b32.xlu0 %v12121_v2, %s15209_s21  ;;  %v4269_v2 = vsel %vm1646_vm7, %v12165_v52, %v12183_v29  ;;  %v4335_v52 = vsel %vm1745_vm8, %v12199_v6, %v12217_v21 }
 0x652   : >> { %v4157_v12 = vadd.f32 %v4137_v14, %v4091_v50  ;;  %4383 = vrot.lane.b32.xlu1 %v12116_v36, %s15209_s21  ;;  %v3897_v14 = vadd.f32 %v12131_v10, %v12021_v23 }
 0x653   : >> { %v3932_v26 = vpop.permute.xlu0 %3931 }
 0x654   : >> { %v4223_v42 = vadd.f32 %v4203_v13, %v4157_v12  ;;  %v3945_v45 = vsel %vm1151_vm2, %v12191_v53, %v3932_v26  ;;  %v12284_v15 = vpop.permute.xlu1 %4127  ;;  %v4208_v53 = vsel %vm1547_vm6, %v12157_v61, %v12159_v30  ;;  %v4401_v61 = vsel %vm14987_vm9, %v4378_v32, %v12245_v5 }
 0x655   : >> { %v3965_v4 = vadd.f32 %v3945_v45, %v3899_v37  ;;  %v4142_v36 = vsel %vm1448_vm5, %v4126_v35, %v12284_v15  ;;  %4385 = vrot.lane.b32.xlu0 %v12129_v47, %s15209_s21  ;;  %v3896_v47 = vadd.f32 %v12131_v10, %v12012_v31  ;;  %v3900_v32 = vadd.f32 %v12145_v62, %v12015_v25  ;;  %v15211_v45 = vld [vmem:[#allocation6_spill] sm:$0xff] }
 0x656   : >> { %v4289_v56 = vadd.f32 %v4269_v2, %v4223_v42  ;;  %v4162_v57 = vadd.f32 %v4142_v36, %v4096_v17  ;;  %4333 = vrot.lane.b32.xlu1 %v12123_v20, %s15207_s19  ;;  %v4274_v20 = vsel %vm1646_vm7, %v12181_v44, %v12201_v24  ;;  %v4340_v44 = vsel %vm1745_vm8, %v12215_v58, %v12231_v54 }
 0x657   : >> { %v3924_v43 = vpop.permute.xlu0 %3923  ;;  %v4406_v35 = vsel %vm14987_vm9, %v4390_v60, %v12259_v38  ;;  %v3901_v58 = vadd.f32 %v12145_v62, %v12017_v9 }
 0x658   : >> { %v4355_v11 = vadd.f32 %v4335_v52, %v4289_v56  ;;  %v4228_v59 = vadd.f32 %v4208_v53, %v4162_v57  ;;  %v3922_v19 = vpop.permute.xlu1 %3921  ;;  %v3902_v53 = vadd.f32 %v12145_v62, %v12025_v28 }
 0x659   : >> { %v3941_v48 = vsel %vm1151_vm2, %v3920_v46, %v3922_v19  ;;  %v3942_v6 = vsel %vm1151_vm2, %v3922_v19, %v3924_v43  ;;  %4397 = vrot.lane.b32.xlu0 %v12138_v40, %s15209_s21 }
 0x65a   : >> { %v4421_v49 = vadd.f32 %v4401_v61, %v4355_v11  ;;  %v4294_v63 = vadd.f32 %v4274_v20, %v4228_v59  ;;  %v3961_v31 = vadd.f32 %v3941_v48, %v3895_v51  ;;  %v3962_v50 = vadd.f32 %v3942_v6, %v3896_v47  ;;  %4395 = vrot.lane.b32.xlu1 %v12125_v7, %s15209_s21 }
 0x65b   : >> { %v3986_v3 = vpop.permute.xlu0 %3985 }
 0x65c   : >> { %v4360_v55 = vadd.f32 %v4340_v44, %v4294_v63  ;;  %v4006_v17 = vsel %vm1250_vm3, %v12207_v41, %v3986_v3  ;;  %v3934_v40 = vpop.permute.xlu1 %3933  ;;  %v4431_v41 = vmax.f32 %v4421_v49, 0.0 }
 0x65d   : >> { %v4026_v1 = vadd.f32 %v4006_v17, %v3960_v0  ;;  %v3946_v46 = vsel %vm1151_vm2, %v3932_v26, %v3934_v40 }
 0x65e   : >> { %v4426_v7 = vadd.f32 %v4406_v35, %v4360_v55  ;;  %v3966_v8 = vadd.f32 %v3946_v46, %v3900_v32  ;;  %4387 = vrot.lane.b32.xlu1 %v12134_v27, %s15209_s21 }
 0x65f   : >> { %v3936_v25 = vpop.permute.xlu0 %3935 }
 0x660   : >> { %v4436_v12 = vmax.f32 %v4426_v7, 0.0  ;;  %v3947_v37 = vsel %vm1151_vm2, %v3934_v40, %v3936_v25  ;;  %v3926_v60 = vpop.permute.xlu1 %3925 }
 0x661   : >> { %v3967_v0 = vadd.f32 %v3947_v37, %v3901_v58  ;;  %v3943_v13 = vsel %vm1151_vm2, %v3924_v43, %v3926_v60 }
 0x662   : >> { %v4441_v26 = vpack.c.bf16 %v4436_v12, %v4431_v41  ;;  %v3963_v42 = vadd.f32 %v3943_v13, %v3897_v14  ;;  %4399 = vrot.lane.b32.xlu1 %v12140_v22, %s15209_s21 }
 0x663   : >> { %v3998_v27 = vpop.permute.xlu0 %3997 }
 0x664   : >> { %v12337_v9 = vmax.bf16 %v15211_v45, %v4441_v26   ;;  %v4011_v23 = vsel %vm1250_vm3, %v12223_v34, %v3998_v27  ;;  %v3988_v10 = vpop.permute.xlu1 %3987 }
 0x665   : >> { %v4031_v2 = vadd.f32 %v4011_v23, %v3965_v4  ;;  %v4007_v36 = vsel %vm1250_vm3, %v3986_v3, %v3988_v10 }
 0x666   : >> { %15212 = vst [vmem:[#allocation79_spill] sm:$0xff] %v12337_v9  ;;  %v4027_v56 = vadd.f32 %v4007_v36, %v3961_v31 }
 0x667   : >> { %v3990_v57 = vpop.permute.xlu0 %3989 }
 0x668   : >> { %v4008_v52 = vsel %vm1250_vm3, %v3988_v10, %v3990_v57  ;;  %v3938_v43 = vpop.permute.xlu1 %3937 }
 0x669   : >> { %v4028_v22 = vadd.f32 %v4008_v52, %v3962_v50  ;;  %v3948_v51 = vsel %vm1151_vm2, %v3936_v25, %v3938_v43 }
 0x66a   : >> { %v3968_v47 = vadd.f32 %v3948_v51, %v3902_v53 }
 0x66b   : >> { %v4052_v11 = vpop.permute.xlu0 %4051 }
 0x66c   : >> { %v4072_v34 = vsel %vm1349_vm4, %v12237_v33, %v4052_v11  ;;  %v4000_v59 = vpop.permute.xlu1 %3999 }
 0x66d   : >> { %v4092_v4 = vadd.f32 %v4072_v34, %v4026_v1  ;;  %v4012_v19 = vsel %vm1250_vm3, %v3998_v27, %v4000_v59 }
 0x66e   : >> { %v4032_v20 = vadd.f32 %v4012_v19, %v3966_v8 }
 0x66f   : >> { %v4002_v61 = vpop.permute.xlu0 %4001 }
 0x670   : >> { %v4013_v48 = vsel %vm1250_vm3, %v4000_v59, %v4002_v61  ;;  %v3992_v28 = vpop.permute.xlu1 %3991 }
 0x671   : >> { %v4033_v62 = vadd.f32 %v4013_v48, %v3967_v0  ;;  %v4009_v6 = vsel %vm1250_vm3, %v3990_v57, %v3992_v28 }
 0x672   : >> { %v4029_v49 = vadd.f32 %v4009_v6, %v3963_v42 }
 0x673   : >> { %v4064_v63 = vpop.permute.xlu0 %4063 }
 0x674   : >> { %v4077_v31 = vsel %vm1349_vm4, %v12251_v18, %v4064_v63  ;;  %v4054_v50 = vpop.permute.xlu1 %4053 }
 0x675   : >> { %v4097_v44 = vadd.f32 %v4077_v31, %v4031_v2  ;;  %v4073_v33 = vsel %vm1349_vm4, %v4052_v11, %v4054_v50 }
 0x676   : >> { %v4093_v3 = vadd.f32 %v4073_v33, %v4027_v56 }
 0x677   : >> { %v4056_v32 = vpop.permute.xlu0 %4055 }
 0x678   : >> { %v4074_v55 = vsel %vm1349_vm4, %v4054_v50, %v4056_v32  ;;  %v4004_v17 = vpop.permute.xlu1 %4003 }
 0x679   : >> { %v4094_v40 = vadd.f32 %v4074_v55, %v4028_v22  ;;  %v4014_v35 = vsel %vm1250_vm3, %v4002_v61, %v4004_v17 }
 0x67a   : >> { %v4034_v1 = vadd.f32 %v4014_v35, %v3968_v47 }
 0x67b   : >> { %v4118_v46 = vpop.permute.xlu0 %4117 }
 0x67c   : >> { %v4138_v7 = vsel %vm1448_vm5, %v12269_v16, %v4118_v46  ;;  %v4066_v8 = vpop.permute.xlu1 %4065 }
 0x67d   : >> { %v4158_v58 = vadd.f32 %v4138_v7, %v4092_v4  ;;  %v4078_v18 = vsel %vm1349_vm4, %v4064_v63, %v4066_v8 }
 0x67e   : >> { %v4098_v25 = vadd.f32 %v4078_v18, %v4032_v20 }
 0x67f   : >> { %v4068_v14 = vpop.permute.xlu0 %4067 }
 0x680   : >> { %v4079_v41 = vsel %vm1349_vm4, %v4066_v8, %v4068_v14  ;;  %v4058_v12 = vpop.permute.xlu1 %4057 }
 0x681   : >> { %v4099_v37 = vadd.f32 %v4079_v41, %v4033_v62  ;;  %v4075_v60 = vsel %vm1349_vm4, %v4056_v32, %v4058_v12 }
 0x682   : >> { %v12361_v0 = vadd.f32 %v4075_v60, %v4029_v49 }
 0x683   : >> { %v4130_v13 = vpop.permute.xlu0 %4129 }
 0x684   : >> { %v4143_v26 = vsel %vm1448_vm5, %v12284_v15, %v4130_v13  ;;  %v4120_v42 = vpop.permute.xlu1 %4119 }
 0x685   : >> { %v4163_v16 = vadd.f32 %v4143_v26, %v4097_v44  ;;  %v4139_v27 = vsel %vm1448_vm5, %v4118_v46, %v4120_v42 }
 0x686   : >> { %v4159_v45 = vadd.f32 %v4139_v27, %v4093_v3 }
 0x687   : >> { %v4122_v23 = vpop.permute.xlu0 %4121 }
 0x688   : >> { %v4140_v10 = vsel %vm1448_vm5, %v4120_v42, %v4122_v23  ;;  %v4070_v2 = vpop.permute.xlu1 %4069 }
 0x689   : >> { %v4160_v36 = vadd.f32 %v4140_v10, %v4094_v40  ;;  %v4080_v56 = vsel %vm1349_vm4, %v4068_v14, %v4070_v2 }
 0x68a   : >> { %v12368_v57 = vadd.f32 %v4080_v56, %v4034_v1 }
 0x68b   : >> { %v4184_v53 = vpop.permute.xlu0 %4183 }
 0x68c   : >> { %v4132_v52 = vpop.permute.xlu1 %4131  ;;  %v4204_v40 = vsel %vm1547_vm6, %v12152_v39, %v4184_v53 }
 0x68d   : >> { %v4144_v43 = vsel %vm1448_vm5, %v4130_v13, %v4132_v52  ;;  %v4224_v8 = vadd.f32 %v4204_v40, %v4158_v58 }
 0x68e   : >> { %v4164_v22 = vadd.f32 %v4144_v43, %v4098_v25 }
 0x68f   : >> { %v4134_v15 = vpop.permute.xlu0 %4133 }
 0x690   : >> { %v4145_v51 = vsel %vm1448_vm5, %v4132_v52, %v4134_v15  ;;  %v4124_v47 = vpop.permute.xlu1 %4123 }
 0x691   : >> { %v4165_v11 = vadd.f32 %v4145_v51, %v4099_v37 }
 0x693   : >> { %v4196_v34 = vpop.permute.xlu0 %4195 }
 0x694   : >> { %v4186_v59 = vpop.permute.xlu1 %4185  ;;  %v4209_v1 = vsel %vm1547_vm6, %v12159_v30, %v4196_v34 }
 0x695   : >> { %v4229_v14 = vadd.f32 %v4209_v1, %v4163_v16 }
 0x697   : >> { %v4188_v4 = vpop.permute.xlu0 %4187 }
 0x698   : >> { %v4136_v19 = vpop.permute.xlu1 %4135  ;;  %v4206_v58 = vsel %vm1547_vm6, %v4186_v59, %v4188_v4 }
 0x699   : >> { %v4226_v10 = vadd.f32 %v4206_v58, %v4160_v36  ;;  %v4146_v56 = vsel %vm1448_vm5, %v4134_v15, %v4136_v19 }
 0x69b   : >> { %v4250_v20 = vpop.permute.xlu0 %4249 }
 0x69c   : >> { %v4198_v61 = vpop.permute.xlu1 %4197  ;;  %v4270_v46 = vsel %vm1646_vm7, %v12183_v29, %v4250_v20  ;;  %v4205_v29 = vsel %vm1547_vm6, %v4184_v53, %v4186_v59 }
 0x69d   : >> { %v4290_v41 = vadd.f32 %v4270_v46, %v4224_v8  ;;  %v4210_v13 = vsel %vm1547_vm6, %v4196_v34, %v4198_v61  ;;  %v4225_v27 = vadd.f32 %v4205_v29, %v4159_v45 }
 0x69e   : >> { %v4230_v51 = vadd.f32 %v4210_v13, %v4164_v22 }
 0x69f   : >> { %v12372_v48 = vpop.permute.xlu0 %4199 }
 0x6a0   : >> { %v4190_v28 = vpop.permute.xlu1 %4189 }
 0x6a1   : >> { %v4207_v19 = vsel %vm1547_vm6, %v4188_v4, %v4190_v28 }
 0x6a3   : >> { %v4262_v62 = vpop.permute.xlu0 %4261 }
 0x6a4   : >> { %v4252_v6 = vpop.permute.xlu1 %4251  ;;  %v4275_v18 = vsel %vm1646_vm7, %v12201_v24, %v4262_v62 }
 0x6a5   : >> { %v4295_v60 = vadd.f32 %v4275_v18, %v4229_v14  ;;  %v4271_v53 = vsel %vm1646_vm7, %v4250_v20, %v4252_v6 }
 0x6a6   : >> { %v4291_v20 = vadd.f32 %v4271_v53, %v4225_v27  ;;  %v15216_v53 = vld [vmem:[#allocation4_spill] sm:$0xff] }
 0x6a7   : >> { %v12374_v49 = vpop.permute.xlu0 %4253 }
 0x6a8   : >> { %v12376_v63 = vpop.permute.xlu1 %4201  ;;  %v4272_v52 = vsel %vm1646_vm7, %v4252_v6, %v12374_v49 }
 0x6a9   : >> { %v4212_v4 = vsel %vm1547_vm6, %v12372_v48, %v12376_v63 }
 0x6ab   : >> { %v4316_v31 = vpop.permute.xlu0 %4315 }
 0x6ac   : >> { %v4264_v50 = vpop.permute.xlu1 %4263  ;;  %v4336_v25 = vsel %vm1745_vm8, %v12217_v21, %v4316_v31  ;;  %v4211_v21 = vsel %vm1547_vm6, %v4198_v61, %v12372_v48  ;;  %v4292_v61 = vadd.f32 %v4272_v52, %v4226_v10 }
 0x6ad   : >> { %v4356_v24 = vadd.f32 %v4336_v25, %v4290_v41  ;;  %v4231_v34 = vadd.f32 %v4211_v21, %v4165_v11  ;;  %v4276_v59 = vsel %vm1646_vm7, %v4262_v62, %v4264_v50 }
 0x6ae   : >> { %v4296_v40 = vadd.f32 %v4276_v59, %v4230_v51 }
 0x6af   : >> { %v12378_v44 = vpop.permute.xlu0 %4265 }
 0x6b0   : >> { %v4256_v33 = vpop.permute.xlu1 %4255  ;;  %v4277_v45 = vsel %vm1646_vm7, %v4264_v50, %v12378_v44 }
 0x6b1   : >> { %v4273_v28 = vsel %vm1646_vm7, %v12374_v49, %v4256_v33 }
 0x6b3   : >> { %v4328_v3 = vpop.permute.xlu0 %4327 }
 0x6b4   : >> { %v4318_v32 = vpop.permute.xlu1 %4317  ;;  %v4341_v39 = vsel %vm1745_vm8, %v12231_v54, %v4328_v3  ;;  %v4141_v54 = vsel %vm1448_vm5, %v4122_v23, %v4124_v47 }
 0x6b5   : >> { %v4361_v26 = vadd.f32 %v4341_v39, %v4295_v60  ;;  %v4337_v23 = vsel %vm1745_vm8, %v4316_v31, %v4318_v32  ;;  %v4161_v8 = vadd.f32 %v4141_v54, %v12361_v0 }
 0x6b6   : >> { %v4357_v1 = vadd.f32 %v4337_v23, %v4291_v20  ;;  %v12500_v20 = vld [vmem:[%s14953_s1 + $0x28] sm:$0xff] (%p431_p5) }
 0x6b7   : >> { %v12380_v55 = vpop.permute.xlu0 %4319  ;;  %v4227_v29 = vadd.f32 %v4207_v19, %v4161_v8  ;;  %v12495_v19 = vld [vmem:[%s14953_s1 + $0x20] sm:$0xff] (%p431_p5)  ;;  %15237 = vst [vmem:[#allocation89_spill] sm:$0xff] (%p431_p5), %v12500_v20 }
 0x6b8   : >> { %v12382_v17 = vpop.permute.xlu1 %4267  ;;  %15236 = vst [vmem:[#allocation88_spill] sm:$0xff] (%p431_p5), %v12495_v19 }
 0x6b9   : >> { %v4293_v49 = vadd.f32 %v4273_v28, %v4227_v29  ;;  %v4278_v33 = vsel %vm1646_vm7, %v12378_v44, %v12382_v17  ;;  %v15218_v17 = vld [vmem:[#allocation3_spill] sm:$0xff] }
 0x6bb   : >> { %v4382_v35 = vpop.permute.xlu0 %4381 }
 0x6bc   : >> { %v4330_v7 = vpop.permute.xlu1 %4329  ;;  %v4402_v30 = vsel %vm14987_vm9, %v12245_v5, %v4382_v35 }
 0x6bd   : >> { %v4422_v42 = vadd.f32 %v4402_v30, %v4356_v24  ;;  %v4342_v22 = vsel %vm1745_vm8, %v4328_v3, %v4330_v7  ;;  %v15213_v3 = vld [vmem:[#allocation5_spill] sm:$0xff]  ;;  %v4166_v30 = vadd.f32 %v4146_v56, %v12368_v57 }
 0x6bf   : >> { %v12394_v12 = vpop.permute.xlu0 %4331  ;;  %v4432_v36 = vmax.f32 %v4422_v42, 0.0  ;;  %v4232_v60 = vadd.f32 %v4212_v4, %v4166_v30  ;;  %v15231_v4 = vmov %v12337_v9 }
 0x6c0   : >> { %v4322_v37 = vpop.permute.xlu1 %4321  ;;  %v4343_v62 = vsel %vm1745_vm8, %v4330_v7, %v12394_v12 }
 0x6c1   : >> { %v4339_v24 = vsel %vm1745_vm8, %v12380_v55, %v4322_v37  ;;  %v4298_v27 = vadd.f32 %v4278_v33, %v4232_v60 }
 0x6c2   : >> { %v4359_v10 = vadd.f32 %v4339_v24, %v4293_v49 }
 0x6c3   : >> { %v4394_v16 = vpop.permute.xlu0 %4393 }
 0x6c4   : >> { %v4407_v5 = vsel %vm14987_vm9, %v12259_v38, %v4394_v16  ;;  %v4384_v2 = vpop.permute.xlu1 %4383  ;;  %v4338_v38 = vsel %vm1745_vm8, %v4318_v32, %v12380_v55  ;;  %v4297_v32 = vadd.f32 %v4277_v45, %v4231_v34  ;;  %v15221_v45 = vld [vmem:[#allocation2_spill] sm:$0xff] }
 0x6c5   : >> { %v4427_v43 = vadd.f32 %v4407_v5, %v4361_v26  ;;  %v4403_v50 = vsel %vm14987_vm9, %v4382_v35, %v4384_v2  ;;  %v4358_v46 = vadd.f32 %v4338_v38, %v4292_v61  ;;  %v4362_v35 = vadd.f32 %v4342_v22, %v4296_v40  ;;  %v12475_v38 = vld [vmem:[%s14953_s1] sm:$0xff] (%p431_p5)  ;;  %v12508_v61 = vld [vmem:[%s14953_s1 + $0x30] sm:$0xff] (%p431_p5)  ;;  %v12513_v22 = vld [vmem:[%s14953_s1 + $0x38] sm:$0xff] (%p431_p5) }
 0x6c6   : >> { %v4363_v25 = vadd.f32 %v4343_v62, %v4297_v32  ;;  %v4423_v14 = vadd.f32 %v4403_v50, %v4357_v1  ;;  %15232 = vst [vmem:[#allocation84_spill] sm:$0xff] (%p431_p5), %v12475_v38  ;;  %15238 = vst [vmem:[#allocation90_spill] sm:$0xff] (%p431_p5), %v12508_v61  ;;  %v12526_v62 = vld [vmem:[%s14953_s1 + $0x48] sm:$0xff] (%p431_p5)  ;;  %vm4468_vm10 = vcmp.gt.f32.partialorder (%p431_p5), %v12513_v22, 0.5  ;;  %v12534_v50 = vmov (%p431_p5), 0.0  }
 0x6c7   : >> { %v4437_v15 = vmax.f32 %v4427_v43, 0.0  ;;  %v4386_v47 = vpop.permute.xlu0 %4385  ;;  %15239 = vst [vmem:[#allocation91_spill] sm:$0xff] (%p431_p5), %v12513_v22  ;;  %15241 = vst [vmem:[#allocation93_spill] sm:$0xff] (%p431_p5), %v12526_v62  ;;  %v12538_v40 = vmov (%p431_p5), 0.0   ;;  %v12540_v32 = vmov (%p431_p5), 0.0  }
 0x6c8   : >> { %v4334_v11 = vpop.permute.xlu1 %4333  ;;  %v4404_v31 = vsel %vm14987_vm9, %v4384_v2, %v4386_v47  ;;  %v4433_v13 = vmax.f32 %v4423_v14, 0.0 }
 0x6c9   : >> { %v4442_v6 = vpack.c.bf16 %v4437_v15, %v4432_v36  ;;  %v4424_v41 = vadd.f32 %v4404_v31, %v4358_v46  ;;  %v12480_v36 = vld [vmem:[%s14953_s1 + $0x8] sm:$0xff] (%p431_p5)  ;;  %v12485_v15 = vld [vmem:[%s14953_s1 + $0x10] sm:$0xff] (%p431_p5)  ;;  %v12536_v31 = vmov (%p431_p5), 0.0   ;;  %v12544_v46 = vmov (%p431_p5), -inf  }
 0x6ca   : > { %15233 = vst [vmem:[#allocation85_spill] sm:$0xff] (%p431_p5), %v12480_v36  ;;  %15234 = vst [vmem:[#allocation86_spill] sm:$0xff] (%p431_p5), %v12485_v15 }
 0x6cb   : >> { %v12431_v3 = vmax.bf16 %v15213_v3, %v4442_v6   ;;  %v4398_v18 = vpop.permute.xlu0 %4397  ;;  %v4434_v21 = vmax.f32 %v4424_v41, 0.0  ;;  %v12532_v6 = vmov (%p431_p5), 0.0  }
 0x6cc   : >> { %v4396_v39 = vpop.permute.xlu1 %4395 }
 0x6cd   : >> { %15214 = vst [vmem:[#allocation80_spill] sm:$0xff] %v12431_v3  ;;  %v4408_v0 = vsel %vm14987_vm9, %v4394_v16, %v4396_v39  ;;  %v4409_v58 = vsel %vm14987_vm9, %v4396_v39, %v4398_v18  ;;  %v4344_v16 = vsel %vm1745_vm8, %v12394_v12, %v4334_v11  ;;  %v15229_v7 = vmov %v12431_v3  ;;  %v12518_v11 = vld [vmem:[%s14953_s1 + $0x40] sm:$0xff] (%p431_p5) }
 0x6ce   : >> { %v4428_v48 = vadd.f32 %v4408_v0, %v4362_v35  ;;  %v4429_v63 = vadd.f32 %v4409_v58, %v4363_v25  ;;  %v4364_v56 = vadd.f32 %v4344_v16, %v4298_v27  ;;  %v15230_v3 = vmov %v15229_v7  ;;  %15240 = vst [vmem:[#allocation92_spill] sm:$0xff] (%p431_p5), %v12518_v11 }
 0x6d0   : >> { %v4438_v26 = vmax.f32 %v4428_v48, 0.0  ;;  %v4439_v57 = vmax.f32 %v4429_v63, 0.0  ;;  %v4388_v42 = vpop.permute.xlu1 %4387 }
 0x6d1   : >> { %v4405_v54 = vsel %vm14987_vm9, %v4386_v47, %v4388_v42  ;;  %v12490_v47 = vld [vmem:[%s14953_s1 + $0x18] sm:$0xff] (%p431_p5) }
 0x6d2   : >> { %v4443_v5 = vpack.c.bf16 %v4438_v26, %v4433_v13  ;;  %v4444_v2 = vpack.c.bf16 %v4439_v57, %v4434_v21  ;;  %v4425_v37 = vadd.f32 %v4405_v54, %v4359_v10  ;;  %15235 = vst [vmem:[#allocation87_spill] sm:$0xff] (%p431_p5), %v12490_v47 }
 0x6d4   : >> { %v12445_v44 = vmax.bf16 %v15216_v53, %v4443_v5   ;;  %v12448_v1 = vmax.bf16 %v15218_v17, %v4444_v2   ;;  %v4400_v52 = vpop.permute.xlu1 %4399  ;;  %v4435_v34 = vmax.f32 %v4425_v37, 0.0 }
 0x6d5   : >> { %v4410_v43 = vsel %vm14987_vm9, %v4398_v18, %v4400_v52 }
 0x6d6   : >> { %15217 = vst [vmem:[#allocation81_spill] sm:$0xff] %v12445_v44  ;;  %15219 = vst [vmem:[#allocation82_spill] sm:$0xff] %v12448_v1  ;;  %v4430_v51 = vadd.f32 %v4410_v43, %v4364_v56  ;;  %v15226_v55 = vmov %v12448_v1  ;;  %v15228_v2 = vmov %v12445_v44 }
 0x6d7   : >> { %v15227_v1 = vmov %v15226_v55 }
 0x6d8   : >> { %v4440_v12 = vmax.f32 %v4430_v51, 0.0  ;;  %v12542_v1 = vmov (%p431_p5), 0.0  }
 0x6d9   : > { %433 = sbr.rel (!%p431_p5) target bundleno = 21 (0x15), region = 142 }
 0x6da   : >> { %v4445_v59 = vpack.c.bf16 %v4440_v12, %v4435_v34 }
 0x6dc   : >> { %v12452_v0 = vmax.bf16 %v15221_v45, %v4445_v59  }
 0x6de   : >> { %15222 = vst [vmem:[#allocation83_spill] sm:$0xff] %v12452_v0  ;;  %v15224_v23 = vmov %v12452_v0 }
 0x6df   : >> { %v15225_v0 = vmov %v15224_v23 }
 0x6e0 LB: >> { %15242 = vst [vmem:[#allocation94_spill] sm:$0xff] %v9863_v6  ;;  %15243 = vst [vmem:[#allocation95_spill] sm:$0xff] %v9867_v50  ;;  %v15249_v7 = vld [vmem:[#allocation80_spill] sm:$0xff]  ;;  %v12576_v8 = vld [vmem:[%s14960_s8] sm:$0xff]   ;;  %v14991_v4 = vmov 0   ;;  %s9073_s23 = sshll.u32 %s9891_s28, 5  ;;  %s9891_s28 = sphi %s12546_s28, %s4476_s28   ;;  %v9887_v46 = vphi %v12544_v46, %v15383_v46   ;;  %v9883_v1 = vphi %v12542_v1, %v15382_v1   ;;  %v9879_v32 = vphi %v12540_v32, %v15381_v32   ;;  %v9875_v40 = vphi %v12538_v40, %v15380_v40   ;;  %v9871_v31 = vphi %v12536_v31, %v15379_v31   ;;  %v9867_v50 = vphi %v12534_v50, %v15378_v50   ;;  %v9863_v6 = vphi %v12532_v6, %v15377_v6  }
 0x6e1   : >> { %15244 = vst [vmem:[#allocation96_spill] sm:$0xff] %v9871_v31  ;;  %15245 = vst [vmem:[#allocation97_spill] sm:$0xff] %v9875_v40  ;;  %4640 = vmatprep.subr.bf16.mxu0 %v15249_v7  ;;  %v15250_v55 = vld [vmem:[#allocation82_spill] sm:$0xff]  ;;  %v15251_v9 = vld [vmem:[#allocation79_spill] sm:$0xff]  ;;  %4672 = vmatprep.mubr.bf16.mxu0 %v14991_v4  ;;  %s4490_s15 = scalar_lea.vmem %s10000_s26, %s9073_s23  ;;  %v14989_v18 = vmov 0.0   ;;  %s9913_s18 = smov 25  }
 0x6e2   : >> { %15246 = vst [vmem:[#allocation98_spill] sm:$0xff] %v9879_v32  ;;  %15247 = vst [vmem:[#allocation99_spill] sm:$0xff] %v9883_v1  ;;  %4763 = vmatprep.subr.bf16.mxu1 %v15250_v55  ;;  %4641 = vmatpush1.bf16.msra.mxu0 %v15251_v9  ;;  %v15252_v44 = vld [vmem:[#allocation81_spill] sm:$0xff]  ;;  %v9638_v28 = vld [vmem:[%s4490_s15 + $0x4] ss:$0 sps:$4 sm:$0xff]   ;;  %vm9914_vm9 = vmmov 0  }
 0x6e3   : >> { %15248 = vst [vmem:[#allocation100_spill] sm:$0xff] %v9887_v46  ;;  %4764 = vmatpush1.bf16.msra.mxu1 %v15252_v44  ;;  %4795 = vmatprep.mubr.bf16.mxu1 %v14991_v4  ;;  %v4492_v3 = vld [vmem:[%s4490_s15 + $0x8] sm:$0xff]  ;;  %v4493_v25 = vld [vmem:[%s4490_s15 + $0x10] sm:$0xff]  ;;  %v9646_v29 = vld [vmem:[%s4490_s15 + $0x18] ss:$0 sps:$4 sm:$0xff]   ;;  %vm4523_vm1 = vcmask 203776   ;;  %s14342_s15 = scalar_lea.vmem %s10005_s29, %s9073_s23 }
 0x6e4   : >> { %9635 = vset.pattern.permute.xlu0 %v14991_v4  ;;  %9636 = vset.pattern.permute.xlu1 %v14991_v4  ;;  %v8893_v35 = vcombine.high %v4492_v3, %v4492_v3  ;;  %v8892_v14 = vcombine.low %v4492_v3, %v4492_v3  ;;  %v8894_v41 = vcombine.low %v4493_v25, %v4493_v25  ;;  %v9641_v39 = vld [vmem:[%s14960_s8 + $0x8] sm:$0xff]   ;;  %v9644_v0 = vld [vmem:[%s14960_s8 + $0x10] sm:$0xff]   ;;  %v9645_v58 = vld [vmem:[%s14960_s8 + $0x18] sm:$0xff]   ;;  %vm15254_vm0 = vcmask 1043456   ;;  %s9916_s19 = smov 126   ;;  %s9917_s20 = smov 96  }
 0x6e5   : >> { %8906 = vmatmul.mubr.msk.bf16.vlgmr.msra.gmra.mrb[0].mxu0 %vm2035_vm14, %v12576_v8  ;;  %9115 = vmatprep.subr.bf16.mxu0 %v14989_v18  ;;  %v15253_v23 = vld [vmem:[#allocation83_spill] sm:$0xff]  ;;  %v8895_v30 = vcombine.high %v4493_v25, %v4493_v25  ;;  %v9648_v63 = vld [vmem:[%s14960_s8 + $0x28] sm:$0xff]   ;;  %v9649_v60 = vld [vmem:[%s14960_s8 + $0x30] sm:$0xff]   ;;  %vm15255_vm12 = vcmask 64512   ;;  %s9918_s21 = smov 95   ;;  %s9919_s22 = smov 94  }
 0x6e6   : >> { %4682 = vmatprep.mubr.bf16.mxu0 %v14991_v4  ;;  %8915 = vmatmul.mubr.msk.bf16.vlgmr.msra.gmra.mrb[0].mxu1 %vm2035_vm14, %v12576_v8  ;;  %v9647_v48 = vld [vmem:[%s14960_s8 + $0x20] sm:$0xff]   ;;  %v9650_v49 = vld [vmem:[%s14960_s8 + $0x38] sm:$0xff]   ;;  %v4566_v13 = vld [vmem:[%s14962_s10 + $0x8] sm:$0xff]  ;;  %s9920_s25 = smov 64   ;;  %s9921_s27 = smov 63  }
 0x6e7   : >> { %4511 = vrot.lane.b32.xlu0 %v9638_v28, %s9913_s18  ;;  %4805 = vmatprep.mubr.bf16.mxu1 %v14991_v4  ;;  %v9651_v33 = vld [vmem:[%s14960_s8 + $0x40] sm:$0xff]   ;;  %v9653_v17 = vld [vmem:[%s14959_s7 + $0x8] sm:$0xff]   ;;  %vm15256_vm11 = vmmov %vm15255_vm12  ;;  %s9922_s12 = smov 62   ;;  %s9923_s23 = smov 87  }
 0x6e8   : >> { %4515 = vrot.lane.b32.xlu1 %v8893_v35, %s9913_s18  ;;  %9116 = vmatpush3.bf16.msra.mxu0 %v15253_v23  ;;  %v4565_v24 = vld [vmem:[%s14962_s10] sm:$0xff]  ;;  %v9654_v43 = vld [vmem:[%s14959_s7 + $0x10] sm:$0xff]   ;;  %vm15258_vm15 = vmmov %vm15256_vm11  ;;  %s4476_s28 = sadd.s32 1, %s9891_s28  }
 0x6e9   : >> { %v9652_v53 = vld [vmem:[%s14959_s7] sm:$0xff]   ;;  %v9655_v34 = vld [vmem:[%s14959_s7 + $0x18] sm:$0xff]   ;;  %v9657_v59 = vld [vmem:[%s14959_s7 + $0x28] sm:$0xff]   ;;  %p4473_p6 = scmp.ge.s32.totalorder %s4476_s28, 2  }
 0x6ea   : >> { %v9656_v12 = vld [vmem:[%s14959_s7 + $0x20] sm:$0xff]   ;;  %v9658_v45 = vld [vmem:[%s14959_s7 + $0x30] sm:$0xff]  }
 0x6eb   : >> { %4513 = vrot.lane.b32.xlu0 %v8892_v14, %s9913_s18  ;;  %v9660_v28 = vld [vmem:[%s14959_s7 + $0x40] sm:$0xff]  }
 0x6ec   : >> { %4517 = vrot.lane.b32.xlu1 %v8894_v41, %s9913_s18 }
 0x6ed   : >> { %8907 = vmatmul.mubr.msk.bf16.gmra.mrb[4].mxu0 %vm2035_vm14, %v9641_v39 }
 0x6ee   : >> { %4692 = vmatprep.mubr.bf16.mxu0 %v14991_v4  ;;  %8916 = vmatmul.mubr.msk.bf16.gmra.mrb[4].mxu1 %vm2035_vm14, %v9641_v39 }
 0x6ef   : >> { %4519 = vrot.lane.b32.xlu0 %v8895_v30, %s9913_s18  ;;  %4815 = vmatprep.mubr.bf16.mxu1 %v14991_v4 }
 0x6f0   : >> { %4521 = vrot.lane.b32.xlu1 %v9646_v29, %s9913_s18  ;;  %s9915_s18 = smov 127  }
 0x6f3   : >> { %5433 = vperm.xlu0 %9635, %v4565_v24  }
 0x6f4   : >> { %5438 = vperm.xlu1 %9636, %v4566_v13  }
 0x6f5   : >> { %8908 = vmatmul.mubr.msk.bf16.gmra.mrb[8].mxu0 %vm2035_vm14, %v9644_v0 }
 0x6f6   : >> { %4702 = vmatprep.mubr.bf16.mxu0 %v14991_v4  ;;  %8917 = vmatmul.mubr.msk.bf16.gmra.mrb[8].mxu1 %vm2035_vm14, %v9644_v0 }
 0x6f7   : >> { %4825 = vmatprep.mubr.bf16.mxu1 %v14991_v4 }
 0x6fd   : >> { %8909 = vmatmul.mubr.msk.bf16.gmra.mrb[12].mxu0 %vm2035_vm14, %v9645_v58 }
 0x6fe   : >> { %4712 = vmatprep.mubr.bf16.mxu0 %v14991_v4  ;;  %8918 = vmatmul.mubr.msk.bf16.gmra.mrb[12].mxu1 %vm2035_vm14, %v9645_v58 }
 0x6ff   : >> { %4835 = vmatprep.mubr.bf16.mxu1 %v14991_v4 }
 0x705   : >> { %8910 = vmatmul.mubr.msk.bf16.gmra.mrb[16].mxu0 %vm2035_vm14, %v9647_v48 }
 0x706   : >> { %4722 = vmatprep.mubr.bf16.mxu0 %v14991_v4  ;;  %8919 = vmatmul.mubr.msk.bf16.gmra.mrb[16].mxu1 %vm2035_vm14, %v9647_v48 }
 0x707   : >> { %4845 = vmatprep.mubr.bf16.mxu1 %v14991_v4 }
 0x70d   : >> { %8911 = vmatmul.mubr.msk.bf16.gmra.mrb[20].mxu0 %vm2035_vm14, %v9648_v63 }
 0x70e   : >> { %4732 = vmatprep.mubr.bf16.mxu0 %v14991_v4  ;;  %8920 = vmatmul.mubr.msk.bf16.gmra.mrb[20].mxu1 %vm2035_vm14, %v9648_v63 }
 0x70f   : >> { %4855 = vmatprep.mubr.bf16.mxu1 %v14991_v4 }
 0x715   : >> { %8912 = vmatmul.mubr.msk.bf16.gmra.mrb[24].mxu0 %vm2035_vm14, %v9649_v60 }
 0x716   : >> { %4742 = vmatprep.mubr.bf16.mxu0 %v14991_v4  ;;  %8921 = vmatmul.mubr.msk.bf16.gmra.mrb[24].mxu1 %vm2035_vm14, %v9649_v60 }
 0x717   : >> { %4865 = vmatprep.mubr.bf16.mxu1 %v14991_v4 }
 0x71d   : >> { %8913 = vmatmul.mubr.msk.bf16.gmra.mrb[28].mxu0 %vm2035_vm14, %v9650_v49 }
 0x71e   : >> { %4752 = vmatprep.mubr.bf16.mxu0 %v14991_v4  ;;  %8922 = vmatmul.mubr.msk.bf16.gmra.mrb[28].mxu1 %vm2035_vm14, %v9650_v49 }
 0x71f   : >> { %4875 = vmatprep.mubr.bf16.mxu1 %v14991_v4 }
 0x725   : >> { %8914 = vmatmul.mubr.msk.bf16.gmra.mrb[32].mxu0 %vm2035_vm14, %v9651_v33 }
 0x726   : >> { %9117 = vmatprep.mubr.msk.bf16.mxu0 %vm9914_vm9, %v14989_v18  ;;  %8923 = vmatmul.mubr.msk.bf16.gmra.mrb[32].mxu1 %vm2035_vm14, %v9651_v33 }
 0x727   : >> { %5235 = vmatprep.mubr.bf16.mxu1 %v14991_v4 }
 0x72d   : >> { %9118 = vmatmul.mubr.msk.bf16.vlgmr.msra.gmra.mrb[36].mxu0 %vm2035_vm14, %v12576_v8  ;;  %v9659_v8 = vld [vmem:[%s14959_s7 + $0x38] sm:$0xff]  }
 0x72e   : >> { %9121 = vmatprep.mubr.msk.bf16.mxu0 %vm9914_vm9, %v14989_v18 }
 0x735   : >> { %9122 = vmatmul.mubr.msk.bf16.gmra.mrb[40].mxu0 %vm2035_vm14, %v9641_v39 }
 0x736   : >> { %9125 = vmatprep.mubr.msk.bf16.mxu0 %vm9914_vm9, %v14989_v18 }
 0x73d   : >> { %9126 = vmatmul.mubr.msk.bf16.gmra.mrb[44].mxu0 %vm2035_vm14, %v9644_v0 }
 0x73e   : >> { %9129 = vmatprep.mubr.msk.bf16.mxu0 %vm9914_vm9, %v14989_v18 }
 0x745   : >> { %9130 = vmatmul.mubr.msk.bf16.gmra.mrb[48].mxu0 %vm2035_vm14, %v9645_v58 }
 0x746   : >> { %9133 = vmatprep.mubr.msk.bf16.mxu0 %vm9914_vm9, %v14989_v18 }
 0x74d   : >> { %9134 = vmatmul.mubr.msk.bf16.gmra.mrb[52].mxu0 %vm2035_vm14, %v9647_v48 }
 0x74e   : >> { %9137 = vmatprep.mubr.msk.bf16.mxu0 %vm9914_vm9, %v14989_v18 }
 0x755   : >> { %9138 = vmatmul.mubr.msk.bf16.gmra.mrb[56].mxu0 %vm2035_vm14, %v9648_v63 }
 0x756   : >> { %9141 = vmatprep.mubr.msk.bf16.mxu0 %vm9914_vm9, %v14989_v18 }
 0x759   : >> { %v4512_v21 = vpop.permute.xlu0 %4511 }
 0x75a   : >> { %v4516_v26 = vpop.permute.xlu1 %4515 }
 0x75d   : >> { %9142 = vmatmul.mubr.msk.bf16.gmra.mrb[60].mxu0 %vm2035_vm14, %v9649_v60  ;;  %v4514_v57 = vpop.permute.xlu0 %4513 }
 0x75e   : >> { %v4524_v42 = vsel %vm4523_vm1, %v4512_v21, %v4514_v57  ;;  %v4518_v16 = vpop.permute.xlu1 %4517  ;;  %9145 = vmatprep.mubr.msk.bf16.mxu0 %vm9914_vm9, %v14989_v18  ;;  %v4525_v54 = vsel %vm4523_vm1, %v4514_v57, %v4516_v26 }
 0x75f   : >> { %v4526_v27 = vsel %vm4523_vm1, %v4516_v26, %v4518_v16  ;;  %8942 = vmatprep.subr.msk.bf16.mxu0 %vm15254_vm0, %v4525_v54  ;;  %v5066_v10 = vsel %vm15254_vm0, %v4524_v42, 0 }
 0x760   : >> { %5081 = vmatpush1.bf16.msra.mxu0 %v5066_v10  ;;  %v5072_v2 = vsel %vm15254_vm0, %v4526_v27, 0 }
 0x761   : >> { %v4520_v5 = vpop.permute.xlu0 %4519  ;;  %9153 = vmatprep.subr.bf16.mxu0 %v14989_v18 }
 0x762   : >> { %v4527_v56 = vsel %vm4523_vm1, %v4518_v16, %v4520_v5  ;;  %v4522_v37 = vpop.permute.xlu1 %4521 }
 0x763   : >> { %8952 = vmatprep.subr.msk.bf16.mxu1 %vm15254_vm0, %v4527_v56  ;;  %v4528_v52 = vsel %vm4523_vm1, %v4520_v5, %v4522_v37  ;;  %vm15259_vm1 = vmmov %vm15256_vm11 }
 0x764   : >> { %5204 = vmatpush1.bf16.msra.mxu1 %v5072_v2  ;;  %v5078_v51 = vsel %vm15254_vm0, %v4528_v52, 0  ;;  %vm15269_vm0 = vmmov %vm15259_vm1 }
 0x765   : >> { %9146 = vmatmul.mubr.msk.bf16.gmra.mrb[64].mxu0 %vm2035_vm14, %v9650_v49 }
 0x766   : >> { %9149 = vmatprep.mubr.msk.bf16.mxu0 %vm9914_vm9, %v14989_v18 }
 0x767   : >> { %8953 = vmatmul.mubr.msk.bf16.vlgmr.msra.gmra.mrb[0].mxu1 %vm15255_vm12, %v9652_v53  ;;  %vm15257_vm12 = vmmov %vm15256_vm11 }
 0x768   : >> { %5245 = vmatprep.mubr.bf16.mxu1 %v14991_v4 }
 0x76d   : >> { %9150 = vmatmul.mubr.msk.bf16.gmra.mrb[68].mxu0 %vm2035_vm14, %v9651_v33 }
 0x76e   : >> { %5112 = vmatprep.mubr.bf16.mxu0 %v14991_v4 }
 0x76f   : >> { %8954 = vmatmul.mubr.msk.bf16.gmra.mrb[4].mxu1 %vm15256_vm11, %v9653_v17  ;;  %vm15260_vm11 = vmmov %vm15259_vm1 }
 0x770   : >> { %5255 = vmatprep.mubr.bf16.mxu1 %v14991_v4 }
 0x775   : >> { %8943 = vmatmul.mubr.msk.bf16.vlgmr.msra.gmra.mrb[0].mxu0 %vm15257_vm12, %v9652_v53  ;;  %vm15262_vm12 = vmmov %vm15259_vm1 }
 0x776   : >> { %9154 = vmatpush3.bf16.msra.mxu0 %v5078_v51  ;;  %5122 = vmatprep.mubr.bf16.mxu0 %v14991_v4 }
 0x777   : >> { %8955 = vmatmul.mubr.msk.bf16.gmra.mrb[8].mxu1 %vm15258_vm15, %v9654_v43  ;;  %9191 = vmatprep.subr.bf16.mxu0 %v14989_v18  ;;  %vm15261_vm15 = vmmov %vm15259_vm1 }
 0x778   : >> { %5265 = vmatprep.mubr.bf16.mxu1 %v14991_v4 }
 0x77d   : >> { %8944 = vmatmul.mubr.msk.bf16.gmra.mrb[4].mxu0 %vm15259_vm1, %v9653_v17 }
 0x77e   : >> { %5132 = vmatprep.mubr.bf16.mxu0 %v14991_v4 }
 0x77f   : >> { %8956 = vmatmul.mubr.msk.bf16.gmra.mrb[12].mxu1 %vm15260_vm11, %v9655_v34  ;;  %vm15263_vm11 = vmmov %vm15259_vm1 }
 0x780   : >> { %5275 = vmatprep.mubr.bf16.mxu1 %v14991_v4 }
 0x785   : >> { %8945 = vmatmul.mubr.msk.bf16.gmra.mrb[8].mxu0 %vm15261_vm15, %v9654_v43  ;;  %vm15264_vm15 = vmmov %vm15259_vm1 }
 0x786   : >> { %5142 = vmatprep.mubr.bf16.mxu0 %v14991_v4 }
 0x787   : >> { %8957 = vmatmul.mubr.msk.bf16.gmra.mrb[16].mxu1 %vm15262_vm12, %v9656_v12  ;;  %vm15265_vm12 = vmmov %vm15259_vm1 }
 0x788   : >> { %5285 = vmatprep.mubr.bf16.mxu1 %v14991_v4 }
 0x78d   : >> { %8946 = vmatmul.mubr.msk.bf16.gmra.mrb[12].mxu0 %vm15259_vm1, %v9655_v34 }
 0x78e   : >> { %5152 = vmatprep.mubr.bf16.mxu0 %v14991_v4 }
 0x78f   : >> { %8958 = vmatmul.mubr.msk.bf16.gmra.mrb[20].mxu1 %vm15263_vm11, %v9657_v59  ;;  %vm15266_vm11 = vmmov %vm15259_vm1 }
 0x790   : >> { %5295 = vmatprep.mubr.bf16.mxu1 %v14991_v4 }
 0x795   : >> { %8947 = vmatmul.mubr.msk.bf16.gmra.mrb[16].mxu0 %vm15264_vm15, %v9656_v12  ;;  %vm15267_vm15 = vmmov %vm15259_vm1 }
 0x796   : >> { %5162 = vmatprep.mubr.bf16.mxu0 %v14991_v4 }
 0x797   : >> { %8959 = vmatmul.mubr.msk.bf16.gmra.mrb[24].mxu1 %vm15265_vm12, %v9658_v45  ;;  %vm15268_vm12 = vmmov %vm15259_vm1 }
 0x798   : >> { %5305 = vmatprep.mubr.bf16.mxu1 %v14991_v4 }
 0x79d   : >> { %8948 = vmatmul.mubr.msk.bf16.gmra.mrb[20].mxu0 %vm15259_vm1, %v9657_v59  ;;  %vm15270_vm1 = vmmov %vm15269_vm0 }
 0x79e   : >> { %5172 = vmatprep.mubr.bf16.mxu0 %v14991_v4 }
 0x79f   : >> { %8960 = vmatmul.mubr.msk.bf16.gmra.mrb[28].mxu1 %vm15266_vm11, %v9659_v8  ;;  %vm15271_vm11 = vmmov %vm15269_vm0 }
 0x7a0   : >> { %5315 = vmatprep.mubr.bf16.mxu1 %v14991_v4 }
 0x7a5   : >> { %8949 = vmatmul.mubr.msk.bf16.gmra.mrb[24].mxu0 %vm15267_vm15, %v9658_v45  ;;  %vm15272_vm15 = vmmov %vm15269_vm0 }
 0x7a6   : >> { %5182 = vmatprep.mubr.bf16.mxu0 %v14991_v4 }
 0x7a7   : >> { %8961 = vmatmul.mubr.msk.bf16.gmra.mrb[32].mxu1 %vm15268_vm12, %v9660_v28  ;;  %vm15273_vm12 = vmmov %vm15269_vm0 }
 0x7a8   : >> { %6115 = vmatprep.mubr.bf16.mxu1 %v14991_v4 }
 0x7ad   : >> { %8950 = vmatmul.mubr.msk.bf16.gmra.mrb[28].mxu0 %vm15269_vm0, %v9659_v8 }
 0x7ae   : >> { %5192 = vmatprep.mubr.bf16.mxu0 %v14991_v4 }
 0x7b5   : >> { %8951 = vmatmul.mubr.msk.bf16.gmra.mrb[32].mxu0 %vm15270_vm1, %v9660_v28  ;;  %vm15274_vm1 = vmmov %vm15269_vm0 }
 0x7b6   : >> { %9155 = vmatprep.mubr.msk.bf16.mxu0 %vm9914_vm9, %v14989_v18 }
 0x7bd   : >> { %9156 = vmatmul.mubr.msk.bf16.vlgmr.msra.gmra.mrb[72].mxu0 %vm15271_vm11, %v9652_v53  ;;  %vm15275_vm11 = vmmov %vm15269_vm0 }
 0x7be   : >> { %9159 = vmatprep.mubr.msk.bf16.mxu0 %vm9914_vm9, %v14989_v18 }
 0x7c5   : >> { %9160 = vmatmul.mubr.msk.bf16.gmra.mrb[40].mxu0 %vm15272_vm15, %v9653_v17  ;;  %vm15276_vm15 = vmmov %vm15269_vm0 }
 0x7c6   : >> { %9163 = vmatprep.mubr.msk.bf16.mxu0 %vm9914_vm9, %v14989_v18 }
 0x7cd   : >> { %9164 = vmatmul.mubr.msk.bf16.gmra.mrb[44].mxu0 %vm15273_vm12, %v9654_v43  ;;  %vm15277_vm12 = vmmov %vm15269_vm0 }
 0x7ce   : >> { %9167 = vmatprep.mubr.msk.bf16.mxu0 %vm9914_vm9, %v14989_v18 }
 0x7d5   : >> { %9168 = vmatmul.mubr.msk.bf16.gmra.mrb[48].mxu0 %vm15269_vm0, %v9655_v34 }
 0x7d6   : >> { %9171 = vmatprep.mubr.msk.bf16.mxu0 %vm9914_vm9, %v14989_v18 }
 0x7dd   : >> { %9172 = vmatmul.mubr.msk.bf16.gmra.mrb[52].mxu0 %vm15274_vm1, %v9656_v12  ;;  %vm15284_vm1 = vcmask 506880  }
 0x7de   : >> { %9175 = vmatprep.mubr.msk.bf16.mxu0 %vm9914_vm9, %v14989_v18 }
 0x7e5   : >> { %9176 = vmatmul.mubr.msk.bf16.gmra.mrb[56].mxu0 %vm15275_vm11, %v9657_v59  ;;  %vm15285_vm11 = vmmov %vm15284_vm1 }
 0x7e6   : >> { %9179 = vmatprep.mubr.msk.bf16.mxu0 %vm9914_vm9, %v14989_v18 }
 0x7ed   : >> { %9180 = vmatmul.mubr.msk.bf16.gmra.mrb[60].mxu0 %vm15276_vm15, %v9658_v45  ;;  %vm15286_vm15 = vmmov %vm15284_vm1 }
 0x7ee   : >> { %9183 = vmatprep.mubr.msk.bf16.mxu0 %vm9914_vm9, %v14989_v18 }
 0x7f5   : >> { %9184 = vmatmul.mubr.msk.bf16.gmra.mrb[64].mxu0 %vm15277_vm12, %v9659_v8 }
 0x7f6   : >> { %9187 = vmatprep.mubr.msk.bf16.mxu0 %vm9914_vm9, %v14989_v18 }
 0x7fd   : >> { %9188 = vmatmul.mubr.msk.bf16.gmra.mrb[68].mxu0 %vm15269_vm0, %v9660_v28  ;;  %vm15287_vm0 = vmmov %vm15284_vm1 }
 0x7fe   : >> { %9193 = vmatprep.mubr.msk.bf16.mxu0 %vm9914_vm9, %v14989_v18 }
 0x800   : >> { %v12790_v3 = vpop.f32.mrb[36].mxu0 }
 0x801   : >> { %v9119_v35 = vpop.f32.mrb[37].mxu0 }
 0x802   : >> { %v12792_v25 = vpop.f32.mrb[38].mxu0 }
 0x803   : >> { %v9120_v14 = vpop.f32.mrb[39].mxu0 }
 0x83a   : >> { %v12794_v41 = vpop.f32.mrb[0].mxu1 }
 0x83b   : >> { %v12796_v39 = vpop.f32.mrb[1].mxu1 }
 0x83c   : >> { %v12798_v30 = vpop.f32.mrb[2].mxu1 }
 0x83d   : >> { %v12800_v29 = vpop.f32.mrb[3].mxu1 }
 0x842   : >> { %v5247_v0 = vpop.f32.mrb[4].mxu1 }
 0x843   : >> { %5465 = vrot.lane.b32.xlu0 %v5247_v0, %s9915_s18  ;;  %v12803_v58 = vpop.f32.mrb[5].mxu1 }
 0x844   : >> { %v5251_v48 = vpop.f32.mrb[6].mxu1 }
 0x845   : >> { %v12805_v63 = vpop.f32.mrb[7].mxu1 }
 0x847   : >> { %5475 = vrot.lane.b32.xlu0 %v5251_v48, %s9915_s18 }
 0x848   : >> { %v12808_v60 = vpop.f32.mrb[0].mxu0 }
 0x849   : >> { %v12810_v49 = vpop.f32.mrb[1].mxu0 }
 0x84a   : >> { %v12812_v33 = vpop.f32.mrb[2].mxu0  ;;  %v5257_v24 = vpop.f32.mrb[8].mxu1 }
 0x84b   : >> { %v12814_v13 = vpop.f32.mrb[3].mxu0  ;;  %5528 = vrot.lane.b32.xlu0 %v5257_v24, %s9916_s19  ;;  %v12817_v21 = vpop.f32.mrb[9].mxu1 }
 0x84c   : >> { %v5261_v26 = vpop.f32.mrb[10].mxu1 }
 0x84d   : >> { %v12819_v57 = vpop.f32.mrb[11].mxu1 }
 0x84f   : >> { %5538 = vrot.lane.b32.xlu0 %v5261_v26, %s9916_s19 }
 0x850   : >> { %v5124_v42 = vpop.f32.mrb[4].mxu0 }
 0x851   : >> { %5461 = vrot.lane.b32.xlu1 %v5124_v42, %s9915_s18  ;;  %v5126_v16 = vpop.f32.mrb[5].mxu0 }
 0x852   : >> { %v5128_v54 = vpop.f32.mrb[6].mxu0  ;;  %v5267_v27 = vpop.f32.mrb[12].mxu1 }
 0x853   : >> { %v5130_v10 = vpop.f32.mrb[7].mxu0  ;;  %5591 = vrot.lane.b32.xlu0 %v5267_v27, %s9917_s20  ;;  %v12824_v5 = vpop.f32.mrb[13].mxu1 }
 0x854   : >> { %v5271_v2 = vpop.f32.mrb[14].mxu1 }
 0x855   : >> { %5463 = vrot.lane.b32.xlu1 %v5126_v16, %s9915_s18  ;;  %v12827_v56 = vpop.f32.mrb[15].mxu1 }
 0x857   : >> { %5601 = vrot.lane.b32.xlu0 %v5271_v2, %s9917_s20 }
 0x858   : >> { %v5134_v53 = vpop.f32.mrb[8].mxu0 }
 0x859   : >> { %5473 = vrot.lane.b32.xlu1 %v5130_v10, %s9915_s18  ;;  %v5136_v17 = vpop.f32.mrb[9].mxu0 }
 0x85a   : >> { %v5138_v37 = vpop.f32.mrb[10].mxu0  ;;  %v5277_v52 = vpop.f32.mrb[16].mxu1 }
 0x85b   : >> { %v5140_v43 = vpop.f32.mrb[11].mxu0  ;;  %5471 = vrot.lane.b32.xlu0 %v5128_v54, %s9915_s18  ;;  %v12832_v51 = vpop.f32.mrb[17].mxu1 }
 0x85c   : >> { %v5281_v34 = vpop.f32.mrb[18].mxu1 }
 0x85d   : >> { %5524 = vrot.lane.b32.xlu1 %v5134_v53, %s9916_s19  ;;  %v12835_v12 = vpop.f32.mrb[19].mxu1 }
 0x85f   : >> { %5654 = vrot.lane.b32.xlu0 %v5277_v52, %s9918_s21 }
 0x860   : >> { %v5144_v59 = vpop.f32.mrb[12].mxu0 }
 0x861   : >> { %5526 = vrot.lane.b32.xlu1 %v5136_v17, %s9916_s19  ;;  %v5146_v45 = vpop.f32.mrb[13].mxu0 }
 0x862   : >> { %v5148_v8 = vpop.f32.mrb[14].mxu0  ;;  %v5287_v28 = vpop.f32.mrb[20].mxu1 }
 0x863   : >> { %v5150_v35 = vpop.f32.mrb[15].mxu0  ;;  %5664 = vrot.lane.b32.xlu0 %v5281_v34, %s9918_s21  ;;  %v12840_v14 = vpop.f32.mrb[21].mxu1 }
 0x864   : >> { %v5291_v0 = vpop.f32.mrb[22].mxu1 }
 0x865   : >> { %5536 = vrot.lane.b32.xlu1 %v5140_v43, %s9916_s19  ;;  %v12843_v48 = vpop.f32.mrb[23].mxu1 }
 0x867   : >> { %5534 = vrot.lane.b32.xlu0 %v5138_v37, %s9916_s19 }
 0x868   : >> { %v5154_v24 = vpop.f32.mrb[16].mxu0 }
 0x869   : >> { %5587 = vrot.lane.b32.xlu1 %v5144_v59, %s9917_s20  ;;  %v5156_v26 = vpop.f32.mrb[17].mxu0 }
 0x86a   : >> { %v5158_v42 = vpop.f32.mrb[18].mxu0  ;;  %v5297_v16 = vpop.f32.mrb[24].mxu1 }
 0x86b   : >> { %v5160_v54 = vpop.f32.mrb[19].mxu0  ;;  %5717 = vrot.lane.b32.xlu0 %v5287_v28, %s9919_s22  ;;  %v12848_v27 = vpop.f32.mrb[25].mxu1 }
 0x86c   : >> { %v5301_v10 = vpop.f32.mrb[26].mxu1 }
 0x86d   : >> { %5589 = vrot.lane.b32.xlu1 %v5146_v45, %s9917_s20  ;;  %v12851_v2 = vpop.f32.mrb[27].mxu1 }
 0x86f   : >> { %5727 = vrot.lane.b32.xlu0 %v5291_v0, %s9919_s22 }
 0x870   : >> { %v5164_v53 = vpop.f32.mrb[20].mxu0 }
 0x871   : >> { %5599 = vrot.lane.b32.xlu1 %v5150_v35, %s9917_s20  ;;  %v5166_v17 = vpop.f32.mrb[21].mxu0 }
 0x872   : >> { %v5168_v37 = vpop.f32.mrb[22].mxu0  ;;  %v5307_v52 = vpop.f32.mrb[28].mxu1 }
 0x873   : >> { %v5170_v43 = vpop.f32.mrb[23].mxu0  ;;  %5597 = vrot.lane.b32.xlu0 %v5148_v8, %s9917_s20  ;;  %v12856_v34 = vpop.f32.mrb[29].mxu1 }
 0x874   : >> { %v5311_v59 = vpop.f32.mrb[30].mxu1 }
 0x875   : >> { %5650 = vrot.lane.b32.xlu1 %v5154_v24, %s9918_s21  ;;  %v12859_v28 = vpop.f32.mrb[31].mxu1 }
 0x877   : >> { %5780 = vrot.lane.b32.xlu0 %v5297_v16, %s9920_s25 }
 0x878   : >> { %v5174_v45 = vpop.f32.mrb[24].mxu0 }
 0x879   : >> { %5652 = vrot.lane.b32.xlu1 %v5156_v26, %s9918_s21  ;;  %v5176_v35 = vpop.f32.mrb[25].mxu0 }
 0x87a   : >> { %v5178_v0 = vpop.f32.mrb[26].mxu0  ;;  %v5317_v18 = vpop.f32.mrb[32].mxu1 }
 0x87b   : >> { %v5180_v4 = vpop.f32.mrb[27].mxu0  ;;  %5790 = vrot.lane.b32.xlu0 %v5301_v10, %s9920_s25  ;;  %v12864_v8 = vpop.f32.mrb[33].mxu1 }
 0x87c   : >> { %v5321_v7 = vpop.f32.mrb[34].mxu1 }
 0x87d   : >> { %5662 = vrot.lane.b32.xlu1 %v5160_v54, %s9918_s21  ;;  %v12867_v24 = vpop.f32.mrb[35].mxu1 }
 0x87f   : >> { %5660 = vrot.lane.b32.xlu0 %v5158_v42, %s9918_s21 }
 0x880   : >> { %v5184_v9 = vpop.f32.mrb[28].mxu0 }
 0x881   : >> { %5713 = vrot.lane.b32.xlu1 %v5164_v53, %s9919_s22  ;;  %v5186_v16 = vpop.f32.mrb[29].mxu0 }
 0x882   : >> { %v5188_v26 = vpop.f32.mrb[30].mxu0 }
 0x883   : >> { %v5190_v23 = vpop.f32.mrb[31].mxu0  ;;  %5843 = vrot.lane.b32.xlu0 %v5307_v52, %s9921_s27 }
 0x885   : >> { %5715 = vrot.lane.b32.xlu1 %v5166_v17, %s9919_s22 }
 0x887   : >> { %5853 = vrot.lane.b32.xlu0 %v5311_v59, %s9921_s27 }
 0x888   : >> { %v5194_v10 = vpop.f32.mrb[32].mxu0 }
 0x889   : >> { %5725 = vrot.lane.b32.xlu1 %v5170_v43, %s9919_s22  ;;  %v5196_v54 = vpop.f32.mrb[33].mxu0 }
 0x88a   : >> { %v5198_v44 = vpop.f32.mrb[34].mxu0 }
 0x88b   : >> { %v5200_v55 = vpop.f32.mrb[35].mxu0  ;;  %5723 = vrot.lane.b32.xlu0 %v5168_v37, %s9919_s22 }
 0x88d   : >> { %5776 = vrot.lane.b32.xlu1 %v5174_v45, %s9920_s25 }
 0x88f   : >> { %5906 = vrot.lane.b32.xlu0 %v5317_v18, %s9922_s12 }
 0x890   : >> { %v5360_v42 = vpop.f32.mrb[72].mxu0 }
 0x891   : >> { %v12879_v53 = vadd.f32 %v5360_v42, %v12790_v3  ;;  %5778 = vrot.lane.b32.xlu1 %v5176_v35, %s9920_s25  ;;  %v9157_v17 = vpop.f32.mrb[73].mxu0 }
 0x892   : >> { %v5363_v52 = vpop.f32.mrb[74].mxu0 }
 0x893   : >> { %v12883_v43 = vadd.f32 %v5363_v52, %v12792_v25  ;;  %5916 = vrot.lane.b32.xlu0 %v5321_v7, %s9922_s12  ;;  %v9158_v59 = vpop.f32.mrb[75].mxu0 }
 0x895   : >> { %5788 = vrot.lane.b32.xlu1 %v5180_v4, %s9920_s25 }
 0x897   : >> { %5786 = vrot.lane.b32.xlu0 %v5178_v0, %s9920_s25 }
 0x898   : >> { %v5368_v37 = vpop.f32.mrb[40].mxu0 }
 0x899   : >> { %5839 = vrot.lane.b32.xlu1 %v5184_v9, %s9921_s27  ;;  %v9161_v18 = vpop.f32.mrb[41].mxu0 }
 0x89a   : >> { %v5371_v3 = vpop.f32.mrb[42].mxu0 }
 0x89b   : >> { %v9162_v45 = vpop.f32.mrb[43].mxu0  ;;  %5849 = vrot.lane.b32.xlu0 %v5188_v26, %s9921_s27 }
 0x89d   : >> { %5841 = vrot.lane.b32.xlu1 %v5186_v16, %s9921_s27 }
 0x89f   : >> { %5912 = vrot.lane.b32.xlu0 %v5198_v44, %s9922_s12 }
 0x8a0   : >> { %v5376_v25 = vpop.f32.mrb[44].mxu0 }
 0x8a1   : >> { %5851 = vrot.lane.b32.xlu1 %v5190_v23, %s9921_s27  ;;  %v9165_v7 = vpop.f32.mrb[45].mxu0  ;;  %v12900_v23 = vpop.permute.xlu0 %5433 }
 0x8a2   : >> { %v5379_v35 = vpop.f32.mrb[46].mxu0  ;;  %v5442_v1 = vadd.f32 %v12900_v23, %v12810_v49 }
 0x8a3   : >> { %v9166_v4 = vpop.f32.mrb[47].mxu0  ;;  %5469 = vrot.lane.b32.xlu0 %v5368_v37, %s9915_s18 }
 0x8a5   : >> { %5904 = vrot.lane.b32.xlu1 %v5196_v54, %s9922_s12 }
 0x8a7   : >> { %5479 = vrot.lane.b32.xlu0 %v5371_v3, %s9915_s18 }
 0x8a8   : >> { %v5384_v9 = vpop.f32.mrb[48].mxu0 }
 0x8a9   : >> { %5914 = vrot.lane.b32.xlu1 %v5200_v55, %s9922_s12  ;;  %v9169_v0 = vpop.f32.mrb[49].mxu0 }
 0x8aa   : >> { %v5387_v26 = vpop.f32.mrb[50].mxu0 }
 0x8ab   : >> { %v9170_v16 = vpop.f32.mrb[51].mxu0  ;;  %5532 = vrot.lane.b32.xlu0 %v5376_v25, %s9916_s19 }
 0x8ad   : >> { %5902 = vrot.lane.b32.xlu1 %v5194_v10, %s9922_s12 }
 0x8af   : >> { %5542 = vrot.lane.b32.xlu0 %v5379_v35, %s9916_s19 }
 0x8b0   : >> { %v5392_v44 = vpop.f32.mrb[52].mxu0 }
 0x8b1   : >> { %v9173_v42 = vpop.f32.mrb[53].mxu0  ;;  %5467 = vrot.lane.b32.xlu1 %v12803_v58, %s9915_s18 }
 0x8b2   : >> { %v5395_v54 = vpop.f32.mrb[54].mxu0 }
 0x8b3   : >> { %v9174_v17 = vpop.f32.mrb[55].mxu0  ;;  %5595 = vrot.lane.b32.xlu0 %v5384_v9, %s9917_s20 }
 0x8b5   : >> { %5477 = vrot.lane.b32.xlu1 %v12805_v63, %s9915_s18  ;;  %v12907_v55 = vpop.permute.xlu0 %5465  ;;  %v12919_v63 = vpop.permute.xlu1 %5438 }
 0x8b6   : >> { %v5446_v20 = vadd.f32 %v12919_v63, %v12812_v33 }
 0x8b7   : >> { %5605 = vrot.lane.b32.xlu0 %v5387_v26, %s9917_s20 }
 0x8b8   : >> { %v5400_v10 = vpop.f32.mrb[56].mxu0 }
 0x8b9   : >> { %v9177_v52 = vpop.f32.mrb[57].mxu0  ;;  %5530 = vrot.lane.b32.xlu1 %v12817_v21, %s9916_s19  ;;  %v12912_v59 = vpop.permute.xlu0 %5475 }
 0x8ba   : >> { %v5403_v37 = vpop.f32.mrb[58].mxu0 }
 0x8bb   : >> { %v9178_v58 = vpop.f32.mrb[59].mxu0  ;;  %5658 = vrot.lane.b32.xlu0 %v5392_v44, %s9918_s21 }
 0x8bd   : >> { %5540 = vrot.lane.b32.xlu1 %v12819_v57, %s9916_s19  ;;  %v12917_v18 = vpop.permute.xlu0 %5528 }
 0x8be   : >> { %15278 = vst [vmem:[#allocation101_spill] sm:$0xff] %v12917_v18 }
 0x8bf   : >> { %5668 = vrot.lane.b32.xlu0 %v5395_v54, %s9918_s21 }
 0x8c0   : >> { %v5408_v3 = vpop.f32.mrb[60].mxu0 }
 0x8c1   : >> { %v9181_v45 = vpop.f32.mrb[61].mxu0  ;;  %5593 = vrot.lane.b32.xlu1 %v12824_v5, %s9917_s20  ;;  %v12924_v21 = vpop.permute.xlu0 %5538 }
 0x8c2   : >> { %v5411_v25 = vpop.f32.mrb[62].mxu0 }
 0x8c3   : >> { %v12926_v7 = vpop.permute.xlu1 %5461  ;;  %v9182_v35 = vpop.f32.mrb[63].mxu0  ;;  %5721 = vrot.lane.b32.xlu0 %v5400_v10, %s9919_s22 }
 0x8c5   : >> { %5603 = vrot.lane.b32.xlu1 %v12827_v56, %s9917_s20  ;;  %v12931_v57 = vpop.permute.xlu0 %5591 }
 0x8c6   : >> { %15279 = vst [vmem:[#allocation102_spill] sm:$0xff] %v12931_v57 }
 0x8c7   : >> { %v12933_v4 = vpop.permute.xlu1 %5463  ;;  %5731 = vrot.lane.b32.xlu0 %v5403_v37, %s9919_s22 }
 0x8c8   : >> { %v5416_v9 = vpop.f32.mrb[64].mxu0  ;;  %v5483_v32 = vsel %vm1151_vm2, %v12933_v4, %v12907_v55 }
 0x8c9   : >> { %v9185_v0 = vpop.f32.mrb[65].mxu0  ;;  %5656 = vrot.lane.b32.xlu1 %v12832_v51, %s9918_s21  ;;  %v12938_v5 = vpop.permute.xlu0 %5601  ;;  %v5505_v11 = vadd.f32 %v5483_v32, %v5442_v1  ;;  %v5447_v32 = vadd.f32 %v12919_v63, %v12814_v13 }
 0x8ca   : >> { %v5419_v26 = vpop.f32.mrb[66].mxu0 }
 0x8cb   : >> { %v12940_v16 = vpop.permute.xlu1 %5473  ;;  %v9186_v44 = vpop.f32.mrb[67].mxu0  ;;  %5784 = vrot.lane.b32.xlu0 %v5408_v3, %s9920_s25 }
 0x8cc   : >> { %v5487_v47 = vsel %vm1151_vm2, %v12940_v16, %v12912_v59 }
 0x8cd   : >> { %5666 = vrot.lane.b32.xlu1 %v12835_v12, %s9918_s21  ;;  %v12945_v56 = vpop.permute.xlu0 %5471  ;;  %v5510_v38 = vadd.f32 %v5487_v47, %v5447_v32  ;;  %v5441_v47 = vadd.f32 %v12900_v23, %v12808_v60 }
 0x8ce   : >> { %v5486_v61 = vsel %vm1151_vm2, %v12945_v56, %v12940_v16 }
 0x8cf   : >> { %v12947_v42 = vpop.permute.xlu1 %5524  ;;  %5794 = vrot.lane.b32.xlu0 %v5411_v25, %s9920_s25  ;;  %v8972_v25 = vld [vmem:[%s14962_s10 + $0x18] sm:$0xff] }
 0x8d0   : >> { %v5424_v54 = vpop.f32.mrb[68].mxu0 }
 0x8d1   : >> { %v9189_v17 = vpop.f32.mrb[69].mxu0  ;;  %5719 = vrot.lane.b32.xlu1 %v12840_v14, %s9919_s22  ;;  %v12952_v51 = vpop.permute.xlu0 %5654 }
 0x8d2   : >> { %v5427_v10 = vpop.f32.mrb[70].mxu0 }
 0x8d3   : >> { %v12954_v52 = vpop.permute.xlu1 %5526  ;;  %v9190_v37 = vpop.f32.mrb[71].mxu0  ;;  %5847 = vrot.lane.b32.xlu0 %v5416_v9, %s9921_s27 }
 0x8d4   : >> { %v5546_v62 = vsel %vm1250_vm3, %v12954_v52, %v12917_v18 }
 0x8d5   : >> { %5729 = vrot.lane.b32.xlu1 %v12843_v48, %s9919_s22  ;;  %v12959_v12 = vpop.permute.xlu0 %5664  ;;  %v5568_v1 = vadd.f32 %v5546_v62, %v5505_v11  ;;  %v5482_v11 = vsel %vm1151_vm2, %v12926_v7, %v12933_v4  ;;  %v5545_v4 = vsel %vm1250_vm3, %v12947_v42, %v12954_v52 }
 0x8d6   : >> { %15280 = vst [vmem:[#allocation103_spill] sm:$0xff] %v12959_v12  ;;  %v5504_v60 = vadd.f32 %v5482_v11, %v5441_v47 }
 0x8d7   : >> { %v5537_v58 = vpop.permute.xlu1 %5536  ;;  %5857 = vrot.lane.b32.xlu0 %v5419_v26, %s9921_s27 }
 0x8d8   : >> { %v5550_v36 = vsel %vm1250_vm3, %v5537_v58, %v12924_v21 }
 0x8d9   : >> { %5782 = vrot.lane.b32.xlu1 %v12848_v27, %s9920_s25  ;;  %v12964_v14 = vpop.permute.xlu0 %5534 }
 0x8da   : >> { %v5549_v15 = vsel %vm1250_vm3, %v12964_v14, %v5537_v58 }
 0x8db   : >> { %v12966_v3 = vpop.permute.xlu1 %5587  ;;  %5910 = vrot.lane.b32.xlu0 %v5424_v54, %s9922_s12 }
 0x8dd   : >> { %5792 = vrot.lane.b32.xlu1 %v12851_v2, %s9920_s25  ;;  %v12971_v45 = vpop.permute.xlu0 %5717 }
 0x8de   : >> { %15281 = vst [vmem:[#allocation104_spill] sm:$0xff] %v12971_v45 }
 0x8df   : >> { %v12973_v48 = vpop.permute.xlu1 %5589  ;;  %5920 = vrot.lane.b32.xlu0 %v5427_v10, %s9922_s12 }
 0x8e0   : >> { %v5609_v49 = vsel %vm1349_vm4, %v12973_v48, %v12931_v57  ;;  %v5509_v57 = vadd.f32 %v5486_v61, %v5446_v20  ;;  %v5573_v20 = vadd.f32 %v5550_v36, %v5510_v38 }
 0x8e1   : >> { %5845 = vrot.lane.b32.xlu1 %v12856_v34, %s9921_s27  ;;  %v12981_v27 = vpop.permute.xlu0 %5727  ;;  %v5631_v18 = vadd.f32 %v5609_v49, %v5568_v1 }
 0x8e2   : >> { %v5572_v61 = vadd.f32 %v5549_v15, %v5509_v57  ;;  %v5608_v57 = vsel %vm1349_vm4, %v12966_v3, %v12973_v48 }
 0x8e3   : >> { %v5600_v35 = vpop.permute.xlu1 %5599  ;;  %6441 = vperm.xlu0 %9635, %v8972_v25  }
 0x8e4   : >> { %v5613_v62 = vsel %vm1349_vm4, %v5600_v35, %v12938_v5 }
 0x8e5   : >> { %5855 = vrot.lane.b32.xlu1 %v12859_v28, %s9921_s27  ;;  %v12985_v2 = vpop.permute.xlu0 %5597  ;;  %v8971_v28 = vld [vmem:[%s14962_s10 + $0x10] sm:$0xff]  ;;  %v5636_v38 = vadd.f32 %v5613_v62, %v5573_v20 }
 0x8e6   : >> { %v5612_v13 = vsel %vm1349_vm4, %v12985_v2, %v5600_v35 }
 0x8e7   : >> { %v12987_v9 = vpop.permute.xlu1 %5650  ;;  %v5635_v36 = vadd.f32 %v5612_v13, %v5572_v61 }
 0x8e9   : >> { %5908 = vrot.lane.b32.xlu1 %v12864_v8, %s9922_s12  ;;  %v12991_v0 = vpop.permute.xlu0 %5780 }
 0x8ea   : >> { %15282 = vst [vmem:[#allocation105_spill] sm:$0xff] %v12991_v0 }
 0x8eb   : >> { %v12993_v26 = vpop.permute.xlu1 %5652 }
 0x8ec   : >> { %v5672_v16 = vsel %vm1448_vm5, %v12993_v26, %v12952_v51 }
 0x8ed   : >> { %5918 = vrot.lane.b32.xlu1 %v12867_v24, %s9922_s12  ;;  %v12997_v34 = vpop.permute.xlu0 %5790  ;;  %v5694_v49 = vadd.f32 %v5672_v16, %v5631_v18 }
 0x8ef   : >> { %v5663_v44 = vpop.permute.xlu1 %5662 }
 0x8f0   : >> { %v5676_v1 = vsel %vm1448_vm5, %v5663_v44, %v12959_v12  ;;  %v5567_v12 = vadd.f32 %v5545_v4, %v5504_v60 }
 0x8f1   : >> { %6436 = vperm.xlu1 %9636, %v8971_v28   ;;  %v13002_v54 = vpop.permute.xlu0 %5660 }
 0x8f2   : >> { %v5675_v35 = vsel %vm1448_vm5, %v13002_v54, %v5663_v44 }
 0x8f3   : >> { %v13004_v17 = vpop.permute.xlu1 %5713  ;;  %v5698_v11 = vadd.f32 %v5675_v35, %v5635_v36 }
 0x8f5   : >> { %v13006_v8 = vpop.permute.xlu0 %5843 }
 0x8f7   : >> { %v13008_v10 = vpop.permute.xlu1 %5715 }
 0x8f8   : >> { %v5735_v58 = vsel %vm1547_vm6, %v13008_v10, %v12971_v45 }
 0x8f9   : >> { %v13010_v37 = vpop.permute.xlu0 %5853  ;;  %v5757_v15 = vadd.f32 %v5735_v58, %v5694_v49  ;;  %v5671_v58 = vsel %vm1448_vm5, %v12987_v9, %v12993_v26 }
 0x8fb   : >> { %v5726_v25 = vpop.permute.xlu1 %5725 }
 0x8fc   : >> { %v5739_v52 = vsel %vm1547_vm6, %v5726_v25, %v12981_v27 }
 0x8fd   : >> { %v13012_v24 = vpop.permute.xlu0 %5723 }
 0x8fe   : >> { %v5738_v16 = vsel %vm1547_vm6, %v13012_v24, %v5726_v25  ;;  %v5630_v25 = vadd.f32 %v5608_v57, %v5567_v12 }
 0x8ff   : >> { %v13014_v6 = vpop.permute.xlu1 %5776  ;;  %v5761_v61 = vadd.f32 %v5738_v16, %v5698_v11 }
 0x900   : >> { %v5693_v60 = vadd.f32 %v5671_v58, %v5630_v25 }
 0x901   : >> { %v13016_v50 = vpop.permute.xlu0 %5906 }
 0x903   : >> { %v13018_v31 = vpop.permute.xlu1 %5778 }
 0x904   : >> { %v5798_v45 = vsel %vm1646_vm7, %v13018_v31, %v12991_v0  ;;  %v5699_v0 = vadd.f32 %v5676_v1, %v5636_v38  ;;  %v5797_v36 = vsel %vm1646_vm7, %v13014_v6, %v13018_v31 }
 0x905   : >> { %v13020_v28 = vpop.permute.xlu0 %5916  ;;  %v5820_v62 = vadd.f32 %v5798_v45, %v5757_v15  ;;  %v5734_v45 = vsel %vm1547_vm6, %v13004_v17, %v13008_v10 }
 0x906   : >> { %15283 = vst [vmem:[#allocation106_spill] sm:$0xff] %v13020_v28  ;;  %v5762_v20 = vadd.f32 %v5739_v52, %v5699_v0  ;;  %v5756_v10 = vadd.f32 %v5734_v45, %v5693_v60 }
 0x907   : >> { %v5789_v40 = vpop.permute.xlu1 %5788 }
 0x908   : >> { %v5802_v48 = vsel %vm1646_vm7, %v5789_v40, %v12997_v34  ;;  %v5819_v11 = vadd.f32 %v5797_v36, %v5756_v10 }
 0x909   : >> { %v13027_v46 = vpop.permute.xlu0 %5786 }
 0x90a   : >> { %v5801_v47 = vsel %vm1646_vm7, %v13027_v46, %v5789_v40  ;;  %v5825_v40 = vadd.f32 %v5802_v48, %v5762_v20 }
 0x90b   : >> { %v13032_v19 = vpop.permute.xlu1 %5839  ;;  %v5824_v12 = vadd.f32 %v5801_v47, %v5761_v61 }
 0x90d   : >> { %v13047_v22 = vpop.permute.xlu0 %5849 }
 0x90f   : >> { %v5842_v33 = vpop.permute.xlu1 %5841 }
 0x910   : >> { %v5861_v44 = vsel %vm1745_vm8, %v5842_v33, %v13006_v8 }
 0x911   : >> { %v13068_v32 = vpop.permute.xlu0 %5912  ;;  %v5883_v49 = vadd.f32 %v5861_v44, %v5820_v62 }
 0x913   : >> { %v5852_v18 = vpop.permute.xlu1 %5851 }
 0x914   : >> { %v5864_v1 = vsel %vm1745_vm8, %v13047_v22, %v5852_v18  ;;  %v5865_v26 = vsel %vm1745_vm8, %v5852_v18, %v13010_v37  ;;  %v5860_v18 = vsel %vm1745_vm8, %v13032_v19, %v5842_v33 }
 0x915   : >> { %v13089_v13 = vpop.permute.xlu0 %5469  ;;  %v5887_v15 = vadd.f32 %v5864_v1, %v5824_v12  ;;  %v5888_v57 = vadd.f32 %v5865_v26, %v5825_v40  ;;  %v5882_v31 = vadd.f32 %v5860_v18, %v5819_v11  ;;  %v15288_v18 = vmov 0   ;;  %v13149_v11 = vld [vmem:[%s14961_s9 + $0x8] sm:$0xff]  }
 0x916   : >> { %15289 = vst [vmem:[#allocation107_spill] sm:$0xff] %v13149_v11 }
 0x917   : >> { %v5905_v4 = vpop.permute.xlu1 %5904 }
 0x918   : >> { %v5924_v35 = vsel %vm15284_vm1, %v5905_v4, %v13016_v50 }
 0x919   : >> { %v5946_v0 = vadd.f32 %v5924_v35, %v5883_v49  ;;  %v13107_v38 = vpop.permute.xlu0 %5479 }
 0x91b   : >> { %v5915_v52 = vpop.permute.xlu1 %5914  ;;  %v5966_v62 = vmul.f32 0.01, %v5946_v0  ;;  %vm5956_vm12 = vcmp.ge.f32.partialorder %v5946_v0, 0.0 }
 0x91c   : >> { %v5927_v16 = vsel %vm15285_vm11, %v13068_v32, %v5915_v52  ;;  %v5928_v44 = vsel %vm15286_vm15, %v5915_v52, %v13020_v28 }
 0x91d   : >> { %v5950_v58 = vadd.f32 %v5927_v16, %v5887_v15  ;;  %v5951_v48 = vadd.f32 %v5928_v44, %v5888_v57  ;;  %v13118_v47 = vpop.permute.xlu0 %5532  ;;  %v5976_v1 = vsel %vm5956_vm12, %v5946_v0, %v5966_v62  ;;  %vm15293_vm12 = vmmov %vm15287_vm0 }
 0x91f   : >> { %v5971_v25 = vmul.f32 0.01, %v5951_v48  ;;  %v13120_v20 = vpop.permute.xlu1 %5902  ;;  %vm5961_vm1 = vcmp.ge.f32.partialorder %v5951_v48, 0.0  ;;  %v5970_v61 = vmul.f32 0.01, %v5950_v58  ;;  %vm5960_vm11 = vcmp.ge.f32.partialorder %v5950_v58, 0.0 }
 0x920   : >> { %v5923_v33 = vsel %vm15287_vm0, %v13120_v20, %v5905_v4  ;;  %v13133_v4 = vld [vmem:[%s14961_s9] sm:$0xff]  }
 0x921   : >> { %v5945_v49 = vadd.f32 %v5923_v33, %v5882_v31  ;;  %v13124_v45 = vpop.permute.xlu0 %5542  ;;  %v5981_v26 = vsel %vm5961_vm1, %v5951_v48, %v5971_v25  ;;  %v5980_v10 = vsel %vm5960_vm11, %v5950_v58, %v5970_v61  ;;  %v13165_v25 = vld [vmem:[%s14961_s9 + $0x10] sm:$0xff]  }
 0x922   : >> { %v5986_v35 = vpack.c.bf16 %v5981_v26, %v5976_v1  ;;  %15290 = vst [vmem:[#allocation108_spill] sm:$0xff] %v13165_v25  ;;  %v5502_v1 = vsel %vm1151_vm2, %v13089_v13, %v12926_v7  ;;  %v5445_v26 = vadd.f32 %v12900_v23, %v12879_v53  ;;  %v5503_v7 = vsel %vm1151_vm2, %v13107_v38, %v12945_v56 }
 0x923   : >> { %vm5955_vm15 = vcmp.ge.f32.partialorder %v5945_v49, 0.0  ;;  %v5965_v60 = vmul.f32 0.01, %v5945_v49  ;;  %v5468_v40 = vpop.permute.xlu1 %5467 }
 0x924   : >> { %6083 = vmatprep.subr.bf16.mxu1 %v5986_v35 }
 0x925   : >> { %v13126_v12 = vpop.permute.xlu0 %5595  ;;  %v5975_v36 = vsel %vm5955_vm15, %v5945_v49, %v5965_v60  ;;  %v13186_v60 = vld [vmem:[%s14961_s9 + $0x18] sm:$0xff]   ;;  %vm15298_vm15 = vmmov %vm15287_vm0 }
 0x926   : >> { %v5985_v15 = vpack.c.bf16 %v5980_v10, %v5975_v36  ;;  %15291 = vst [vmem:[#allocation109_spill] sm:$0xff] %v13186_v60  ;;  %v5565_v36 = vsel %vm1250_vm3, %v13118_v47, %v12947_v42  ;;  %v5508_v10 = vadd.f32 %v5502_v1, %v5445_v26  ;;  %v5628_v53 = vsel %vm1349_vm4, %v13126_v12, %v12966_v3 }
 0x927   : >> { %v13128_v57 = vpop.permute.xlu1 %5477  ;;  %v5566_v42 = vsel %vm1250_vm3, %v13124_v45, %v12964_v14  ;;  %v5443_v14 = vadd.f32 %v12900_v23, %v12794_v41 }
 0x928   : >> { %6084 = vmatpush1.bf16.msra.mxu1 %v5985_v15 }
 0x929   : >> { %v13135_v0 = vpop.permute.xlu0 %5605 }
 0x92b   : >> { %v13137_v52 = vpop.permute.xlu1 %5530  ;;  %8982 = vmatmul.mubr.msk.bf16.vlgmr.msra.gmra.mrb[36].mxu1 %vm2035_vm14, %v13133_v4 }
 0x92c   : >> { %6125 = vmatprep.mubr.bf16.mxu1 %v15288_v18 }
 0x92d   : >> { %v13142_v16 = vpop.permute.xlu0 %5658 }
 0x92e   : >> { %v5691_v56 = vsel %vm1448_vm5, %v13142_v16, %v12987_v9 }
 0x92f   : >> { %v13144_v44 = vpop.permute.xlu1 %5540 }
 0x931   : >> { %v13151_v62 = vpop.permute.xlu0 %5668 }
 0x933   : >> { %v13153_v58 = vpop.permute.xlu1 %5593  ;;  %8983 = vmatmul.mubr.msk.bf16.gmra.mrb[40].mxu1 %vm2035_vm14, %v13149_v11  ;;  %v5571_v11 = vadd.f32 %v5565_v36, %v5508_v10 }
 0x934   : >> { %6135 = vmatprep.mubr.bf16.mxu1 %v15288_v18 }
 0x935   : >> { %v13158_v48 = vpop.permute.xlu0 %5721  ;;  %v5634_v1 = vadd.f32 %v5628_v53, %v5571_v11  ;;  %v13227_v11 = vld [vmem:[%s14961_s9 + $0x20] sm:$0xff]   ;;  %v5488_v53 = vsel %vm1151_vm2, %v12912_v59, %v13128_v57  ;;  %v5489_v59 = vsel %vm1151_vm2, %v13128_v57, %v13107_v38  ;;  %v5548_v38 = vsel %vm1250_vm3, %v13137_v52, %v13118_v47 }
 0x936   : >> { %v5754_v36 = vsel %vm1547_vm6, %v13158_v48, %v13004_v17  ;;  %v5692_v17 = vsel %vm1448_vm5, %v13151_v62, %v13002_v54  ;;  %v5449_v54 = vadd.f32 %v12919_v63, %v12800_v29  ;;  %v5551_v57 = vsel %vm1250_vm3, %v12924_v21, %v13144_v44 }
 0x937   : >> { %v13160_v31 = vpop.permute.xlu1 %5603 }
 0x939   : >> { %v13167_v33 = vpop.permute.xlu0 %5731 }
 0x93b   : >> { %v13169_v61 = vpop.permute.xlu1 %5656  ;;  %8984 = vmatmul.mubr.msk.bf16.gmra.mrb[44].mxu1 %vm2035_vm14, %v13165_v25  ;;  %v5450_v25 = vadd.f32 %v12919_v63, %v12883_v43  ;;  %v5629_v43 = vsel %vm1349_vm4, %v13135_v0, %v12985_v2  ;;  %v5484_v2 = vsel %vm1151_vm2, %v12907_v55, %v5468_v40  ;;  %v5448_v55 = vadd.f32 %v12919_v63, %v12798_v30  ;;  %v15292_v63 = vld [vmem:[#allocation101_spill] sm:$0xff] }
 0x93c   : >> { %6145 = vmatprep.mubr.bf16.mxu1 %v15288_v18 }
 0x93d   : >> { %v13174_v49 = vpop.permute.xlu0 %5784  ;;  %v5513_v3 = vadd.f32 %v5503_v7, %v5450_v25  ;;  %v5444_v25 = vadd.f32 %v12900_v23, %v12796_v39  ;;  %v5485_v7 = vsel %vm1151_vm2, %v5468_v40, %v13089_v13  ;;  %v5506_v40 = vadd.f32 %v5484_v2, %v5443_v14 }
 0x93e   : >> { %v5817_v41 = vsel %vm1646_vm7, %v13174_v49, %v13014_v6  ;;  %v5755_v6 = vsel %vm1547_vm6, %v13167_v33, %v13012_v24  ;;  %v5511_v29 = vadd.f32 %v5488_v53, %v5448_v55  ;;  %v5547_v24 = vsel %vm1250_vm3, %v15292_v63, %v13137_v52  ;;  %v15294_v52 = vld [vmem:[#allocation102_spill] sm:$0xff] }
 0x93f   : >> { %v13181_v35 = vpop.permute.xlu1 %5666  ;;  %v5576_v10 = vadd.f32 %v5566_v42, %v5513_v3  ;;  %v5507_v30 = vadd.f32 %v5485_v7, %v5444_v25  ;;  %v5552_v14 = vsel %vm1250_vm3, %v13144_v44, %v13124_v45  ;;  %v5610_v21 = vsel %vm1349_vm4, %v15294_v52, %v13153_v58  ;;  %v13294_v45 = vld [vmem:[%s14961_s9 + $0x28] sm:$0xff]  }
 0x940   : >> { %v5611_v25 = vsel %vm1349_vm4, %v13153_v58, %v13126_v12  ;;  %v5574_v7 = vadd.f32 %v5551_v57, %v5511_v29  ;;  %v5615_v12 = vsel %vm1349_vm4, %v13160_v31, %v13135_v0  ;;  %v5673_v58 = vsel %vm1448_vm5, %v12952_v51, %v13169_v61  ;;  %v15295_v0 = vld [vmem:[#allocation104_spill] sm:$0xff] }
 0x941   : >> { %v13191_v15 = vpop.permute.xlu0 %5794  ;;  %v5639_v42 = vadd.f32 %v5629_v43, %v5576_v10  ;;  %v5512_v10 = vadd.f32 %v5489_v59, %v5449_v54  ;;  %v5570_v44 = vadd.f32 %v5548_v38, %v5507_v30  ;;  %v5678_v63 = vsel %vm1448_vm5, %v13181_v35, %v13151_v62 }
 0x943   : >> { %v13201_v28 = vpop.permute.xlu1 %5719  ;;  %8985 = vmatmul.mubr.msk.bf16.gmra.mrb[48].mxu1 %vm2035_vm14, %v13186_v60  ;;  %v5697_v60 = vadd.f32 %v5691_v56, %v5634_v1  ;;  %v5575_v53 = vadd.f32 %v5552_v14, %v5512_v10  ;;  %v5633_v54 = vadd.f32 %v5611_v25, %v5570_v44 }
 0x944   : >> { %6155 = vmatprep.mubr.bf16.mxu1 %v15288_v18 }
 0x945   : >> { %v13212_v26 = vpop.permute.xlu0 %5847  ;;  %v5760_v39 = vadd.f32 %v5754_v36, %v5697_v60  ;;  %v5702_v60 = vadd.f32 %v5692_v17, %v5639_v42 }
 0x946   : >> { %v5880_v13 = vsel %vm1745_vm8, %v13212_v26, %v13032_v19  ;;  %v5818_v19 = vsel %vm1646_vm7, %v13191_v15, %v13027_v46 }
 0x947   : >> { %v13222_v9 = vpop.permute.xlu1 %5729  ;;  %v5823_v56 = vadd.f32 %v5817_v41, %v5760_v39  ;;  %v5765_v1 = vadd.f32 %v5755_v6, %v5702_v60  ;;  %v5674_v6 = vsel %vm1448_vm5, %v13169_v61, %v13142_v16  ;;  %v5638_v60 = vadd.f32 %v5615_v12, %v5575_v53  ;;  %v15296_v61 = vld [vmem:[#allocation103_spill] sm:$0xff] }
 0x948   : >> { %v5737_v16 = vsel %vm1547_vm6, %v13201_v28, %v13158_v48  ;;  %v5677_v30 = vsel %vm1448_vm5, %v15296_v61, %v13181_v35  ;;  %v5740_v57 = vsel %vm1547_vm6, %v12981_v27, %v13222_v9  ;;  %v5741_v35 = vsel %vm1547_vm6, %v13222_v9, %v13167_v33  ;;  %v15305_v61 = vld [vmem:[#allocation109_spill] sm:$0xff] }
 0x949   : >> { %v13244_v23 = vpop.permute.xlu0 %5857  ;;  %v5886_v43 = vadd.f32 %v5880_v13, %v5823_v56  ;;  %v5828_v2 = vadd.f32 %v5818_v19, %v5765_v1  ;;  %v15297_v19 = vld [vmem:[#allocation105_spill] sm:$0xff]  ;;  %v15300_v53 = vmov 0.0  }
 0x94a   : >> { %v5881_v46 = vsel %vm1745_vm8, %v13244_v23, %v13047_v22  ;;  %v5569_v22 = vadd.f32 %v5547_v24, %v5506_v40 }
 0x94b   : >> { %v5783_v3 = vpop.permute.xlu1 %5782  ;;  %8986 = vmatmul.mubr.msk.bf16.gmra.mrb[52].mxu1 %vm2035_vm14, %v13227_v11  ;;  %v5891_v42 = vadd.f32 %v5881_v46, %v5828_v2  ;;  %v5701_v46 = vadd.f32 %v5678_v63, %v5638_v60  ;;  %v15303_v60 = vld [vmem:[#allocation107_spill] sm:$0xff] }
 0x94c   : >> { %6165 = vmatprep.mubr.bf16.mxu1 %v15288_v18  ;;  %v5632_v55 = vadd.f32 %v5610_v21, %v5569_v22  ;;  %v5799_v38 = vsel %vm1646_vm7, %v15297_v19, %v5783_v3 }
 0x94d   : >> { %v13274_v36 = vpop.permute.xlu0 %5910  ;;  %v5764_v33 = vadd.f32 %v5741_v35, %v5701_v46 }
 0x94e   : >> { %v5943_v47 = vsel %vm15293_vm12, %v13274_v36, %v13120_v20  ;;  %v5614_v20 = vsel %vm1349_vm4, %v12938_v5, %v13160_v31  ;;  %v5736_v31 = vsel %vm1547_vm6, %v15295_v0, %v13201_v28  ;;  %v5695_v56 = vadd.f32 %v5673_v58, %v5632_v55  ;;  %vm15299_vm12 = vmmov %vm15287_vm0 }
 0x94f   : >> { %v5949_v17 = vadd.f32 %v5943_v47, %v5886_v43  ;;  %v5793_v41 = vpop.permute.xlu1 %5792  ;;  %v5637_v13 = vadd.f32 %v5614_v20, %v5574_v7  ;;  %v5800_v28 = vsel %vm1646_vm7, %v5783_v3, %v13174_v49  ;;  %v13338_v43 = vld [vmem:[%s14961_s9 + $0x30] sm:$0xff]  }
 0x950   : >> { %v5758_v24 = vadd.f32 %v5736_v31, %v5695_v56  ;;  %v5803_v21 = vsel %vm1646_vm7, %v12997_v34, %v5793_v41  ;;  %v5804_v25 = vsel %vm1646_vm7, %v5793_v41, %v13191_v15 }
 0x951   : >> { %v13305_v39 = vpop.permute.xlu0 %5920  ;;  %v5969_v40 = vmul.f32 0.01, %v5949_v17  ;;  %vm5959_vm1 = vcmp.ge.f32.partialorder %v5949_v17, 0.0  ;;  %v5700_v27 = vadd.f32 %v5677_v30, %v5637_v13  ;;  %v5827_v44 = vadd.f32 %v5804_v25, %v5764_v33 }
 0x952   : >> { %v5944_v5 = vsel %vm15287_vm0, %v13305_v39, %v13068_v32  ;;  %v5696_v32 = vadd.f32 %v5674_v6, %v5633_v54  ;;  %v5821_v47 = vadd.f32 %v5799_v38, %v5758_v24 }
 0x953   : >> { %v5954_v51 = vadd.f32 %v5944_v5, %v5891_v42  ;;  %v5846_v59 = vpop.permute.xlu1 %5845  ;;  %8987 = vmatmul.mubr.msk.bf16.gmra.mrb[56].mxu1 %vm2035_vm14, %v13294_v45  ;;  %v5979_v10 = vsel %vm5959_vm1, %v5949_v17, %v5969_v40  ;;  %v5763_v2 = vadd.f32 %v5740_v57, %v5700_v27  ;;  %vm15302_vm1 = vmmov %vm15287_vm0 }
 0x954   : >> { %6175 = vmatprep.mubr.bf16.mxu1 %v15288_v18  ;;  %v5759_v48 = vadd.f32 %v5737_v16, %v5696_v32  ;;  %v5862_v49 = vsel %vm1745_vm8, %v13006_v8, %v5846_v59  ;;  %v5863_v3 = vsel %vm1745_vm8, %v5846_v59, %v13212_v26  ;;  %v9669_v16 = vld [vmem:[%s14961_s9 + $0x40] sm:$0xff]   ;;  %v15304_v32 = vld [vmem:[#allocation108_spill] sm:$0xff] }
 0x955   : >> { %vm5964_vm11 = vcmp.ge.f32.partialorder %v5954_v51, 0.0  ;;  %v5974_v29 = vmul.f32 0.01, %v5954_v51  ;;  %v5884_v9 = vadd.f32 %v5862_v49, %v5821_v47  ;;  %v5826_v41 = vadd.f32 %v5803_v21, %v5763_v2 }
 0x956   : >> { %v5822_v52 = vadd.f32 %v5800_v28, %v5759_v48 }
 0x957   : >> { %v5856_v1 = vpop.permute.xlu1 %5855  ;;  %v5984_v62 = vsel %vm5964_vm11, %v5954_v51, %v5974_v29 }
 0x958   : >> { %v5989_v14 = vpack.c.bf16 %v5984_v62, %v5979_v10  ;;  %v5885_v17 = vadd.f32 %v5863_v3, %v5822_v52  ;;  %v5866_v26 = vsel %vm1745_vm8, %v13010_v37, %v5856_v1  ;;  %v5867_v22 = vsel %vm1745_vm8, %v5856_v1, %v13244_v23 }
 0x959   : >> { %v5889_v37 = vadd.f32 %v5866_v26, %v5826_v41  ;;  %v5890_v23 = vadd.f32 %v5867_v22, %v5827_v44 }
 0x95a   : >> { %9192 = vmatpush3.bf16.msra.mxu0 %v5989_v14 }
 0x95b   : >> { %v5909_v8 = vpop.permute.xlu1 %5908  ;;  %8988 = vmatmul.mubr.msk.bf16.gmra.mrb[60].mxu1 %vm2035_vm14, %v13338_v43 }
 0x95c   : >> { %v5925_v34 = vsel %vm15298_vm15, %v13016_v50, %v5909_v8  ;;  %v5926_v15 = vsel %vm15299_vm12, %v5909_v8, %v13274_v36  ;;  %6185 = vmatprep.mubr.bf16.mxu1 %v15288_v18  ;;  %v9668_v50 = vld [vmem:[%s14961_s9 + $0x38] sm:$0xff]  }
 0x95d   : >> { %v5947_v7 = vadd.f32 %v5925_v34, %v5884_v9  ;;  %v5948_v20 = vadd.f32 %v5926_v15, %v5885_v17  ;;  %9194 = vmatmul.mubr.msk.bf16.vlgmr.msra.gmra.mrb[76].mxu0 %vm2035_vm14, %v13133_v4  ;;  %v15301_v36 = vld [vmem:[#allocation106_spill] sm:$0xff] }
 0x95e   : >> { %9197 = vmatprep.mubr.msk.bf16.mxu0 %vm9914_vm9, %v15300_v53 }
 0x95f   : >> { %v5919_v12 = vpop.permute.xlu1 %5918  ;;  %v5967_v55 = vmul.f32 0.01, %v5947_v7  ;;  %v5968_v54 = vmul.f32 0.01, %v5948_v20  ;;  %vm5957_vm11 = vcmp.ge.f32.partialorder %v5947_v7, 0.0  ;;  %vm5958_vm15 = vcmp.ge.f32.partialorder %v5948_v20, 0.0 }
 0x960   : >> { %v5929_v58 = vsel %vm15287_vm0, %v15301_v36, %v5919_v12  ;;  %v5930_v42 = vsel %vm15302_vm1, %v5919_v12, %v13305_v39  ;;  %vm15319_vm1 = vmmov %vm15287_vm0 }
 0x961   : >> { %v5952_v6 = vadd.f32 %v5929_v58, %v5889_v37  ;;  %v5953_v5 = vadd.f32 %v5930_v42, %v5890_v23  ;;  %v5978_v31 = vsel %vm5958_vm15, %v5948_v20, %v5968_v54  ;;  %v5977_v51 = vsel %vm5957_vm11, %v5947_v7, %v5967_v55 }
 0x963   : >> { %vm5962_vm12 = vcmp.ge.f32.partialorder %v5952_v6, 0.0  ;;  %v5972_v13 = vmul.f32 0.01, %v5952_v6  ;;  %v5973_v0 = vmul.f32 0.01, %v5953_v5  ;;  %8989 = vmatmul.mubr.msk.bf16.gmra.mrb[64].mxu1 %vm2035_vm14, %v9668_v50  ;;  %vm5963_vm13 = vcmp.ge.f32.partialorder %v5953_v5, 0.0 }
 0x964   : >> { %6195 = vmatprep.mubr.bf16.mxu1 %v15288_v18 }
 0x965   : >> { %v5983_v40 = vsel %vm5963_vm13, %v5953_v5, %v5973_v0  ;;  %v5982_v59 = vsel %vm5962_vm12, %v5952_v6, %v5972_v13  ;;  %9198 = vmatmul.mubr.msk.bf16.gmra.mrb[80].mxu0 %vm2035_vm14, %v15303_v60  ;;  %vm15318_vm13 = vmmov %vm15287_vm0 }
 0x966   : >> { %v5988_v39 = vpack.c.bf16 %v5983_v40, %v5978_v31  ;;  %v5987_v56 = vpack.c.bf16 %v5982_v59, %v5977_v51  ;;  %9201 = vmatprep.mubr.msk.bf16.mxu0 %vm9914_vm9, %v15300_v53  ;;  %vm15320_vm12 = vmmov %vm15287_vm0 }
 0x968   : >> { %6206 = vmatprep.subr.bf16.mxu1 %v5988_v39 }
 0x969   : >> { %6207 = vmatpush1.bf16.msra.mxu1 %v5987_v56 }
 0x96b   : >> { %8990 = vmatmul.mubr.msk.bf16.gmra.mrb[68].mxu1 %vm2035_vm14, %v9669_v16 }
 0x96c   : >> { %6238 = vmatprep.mubr.bf16.mxu1 %v15288_v18 }
 0x96d   : >> { %9202 = vmatmul.mubr.msk.bf16.gmra.mrb[84].mxu0 %vm2035_vm14, %v15304_v32 }
 0x96e   : >> { %9205 = vmatprep.mubr.msk.bf16.mxu0 %vm9914_vm9, %v15300_v53 }
 0x973   : >> { %8991 = vmatmul.mubr.msk.bf16.vlgmr.msra.gmra.mrb[72].mxu1 %vm2035_vm14, %v13133_v4 }
 0x974   : >> { %6248 = vmatprep.mubr.bf16.mxu1 %v15288_v18 }
 0x975   : >> { %9206 = vmatmul.mubr.msk.bf16.gmra.mrb[88].mxu0 %vm2035_vm14, %v15305_v61 }
 0x976   : >> { %9209 = vmatprep.mubr.msk.bf16.mxu0 %vm9914_vm9, %v15300_v53 }
 0x97b   : >> { %8992 = vmatmul.mubr.msk.bf16.gmra.mrb[76].mxu1 %vm2035_vm14, %v15303_v60 }
 0x97c   : >> { %6258 = vmatprep.mubr.bf16.mxu1 %v15288_v18 }
 0x97d   : >> { %9210 = vmatmul.mubr.msk.bf16.gmra.mrb[92].mxu0 %vm2035_vm14, %v13227_v11 }
 0x97e   : >> { %9213 = vmatprep.mubr.msk.bf16.mxu0 %vm9914_vm9, %v15300_v53 }
 0x983   : >> { %8993 = vmatmul.mubr.msk.bf16.gmra.mrb[80].mxu1 %vm2035_vm14, %v15304_v32 }
 0x984   : >> { %6268 = vmatprep.mubr.bf16.mxu1 %v15288_v18 }
 0x985   : >> { %9214 = vmatmul.mubr.msk.bf16.gmra.mrb[96].mxu0 %vm2035_vm14, %v13294_v45 }
 0x986   : >> { %9217 = vmatprep.mubr.msk.bf16.mxu0 %vm9914_vm9, %v15300_v53 }
 0x98b   : >> { %8994 = vmatmul.mubr.msk.bf16.gmra.mrb[84].mxu1 %vm2035_vm14, %v15305_v61 }
 0x98c   : >> { %6278 = vmatprep.mubr.bf16.mxu1 %v15288_v18 }
 0x98d   : >> { %9218 = vmatmul.mubr.msk.bf16.gmra.mrb[100].mxu0 %vm2035_vm14, %v13338_v43 }
 0x98e   : >> { %9221 = vmatprep.mubr.msk.bf16.mxu0 %vm9914_vm9, %v15300_v53 }
 0x993   : >> { %8995 = vmatmul.mubr.msk.bf16.gmra.mrb[88].mxu1 %vm2035_vm14, %v13227_v11 }
 0x994   : >> { %6288 = vmatprep.mubr.bf16.mxu1 %v15288_v18 }
 0x995   : >> { %9222 = vmatmul.mubr.msk.bf16.gmra.mrb[104].mxu0 %vm2035_vm14, %v9668_v50 }
 0x996   : >> { %9225 = vmatprep.mubr.msk.bf16.mxu0 %vm9914_vm9, %v15300_v53 }
 0x99b   : >> { %8996 = vmatmul.mubr.msk.bf16.gmra.mrb[92].mxu1 %vm2035_vm14, %v13294_v45 }
 0x99c   : >> { %6298 = vmatprep.mubr.bf16.mxu1 %v15288_v18 }
 0x99d   : >> { %9226 = vmatmul.mubr.msk.bf16.gmra.mrb[108].mxu0 %vm2035_vm14, %v9669_v16 }
 0x99e   : >> { %7234 = vmatprep.mubr.bf16.mxu0 %v15288_v18 }
 0x9a3   : >> { %8997 = vmatmul.mubr.msk.bf16.gmra.mrb[96].mxu1 %vm2035_vm14, %v13338_v43 }
 0x9a4   : >> { %6308 = vmatprep.mubr.bf16.mxu1 %v15288_v18 }
 0x9ab   : >> { %8998 = vmatmul.mubr.msk.bf16.gmra.mrb[100].mxu1 %vm2035_vm14, %v9668_v50 }
 0x9ac   : >> { %6318 = vmatprep.mubr.bf16.mxu1 %v15288_v18 }
 0x9b3   : >> { %8999 = vmatmul.mubr.msk.bf16.gmra.mrb[104].mxu1 %vm2035_vm14, %v9669_v16 }
 0x9b4   : >> { %7111 = vmatprep.mubr.bf16.mxu1 %v15288_v18 }
 0x9fe   : >> { %v13434_v4 = vpop.f32.mrb[36].mxu1 }
 0x9ff   : >> { %v13436_v11 = vpop.f32.mrb[37].mxu1 }
 0xa00   : >> { %v13438_v45 = vpop.f32.mrb[38].mxu1 }
 0xa01   : >> { %v13440_v30 = vpop.f32.mrb[39].mxu1 }
 0xa06   : >> { %v6127_v29 = vpop.f32.mrb[40].mxu1 }
 0xa07   : >> { %6464 = vrot.lane.b32.xlu1 %v6127_v29, %s9915_s18  ;;  %v6129_v63 = vpop.f32.mrb[41].mxu1 }
 0xa08   : >> { %v6131_v24 = vpop.f32.mrb[42].mxu1 }
 0xa09   : >> { %6474 = vrot.lane.b32.xlu0 %v6131_v24, %s9915_s18  ;;  %v6133_v19 = vpop.f32.mrb[43].mxu1 }
 0xa0b   : >> { %6466 = vrot.lane.b32.xlu1 %v6129_v63, %s9915_s18 }
 0xa0e   : >> { %v6137_v38 = vpop.f32.mrb[44].mxu1 }
 0xa0f   : >> { %6476 = vrot.lane.b32.xlu1 %v6133_v19, %s9915_s18  ;;  %v6139_v28 = vpop.f32.mrb[45].mxu1 }
 0xa10   : >> { %v6141_v48 = vpop.f32.mrb[46].mxu1 }
 0xa11   : >> { %6536 = vrot.lane.b32.xlu0 %v6141_v48, %s9916_s19  ;;  %v6143_v57 = vpop.f32.mrb[47].mxu1 }
 0xa13   : >> { %6526 = vrot.lane.b32.xlu1 %v6137_v38, %s9916_s19 }
 0xa16   : >> { %v6147_v1 = vpop.f32.mrb[48].mxu1 }
 0xa17   : >> { %6528 = vrot.lane.b32.xlu1 %v6139_v28, %s9916_s19  ;;  %v6149_v43 = vpop.f32.mrb[49].mxu1 }
 0xa18   : >> { %v6151_v10 = vpop.f32.mrb[50].mxu1 }
 0xa19   : >> { %6598 = vrot.lane.b32.xlu0 %v6151_v10, %s9917_s20  ;;  %v6153_v62 = vpop.f32.mrb[51].mxu1 }
 0xa1b   : >> { %6538 = vrot.lane.b32.xlu1 %v6143_v57, %s9916_s19 }
 0xa1e   : >> { %v6157_v35 = vpop.f32.mrb[52].mxu1 }
 0xa1f   : >> { %6588 = vrot.lane.b32.xlu1 %v6147_v1, %s9917_s20  ;;  %v6159_v49 = vpop.f32.mrb[53].mxu1 }
 0xa20   : >> { %v6161_v3 = vpop.f32.mrb[54].mxu1 }
 0xa21   : >> { %6660 = vrot.lane.b32.xlu0 %v6161_v3, %s9918_s21  ;;  %v6163_v14 = vpop.f32.mrb[55].mxu1 }
 0xa23   : >> { %6590 = vrot.lane.b32.xlu1 %v6149_v43, %s9917_s20 }
 0xa26   : >> { %v6167_v27 = vpop.f32.mrb[56].mxu1 }
 0xa27   : >> { %6600 = vrot.lane.b32.xlu1 %v6153_v62, %s9917_s20  ;;  %v6169_v46 = vpop.f32.mrb[57].mxu1 }
 0xa28   : >> { %v6171_v47 = vpop.f32.mrb[58].mxu1 }
 0xa29   : >> { %6722 = vrot.lane.b32.xlu0 %v6171_v47, %s9919_s22  ;;  %v6173_v52 = vpop.f32.mrb[59].mxu1 }
 0xa2b   : >> { %6650 = vrot.lane.b32.xlu1 %v6157_v35, %s9918_s21 }
 0xa2e   : >> { %v6177_v21 = vpop.f32.mrb[60].mxu1 }
 0xa2f   : >> { %6652 = vrot.lane.b32.xlu1 %v6159_v49, %s9918_s21  ;;  %v6179_v25 = vpop.f32.mrb[61].mxu1 }
 0xa30   : >> { %v6181_v2 = vpop.f32.mrb[62].mxu1  ;;  %v13458_v33 = vpop.f32.mrb[76].mxu0 }
 0xa31   : >> { %15306 = vst [vmem:[#allocation101_spill] sm:$0xff] %v13458_v33  ;;  %6784 = vrot.lane.b32.xlu0 %v6181_v2, %s9920_s25  ;;  %v6183_v9 = vpop.f32.mrb[63].mxu1  ;;  %v9195_v17 = vpop.f32.mrb[77].mxu0 }
 0xa32   : >> { %v13461_v8 = vpop.f32.mrb[78].mxu0 }
 0xa33   : >> { %15307 = vst [vmem:[#allocation102_spill] sm:$0xff] %v13461_v8  ;;  %6662 = vrot.lane.b32.xlu1 %v6163_v14, %s9918_s21  ;;  %v9196_v26 = vpop.f32.mrb[79].mxu0 }
 0xa36   : >> { %v6187_v22 = vpop.f32.mrb[64].mxu1 }
 0xa37   : >> { %6712 = vrot.lane.b32.xlu1 %v6167_v27, %s9919_s22  ;;  %v6189_v34 = vpop.f32.mrb[65].mxu1 }
 0xa38   : >> { %v6191_v15 = vpop.f32.mrb[66].mxu1  ;;  %v13465_v41 = vpop.f32.mrb[80].mxu0 }
 0xa39   : >> { %6846 = vrot.lane.b32.xlu0 %v6191_v15, %s9921_s27  ;;  %v6193_v44 = vpop.f32.mrb[67].mxu1  ;;  %v9199_v7 = vpop.f32.mrb[81].mxu0 }
 0xa3a   : >> { %v13468_v20 = vpop.f32.mrb[82].mxu0 }
 0xa3b   : >> { %6714 = vrot.lane.b32.xlu1 %v6169_v46, %s9919_s22  ;;  %v9200_v37 = vpop.f32.mrb[83].mxu0 }
 0xa3e   : >> { %v6197_v23 = vpop.f32.mrb[68].mxu1 }
 0xa3f   : >> { %6724 = vrot.lane.b32.xlu1 %v6173_v52, %s9919_s22  ;;  %v6199_v12 = vpop.f32.mrb[69].mxu1 }
 0xa40   : >> { %v13472_v50 = vpop.f32.mrb[70].mxu1  ;;  %v13474_v36 = vpop.f32.mrb[84].mxu0 }
 0xa41   : >> { %v6203_v58 = vpop.f32.mrb[71].mxu1  ;;  %v9203_v42 = vpop.f32.mrb[85].mxu0 }
 0xa42   : >> { %v13476_v55 = vpop.f32.mrb[86].mxu0 }
 0xa43   : >> { %6774 = vrot.lane.b32.xlu1 %v6177_v21, %s9920_s25  ;;  %v9204_v54 = vpop.f32.mrb[87].mxu0 }
 0xa46   : >> { %v13479_v6 = vpop.f32.mrb[72].mxu1 }
 0xa47   : >> { %6776 = vrot.lane.b32.xlu1 %v6179_v25, %s9920_s25  ;;  %v13482_v5 = vpop.f32.mrb[73].mxu1 }
 0xa48   : >> { %15308 = vst [vmem:[#allocation104_spill] sm:$0xff] %v13482_v5  ;;  %v13484_v13 = vpop.f32.mrb[74].mxu1  ;;  %v13486_v0 = vpop.f32.mrb[88].mxu0 }
 0xa49   : >> { %15309 = vst [vmem:[#allocation103_spill] sm:$0xff] %v13484_v13  ;;  %v13488_v31 = vpop.f32.mrb[75].mxu1  ;;  %v9207_v40 = vpop.f32.mrb[89].mxu0 }
 0xa4a   : >> { %15310 = vst [vmem:[#allocation105_spill] sm:$0xff] %v13488_v31  ;;  %v13490_v51 = vpop.f32.mrb[90].mxu0 }
 0xa4b   : >> { %6786 = vrot.lane.b32.xlu1 %v6183_v9, %s9920_s25  ;;  %v9208_v59 = vpop.f32.mrb[91].mxu0 }
 0xa4e   : >> { %v6250_v60 = vpop.f32.mrb[76].mxu1 }
 0xa4f   : >> { %6836 = vrot.lane.b32.xlu1 %v6187_v22, %s9921_s27  ;;  %6468 = vrot.lane.b32.xlu0 %v6250_v60, %s9915_s18  ;;  %v6252_v39 = vpop.f32.mrb[77].mxu1 }
 0xa50   : >> { %v6254_v56 = vpop.f32.mrb[78].mxu1  ;;  %v13495_v16 = vpop.f32.mrb[92].mxu0 }
 0xa51   : >> { %v6256_v32 = vpop.f32.mrb[79].mxu1  ;;  %v9211_v61 = vpop.f32.mrb[93].mxu0 }
 0xa52   : >> { %v13497_v29 = vpop.f32.mrb[94].mxu0 }
 0xa53   : >> { %6838 = vrot.lane.b32.xlu1 %v6189_v34, %s9921_s27  ;;  %6478 = vrot.lane.b32.xlu0 %v6254_v56, %s9915_s18  ;;  %v9212_v63 = vpop.f32.mrb[95].mxu0 }
 0xa56   : >> { %v6260_v24 = vpop.f32.mrb[80].mxu1 }
 0xa57   : >> { %6848 = vrot.lane.b32.xlu1 %v6193_v44, %s9921_s27  ;;  %6530 = vrot.lane.b32.xlu0 %v6260_v24, %s9916_s19  ;;  %v6262_v19 = vpop.f32.mrb[81].mxu1 }
 0xa58   : >> { %v6264_v38 = vpop.f32.mrb[82].mxu1  ;;  %v13503_v28 = vpop.f32.mrb[96].mxu0 }
 0xa59   : >> { %v6266_v48 = vpop.f32.mrb[83].mxu1  ;;  %v9215_v57 = vpop.f32.mrb[97].mxu0 }
 0xa5a   : >> { %v13505_v1 = vpop.f32.mrb[98].mxu0 }
 0xa5b   : >> { %6900 = vrot.lane.b32.xlu1 %v6199_v12, %s9922_s12  ;;  %6540 = vrot.lane.b32.xlu0 %v6264_v38, %s9916_s19  ;;  %v9216_v43 = vpop.f32.mrb[99].mxu0 }
 0xa5e   : >> { %v6270_v10 = vpop.f32.mrb[84].mxu1 }
 0xa5f   : >> { %6910 = vrot.lane.b32.xlu1 %v6203_v58, %s9922_s12  ;;  %6592 = vrot.lane.b32.xlu0 %v6270_v10, %s9917_s20  ;;  %v6272_v62 = vpop.f32.mrb[85].mxu1  ;;  %v13533_v58 = vpop.permute.xlu1 %6436 }
 0xa60   : >> { %v6274_v35 = vpop.f32.mrb[86].mxu1  ;;  %v13511_v49 = vpop.f32.mrb[100].mxu0  ;;  %v6444_v53 = vadd.f32 %v13533_v58, %v13434_v4 }
 0xa61   : >> { %v6276_v3 = vpop.f32.mrb[87].mxu1  ;;  %v9219_v14 = vpop.f32.mrb[101].mxu0 }
 0xa62   : >> { %v13513_v27 = vpop.f32.mrb[102].mxu0 }
 0xa63   : >> { %6898 = vrot.lane.b32.xlu1 %v6197_v23, %s9922_s12  ;;  %6602 = vrot.lane.b32.xlu0 %v6274_v35, %s9917_s20  ;;  %v9220_v46 = vpop.f32.mrb[103].mxu0 }
 0xa66   : >> { %v6280_v47 = vpop.f32.mrb[88].mxu1 }
 0xa67   : >> { %6470 = vrot.lane.b32.xlu1 %v6252_v39, %s9915_s18  ;;  %6654 = vrot.lane.b32.xlu0 %v6280_v47, %s9918_s21  ;;  %v6282_v52 = vpop.f32.mrb[89].mxu1 }
 0xa68   : >> { %v6284_v21 = vpop.f32.mrb[90].mxu1  ;;  %v13519_v25 = vpop.f32.mrb[104].mxu0 }
 0xa69   : >> { %v6286_v2 = vpop.f32.mrb[91].mxu1  ;;  %v9223_v9 = vpop.f32.mrb[105].mxu0 }
 0xa6a   : >> { %v13521_v17 = vpop.f32.mrb[106].mxu0 }
 0xa6b   : >> { %6480 = vrot.lane.b32.xlu1 %v6256_v32, %s9915_s18  ;;  %6664 = vrot.lane.b32.xlu0 %v6284_v21, %s9918_s21  ;;  %v9224_v26 = vpop.f32.mrb[107].mxu0 }
 0xa6e   : >> { %v6290_v22 = vpop.f32.mrb[92].mxu1 }
 0xa6f   : >> { %6532 = vrot.lane.b32.xlu1 %v6262_v19, %s9916_s19  ;;  %6716 = vrot.lane.b32.xlu0 %v6290_v22, %s9919_s22  ;;  %v6292_v34 = vpop.f32.mrb[93].mxu1 }
 0xa70   : >> { %v6294_v15 = vpop.f32.mrb[94].mxu1  ;;  %v13527_v44 = vpop.f32.mrb[108].mxu0 }
 0xa71   : >> { %v6296_v7 = vpop.f32.mrb[95].mxu1  ;;  %v9227_v37 = vpop.f32.mrb[109].mxu0 }
 0xa72   : >> { %v13529_v23 = vpop.f32.mrb[110].mxu0 }
 0xa73   : >> { %6542 = vrot.lane.b32.xlu1 %v6266_v48, %s9916_s19  ;;  %6726 = vrot.lane.b32.xlu0 %v6294_v15, %s9919_s22  ;;  %v9228_v12 = vpop.f32.mrb[111].mxu0 }
 0xa76   : >> { %v6300_v42 = vpop.f32.mrb[96].mxu1 }
 0xa77   : >> { %6594 = vrot.lane.b32.xlu1 %v6272_v62, %s9917_s20  ;;  %6778 = vrot.lane.b32.xlu0 %v6300_v42, %s9920_s25  ;;  %v6302_v54 = vpop.f32.mrb[97].mxu1 }
 0xa78   : >> { %v6304_v40 = vpop.f32.mrb[98].mxu1 }
 0xa79   : >> { %v13537_v59 = vpop.permute.xlu1 %6464  ;;  %v6306_v60 = vpop.f32.mrb[99].mxu1 }
 0xa7a   : >> { %15311 = vst [vmem:[#allocation106_spill] sm:$0xff] %v13537_v59 }
 0xa7b   : >> { %6604 = vrot.lane.b32.xlu1 %v6276_v3, %s9917_s20  ;;  %6788 = vrot.lane.b32.xlu0 %v6304_v40, %s9920_s25 }
 0xa7d   : >> { %v13541_v39 = vpop.permute.xlu1 %6466 }
 0xa7e   : >> { %v6310_v56 = vpop.f32.mrb[100].mxu1  ;;  %v6484_v33 = vsel %vm1151_vm2, %v13537_v59, %v13541_v39 }
 0xa7f   : >> { %6656 = vrot.lane.b32.xlu1 %v6282_v52, %s9918_s21  ;;  %6840 = vrot.lane.b32.xlu0 %v6310_v56, %s9921_s27  ;;  %v6312_v32 = vpop.f32.mrb[101].mxu1 }
 0xa80   : >> { %v6314_v61 = vpop.f32.mrb[102].mxu1 }
 0xa81   : >> { %v13545_v63 = vpop.permute.xlu1 %6476  ;;  %v6316_v24 = vpop.f32.mrb[103].mxu1 }
 0xa83   : >> { %6666 = vrot.lane.b32.xlu1 %v6286_v2, %s9918_s21  ;;  %6850 = vrot.lane.b32.xlu0 %v6314_v61, %s9921_s27 }
 0xa85   : >> { %v13549_v19 = vpop.permute.xlu1 %6526 }
 0xa86   : >> { %v6320_v38 = vpop.f32.mrb[104].mxu1 }
 0xa87   : >> { %6718 = vrot.lane.b32.xlu1 %v6292_v34, %s9919_s22  ;;  %6902 = vrot.lane.b32.xlu0 %v6320_v38, %s9922_s12  ;;  %v6322_v48 = vpop.f32.mrb[105].mxu1 }
 0xa88   : >> { %v6324_v57 = vpop.f32.mrb[106].mxu1 }
 0xa89   : >> { %v13553_v43 = vpop.permute.xlu1 %6528  ;;  %v6326_v10 = vpop.f32.mrb[107].mxu1 }
 0xa8b   : >> { %6728 = vrot.lane.b32.xlu1 %v6296_v7, %s9919_s22  ;;  %6912 = vrot.lane.b32.xlu0 %v6324_v57, %s9922_s12 }
 0xa8d   : >> { %v13557_v62 = vpop.permute.xlu1 %6538 }
 0xa8f   : >> { %6780 = vrot.lane.b32.xlu1 %v6302_v54, %s9920_s25  ;;  %6908 = vrot.lane.b32.xlu0 %v13472_v50, %s9922_s12 }
 0xa91   : >> { %v13562_v35 = vpop.permute.xlu1 %6588 }
 0xa93   : >> { %6790 = vrot.lane.b32.xlu1 %v6306_v60, %s9920_s25  ;;  %6472 = vrot.lane.b32.xlu0 %v13465_v41, %s9915_s18  ;;  %v13582_v41 = vpop.permute.xlu0 %6441 }
 0xa95   : >> { %v13567_v3 = vpop.permute.xlu1 %6590 }
 0xa97   : >> { %6842 = vrot.lane.b32.xlu1 %v6312_v32, %s9921_s27  ;;  %6482 = vrot.lane.b32.xlu0 %v13468_v20, %s9915_s18  ;;  %v9027_v20 = vld [vmem:[%s14962_s10 + $0x20] sm:$0xff] }
 0xa99   : >> { %v13572_v14 = vpop.permute.xlu1 %6600 }
 0xa9b   : >> { %6852 = vrot.lane.b32.xlu1 %v6316_v24, %s9921_s27  ;;  %6534 = vrot.lane.b32.xlu0 %v13474_v36, %s9916_s19  ;;  %v13592_v36 = vpop.permute.xlu0 %6474 }
 0xa9d   : >> { %v13577_v50 = vpop.permute.xlu1 %6650 }
 0xa9f   : >> { %6904 = vrot.lane.b32.xlu1 %v6322_v48, %s9922_s12  ;;  %6544 = vrot.lane.b32.xlu0 %v13476_v55, %s9916_s19  ;;  %v13598_v55 = vpop.permute.xlu0 %6536 }
 0xaa1   : >> { %v13584_v46 = vpop.permute.xlu1 %6652 }
 0xaa3   : >> { %6596 = vrot.lane.b32.xlu0 %v13486_v0, %s9917_s20  ;;  %6914 = vrot.lane.b32.xlu1 %v6326_v10, %s9922_s12  ;;  %v13604_v0 = vpop.permute.xlu0 %6598 }
 0xaa4   : >> { %15313 = vst [vmem:[#allocation108_spill] sm:$0xff] %v13604_v0 }
 0xaa5   : >> { %v13594_v47 = vpop.permute.xlu1 %6662 }
 0xaa7   : >> { %6606 = vrot.lane.b32.xlu0 %v13490_v51, %s9917_s20  ;;  %7432 = vperm.xlu1 %9636, %v9027_v20   ;;  %v13610_v2 = vpop.permute.xlu0 %6660  ;;  %v6445_v20 = vadd.f32 %v13533_v58, %v13436_v11 }
 0xaa9   : >> { %v13600_v52 = vpop.permute.xlu1 %6712 }
 0xaaa   : >> { %15312 = vst [vmem:[#allocation107_spill] sm:$0xff] %v13600_v52 }
 0xaab   : >> { %6658 = vrot.lane.b32.xlu0 %v13495_v16, %s9918_s21  ;;  %v13616_v51 = vpop.permute.xlu0 %6722 }
 0xaad   : >> { %v13606_v21 = vpop.permute.xlu1 %6714 }
 0xaaf   : >> { %6668 = vrot.lane.b32.xlu0 %v13497_v29, %s9918_s21  ;;  %v13622_v16 = vpop.permute.xlu0 %6784 }
 0xab1   : >> { %v13612_v9 = vpop.permute.xlu1 %6724 }
 0xab3   : >> { %6720 = vrot.lane.b32.xlu0 %v13503_v28, %s9919_s22  ;;  %v13628_v29 = vpop.permute.xlu0 %6846 }
 0xab5   : >> { %v13618_v26 = vpop.permute.xlu1 %6774 }
 0xab7   : >> { %6730 = vrot.lane.b32.xlu0 %v13505_v1, %s9919_s22 }
 0xab9   : >> { %v13624_v22 = vpop.permute.xlu1 %6776 }
 0xabb   : >> { %6782 = vrot.lane.b32.xlu0 %v13511_v49, %s9920_s25 }
 0xabd   : >> { %v13630_v34 = vpop.permute.xlu1 %6786 }
 0xabf   : >> { %6792 = vrot.lane.b32.xlu0 %v13513_v27, %s9920_s25 }
 0xac1   : >> { %v13634_v28 = vpop.permute.xlu1 %6836  ;;  %v13636_v15 = vpop.permute.xlu0 %6468 }
 0xac2   : >> { %v6485_v10 = vsel %vm1151_vm2, %v13541_v39, %v13636_v15 }
 0xac3   : >> { %6844 = vrot.lane.b32.xlu0 %v13519_v25, %s9921_s27  ;;  %v9028_v25 = vld [vmem:[%s14962_s10 + $0x28] sm:$0xff]  ;;  %v6507_v31 = vadd.f32 %v6485_v10, %v6445_v20  ;;  %v6450_v10 = vadd.f32 %v13582_v41, %v13440_v30  ;;  %v6488_v30 = vsel %vm1151_vm2, %v13592_v36, %v13545_v63 }
 0xac5   : >> { %v13640_v1 = vpop.permute.xlu1 %6838  ;;  %v13642_v7 = vpop.permute.xlu0 %6478 }
 0xac6   : >> { %v6489_v18 = vsel %vm1151_vm2, %v13545_v63, %v13642_v7  ;;  %v6550_v63 = vsel %vm1250_vm3, %v13598_v55, %v13557_v62 }
 0xac7   : >> { %6854 = vrot.lane.b32.xlu0 %v13521_v17, %s9921_s27  ;;  %v6512_v13 = vadd.f32 %v6489_v18, %v6450_v10 }
 0xac9   : >> { %v13646_v49 = vpop.permute.xlu1 %6848  ;;  %v13648_v37 = vpop.permute.xlu0 %6530 }
 0xacb   : >> { %6906 = vrot.lane.b32.xlu0 %v13527_v44, %s9922_s12 }
 0xacd   : >> { %v13652_v27 = vpop.permute.xlu1 %6900  ;;  %v13654_v12 = vpop.permute.xlu0 %6540 }
 0xace   : >> { %v6551_v39 = vsel %vm1250_vm3, %v13557_v62, %v13654_v12  ;;  %v6612_v62 = vsel %vm1349_vm4, %v13604_v0, %v13572_v14 }
 0xacf   : >> { %6916 = vrot.lane.b32.xlu0 %v13529_v23, %s9922_s12 }
 0xad1   : >> { %v13661_v42 = vpop.permute.xlu1 %6910  ;;  %v13663_v17 = vpop.permute.xlu0 %6592 }
 0xad2   : >> { %15314 = vst [vmem:[#allocation109_spill] sm:$0xff] %v13663_v17  ;;  %v6609_v11 = vsel %vm1349_vm4, %v13567_v3, %v13663_v17 }
 0xad3   : >> { %7437 = vperm.xlu0 %9635, %v9028_v25   ;;  %v6547_v25 = vsel %vm1250_vm3, %v13553_v43, %v13648_v37 }
 0xad4   : >> { %v6569_v20 = vadd.f32 %v6547_v25, %v6507_v31  ;;  %v6608_v31 = vsel %vm1349_vm4, %v13562_v35, %v13567_v3  ;;  %v6574_v25 = vadd.f32 %v6551_v39, %v6512_v13  ;;  %v6670_v3 = vsel %vm1448_vm5, %v13577_v50, %v13584_v46 }
 0xad5   : >> { %v13665_v54 = vpop.permute.xlu1 %6898  ;;  %v13667_v40 = vpop.permute.xlu0 %6602 }
 0xad6   : >> { %v6631_v17 = vadd.f32 %v6609_v11, %v6569_v20 }
 0xad9   : >> { %v13669_v44 = vpop.permute.xlu1 %6470  ;;  %v13671_v60 = vpop.permute.xlu0 %6654 }
 0xada   : >> { %v6671_v59 = vsel %vm1448_vm5, %v13584_v46, %v13671_v60  ;;  %v6732_v46 = vsel %vm1547_vm6, %v13600_v52, %v13606_v21 }
 0xadb   : >> { %v6693_v11 = vadd.f32 %v6671_v59, %v6631_v17 }
 0xadd   : >> { %v13673_v56 = vpop.permute.xlu1 %6480  ;;  %v13675_v23 = vpop.permute.xlu0 %6664 }
 0xade   : >> { %v6675_v10 = vsel %vm1448_vm5, %v13594_v47, %v13675_v23 }
 0xae1   : >> { %v13677_v32 = vpop.permute.xlu1 %6532  ;;  %v13679_v61 = vpop.permute.xlu0 %6716 }
 0xae2   : >> { %v6733_v18 = vsel %vm1547_vm6, %v13606_v21, %v13679_v61  ;;  %v6794_v21 = vsel %vm1646_vm7, %v13618_v26, %v13624_v22 }
 0xae3   : >> { %v6755_v59 = vadd.f32 %v6733_v18, %v6693_v11 }
 0xae5   : >> { %v13681_v24 = vpop.permute.xlu1 %6542  ;;  %v13683_v38 = vpop.permute.xlu0 %6726 }
 0xae6   : >> { %15315 = vst [vmem:[#allocation110_spill] sm:$0xff] %v13681_v24  ;;  %v6506_v24 = vadd.f32 %v6484_v33, %v6444_v53  ;;  %v6449_v53 = vadd.f32 %v13582_v41, %v13438_v45  ;;  %v6737_v39 = vsel %vm1547_vm6, %v13612_v9, %v13683_v38 }
 0xae8   : >> { %v6511_v45 = vadd.f32 %v6488_v30, %v6449_v53 }
 0xae9   : >> { %v13685_v48 = vpop.permute.xlu1 %6594  ;;  %v13687_v57 = vpop.permute.xlu0 %6778 }
 0xaea   : >> { %15316 = vst [vmem:[#allocation111_spill] sm:$0xff] %v13685_v48  ;;  %v6795_v20 = vsel %vm1646_vm7, %v13624_v22, %v13687_v57  ;;  %v6856_v22 = vsel %vm1745_vm8, %v13634_v28, %v13640_v1 }
 0xaeb   : >> { %v6817_v53 = vadd.f32 %v6795_v20, %v6755_v59 }
 0xaed   : >> { %v13697_v8 = vpop.permute.xlu1 %6604  ;;  %v13699_v5 = vpop.permute.xlu0 %6788 }
 0xaee   : >> { %15317 = vst [vmem:[#allocation112_spill] sm:$0xff] %v13697_v8  ;;  %v6546_v8 = vsel %vm1250_vm3, %v13549_v19, %v13553_v43  ;;  %v6613_v43 = vsel %vm1349_vm4, %v13572_v14, %v13667_v40  ;;  %v6674_v14 = vsel %vm1448_vm5, %v13610_v2, %v13594_v47  ;;  %v6736_v47 = vsel %vm1547_vm6, %v13616_v51, %v13612_v9 }
 0xaef   : >> { %v6568_v33 = vadd.f32 %v6546_v8, %v6506_v24  ;;  %v6636_v13 = vadd.f32 %v6613_v43, %v6574_v25  ;;  %v6798_v9 = vsel %vm1646_vm7, %v13622_v16, %v13630_v34 }
 0xaf1   : >> { %v13723_v4 = vpop.permute.xlu1 %6656  ;;  %v13725_v48 = vpop.permute.xlu0 %6840  ;;  %v6630_v8 = vadd.f32 %v6608_v31, %v6568_v33  ;;  %v6573_v31 = vadd.f32 %v6550_v63, %v6511_v45  ;;  %v6698_v18 = vadd.f32 %v6675_v10, %v6636_v13  ;;  %v6799_v33 = vsel %vm1646_vm7, %v13630_v34, %v13699_v5 }
 0xaf2   : >> { %v6857_v30 = vsel %vm1745_vm8, %v13640_v1, %v13725_v48  ;;  %v6918_v1 = vsel %vm15287_vm0, %v13665_v54, %v13652_v27 }
 0xaf3   : >> { %v6692_v43 = vadd.f32 %v6670_v3, %v6630_v8  ;;  %v6635_v25 = vadd.f32 %v6612_v62, %v6573_v31  ;;  %v6760_v52 = vadd.f32 %v6737_v39, %v6698_v18  ;;  %v6879_v0 = vadd.f32 %v6857_v30, %v6817_v53 }
 0xaf5   : >> { %v13753_v17 = vpop.permute.xlu1 %6666  ;;  %v13755_v24 = vpop.permute.xlu0 %6850  ;;  %v6754_v11 = vadd.f32 %v6732_v46, %v6692_v43  ;;  %v6697_v45 = vadd.f32 %v6674_v14, %v6635_v25  ;;  %v6822_v13 = vadd.f32 %v6799_v33, %v6760_v52  ;;  %v6860_v52 = vsel %vm1745_vm8, %v13628_v29, %v13646_v49 }
 0xaf6   : >> { %v6861_v10 = vsel %vm1745_vm8, %v13646_v49, %v13755_v24  ;;  %v6446_v25 = vadd.f32 %v13533_v58, %v13479_v6  ;;  %v6486_v49 = vsel %vm1151_vm2, %v13636_v15, %v13669_v44 }
 0xaf7   : >> { %v6816_v8 = vadd.f32 %v6794_v21, %v6754_v11  ;;  %v6759_v62 = vadd.f32 %v6736_v47, %v6697_v45  ;;  %v6884_v39 = vadd.f32 %v6861_v10, %v6822_v13  ;;  %v6548_v45 = vsel %vm1250_vm3, %v13648_v37, %v13677_v32 }
 0xaf8   : >> { %v6508_v13 = vadd.f32 %v6486_v49, %v6446_v25 }
 0xaf9   : >> { %v13778_v63 = vpop.permute.xlu1 %6718  ;;  %v13780_v3 = vpop.permute.xlu0 %6902  ;;  %v6878_v46 = vadd.f32 %v6856_v22, %v6816_v8  ;;  %v6821_v34 = vadd.f32 %v6798_v9, %v6759_v62 }
 0xafa   : >> { %v6919_v20 = vsel %vm15318_vm13, %v13652_v27, %v13780_v3 }
 0xafb   : >> { %v6941_v59 = vadd.f32 %v6919_v20, %v6879_v0  ;;  %v6940_v43 = vadd.f32 %v6918_v1, %v6878_v46  ;;  %v6883_v27 = vadd.f32 %v6860_v52, %v6821_v34  ;;  %v15321_v1 = vld [vmem:[#allocation111_spill] sm:$0xff]  ;;  %v15324_v34 = vld [vmem:[#allocation110_spill] sm:$0xff] }
 0xafc   : >> { %v15323_v46 = vld [vmem:[#allocation103_spill] sm:$0xff] }
 0xafd   : >> { %v13800_v30 = vpop.permute.xlu1 %6728  ;;  %v13802_v31 = vpop.permute.xlu0 %6912  ;;  %v6961_v18 = vmul.f32 0.01, %v6941_v59  ;;  %vm6951_vm11 = vcmp.ge.f32.partialorder %v6941_v59, 0.0  ;;  %v6960_v47 = vmul.f32 0.01, %v6940_v43  ;;  %vm6950_vm13 = vcmp.ge.f32.partialorder %v6940_v43, 0.0 }
 0xafe   : >> { %v6923_v0 = vsel %vm15319_vm1, %v13661_v42, %v13802_v31  ;;  %v6451_v37 = vadd.f32 %v13582_v41, %v15323_v46 }
 0xaff   : >> { %v6946_v53 = vadd.f32 %v6923_v0, %v6884_v39  ;;  %v6971_v10 = vsel %vm6951_vm11, %v6941_v59, %v6961_v18  ;;  %v15322_v59 = vld [vmem:[#allocation109_spill] sm:$0xff]  ;;  %v6570_v39 = vadd.f32 %v6548_v45, %v6508_v13  ;;  %v6970_v52 = vsel %vm6950_vm13, %v6940_v43, %v6960_v47  ;;  %v13850_v43 = vld [vmem:[%s14961_s9 + $0x48] sm:$0xff]   ;;  %vm15328_vm11 = vmmov %vm15319_vm1 }
 0xb00   : >> { %v6610_v62 = vsel %vm1349_vm4, %v15322_v59, %v15321_v1  ;;  %v6552_v18 = vsel %vm1250_vm3, %v13654_v12, %v15324_v34  ;;  %vm15336_vm13 = vmmov %vm15319_vm1 }
 0xb01   : >> { %v6966_v14 = vmul.f32 0.01, %v6946_v53  ;;  %v13810_v21 = vpop.permute.xlu1 %6780  ;;  %v13812_v33 = vpop.permute.xlu0 %6908  ;;  %vm6956_vm15 = vcmp.ge.f32.partialorder %v6946_v53, 0.0 }
 0xb02   : >> { %v6922_v11 = vsel %vm15320_vm12, %v13812_v33, %v13661_v42  ;;  %v6490_v42 = vsel %vm1151_vm2, %v13642_v7, %v13673_v56  ;;  %v6796_v45 = vsel %vm1646_vm7, %v13687_v57, %v13810_v21 }
 0xb03   : >> { %v6945_v22 = vadd.f32 %v6922_v11, %v6883_v27  ;;  %v6976_v20 = vsel %vm6956_vm15, %v6946_v53, %v6966_v14  ;;  %v6672_v53 = vsel %vm1448_vm5, %v13671_v60, %v13723_v4  ;;  %v6513_v27 = vadd.f32 %v6490_v42, %v6451_v37  ;;  %v15325_v11 = vld [vmem:[#allocation112_spill] sm:$0xff] }
 0xb04   : >> { %v6981_v8 = vpack.c.bf16 %v6976_v20, %v6971_v10  ;;  %v6632_v14 = vadd.f32 %v6610_v62, %v6570_v39  ;;  %v6614_v12 = vsel %vm1349_vm4, %v13667_v40, %v15325_v11  ;;  %v6734_v60 = vsel %vm1547_vm6, %v13679_v61, %v13778_v63 }
 0xb05   : >> { %vm6955_vm0 = vcmp.ge.f32.partialorder %v6945_v22, 0.0  ;;  %v6965_v6 = vmul.f32 0.01, %v6945_v22  ;;  %v13825_v9 = vpop.permute.xlu1 %6790  ;;  %v13827_v15 = vpop.permute.xlu0 %6472  ;;  %v6575_v47 = vadd.f32 %v6552_v18, %v6513_v27  ;;  %v15326_v10 = vmov 0.0  }
 0xb06   : >> { %7079 = vmatprep.subr.bf16.mxu1 %v6981_v8  ;;  %v6676_v20 = vsel %vm1448_vm5, %v13675_v23, %v13753_v17  ;;  %v15327_v42 = vmov 0   ;;  %v6800_v62 = vsel %vm1646_vm7, %v13699_v5, %v13825_v9 }
 0xb07   : >> { %v6975_v0 = vsel %vm6955_vm0, %v6945_v22, %v6965_v6  ;;  %v6694_v22 = vadd.f32 %v6672_v53, %v6632_v14  ;;  %v6637_v8 = vadd.f32 %v6614_v12, %v6575_v47  ;;  %v6738_v6 = vsel %vm1547_vm6, %v13683_v38, %v13800_v30  ;;  %v13884_v38 = vld [vmem:[%s14961_s9 + $0x50] sm:$0xff]   ;;  %v13903_v47 = vld [vmem:[%s14961_s9 + $0x58] sm:$0xff]   ;;  %vm15337_vm0 = vmmov %vm15319_vm1 }
 0xb08   : >> { %v6980_v7 = vpack.c.bf16 %v6975_v0, %v6970_v52 }
 0xb09   : >> { %v13843_v25 = vpop.permute.xlu1 %6842  ;;  %v13845_v49 = vpop.permute.xlu0 %6482  ;;  %v6756_v13 = vadd.f32 %v6734_v60, %v6694_v22  ;;  %v6699_v59 = vadd.f32 %v6676_v20, %v6637_v8 }
 0xb0a   : >> { %7080 = vmatpush1.bf16.msra.mxu1 %v6980_v7  ;;  %v6858_v23 = vsel %vm1745_vm8, %v13725_v48, %v13843_v25 }
 0xb0b   : >> { %9229 = vmatprep.subr.bf16.mxu1 %v15326_v10  ;;  %v6818_v57 = vadd.f32 %v6796_v45, %v6756_v13  ;;  %v6761_v46 = vadd.f32 %v6738_v6, %v6699_v59  ;;  %v13917_v13 = vld [vmem:[%s14961_s9 + $0x60] sm:$0xff]   ;;  %v13925_v59 = vld [vmem:[%s14961_s9 + $0x68] sm:$0xff]  }
 0xb0d   : >> { %v13865_v40 = vpop.permute.xlu1 %6852  ;;  %9038 = vmatmul.mubr.msk.bf16.vlgmr.msra.gmra.mrb[108].mxu1 %vm2035_vm14, %v13850_v43  ;;  %v6535_v61 = vpop.permute.xlu0 %6534  ;;  %v6880_v37 = vadd.f32 %v6858_v23, %v6818_v57  ;;  %v6823_v18 = vadd.f32 %v6800_v62, %v6761_v46  ;;  %v6487_v62 = vsel %vm1151_vm2, %v13669_v44, %v13827_v15  ;;  %v15329_v46 = vld [vmem:[#allocation106_spill] sm:$0xff] }
 0xb0e   : >> { %7121 = vmatprep.mubr.bf16.mxu1 %v15327_v42  ;;  %v6862_v48 = vsel %vm1745_vm8, %v13755_v24, %v13865_v40 }
 0xb0f   : >> { %v6885_v53 = vadd.f32 %v6862_v48, %v6823_v18  ;;  %v15330_v48 = vld [vmem:[#allocation101_spill] sm:$0xff]  ;;  %v15331_v18 = vld [vmem:[#allocation104_spill] sm:$0xff] }
 0xb11   : >> { %v13879_v39 = vpop.permute.xlu1 %6904  ;;  %v6545_v52 = vpop.permute.xlu0 %6544 }
 0xb12   : >> { %v6920_v0 = vsel %vm15319_vm1, %v13780_v3, %v13879_v39  ;;  %vm15338_vm1 = vmmov %vm15337_vm0 }
 0xb13   : >> { %v6942_v5 = vadd.f32 %v6920_v0, %v6880_v37  ;;  %v6504_v37 = vsel %vm1151_vm2, %v13827_v15, %v15329_v46  ;;  %v6448_v0 = vadd.f32 %v13533_v58, %v15330_v48  ;;  %v13947_v15 = vld [vmem:[%s14961_s9 + $0x70] sm:$0xff]  }
 0xb14   : >> { %v15333_v46 = vld [vmem:[#allocation105_spill] sm:$0xff] }
 0xb15   : >> { %v13892_v7 = vpop.permute.xlu1 %6914  ;;  %9039 = vmatmul.mubr.msk.bf16.gmra.mrb[112].mxu1 %vm2035_vm14, %v13884_v38  ;;  %v6597_v27 = vpop.permute.xlu0 %6596  ;;  %v6962_v24 = vmul.f32 0.01, %v6942_v5  ;;  %vm6952_vm15 = vcmp.ge.f32.partialorder %v6942_v5, 0.0  ;;  %v6510_v44 = vadd.f32 %v6504_v37, %v6448_v0  ;;  %v6452_v37 = vadd.f32 %v13582_v41, %v15333_v46 }
 0xb16   : >> { %v6924_v14 = vsel %vm15328_vm11, %v13802_v31, %v13892_v7  ;;  %7131 = vmatprep.mubr.bf16.mxu1 %v15327_v42  ;;  %vm15339_vm11 = vmmov %vm15337_vm0 }
 0xb17   : >> { %v6947_v12 = vadd.f32 %v6924_v14, %v6885_v53  ;;  %v13905_v22 = vsel %vm6952_vm15, %v6942_v5, %v6962_v24  ;;  %v6447_v5 = vadd.f32 %v13533_v58, %v15331_v18  ;;  %v6549_v53 = vsel %vm1250_vm3, %v13677_v32, %v6535_v61 }
 0xb18   : >> { %v6566_v14 = vsel %vm1250_vm3, %v6535_v61, %v13549_v19  ;;  %v6505_v58 = vsel %vm1151_vm2, %v13845_v49, %v13592_v36  ;;  %v6611_v32 = vsel %vm1349_vm4, %v15321_v1, %v6597_v27  ;;  %v6628_v19 = vsel %vm1349_vm4, %v6597_v27, %v13562_v35  ;;  %v15332_v61 = vld [vmem:[#allocation102_spill] sm:$0xff] }
 0xb19   : >> { %vm6957_vm12 = vcmp.ge.f32.partialorder %v6947_v12, 0.0  ;;  %v6967_v3 = vmul.f32 0.01, %v6947_v12  ;;  %v6607_v60 = vpop.permute.xlu0 %6606  ;;  %v6509_v24 = vadd.f32 %v6487_v62, %v6447_v5  ;;  %v6453_v62 = vadd.f32 %v13582_v41, %v15332_v61 }
 0xb1a   : >> { %v6572_v0 = vadd.f32 %v6566_v14, %v6510_v44  ;;  %v6567_v36 = vsel %vm1250_vm3, %v6545_v52, %v13598_v55 }
 0xb1b   : >> { %v13907_v20 = vsel %vm6957_vm12, %v6947_v12, %v6967_v3  ;;  %v6491_v3 = vsel %vm1151_vm2, %v13673_v56, %v13845_v49  ;;  %v6571_v48 = vadd.f32 %v6549_v53, %v6509_v24  ;;  %v6553_v56 = vsel %vm1250_vm3, %v15324_v34, %v6545_v52  ;;  %v15334_v53 = vld [vmem:[#allocation108_spill] sm:$0xff]  ;;  %v15335_v52 = vld [vmem:[#allocation107_spill] sm:$0xff] }
 0xb1c   : >> { %v6982_v31 = vpack.c.bf16 %v13907_v20, %v13905_v22  ;;  %v6514_v49 = vadd.f32 %v6491_v3, %v6452_v37  ;;  %v6515_v27 = vadd.f32 %v6505_v58, %v6453_v62  ;;  %v6634_v5 = vadd.f32 %v6628_v19, %v6572_v0  ;;  %v13993_v62 = vld [vmem:[%s14961_s9 + $0x78] sm:$0xff]  }
 0xb1d   : >> { %9040 = vmatmul.mubr.msk.bf16.gmra.mrb[116].mxu1 %vm2035_vm14, %v13903_v47  ;;  %v6659_v45 = vpop.permute.xlu0 %6658  ;;  %v6633_v18 = vadd.f32 %v6611_v32, %v6571_v48  ;;  %v6615_v34 = vsel %vm1349_vm4, %v15325_v11, %v6607_v60  ;;  %v6629_v55 = vsel %vm1349_vm4, %v6607_v60, %v15334_v53 }
 0xb1e   : >> { %7141 = vmatprep.mubr.bf16.mxu1 %v15327_v42  ;;  %v6673_v1 = vsel %vm1448_vm5, %v13723_v4, %v6659_v45  ;;  %v6690_v35 = vsel %vm1448_vm5, %v6659_v45, %v13577_v50  ;;  %v6576_v45 = vadd.f32 %v6553_v56, %v6514_v49  ;;  %v6577_v14 = vadd.f32 %v6567_v36, %v6515_v27 }
 0xb1f   : >> { %v6695_v24 = vadd.f32 %v6673_v1, %v6633_v18  ;;  %v6696_v44 = vadd.f32 %v6690_v35, %v6634_v5 }
 0xb20   : >> { %v6638_v58 = vadd.f32 %v6615_v34, %v6576_v45 }
 0xb21   : >> { %v6669_v8 = vpop.permute.xlu0 %6668 }
 0xb22   : >> { %v6677_v3 = vsel %vm1448_vm5, %v13753_v17, %v6669_v8  ;;  %v6691_v11 = vsel %vm1448_vm5, %v6669_v8, %v13610_v2 }
 0xb23   : >> { %v6700_v8 = vadd.f32 %v6677_v3, %v6638_v58 }
 0xb25   : >> { %9041 = vmatmul.mubr.msk.bf16.gmra.mrb[120].mxu1 %vm2035_vm14, %v13917_v13  ;;  %v6721_v6 = vpop.permute.xlu0 %6720 }
 0xb26   : >> { %7151 = vmatprep.mubr.bf16.mxu1 %v15327_v42  ;;  %v6735_v4 = vsel %vm1547_vm6, %v13778_v63, %v6721_v6  ;;  %v6752_v50 = vsel %vm1547_vm6, %v6721_v6, %v15335_v52  ;;  %v6639_v6 = vadd.f32 %v6629_v55, %v6577_v14 }
 0xb27   : >> { %v6757_v32 = vadd.f32 %v6735_v4, %v6695_v24  ;;  %v6758_v19 = vadd.f32 %v6752_v50, %v6696_v44  ;;  %v9678_v24 = vld [vmem:[%s14961_s9 + $0x88] sm:$0xff]  }
 0xb29   : >> { %v6731_v23 = vpop.permute.xlu0 %6730 }
 0xb2a   : >> { %v6739_v17 = vsel %vm1547_vm6, %v13800_v30, %v6731_v23  ;;  %v6753_v2 = vsel %vm1547_vm6, %v6731_v23, %v13616_v51 }
 0xb2b   : >> { %v6762_v30 = vadd.f32 %v6739_v17, %v6700_v8 }
 0xb2d   : >> { %9042 = vmatmul.mubr.msk.bf16.gmra.mrb[124].mxu1 %vm2035_vm14, %v13925_v59  ;;  %v6783_v57 = vpop.permute.xlu0 %6782 }
 0xb2e   : >> { %7161 = vmatprep.mubr.bf16.mxu1 %v15327_v42  ;;  %v6797_v60 = vsel %vm1646_vm7, %v13810_v21, %v6783_v57  ;;  %v6814_v63 = vsel %vm1646_vm7, %v6783_v57, %v13618_v26  ;;  %v6701_v57 = vadd.f32 %v6691_v11, %v6639_v6 }
 0xb2f   : >> { %v6819_v46 = vadd.f32 %v6797_v60, %v6757_v32  ;;  %v6820_v37 = vadd.f32 %v6814_v63, %v6758_v19 }
 0xb30   : >> { %v6763_v56 = vadd.f32 %v6753_v2, %v6701_v57 }
 0xb31   : >> { %v6793_v12 = vpop.permute.xlu0 %6792 }
 0xb32   : >> { %v6801_v48 = vsel %vm1646_vm7, %v13825_v9, %v6793_v12  ;;  %v6815_v0 = vsel %vm1646_vm7, %v6793_v12, %v13622_v16 }
 0xb33   : >> { %v6824_v12 = vadd.f32 %v6801_v48, %v6762_v30  ;;  %v6825_v1 = vadd.f32 %v6815_v0, %v6763_v56 }
 0xb35   : >> { %9043 = vmatmul.mubr.msk.bf16.gmra.mrb[128].mxu1 %vm2035_vm14, %v13947_v15  ;;  %v6845_v41 = vpop.permute.xlu0 %6844 }
 0xb36   : >> { %7171 = vmatprep.mubr.bf16.mxu1 %v15327_v42  ;;  %v6859_v21 = vsel %vm1745_vm8, %v13843_v25, %v6845_v41  ;;  %v6876_v26 = vsel %vm1745_vm8, %v6845_v41, %v13634_v28 }
 0xb37   : >> { %v6881_v36 = vadd.f32 %v6859_v21, %v6819_v46  ;;  %v6882_v51 = vadd.f32 %v6876_v26, %v6820_v37 }
 0xb39   : >> { %v6855_v61 = vpop.permute.xlu0 %6854 }
 0xb3a   : >> { %v6863_v28 = vsel %vm1745_vm8, %v13865_v40, %v6855_v61  ;;  %v6877_v23 = vsel %vm1745_vm8, %v6855_v61, %v13628_v29  ;;  %v9677_v40 = vld [vmem:[%s14961_s9 + $0x80] sm:$0xff]  }
 0xb3b   : >> { %v6886_v27 = vadd.f32 %v6863_v28, %v6824_v12  ;;  %v6887_v18 = vadd.f32 %v6877_v23, %v6825_v1 }
 0xb3d   : >> { %9044 = vmatmul.mubr.msk.bf16.gmra.mrb[132].mxu1 %vm2035_vm14, %v13993_v62  ;;  %v6907_v25 = vpop.permute.xlu0 %6906 }
 0xb3e   : >> { %v6921_v9 = vsel %vm15336_vm13, %v13879_v39, %v6907_v25  ;;  %v6938_v16 = vsel %vm15337_vm0, %v6907_v25, %v13665_v54  ;;  %7181 = vmatprep.mubr.bf16.mxu1 %v15327_v42 }
 0xb3f   : >> { %v6943_v35 = vadd.f32 %v6921_v9, %v6881_v36  ;;  %v6944_v49 = vadd.f32 %v6938_v16, %v6882_v51 }
 0xb41   : >> { %v6917_v5 = vpop.permute.xlu0 %6916  ;;  %v6963_v54 = vmul.f32 0.01, %v6943_v35  ;;  %v6964_v41 = vmul.f32 0.01, %v6944_v49  ;;  %vm6954_vm15 = vcmp.ge.f32.partialorder %v6944_v49, 0.0  ;;  %vm6953_vm12 = vcmp.ge.f32.partialorder %v6943_v35, 0.0 }
 0xb42   : >> { %v6925_v29 = vsel %vm15338_vm1, %v13892_v7, %v6917_v5  ;;  %v6939_v39 = vsel %vm15339_vm11, %v6917_v5, %v13812_v33  ;;  %vm15341_vm11 = vmmov %vm15338_vm1 }
 0xb43   : >> { %v6948_v34 = vadd.f32 %v6925_v29, %v6886_v27  ;;  %v6949_v53 = vadd.f32 %v6939_v39, %v6887_v18  ;;  %v6973_v52 = vsel %vm6953_vm12, %v6943_v35, %v6963_v54  ;;  %v6974_v7 = vsel %vm6954_vm15, %v6944_v49, %v6964_v41  ;;  %vm15342_vm15 = vmmov %vm15338_vm1 }
 0xb44   : >> { %vm15343_vm12 = vmmov %vm15338_vm1 }
 0xb45   : >> { %vm6959_vm13 = vcmp.ge.f32.partialorder %v6949_v53, 0.0  ;;  %v6968_v55 = vmul.f32 0.01, %v6948_v34  ;;  %v6969_v4 = vmul.f32 0.01, %v6949_v53  ;;  %9045 = vmatmul.mubr.msk.bf16.gmra.mrb[136].mxu1 %vm2035_vm14, %v9677_v40  ;;  %vm6958_vm0 = vcmp.ge.f32.partialorder %v6948_v34, 0.0 }
 0xb46   : >> { %7191 = vmatprep.mubr.bf16.mxu1 %v15327_v42 }
 0xb47   : >> { %v6978_v50 = vsel %vm6958_vm0, %v6948_v34, %v6968_v55  ;;  %v6979_v45 = vsel %vm6959_vm13, %v6949_v53, %v6969_v4  ;;  %vm15344_vm13 = vmmov %vm15338_vm1 }
 0xb48   : >> { %v6983_v14 = vpack.c.bf16 %v6978_v50, %v6973_v52  ;;  %v6984_v33 = vpack.c.bf16 %v6979_v45, %v6974_v7 }
 0xb4a   : >> { %7202 = vmatprep.subr.bf16.mxu0 %v6983_v14  ;;  %9230 = vmatpush3.bf16.msra.mxu1 %v6984_v33 }
 0xb4b   : >> { %7203 = vmatpush1.bf16.msra.mxu0 %v6982_v31 }
 0xb4d   : >> { %9046 = vmatmul.mubr.msk.bf16.gmra.mrb[140].mxu1 %vm2035_vm14, %v9678_v24 }
 0xb4e   : >> { %9047 = vmatmul.mubr.msk.bf16.vlgmr.msra.gmra.mrb[112].mxu0 %vm2035_vm14, %v13850_v43  ;;  %9231 = vmatprep.mubr.msk.bf16.mxu1 %vm9914_vm9, %v15326_v10 }
 0xb4f   : >> { %7244 = vmatprep.mubr.bf16.mxu0 %v15327_v42 }
 0xb55   : >> { %9232 = vmatmul.mubr.msk.bf16.vlgmr.msra.gmra.mrb[144].mxu1 %vm2035_vm14, %v13850_v43 }
 0xb56   : >> { %9048 = vmatmul.mubr.msk.bf16.gmra.mrb[116].mxu0 %vm2035_vm14, %v13884_v38  ;;  %9235 = vmatprep.mubr.msk.bf16.mxu1 %vm9914_vm9, %v15326_v10 }
 0xb57   : >> { %7254 = vmatprep.mubr.bf16.mxu0 %v15327_v42 }
 0xb5d   : >> { %9236 = vmatmul.mubr.msk.bf16.gmra.mrb[148].mxu1 %vm2035_vm14, %v13884_v38 }
 0xb5e   : >> { %9049 = vmatmul.mubr.msk.bf16.gmra.mrb[120].mxu0 %vm2035_vm14, %v13903_v47  ;;  %9239 = vmatprep.mubr.msk.bf16.mxu1 %vm9914_vm9, %v15326_v10 }
 0xb5f   : >> { %7264 = vmatprep.mubr.bf16.mxu0 %v15327_v42 }
 0xb65   : >> { %9240 = vmatmul.mubr.msk.bf16.gmra.mrb[152].mxu1 %vm2035_vm14, %v13903_v47 }
 0xb66   : >> { %9050 = vmatmul.mubr.msk.bf16.gmra.mrb[124].mxu0 %vm2035_vm14, %v13917_v13  ;;  %9243 = vmatprep.mubr.msk.bf16.mxu1 %vm9914_vm9, %v15326_v10 }
 0xb67   : >> { %7274 = vmatprep.mubr.bf16.mxu0 %v15327_v42 }
 0xb6d   : >> { %9244 = vmatmul.mubr.msk.bf16.gmra.mrb[156].mxu1 %vm2035_vm14, %v13917_v13 }
 0xb6e   : >> { %9051 = vmatmul.mubr.msk.bf16.gmra.mrb[128].mxu0 %vm2035_vm14, %v13925_v59  ;;  %9247 = vmatprep.mubr.msk.bf16.mxu1 %vm9914_vm9, %v15326_v10 }
 0xb6f   : >> { %7284 = vmatprep.mubr.bf16.mxu0 %v15327_v42 }
 0xb75   : >> { %9248 = vmatmul.mubr.msk.bf16.gmra.mrb[160].mxu1 %vm2035_vm14, %v13925_v59 }
 0xb76   : >> { %9052 = vmatmul.mubr.msk.bf16.gmra.mrb[132].mxu0 %vm2035_vm14, %v13947_v15  ;;  %9251 = vmatprep.mubr.msk.bf16.mxu1 %vm9914_vm9, %v15326_v10 }
 0xb77   : >> { %7294 = vmatprep.mubr.bf16.mxu0 %v15327_v42 }
 0xb7d   : >> { %9252 = vmatmul.mubr.msk.bf16.gmra.mrb[164].mxu1 %vm2035_vm14, %v13947_v15 }
 0xb7e   : >> { %9053 = vmatmul.mubr.msk.bf16.gmra.mrb[136].mxu0 %vm2035_vm14, %v13993_v62  ;;  %9255 = vmatprep.mubr.msk.bf16.mxu1 %vm9914_vm9, %v15326_v10 }
 0xb7f   : >> { %7304 = vmatprep.mubr.bf16.mxu0 %v15327_v42 }
 0xb85   : >> { %9256 = vmatmul.mubr.msk.bf16.gmra.mrb[168].mxu1 %vm2035_vm14, %v13993_v62 }
 0xb86   : >> { %9054 = vmatmul.mubr.msk.bf16.gmra.mrb[140].mxu0 %vm2035_vm14, %v9677_v40  ;;  %9259 = vmatprep.mubr.msk.bf16.mxu1 %vm9914_vm9, %v15326_v10 }
 0xb87   : >> { %7314 = vmatprep.mubr.bf16.mxu0 %v15327_v42 }
 0xb8d   : >> { %9260 = vmatmul.mubr.msk.bf16.gmra.mrb[172].mxu1 %vm2035_vm14, %v9677_v40 }
 0xb8e   : >> { %9055 = vmatmul.mubr.msk.bf16.gmra.mrb[144].mxu0 %vm2035_vm14, %v9678_v24  ;;  %9263 = vmatprep.mubr.msk.bf16.mxu1 %vm9914_vm9, %v15326_v10  ;;  %vm15340_vm9 = vmmov %vm15338_vm1 }
 0xb95   : >> { %9264 = vmatmul.mubr.msk.bf16.gmra.mrb[176].mxu1 %vm2035_vm14, %v9678_v24 }
 0xbe0   : >> { %v14092_v43 = vpop.f32.mrb[108].mxu1 }
 0xbe1   : >> { %v14094_v38 = vpop.f32.mrb[109].mxu1 }
 0xbe2   : >> { %v14096_v47 = vpop.f32.mrb[110].mxu1 }
 0xbe3   : >> { %v14098_v22 = vpop.f32.mrb[111].mxu1 }
 0xbe8   : >> { %v7123_v20 = vpop.f32.mrb[112].mxu1 }
 0xbe9   : >> { %v7125_v31 = vpop.f32.mrb[113].mxu1  ;;  %7460 = vrot.lane.b32.xlu1 %v7123_v20, %s9915_s18 }
 0xbea   : >> { %7462 = vrot.lane.b32.xlu0 %v7125_v31, %s9915_s18  ;;  %v7127_v42 = vpop.f32.mrb[114].mxu1 }
 0xbeb   : >> { %v7129_v13 = vpop.f32.mrb[115].mxu1 }
 0xbf0   : >> { %v7133_v59 = vpop.f32.mrb[116].mxu1 }
 0xbf1   : >> { %v7135_v10 = vpop.f32.mrb[117].mxu1 }
 0xbf2   : >> { %v14102_v15 = vpop.f32.mrb[118].mxu1 }
 0xbf3   : >> { %v7139_v44 = vpop.f32.mrb[119].mxu1 }
 0xbf8   : >> { %v14104_v3 = vpop.f32.mrb[120].mxu1 }
 0xbf9   : >> { %v14106_v11 = vpop.f32.mrb[121].mxu1 }
 0xbfa   : >> { %v14108_v60 = vpop.f32.mrb[122].mxu1 }
 0xbfb   : >> { %v14110_v63 = vpop.f32.mrb[123].mxu1 }
 0xc00   : >> { %v14112_v58 = vpop.f32.mrb[124].mxu1 }
 0xc01   : >> { %v14114_v6 = vpop.f32.mrb[125].mxu1 }
 0xc02   : >> { %v14116_v32 = vpop.f32.mrb[126].mxu1 }
 0xc03   : >> { %v14118_v19 = vpop.f32.mrb[127].mxu1 }
 0xc08   : >> { %v14120_v61 = vpop.f32.mrb[128].mxu1 }
 0xc09   : >> { %v14122_v62 = vpop.f32.mrb[129].mxu1 }
 0xc0a   : >> { %v14124_v17 = vpop.f32.mrb[130].mxu1 }
 0xc0b   : >> { %v14126_v2 = vpop.f32.mrb[131].mxu1 }
 0xc10   : >> { %v14128_v21 = vpop.f32.mrb[132].mxu1 }
 0xc11   : >> { %v14130_v26 = vpop.f32.mrb[133].mxu1 }
 0xc12   : >> { %v14132_v8 = vpop.f32.mrb[134].mxu1 }
 0xc13   : >> { %v14134_v57 = vpop.f32.mrb[135].mxu1 }
 0xc18   : >> { %v14136_v46 = vpop.f32.mrb[136].mxu1 }
 0xc19   : >> { %v14138_v37 = vpop.f32.mrb[137].mxu1 }
 0xc1a   : >> { %v14140_v48 = vpop.f32.mrb[138].mxu1 }
 0xc1b   : >> { %v14142_v0 = vpop.f32.mrb[139].mxu1 }
 0xc20   : >> { %v14144_v30 = vpop.f32.mrb[140].mxu1 }
 0xc21   : >> { %v14146_v56 = vpop.f32.mrb[112].mxu0  ;;  %v14148_v36 = vpop.f32.mrb[141].mxu1 }
 0xc22   : >> { %v14150_v51 = vpop.f32.mrb[113].mxu0  ;;  %v14152_v25 = vpop.f32.mrb[142].mxu1 }
 0xc23   : >> { %v14154_v28 = vpop.f32.mrb[114].mxu0  ;;  %v14156_v23 = vpop.f32.mrb[143].mxu1 }
 0xc24   : >> { %v14158_v9 = vpop.f32.mrb[115].mxu0 }
 0xc28   : >> { %v14160_v16 = vpop.f32.mrb[144].mxu1 }
 0xc29   : >> { %v7246_v12 = vpop.f32.mrb[116].mxu0  ;;  %v9233_v1 = vpop.f32.mrb[145].mxu1 }
 0xc2a   : >> { %v14162_v35 = vpop.f32.mrb[146].mxu1  ;;  %7464 = vrot.lane.b32.xlu1 %v7246_v12, %s9915_s18  ;;  %v7248_v49 = vpop.f32.mrb[117].mxu0 }
 0xc2b   : >> { %7466 = vrot.lane.b32.xlu0 %v7248_v49, %s9915_s18  ;;  %v7250_v27 = vpop.f32.mrb[118].mxu0  ;;  %v9234_v18 = vpop.f32.mrb[147].mxu1 }
 0xc2c   : >> { %v7252_v5 = vpop.f32.mrb[119].mxu0 }
 0xc2e   : >> { %7472 = vrot.lane.b32.xlu1 %v7129_v13, %s9915_s18 }
 0xc2f   : >> { %7470 = vrot.lane.b32.xlu0 %v7127_v42, %s9915_s18 }
 0xc30   : >> { %v14168_v40 = vpop.f32.mrb[148].mxu1 }
 0xc31   : >> { %v7256_v29 = vpop.f32.mrb[120].mxu0  ;;  %v9237_v39 = vpop.f32.mrb[149].mxu1 }
 0xc32   : >> { %7476 = vrot.lane.b32.xlu1 %v7252_v5, %s9915_s18  ;;  %v7258_v54 = vpop.f32.mrb[121].mxu0  ;;  %v14171_v41 = vpop.f32.mrb[150].mxu1 }
 0xc33   : >> { %7474 = vrot.lane.b32.xlu0 %v7250_v27, %s9915_s18  ;;  %v7260_v34 = vpop.f32.mrb[122].mxu0  ;;  %v9238_v53 = vpop.f32.mrb[151].mxu1 }
 0xc34   : >> { %v7262_v55 = vpop.f32.mrb[123].mxu0 }
 0xc36   : >> { %7522 = vrot.lane.b32.xlu1 %v7133_v59, %s9916_s19 }
 0xc37   : >> { %7524 = vrot.lane.b32.xlu0 %v7135_v10, %s9916_s19 }
 0xc38   : >> { %v14176_v4 = vpop.f32.mrb[152].mxu1 }
 0xc39   : >> { %v7266_v52 = vpop.f32.mrb[124].mxu0  ;;  %v9241_v50 = vpop.f32.mrb[153].mxu1 }
 0xc3a   : >> { %7526 = vrot.lane.b32.xlu1 %v7256_v29, %s9916_s19  ;;  %v7268_v7 = vpop.f32.mrb[125].mxu0  ;;  %v14179_v45 = vpop.f32.mrb[154].mxu1 }
 0xc3b   : >> { %7528 = vrot.lane.b32.xlu0 %v7258_v54, %s9916_s19  ;;  %v7270_v14 = vpop.f32.mrb[126].mxu0  ;;  %v9242_v33 = vpop.f32.mrb[155].mxu1 }
 0xc3c   : >> { %v7272_v24 = vpop.f32.mrb[127].mxu0 }
 0xc3e   : >> { %7534 = vrot.lane.b32.xlu1 %v7139_v44, %s9916_s19 }
 0xc3f   : >> { %7532 = vrot.lane.b32.xlu0 %v14102_v15, %s9916_s19 }
 0xc40   : >> { %v14185_v20 = vpop.f32.mrb[156].mxu1 }
 0xc41   : >> { %v7276_v31 = vpop.f32.mrb[128].mxu0  ;;  %v9245_v42 = vpop.f32.mrb[157].mxu1 }
 0xc42   : >> { %7538 = vrot.lane.b32.xlu1 %v7262_v55, %s9916_s19  ;;  %v7278_v13 = vpop.f32.mrb[129].mxu0  ;;  %v14188_v59 = vpop.f32.mrb[158].mxu1 }
 0xc43   : >> { %7536 = vrot.lane.b32.xlu0 %v7260_v34, %s9916_s19  ;;  %v7280_v10 = vpop.f32.mrb[130].mxu0  ;;  %v9246_v12 = vpop.f32.mrb[159].mxu1 }
 0xc44   : >> { %v7282_v1 = vpop.f32.mrb[131].mxu0 }
 0xc46   : >> { %7584 = vrot.lane.b32.xlu1 %v14104_v3, %s9917_s20 }
 0xc47   : >> { %7586 = vrot.lane.b32.xlu0 %v14106_v11, %s9917_s20 }
 0xc48   : >> { %v14195_v15 = vpop.f32.mrb[160].mxu1 }
 0xc49   : >> { %v7286_v44 = vpop.f32.mrb[132].mxu0  ;;  %v9249_v49 = vpop.f32.mrb[161].mxu1 }
 0xc4a   : >> { %7588 = vrot.lane.b32.xlu1 %v7266_v52, %s9917_s20  ;;  %v7288_v27 = vpop.f32.mrb[133].mxu0  ;;  %v14198_v18 = vpop.f32.mrb[162].mxu1 }
 0xc4b   : >> { %7590 = vrot.lane.b32.xlu0 %v7268_v7, %s9917_s20  ;;  %v7290_v5 = vpop.f32.mrb[134].mxu0  ;;  %v9250_v29 = vpop.f32.mrb[163].mxu1 }
 0xc4c   : >> { %v7292_v39 = vpop.f32.mrb[135].mxu0 }
 0xc4e   : >> { %7596 = vrot.lane.b32.xlu1 %v14110_v63, %s9917_s20 }
 0xc4f   : >> { %7594 = vrot.lane.b32.xlu0 %v14108_v60, %s9917_s20 }
 0xc50   : >> { %v14205_v3 = vpop.f32.mrb[164].mxu1 }
 0xc51   : >> { %v7296_v11 = vpop.f32.mrb[136].mxu0  ;;  %v9253_v54 = vpop.f32.mrb[165].mxu1 }
 0xc52   : >> { %7600 = vrot.lane.b32.xlu1 %v7272_v24, %s9917_s20  ;;  %v7298_v34 = vpop.f32.mrb[137].mxu0  ;;  %v14208_v53 = vpop.f32.mrb[166].mxu1 }
 0xc53   : >> { %7598 = vrot.lane.b32.xlu0 %v7270_v14, %s9917_s20  ;;  %v7300_v55 = vpop.f32.mrb[138].mxu0  ;;  %v9254_v52 = vpop.f32.mrb[167].mxu1 }
 0xc54   : >> { %v7302_v50 = vpop.f32.mrb[139].mxu0 }
 0xc56   : >> { %7646 = vrot.lane.b32.xlu1 %v14112_v58, %s9918_s21 }
 0xc57   : >> { %7648 = vrot.lane.b32.xlu0 %v14114_v6, %s9918_s21 }
 0xc58   : >> { %v14215_v60 = vpop.f32.mrb[168].mxu1 }
 0xc59   : >> { %v7306_v63 = vpop.f32.mrb[140].mxu0  ;;  %v9257_v7 = vpop.f32.mrb[169].mxu1 }
 0xc5a   : >> { %7650 = vrot.lane.b32.xlu1 %v7276_v31, %s9918_s21  ;;  %v7308_v33 = vpop.f32.mrb[141].mxu0  ;;  %v14218_v24 = vpop.f32.mrb[170].mxu1 }
 0xc5b   : >> { %7652 = vrot.lane.b32.xlu0 %v7278_v13, %s9918_s21  ;;  %v7310_v14 = vpop.f32.mrb[142].mxu0  ;;  %v9258_v12 = vpop.f32.mrb[171].mxu1 }
 0xc5c   : >> { %v7312_v42 = vpop.f32.mrb[143].mxu0 }
 0xc5e   : >> { %7656 = vrot.lane.b32.xlu1 %v14116_v32, %s9918_s21 }
 0xc5f   : >> { %7658 = vrot.lane.b32.xlu0 %v14118_v19, %s9918_s21 }
 0xc60   : >> { %v14225_v58 = vpop.f32.mrb[172].mxu1 }
 0xc61   : >> { %v7316_v6 = vpop.f32.mrb[144].mxu0  ;;  %v9261_v49 = vpop.f32.mrb[173].mxu1 }
 0xc62   : >> { %7660 = vrot.lane.b32.xlu1 %v7280_v10, %s9918_s21  ;;  %v7318_v31 = vpop.f32.mrb[145].mxu0  ;;  %v14228_v29 = vpop.f32.mrb[174].mxu1 }
 0xc63   : >> { %7662 = vrot.lane.b32.xlu0 %v7282_v1, %s9918_s21  ;;  %v7320_v13 = vpop.f32.mrb[146].mxu0  ;;  %v9262_v54 = vpop.f32.mrb[175].mxu1 }
 0xc64   : >> { %v7322_v52 = vpop.f32.mrb[147].mxu0 }
 0xc66   : >> { %7708 = vrot.lane.b32.xlu1 %v14120_v61, %s9919_s22  ;;  %v14271_v61 = vpop.permute.xlu1 %7432 }
 0xc67   : >> { %7710 = vrot.lane.b32.xlu0 %v14122_v62, %s9919_s22  ;;  %v14273_v62 = vpop.permute.xlu0 %7437 }
 0xc68   : >> { %v14235_v32 = vpop.f32.mrb[176].mxu1 }
 0xc69   : >> { %v9265_v19 = vpop.f32.mrb[177].mxu1 }
 0xc6a   : >> { %7712 = vrot.lane.b32.xlu1 %v7286_v44, %s9919_s22  ;;  %v14238_v10 = vpop.f32.mrb[178].mxu1 }
 0xc6b   : >> { %7714 = vrot.lane.b32.xlu0 %v7288_v27, %s9919_s22  ;;  %v9266_v7 = vpop.f32.mrb[179].mxu1  ;;  %v8008_v27 = vld [vmem:[%s14342_s15 + $0x8] sm:$0x77] }
 0xc6e   : >> { %7718 = vrot.lane.b32.xlu1 %v14124_v17, %s9919_s22  ;;  %v14279_v17 = vpop.permute.xlu1 %7460 }
 0xc6f   : >> { %7720 = vrot.lane.b32.xlu0 %v14126_v2, %s9919_s22  ;;  %v14281_v2 = vpop.permute.xlu0 %7462 }
 0xc72   : >> { %7722 = vrot.lane.b32.xlu1 %v7290_v5, %s9919_s22  ;;  %v7447_v5 = vadd.f32 %v14273_v62, %v14154_v28 }
 0xc73   : >> { %7724 = vrot.lane.b32.xlu0 %v7292_v39, %s9919_s22 }
 0xc76   : >> { %7770 = vrot.lane.b32.xlu1 %v14128_v21, %s9920_s25 }
 0xc77   : >> { %7772 = vrot.lane.b32.xlu0 %v14130_v26, %s9920_s25 }
 0xc7a   : >> { %7774 = vrot.lane.b32.xlu1 %v7296_v11, %s9920_s25  ;;  %v7480_v11 = vsel %vm1151_vm2, %v14279_v17, %v14281_v2 }
 0xc7b   : >> { %7776 = vrot.lane.b32.xlu0 %v7298_v34, %s9920_s25 }
 0xc7e   : >> { %7780 = vrot.lane.b32.xlu1 %v14132_v8, %s9920_s25 }
 0xc7f   : >> { %7782 = vrot.lane.b32.xlu0 %v14134_v57, %s9920_s25 }
 0xc82   : >> { %7784 = vrot.lane.b32.xlu1 %v7300_v55, %s9920_s25 }
 0xc83   : >> { %7786 = vrot.lane.b32.xlu0 %v7302_v50, %s9920_s25  ;;  %v8014_v50 = vcombine.high %v8008_v27, %v8008_v27 }
 0xc86   : >> { %7832 = vrot.lane.b32.xlu1 %v14136_v46, %s9921_s27 }
 0xc87   : >> { %7834 = vrot.lane.b32.xlu0 %v14138_v37, %s9921_s27 }
 0xc8a   : >> { %7836 = vrot.lane.b32.xlu1 %v7306_v63, %s9921_s27  ;;  %v7442_v63 = vadd.f32 %v14271_v61, %v14146_v56 }
 0xc8b   : >> { %7838 = vrot.lane.b32.xlu0 %v7308_v33, %s9921_s27 }
 0xc8e   : >> { %7842 = vrot.lane.b32.xlu1 %v14140_v48, %s9921_s27 }
 0xc8f   : >> { %7844 = vrot.lane.b32.xlu0 %v14142_v0, %s9921_s27 }
 0xc92   : >> { %7846 = vrot.lane.b32.xlu1 %v7310_v14, %s9921_s27 }
 0xc93   : >> { %7848 = vrot.lane.b32.xlu0 %v7312_v42, %s9921_s27 }
 0xc96   : >> { %7894 = vrot.lane.b32.xlu1 %v14144_v30, %s9922_s12 }
 0xc97   : >> { %7896 = vrot.lane.b32.xlu0 %v14148_v36, %s9922_s12 }
 0xc9a   : >> { %7898 = vrot.lane.b32.xlu1 %v7316_v6, %s9922_s12 }
 0xc9b   : >> { %7900 = vrot.lane.b32.xlu0 %v7318_v31, %s9922_s12 }
 0xc9c   : >> { %v14285_v21 = vpop.permute.xlu1 %7464 }
 0xc9d   : >> { %v14287_v26 = vpop.permute.xlu0 %7466 }
 0xc9e   : >> { %7904 = vrot.lane.b32.xlu1 %v14152_v25, %s9922_s12 }
 0xc9f   : >> { %7906 = vrot.lane.b32.xlu0 %v14156_v23, %s9922_s12 }
 0xca0   : >> { %v14293_v8 = vpop.permute.xlu1 %7472 }
 0xca1   : >> { %v14295_v57 = vpop.permute.xlu0 %7470 }
 0xca2   : >> { %7908 = vrot.lane.b32.xlu1 %v7320_v13, %s9922_s12 }
 0xca3   : >> { %7910 = vrot.lane.b32.xlu0 %v7322_v52, %s9922_s12 }
 0xca4   : >> { %v14299_v46 = vpop.permute.xlu1 %7476 }
 0xca5   : >> { %v7475_v37 = vpop.permute.xlu0 %7474 }
 0xca6   : >> { %7468 = vrot.lane.b32.xlu1 %v14168_v40, %s9915_s18  ;;  %v7485_v1 = vsel %vm1151_vm2, %v14293_v8, %v7475_v37 }
 0xca7   : >> { %7478 = vrot.lane.b32.xlu0 %v14171_v41, %s9915_s18 }
 0xca8   : >> { %v14305_v48 = vpop.permute.xlu1 %7522 }
 0xca9   : >> { %v7525_v0 = vpop.permute.xlu0 %7524 }
 0xcaa   : >> { %7530 = vrot.lane.b32.xlu1 %v14176_v4, %s9916_s19  ;;  %v7542_v33 = vsel %vm1250_vm3, %v14305_v48, %v7525_v0 }
 0xcab   : >> { %7540 = vrot.lane.b32.xlu0 %v14179_v45, %s9916_s19 }
 0xcac   : >> { %v7527_v30 = vpop.permute.xlu1 %7526 }
 0xcad   : >> { %v14311_v36 = vpop.permute.xlu0 %7528  ;;  %v7543_v13 = vsel %vm1250_vm3, %v7525_v0, %v7527_v30  ;;  %v7484_v0 = vsel %vm1151_vm2, %v14295_v57, %v14293_v8 }
 0xcae   : >> { %7592 = vrot.lane.b32.xlu1 %v14185_v20, %s9917_s20  ;;  %v7544_v19 = vsel %vm1250_vm3, %v7527_v30, %v14311_v36  ;;  %v7445_v30 = vadd.f32 %v14273_v62, %v14096_v47 }
 0xcaf   : >> { %7602 = vrot.lane.b32.xlu0 %v14188_v59, %s9917_s20 }
 0xcb0   : >> { %v14317_v25 = vpop.permute.xlu1 %7534 }
 0xcb1   : >> { %v14319_v23 = vpop.permute.xlu0 %7532 }
 0xcb2   : >> { %7654 = vrot.lane.b32.xlu1 %v14195_v15, %s9918_s21  ;;  %v7486_v15 = vsel %vm1151_vm2, %v7475_v37, %v14299_v46  ;;  %v7546_v8 = vsel %vm1250_vm3, %v14319_v23, %v14317_v25 }
 0xcb3   : >> { %7664 = vrot.lane.b32.xlu0 %v14198_v18, %s9918_s21  ;;  %v7446_v18 = vadd.f32 %v14273_v62, %v14098_v22  ;;  %v7440_v22 = vadd.f32 %v14271_v61, %v14092_v43  ;;  %v7509_v55 = vadd.f32 %v7486_v15, %v7447_v5  ;;  %v7481_v43 = vsel %vm1151_vm2, %v14281_v2, %v14285_v21 }
 0xcb4   : >> { %v14325_v40 = vpop.permute.xlu1 %7538 }
 0xcb5   : >> { %v7537_v41 = vpop.permute.xlu0 %7536  ;;  %v7508_v28 = vadd.f32 %v7485_v1, %v7446_v18  ;;  %v7502_v42 = vadd.f32 %v7480_v11, %v7440_v22 }
 0xcb6   : >> { %7716 = vrot.lane.b32.xlu1 %v14205_v3, %s9919_s22  ;;  %v8009_v3 = vld [vmem:[%s14342_s15 + $0x10] sm:$0x77]  ;;  %v7547_v34 = vsel %vm1250_vm3, %v14317_v25, %v7537_v41 }
 0xcb7   : >> { %7726 = vrot.lane.b32.xlu0 %v14208_v53, %s9919_s22  ;;  %v7548_v53 = vsel %vm1250_vm3, %v7537_v41, %v14325_v40  ;;  %v8015_v14 = vcombine.high %v8009_v3, %v8009_v3  ;;  %v7570_v12 = vadd.f32 %v7547_v34, %v7508_v28 }
 0xcb8   : >> { %v14331_v4 = vpop.permute.xlu1 %7584 }
 0xcb9   : >> { %v7587_v45 = vpop.permute.xlu0 %7586 }
 0xcba   : >> { %7778 = vrot.lane.b32.xlu1 %v14215_v60, %s9920_s25  ;;  %v7441_v60 = vadd.f32 %v14271_v61, %v14094_v38  ;;  %v7482_v38 = vsel %vm1151_vm2, %v14285_v21, %v14287_v26  ;;  %v7604_v56 = vsel %vm1349_vm4, %v14331_v4, %v7587_v45 }
 0xcbb   : >> { %7788 = vrot.lane.b32.xlu0 %v14218_v24, %s9920_s25  ;;  %v7504_v7 = vadd.f32 %v7482_v38, %v7442_v63 }
 0xcbc   : >> { %v7589_v20 = vpop.permute.xlu1 %7588 }
 0xcbd   : >> { %v14337_v59 = vpop.permute.xlu0 %7590  ;;  %v7605_v21 = vsel %vm1349_vm4, %v7587_v45, %v7589_v20  ;;  %v8010_v45 = vld [vmem:[%s14342_s15 + $0x18] sm:$0x77] }
 0xcbe   : >> { %7840 = vrot.lane.b32.xlu1 %v14225_v58, %s9921_s27  ;;  %v7571_v58 = vadd.f32 %v7548_v53, %v7509_v55  ;;  %v7606_v1 = vsel %vm1349_vm4, %v7589_v20, %v14337_v59  ;;  %v7507_v20 = vadd.f32 %v7484_v0, %v7445_v30 }
 0xcbf   : >> { %7850 = vrot.lane.b32.xlu0 %v14228_v29, %s9921_s27  ;;  %v7564_v29 = vadd.f32 %v7542_v33, %v7502_v42 }
 0xcc0   : >> { %v7597_v44 = vpop.permute.xlu1 %7596  ;;  %v7569_v55 = vadd.f32 %v7546_v8, %v7507_v20 }
 0xcc1   : >> { %v14357_v39 = vpop.permute.xlu0 %7594  ;;  %v7626_v2 = vadd.f32 %v7604_v56, %v7564_v29 }
 0xcc2   : >> { %7902 = vrot.lane.b32.xlu1 %v14235_v32, %s9922_s12  ;;  %v7503_v32 = vadd.f32 %v7481_v43, %v7441_v60  ;;  %v7608_v47 = vsel %vm1349_vm4, %v14357_v39, %v7597_v44 }
 0xcc3   : >> { %7912 = vrot.lane.b32.xlu0 %v14238_v10, %s9922_s12  ;;  %v7631_v60 = vadd.f32 %v7608_v47, %v7569_v55 }
 0xcc4   : >> { %v14379_v24 = vpop.permute.xlu1 %7600  ;;  %v7565_v41 = vadd.f32 %v7543_v13, %v7503_v32 }
 0xcc5   : >> { %v7599_v6 = vpop.permute.xlu0 %7598 }
 0xcc6   : >> { %v7609_v49 = vsel %vm1349_vm4, %v7597_v44, %v7599_v6  ;;  %v7610_v31 = vsel %vm1349_vm4, %v7599_v6, %v14379_v24  ;;  %8017 = vrot.lane.b32.xlu1 %v8008_v27, %s9923_s23  ;;  %v7566_v27 = vadd.f32 %v7544_v19, %v7504_v7  ;;  %v7627_v5 = vadd.f32 %v7605_v21, %v7565_v41 }
 0xcc7   : >> { %v7632_v54 = vadd.f32 %v7609_v49, %v7570_v12  ;;  %v7633_v52 = vadd.f32 %v7610_v31, %v7571_v58  ;;  %8019 = vrot.lane.b32.xlu0 %v8014_v50, %s9923_s23 }
 0xcc8   : >> { %v14397_v10 = vpop.permute.xlu1 %7646  ;;  %v7628_v34 = vadd.f32 %v7606_v1, %v7566_v27 }
 0xcc9   : >> { %v7649_v37 = vpop.permute.xlu0 %7648 }
 0xcca   : >> { %v7666_v15 = vsel %vm1448_vm5, %v14397_v10, %v7649_v37  ;;  %8021 = vrot.lane.b32.xlu1 %v8009_v3, %s9923_s23 }
 0xccb   : >> { %v7688_v18 = vadd.f32 %v7666_v15, %v7626_v2  ;;  %8023 = vrot.lane.b32.xlu0 %v8015_v14, %s9923_s23 }
 0xccc   : >> { %v7651_v11 = vpop.permute.xlu1 %7650 }
 0xccd   : >> { %v7667_v53 = vsel %vm1448_vm5, %v7649_v37, %v7651_v11  ;;  %v14416_v22 = vpop.permute.xlu0 %7652 }
 0xcce   : >> { %v7689_v3 = vadd.f32 %v7667_v53, %v7627_v5  ;;  %v7668_v28 = vsel %vm1448_vm5, %v7651_v11, %v14416_v22  ;;  %8025 = vrot.lane.b32.xlu1 %v8010_v45, %s9923_s23 }
 0xccf   : >> { %v7690_v50 = vadd.f32 %v7668_v28, %v7628_v34 }
 0xcd0   : >> { %v14423_v25 = vpop.permute.xlu1 %7656 }
 0xcd1   : >> { %v7659_v63 = vpop.permute.xlu0 %7658 }
 0xcd2   : >> { %v7670_v33 = vsel %vm1448_vm5, %v14423_v25, %v7659_v63 }
 0xcd3   : >> { %v7693_v14 = vadd.f32 %v7670_v33, %v7631_v60 }
 0xcd4   : >> { %v7661_v42 = vpop.permute.xlu1 %7660 }
 0xcd5   : >> { %v7671_v43 = vsel %vm1448_vm5, %v7659_v63, %v7661_v42  ;;  %v14428_v44 = vpop.permute.xlu0 %7662 }
 0xcd6   : >> { %v7694_v12 = vadd.f32 %v7671_v43, %v7632_v54  ;;  %v7672_v58 = vsel %vm1448_vm5, %v7661_v42, %v14428_v44 }
 0xcd7   : >> { %v7695_v6 = vadd.f32 %v7672_v58, %v7633_v52 }
 0xcd8   : >> { %v14432_v38 = vpop.permute.xlu1 %7708 }
 0xcd9   : >> { %v7711_v56 = vpop.permute.xlu0 %7710 }
 0xcda   : >> { %v7728_v49 = vsel %vm1547_vm6, %v14432_v38, %v7711_v56 }
 0xcdb   : >> { %v7750_v31 = vadd.f32 %v7728_v49, %v7688_v18 }
 0xcdc   : >> { %v7713_v29 = vpop.permute.xlu1 %7712 }
 0xcdd   : >> { %v7729_v13 = vsel %vm1547_vm6, %v7711_v56, %v7713_v29  ;;  %v14437_v32 = vpop.permute.xlu0 %7714 }
 0xcde   : >> { %v7751_v19 = vadd.f32 %v7729_v13, %v7689_v3  ;;  %v7730_v54 = vsel %vm1547_vm6, %v7713_v29, %v14437_v32 }
 0xcdf   : >> { %v7752_v7 = vadd.f32 %v7730_v54, %v7690_v50 }
 0xce0   : >> { %v14441_v2 = vpop.permute.xlu1 %7718 }
 0xce1   : >> { %v7721_v52 = vpop.permute.xlu0 %7720 }
 0xce2   : >> { %v7732_v21 = vsel %vm1547_vm6, %v14441_v2, %v7721_v52 }
 0xce3   : >> { %v7755_v37 = vadd.f32 %v7732_v21, %v7693_v14 }
 0xce4   : >> { %v7723_v0 = vpop.permute.xlu1 %7722 }
 0xce5   : >> { %v7733_v41 = vsel %vm1547_vm6, %v7721_v52, %v7723_v0  ;;  %v14446_v1 = vpop.permute.xlu0 %7724 }
 0xce6   : >> { %v7756_v15 = vadd.f32 %v7733_v41, %v7694_v12  ;;  %v7734_v30 = vsel %vm1547_vm6, %v7723_v0, %v14446_v1 }
 0xce7   : >> { %v7757_v27 = vadd.f32 %v7734_v30, %v7695_v6 }
 0xce8   : >> { %v14450_v18 = vpop.permute.xlu1 %7770 }
 0xce9   : >> { %v7773_v45 = vpop.permute.xlu0 %7772 }
 0xcea   : >> { %v7790_v8 = vsel %vm1646_vm7, %v14450_v18, %v7773_v45 }
 0xceb   : >> { %v7812_v5 = vadd.f32 %v7790_v8, %v7750_v31 }
 0xcec   : >> { %v7775_v11 = vpop.permute.xlu1 %7774 }
 0xced   : >> { %v7791_v20 = vsel %vm1646_vm7, %v7773_v45, %v7775_v11  ;;  %v14455_v34 = vpop.permute.xlu0 %7776 }
 0xcee   : >> { %v7813_v53 = vadd.f32 %v7791_v20, %v7751_v19  ;;  %v7792_v47 = vsel %vm1646_vm7, %v7775_v11, %v14455_v34 }
 0xcef   : >> { %v7814_v3 = vadd.f32 %v7792_v47, %v7752_v7 }
 0xcf0   : >> { %v14459_v28 = vpop.permute.xlu1 %7780 }
 0xcf1   : >> { %v7783_v55 = vpop.permute.xlu0 %7782 }
 0xcf2   : >> { %v7794_v50 = vsel %vm1646_vm7, %v14459_v28, %v7783_v55 }
 0xcf3   : >> { %v7817_v60 = vadd.f32 %v7794_v50, %v7755_v37 }
 0xcf4   : >> { %v7785_v63 = vpop.permute.xlu1 %7784 }
 0xcf5   : >> { %v7795_v33 = vsel %vm1646_vm7, %v7783_v55, %v7785_v63  ;;  %v14464_v14 = vpop.permute.xlu0 %7786 }
 0xcf6   : >> { %v7818_v42 = vadd.f32 %v7795_v33, %v7756_v15  ;;  %v7796_v43 = vsel %vm1646_vm7, %v7785_v63, %v14464_v14 }
 0xcf7   : >> { %v7819_v12 = vadd.f32 %v7796_v43, %v7757_v27 }
 0xcf8   : >> { %v14468_v58 = vpop.permute.xlu1 %7832 }
 0xcf9   : >> { %v7835_v6 = vpop.permute.xlu0 %7834 }
 0xcfa   : >> { %v7852_v56 = vsel %vm1745_vm8, %v14468_v58, %v7835_v6 }
 0xcfb   : >> { %v7874_v49 = vadd.f32 %v7852_v56, %v7812_v5 }
 0xcfc   : >> { %v7837_v31 = vpop.permute.xlu1 %7836 }
 0xcfd   : >> { %v7853_v29 = vsel %vm1745_vm8, %v7835_v6, %v7837_v31  ;;  %v14473_v13 = vpop.permute.xlu0 %7838 }
 0xcfe   : >> { %v7875_v19 = vadd.f32 %v7853_v29, %v7813_v53  ;;  %v7854_v54 = vsel %vm1745_vm8, %v7837_v31, %v14473_v13 }
 0xcff   : >> { %v7876_v7 = vadd.f32 %v7854_v54, %v7814_v3  ;;  %v7443_v54 = vadd.f32 %v14271_v61, %v14150_v51 }
 0xd00   : >> { %v14477_v52 = vpop.permute.xlu1 %7842 }
 0xd01   : >> { %v7845_v21 = vpop.permute.xlu0 %7844 }
 0xd02   : >> { %v7856_v37 = vsel %vm1745_vm8, %v14477_v52, %v7845_v21 }
 0xd03   : >> { %v7879_v0 = vadd.f32 %v7856_v37, %v7817_v60  ;;  %v7448_v37 = vadd.f32 %v14273_v62, %v14158_v9 }
 0xd04   : >> { %v7847_v41 = vpop.permute.xlu1 %7846 }
 0xd05   : >> { %v7857_v15 = vsel %vm1745_vm8, %v7845_v21, %v7847_v41  ;;  %v14482_v30 = vpop.permute.xlu0 %7848 }
 0xd06   : >> { %v7880_v27 = vadd.f32 %v7857_v15, %v7818_v42  ;;  %v7858_v45 = vsel %vm1745_vm8, %v7847_v41, %v14482_v30 }
 0xd07   : >> { %v7881_v8 = vadd.f32 %v7858_v45, %v7819_v12 }
 0xd08   : >> { %v14486_v5 = vpop.permute.xlu1 %7894 }
 0xd09   : >> { %v7897_v11 = vpop.permute.xlu0 %7896 }
 0xd0a   : >> { %v7914_v20 = vsel %vm15340_vm9, %v14486_v5, %v7897_v11 }
 0xd0b   : >> { %v14490_v53 = vadd.f32 %v7914_v20, %v7874_v49 }
 0xd0c   : >> { %v7899_v47 = vpop.permute.xlu1 %7898 }
 0xd0d   : >> { %v7915_v3 = vsel %vm15338_vm1, %v7897_v11, %v7899_v47  ;;  %v14493_v55 = vpop.permute.xlu0 %7900  ;;  %vm8029_vm1 = vcmask 711680  }
 0xd0e   : >> { %v14495_v50 = vadd.f32 %v7915_v3, %v7875_v19  ;;  %v7916_v60 = vsel %vm15341_vm11, %v7899_v47, %v14493_v55 }
 0xd0f   : >> { %v14499_v63 = vadd.f32 %v7916_v60, %v7876_v7  ;;  %v7444_v7 = vadd.f32 %v14271_v61, %v14160_v16 }
 0xd10   : >> { %v14501_v33 = vpop.permute.xlu1 %7904 }
 0xd11   : >> { %v7907_v42 = vpop.permute.xlu0 %7906 }
 0xd12   : >> { %v7918_v43 = vsel %vm15342_vm15, %v14501_v33, %v7907_v42  ;;  %vm15352_vm15 = vmmov %vm15343_vm12 }
 0xd13   : >> { %v14505_v12 = vadd.f32 %v7918_v43, %v7879_v0 }
 0xd14   : >> { %v7909_v6 = vpop.permute.xlu1 %7908 }
 0xd15   : >> { %v7919_v56 = vsel %vm15343_vm12, %v7907_v42, %v7909_v6  ;;  %v14508_v49 = vpop.permute.xlu0 %7910 }
 0xd16   : >> { %v14510_v31 = vadd.f32 %v7919_v56, %v7880_v27  ;;  %v7920_v29 = vsel %vm15344_vm13, %v7909_v6, %v14508_v49  ;;  %v7449_v27 = vadd.f32 %v14273_v62, %v14162_v35  ;;  %vm15353_vm13 = vmmov %vm15343_vm12 }
 0xd17   : >> { %v14514_v19 = vadd.f32 %v7920_v29, %v7881_v8 }
 0xd18   : >> { %v7469_v21 = vpop.permute.xlu1 %7468 }
 0xd19   : >> { %v7483_v0 = vsel %vm1151_vm2, %v14287_v26, %v7469_v21  ;;  %v7500_v41 = vsel %vm1151_vm2, %v7469_v21, %v14279_v17  ;;  %v7479_v15 = vpop.permute.xlu0 %7478 }
 0xd1a   : >> { %v7505_v45 = vadd.f32 %v7483_v0, %v7443_v54  ;;  %v7506_v8 = vadd.f32 %v7500_v41, %v7444_v7  ;;  %v7487_v51 = vsel %vm1151_vm2, %v14299_v46, %v7479_v15  ;;  %v7501_v16 = vsel %vm1151_vm2, %v7479_v15, %v14295_v57 }
 0xd1b   : >> { %v7510_v61 = vadd.f32 %v7487_v51, %v7448_v37  ;;  %v7511_v9 = vadd.f32 %v7501_v16, %v7449_v27 }
 0xd1c   : >> { %v7531_v11 = vpop.permute.xlu1 %7530 }
 0xd1d   : >> { %v7545_v26 = vsel %vm1250_vm3, %v14311_v36, %v7531_v11  ;;  %v7562_v17 = vsel %vm1250_vm3, %v7531_v11, %v14305_v48  ;;  %v7541_v20 = vpop.permute.xlu0 %7540 }
 0xd1e   : >> { %v7567_v47 = vadd.f32 %v7545_v26, %v7505_v45  ;;  %v7568_v35 = vadd.f32 %v7562_v17, %v7506_v8  ;;  %v7549_v62 = vsel %vm1250_vm3, %v14325_v40, %v7541_v20  ;;  %v7563_v46 = vsel %vm1250_vm3, %v7541_v20, %v14319_v23 }
 0xd1f   : >> { %v7572_v3 = vadd.f32 %v7549_v62, %v7510_v61  ;;  %v7573_v57 = vadd.f32 %v7563_v46, %v7511_v9 }
 0xd20   : >> { %v7593_v60 = vpop.permute.xlu1 %7592 }
 0xd21   : >> { %v7603_v42 = vpop.permute.xlu0 %7602  ;;  %v7607_v29 = vsel %vm1349_vm4, %v14337_v59, %v7593_v60  ;;  %v7624_v7 = vsel %vm1349_vm4, %v7593_v60, %v14331_v4  ;;  %v15345_v60 = vld [vmem:[#allocation84_spill] sm:$0xff] }
 0xd22   : >> { %v7611_v43 = vsel %vm1349_vm4, %v14379_v24, %v7603_v42  ;;  %v7625_v36 = vsel %vm1349_vm4, %v7603_v42, %v14357_v39  ;;  %v7629_v37 = vadd.f32 %v7607_v29, %v7567_v47  ;;  %v7630_v15 = vadd.f32 %v7624_v7, %v7568_v35 }
 0xd23   : >> { %v7634_v48 = vadd.f32 %v7611_v43, %v7572_v3  ;;  %v7635_v6 = vadd.f32 %v7625_v36, %v7573_v57  ;;  %vm15346_vm0 = vcmp.gt.f32.partialorder %v15345_v60, 0.5  ;;  %v15349_v36 = vld [vmem:[#allocation85_spill] sm:$0xff] }
 0xd24   : >> { %v7655_v56 = vpop.permute.xlu1 %7654  ;;  %v14583_v42 = vsel %vm15346_vm0, %v14490_v53, -inf  ;;  %vm15350_vm11 = vcmp.gt.f32.partialorder %v15349_v36, 0.5  ;;  %vm15354_vm0 = vmmov %vm15343_vm12 }
 0xd25   : >> { %v7665_v40 = vpop.permute.xlu0 %7664  ;;  %v7669_v24 = vsel %vm1448_vm5, %v14416_v22, %v7655_v56  ;;  %v7686_v59 = vsel %vm1448_vm5, %v7655_v56, %v14397_v10 }
 0xd26   : >> { %v7673_v23 = vsel %vm1448_vm5, %v14428_v44, %v7665_v40  ;;  %v7687_v54 = vsel %vm1448_vm5, %v7665_v40, %v14423_v25  ;;  %v7691_v27 = vadd.f32 %v7669_v24, %v7629_v37  ;;  %v7692_v51 = vadd.f32 %v7686_v59, %v7630_v15  ;;  %v15365_v15 = vld [vmem:[#allocation93_spill] sm:$0xff] }
 0xd27   : >> { %v7696_v39 = vadd.f32 %v7673_v23, %v7634_v48  ;;  %v7697_v21 = vadd.f32 %v7687_v54, %v7635_v6  ;;  %v14598_v48 = vsel %vm4468_vm10, %v14514_v19, -inf  ;;  %v15355_v19 = vld [vmem:[#allocation89_spill] sm:$0xff] }
 0xd28   : >> { %v7717_v0 = vpop.permute.xlu1 %7716 }
 0xd29   : >> { %v7731_v41 = vsel %vm1547_vm6, %v14437_v32, %v7717_v0  ;;  %v7727_v44 = vpop.permute.xlu0 %7726  ;;  %v7748_v22 = vsel %vm1547_vm6, %v7717_v0, %v14432_v38 }
 0xd2a   : >> { %v7735_v25 = vsel %vm1547_vm6, %v14446_v1, %v7727_v44  ;;  %v7749_v4 = vsel %vm1547_vm6, %v7727_v44, %v14441_v2  ;;  %v7753_v16 = vadd.f32 %v7731_v41, %v7691_v27  ;;  %v7754_v11 = vadd.f32 %v7748_v22, %v7692_v51  ;;  %v15363_v41 = vld [vmem:[#allocation92_spill] sm:$0xff] }
 0xd2b   : >> { %v7758_v45 = vadd.f32 %v7735_v25, %v7696_v39  ;;  %v7759_v8 = vadd.f32 %v7749_v4, %v7697_v21  ;;  %v15359_v39 = vld [vmem:[#allocation87_spill] sm:$0xff]  ;;  %v15361_v21 = vld [vmem:[#allocation88_spill] sm:$0xff] }
 0xd2c   : >> { %v7779_v10 = vpop.permute.xlu1 %7778 }
 0xd2d   : >> { %v7793_v32 = vsel %vm1646_vm7, %v14455_v34, %v7779_v10  ;;  %v7810_v61 = vsel %vm1646_vm7, %v7779_v10, %v14450_v18  ;;  %v7789_v9 = vpop.permute.xlu0 %7788 }
 0xd2e   : >> { %v7815_v1 = vadd.f32 %v7793_v32, %v7753_v16  ;;  %v7797_v2 = vsel %vm1646_vm7, %v14464_v14, %v7789_v9  ;;  %v7811_v38 = vsel %vm1646_vm7, %v7789_v9, %v14459_v28  ;;  %v7816_v20 = vadd.f32 %v7810_v61, %v7754_v11 }
 0xd2f   : >> { %v7820_v26 = vadd.f32 %v7797_v2, %v7758_v45  ;;  %v7821_v17 = vadd.f32 %v7811_v38, %v7759_v8 }
 0xd30   : >> { %v7841_v47 = vpop.permute.xlu1 %7840 }
 0xd31   : >> { %v7855_v35 = vsel %vm1745_vm8, %v14473_v13, %v7841_v47  ;;  %v7872_v34 = vsel %vm1745_vm8, %v7841_v47, %v14468_v58  ;;  %v7851_v18 = vpop.permute.xlu0 %7850  ;;  %v15347_v13 = vld [vmem:[#allocation86_spill] sm:$0xff] }
 0xd32   : >> { %v7877_v62 = vadd.f32 %v7855_v35, %v7815_v1  ;;  %v7878_v46 = vadd.f32 %v7872_v34, %v7816_v20  ;;  %v7859_v3 = vsel %vm1745_vm8, %v14482_v30, %v7851_v18  ;;  %v7873_v14 = vsel %vm1745_vm8, %v7851_v18, %v14477_v52 }
 0xd33   : >> { %v7882_v28 = vadd.f32 %v7859_v3, %v7820_v26  ;;  %v7883_v57 = vadd.f32 %v7873_v14, %v7821_v17  ;;  %vm15348_vm9 = vcmp.gt.f32.partialorder %v15347_v13, 0.5  ;;  %v14593_v30 = vsel %vm15350_vm11, %v14495_v50, -inf }
 0xd34   : >> { %v14588_v58 = vsel %vm15348_vm9, %v14499_v63, -inf  ;;  %v7903_v43 = vpop.permute.xlu1 %7902  ;;  %vm15356_vm9 = vcmp.gt.f32.partialorder %v15355_v19, 0.5  ;;  %v8040_v19 = vlaneseq }
 0xd35   : >> { %v7917_v53 = vsel %vm15352_vm15, %v14493_v55, %v7903_v43  ;;  %v7934_v6 = vsel %vm15343_vm12, %v7903_v43, %v14486_v5  ;;  %v7913_v63 = vpop.permute.xlu0 %7912  ;;  %v7956_v23 = vmax.f32 %v14583_v42, %v14588_v58  ;;  %v14613_v54 = vsel %vm15356_vm9, %v14505_v12, -inf  ;;  %v15357_v5 = vld [vmem:[#allocation90_spill] sm:$0xff] }
 0xd36   : >> { %v7939_v56 = vadd.f32 %v7917_v53, %v7877_v62  ;;  %v7940_v29 = vadd.f32 %v7934_v6, %v7878_v46  ;;  %v7921_v40 = vsel %vm15353_vm13, %v14508_v49, %v7913_v63  ;;  %v7935_v50 = vsel %vm15354_vm0, %v7913_v63, %v14501_v33 }
 0xd37   : >> { %v7944_v55 = vadd.f32 %v7921_v40, %v7882_v28  ;;  %v7945_v7 = vadd.f32 %v7935_v50, %v7883_v57  ;;  %vm15358_vm11 = vcmp.gt.f32.partialorder %v15357_v5, 0.5  ;;  %v7962_v49 = vmax.f32 %v14613_v54, %v14598_v48 }
 0xd38   : >> { %v14618_v24 = vsel %vm15358_vm11, %v14510_v31, -inf  ;;  %vm15360_vm15 = vcmp.gt.f32.partialorder %v15359_v39, 0.5  ;;  %vm15362_vm12 = vcmp.gt.f32.partialorder %v15361_v21, 0.5  ;;  %v8018_v0 = vpop.permute.xlu1 %8017  ;;  %vm15364_vm13 = vcmp.gt.f32.partialorder %v15363_v41, 0.5 }
 0xd39   : >> { %v7949_v33 = vsel %vm15360_vm15, %v7939_v56, -inf  ;;  %v7950_v37 = vsel %vm15362_vm12, %v7940_v29, -inf  ;;  %v7954_v44 = vsel %vm15364_vm13, %v7944_v55, -inf  ;;  %vm15366_vm0 = vcmp.gt.f32.partialorder %v15365_v15, 0.5  ;;  %v8020_v27 = vpop.permute.xlu0 %8019 }
 0xd3a   : >> { %v7957_v12 = vmax.f32 %v14593_v30, %v7949_v33  ;;  %v7958_v59 = vmax.f32 %v7956_v23, %v7950_v37  ;;  %v7955_v31 = vsel %vm15366_vm0, %v7945_v7, -inf  ;;  %v7963_v25 = vmax.f32 %v14618_v24, %v7954_v44  ;;  %v15367_v33 = vld [vmem:[#allocation100_spill] sm:$0xff] }
 0xd3b   : >> { %v7964_v4 = vmax.f32 %v7962_v49, %v7955_v31  ;;  %v14633_v22 = vsel %vm8029_vm1, %v8018_v0, %v8020_v27  ;;  %v8041_v39 = vshrl.u32 %v8040_v19, 7 }
 0xd3c   : >> { %8070 = vrot.lane.b32.xlu0 %v14633_v22, %s9915_s18  ;;  %v7959_v45 = vmax.f32 %v7958_v59, %v7957_v12  ;;  %v8022_v8 = vpop.permute.xlu1 %8021 }
 0xd3d   : >> { %v7965_v51 = vmax.f32 %v7964_v4, %v7963_v25  ;;  %v14638_v16 = vsel %vm8029_vm1, %v8020_v27, %v8022_v8  ;;  %v8024_v10 = vpop.permute.xlu0 %8023  ;;  %v14729_v41 = vsub.s32 0, %v8041_v39  ;;  %v14731_v44 = vsub.s32 1, %v8041_v39 }
 0xd3e   : >> { %v14641_v32 = vsel %vm8029_vm1, %v8022_v8, %v8024_v10  ;;  %8072 = vrot.lane.b32.xlu1 %v14638_v16, %s9915_s18  ;;  %v14733_v15 = vsub.s32 2, %v8041_v39  ;;  %v14737_v8 = vsub.s32 4, %v8041_v39 }
 0xd40   : >> { %8074 = vrot.lane.b32.xlu0 %v14641_v32, %s9915_s18  ;;  %v8026_v61 = vpop.permute.xlu1 %8025 }
 0xd41   : >> { %v8033_v9 = vsel %vm8029_vm1, %v8024_v10, %v8026_v61  ;;  %vm15368_vm1 = vcmask 506880  }
 0xd42   : >> { %8076 = vrot.lane.b32.xlu1 %v8033_v9, %s9915_s18  ;;  %vm15369_vm9 = vmmov %vm15368_vm1 }
 0xd43   : >> { %vm15370_vm11 = vmmov %vm15368_vm1 }
 0xd44   : >> { %8121 = vrot.lane.b32.xlu0 %v14633_v22, %s9916_s19 }
 0xd46   : >> { %8123 = vrot.lane.b32.xlu1 %v14638_v16, %s9916_s19 }
 0xd48   : >> { %8125 = vrot.lane.b32.xlu0 %v14641_v32, %s9916_s19 }
 0xd4a   : >> { %8127 = vrot.lane.b32.xlu1 %v8033_v9, %s9916_s19 }
 0xd4c   : >> { %8172 = vrot.lane.b32.xlu0 %v14633_v22, %s9917_s20 }
 0xd4e   : >> { %8174 = vrot.lane.b32.xlu1 %v14638_v16, %s9917_s20 }
 0xd50   : >> { %8176 = vrot.lane.b32.xlu0 %v14641_v32, %s9917_s20 }
 0xd52   : >> { %8178 = vrot.lane.b32.xlu1 %v8033_v9, %s9917_s20 }
 0xd54   : >> { %8223 = vrot.lane.b32.xlu0 %v14633_v22, %s9918_s21 }
 0xd56   : >> { %8225 = vrot.lane.b32.xlu1 %v14638_v16, %s9918_s21 }
 0xd5a   : >> { %8229 = vrot.lane.b32.xlu1 %v8033_v9, %s9918_s21 }
 0xd5e   : >> { %8276 = vrot.lane.b32.xlu1 %v14638_v16, %s9919_s22 }
 0xd73   : >> { %7960 = vmax.xlane.f32.xlu0 %v7959_v45  ;;  %v14735_v45 = vsub.s32 3, %v8041_v39 }
 0xd82   : >> { %7966 = vmax.xlane.f32.xlu1 %v7965_v51 }
 0xd89   : >> { %8227 = vrot.lane.b32.xlu0 %v14641_v32, %s9918_s21 }
 0xd8d   : >> { %8274 = vrot.lane.b32.xlu0 %v14633_v22, %s9919_s22 }
 0xd91   : >> { %8278 = vrot.lane.b32.xlu0 %v14641_v32, %s9919_s22 }
 0xd93   : >> { %8280 = vrot.lane.b32.xlu1 %v8033_v9, %s9919_s22 }
 0xd95   : >> { %8325 = vrot.lane.b32.xlu0 %v14633_v22, %s9920_s25 }
 0xd97   : >> { %8327 = vrot.lane.b32.xlu1 %v14638_v16, %s9920_s25 }
 0xd99   : >> { %8329 = vrot.lane.b32.xlu0 %v14641_v32, %s9920_s25 }
 0xd9b   : >> { %8331 = vrot.lane.b32.xlu1 %v8033_v9, %s9920_s25 }
 0xd9d   : >> { %8376 = vrot.lane.b32.xlu0 %v14633_v22, %s9921_s27 }
 0xd9f   : >> { %8378 = vrot.lane.b32.xlu1 %v14638_v16, %s9921_s27 }
 0xda1   : >> { %8380 = vrot.lane.b32.xlu0 %v14641_v32, %s9921_s27 }
 0xda3   : >> { %8382 = vrot.lane.b32.xlu1 %v8033_v9, %s9921_s27 }
 0xda5   : >> { %8427 = vrot.lane.b32.xlu0 %v14633_v22, %s9922_s12 }
 0xda7   : >> { %8429 = vrot.lane.b32.xlu1 %v14638_v16, %s9922_s12 }
 0xda9   : >> { %8431 = vrot.lane.b32.xlu0 %v14641_v32, %s9922_s12 }
 0xdab   : >> { %8433 = vrot.lane.b32.xlu1 %v8033_v9, %s9922_s12 }
 0xdae   : >> { %v8071_v11 = vpop.permute.xlu0 %8070 }
 0xdb0   : >> { %v8073_v1 = vpop.permute.xlu1 %8072 }
 0xdb2   : >> { %v8075_v2 = vpop.permute.xlu0 %8074 }
 0xdb3   : >> { %v14747_v10 = vsel %vm1151_vm2, %v8073_v1, %v8075_v2 }
 0xdb4   : >> { %v8077_v38 = vpop.permute.xlu1 %8076 }
 0xdb6   : >> { %v8122_v26 = vpop.permute.xlu0 %8121 }
 0xdb8   : >> { %v8124_v17 = vpop.permute.xlu1 %8123 }
 0xdba   : >> { %v14698_v20 = vpop.permute.xlu0 %8125 }
 0xdbc   : >> { %v14700_v47 = vpop.permute.xlu1 %8127 }
 0xdbe   : >> { %v14702_v35 = vpop.permute.xlu0 %8172 }
 0xdc0   : >> { %v14704_v34 = vpop.permute.xlu1 %8174 }
 0xdc2   : >> { %v14706_v18 = vpop.permute.xlu0 %8176 }
 0xdc4   : >> { %v14708_v62 = vpop.permute.xlu1 %8178 }
 0xdc6   : >> { %v14710_v46 = vpop.permute.xlu0 %8223 }
 0xdc8   : >> { %v14712_v3 = vpop.permute.xlu1 %8225 }
 0xdcc   : >> { %v8230_v57 = vpop.permute.xlu1 %8229 }
 0xdd0   : >> { %v14716_v13 = vpop.permute.xlu1 %8276 }
 0xe00   : >> { %v7961_v14 = vpop.xlane.xlu0 %7960 }
 0xe04   : >> { %v14714_v28 = vpop.permute.xlu0 %8227 }
 0xe08   : >> { %v8275_v60 = vpop.permute.xlu0 %8274 }
 0xe0c   : >> { %v14718_v43 = vpop.permute.xlu0 %8278 }
 0xe0f   : >> { %v7967_v36 = vpop.xlane.xlu1 %7966 }
 0xe10   : >> { %v7968_v52 = vmax.f32 %v7961_v14, %v7967_v36  ;;  %v8326_v53 = vpop.permute.xlu0 %8325  ;;  %v8082_v14 = vsel %vm1151_vm2, %v8075_v2, %v8077_v38  ;;  %v14755_v36 = vsel %vm1250_vm3, %v8122_v26, %v8124_v17  ;;  %v8133_v2 = vsel %vm1250_vm3, %v14698_v20, %v14700_v47 }
 0xe11   : >> { %v14778_v38 = vsel %vm1349_vm4, %v14704_v34, %v14706_v18  ;;  %v14791_v47 = vsel %vm1448_vm5, %v14712_v3, %v14714_v28 }
 0xe12   : >> { %v7969_v6 = vrot.slane %v7968_v52, 4 }
 0xe13   : >> { %v8281_v63 = vpop.permute.xlu1 %8280 }
 0xe14   : >> { %v7970_v56 = vmax.f32 %v7968_v52, %v7969_v6  ;;  %v8330_v40 = vpop.permute.xlu0 %8329  ;;  %v14763_v52 = vsub.s32 7, %v8041_v39 }
 0xe16   : >> { %v7971_v29 = vrot.slane %v7970_v56, 2 }
 0xe17   : >> { %v8328_v50 = vpop.permute.xlu1 %8327 }
 0xe18   : >> { %v7972_v23 = vmax.f32 %v7970_v56, %v7971_v29  ;;  %v8377_v49 = vpop.permute.xlu0 %8376 }
 0xe1a   : >> { %v7973_v55 = vrot.slane %v7972_v23, 1 }
 0xe1b   : >> { %v8332_v7 = vpop.permute.xlu1 %8331 }
 0xe1c   : >> { %v7974_v5 = vmax.f32 %v7972_v23, %v7973_v55  ;;  %v8381_v4 = vpop.permute.xlu0 %8380 }
 0xe1e   : >> { %v14721_v21 = vmax.f32 %v15367_v33, %v7974_v5  }
 0xe1f   : >> { %v8379_v37 = vpop.permute.xlu1 %8378 }
 0xe20   : >> { %v7976_v0 = vsub.f32 %v14583_v42, %v14721_v21  ;;  %v7977_v12 = vsub.f32 %v14593_v30, %v14721_v21  ;;  %v7978_v59 = vsub.f32 %v14588_v58, %v14721_v21  ;;  %v14739_v42 = vsub.s32 5, %v8041_v39  ;;  %v8428_v29 = vpop.permute.xlu0 %8427 }
 0xe21   : >> { %v14741_v30 = vsub.s32 6, %v8041_v39  ;;  %v14744_v58 = vsel %vm1151_vm2, %v8071_v11, %v8073_v1  ;;  %v8513_v61 = vsub.f32 %v15367_v33, %v14721_v21  ;;  %v7981_v9 = vsub.f32 %v14613_v54, %v14721_v21 }
 0xe22   : >> { %v7986_v31 = vmul.f32 1.442695, %v7976_v0  ;;  %v7988_v27 = vmul.f32 1.442695, %v7977_v12  ;;  %v7990_v25 = vmul.f32 1.442695, %v7978_v59  ;;  %v7982_v11 = vsub.f32 %v14618_v24, %v14721_v21 }
 0xe23   : >> { %v8383_v51 = vpop.permute.xlu1 %8382  ;;  %v14761_v1 = vsel %vm1250_vm3, %v8124_v17, %v14698_v20  ;;  %v7983_v56 = vsub.f32 %v14598_v48, %v14721_v21  ;;  %v8514_v54 = vmul.f32 1.442695, %v8513_v61  ;;  %v14773_v24 = vsel %vm1349_vm4, %v14702_v35, %v14704_v34 }
 0xe24   : >> { %9681 = vpow2.f32 %v7986_v31  ;;  %v7996_v26 = vmul.f32 1.442695, %v7981_v9  ;;  %v8184_v48 = vsel %vm1349_vm4, %v14706_v18, %v14708_v62  ;;  %v14786_v17 = vsel %vm1448_vm5, %v14710_v46, %v14712_v3 }
 0xe25   : >> { %9683 = vpow2.f32 %v7988_v27  ;;  %v7998_v20 = vmul.f32 1.442695, %v7982_v11  ;;  %v8235_v35 = vsel %vm1448_vm5, %v14714_v28, %v8230_v57  ;;  %v14797_v34 = vsel %vm1547_vm6, %v8275_v60, %v14716_v13 }
 0xe26   : >> { %9685 = vpow2.f32 %v7990_v25  ;;  %v8000_v23 = vmul.f32 1.442695, %v7983_v56  ;;  %v14802_v18 = vsel %vm1547_vm6, %v14716_v13, %v14718_v43  ;;  %v8286_v62 = vsel %vm1547_vm6, %v14718_v43, %v8281_v63 }
 0xe27   : >> { %v8430_v6 = vpop.permute.xlu1 %8429  ;;  %9687 = vpow2.f32 %v8514_v54  ;;  %v14807_v46 = vsel %vm1646_vm7, %v8326_v53, %v8328_v50  ;;  %v14810_v28 = vsel %vm1646_vm7, %v8328_v50, %v8330_v40  ;;  %v14813_v57 = vsel %vm1646_vm7, %v8330_v40, %v8332_v7  ;;  %v8432_v53 = vpop.permute.xlu0 %8431 }
 0xe28   : >> { %v14816_v60 = vsel %vm1745_vm8, %v8377_v49, %v8379_v37  ;;  %9689 = vpow2.f32 %v7996_v26  ;;  %v14821_v19 = vsel %vm1745_vm8, %v8379_v37, %v8381_v4  ;;  %v14824_v43 = vsel %vm1745_vm8, %v8381_v4, %v8383_v51 }
 0xe29   : >> { %9691 = vpow2.f32 %v7998_v20  ;;  %v14827_v63 = vsel %vm15368_vm1, %v8428_v29, %v8430_v6  ;;  %v14834_v55 = vsel %vm15369_vm9, %v8430_v6, %v8432_v53 }
 0xe2a   : >> { %9693 = vpow2.f32 %v8000_v23 }
 0xe2b   : >> { %v8434_v3 = vpop.permute.xlu1 %8433 }
 0xe2c   : >> { %v14837_v7 = vsel %vm15370_vm11, %v8432_v53, %v8434_v3 }
 0xe2e   : >> { %v14818_v13 = vpop.eup %9681 }
 0xe2f   : >> { %v14829_v50 = vpop.eup %9683  ;;  %v8043_v40 = vrot.slane %v14818_v13, %v14729_v41  ;;  %v8094_v39 = vrot.slane %v14818_v13, %v14731_v44  ;;  %v8145_v37 = vrot.slane %v14818_v13, %v14733_v15 }
 0xe30   : >> { %v14839_v5 = vpop.eup %9685  ;;  %v8047_v49 = vrot.slane %v14829_v50, %v14729_v41  ;;  %v8098_v33 = vrot.slane %v14829_v50, %v14731_v44  ;;  %v8149_v51 = vrot.slane %v14829_v50, %v14733_v15  ;;  %v8200_v11 = vrot.slane %v14829_v50, %v14735_v45 }
 0xe31   : >> { %v8051_v0 = vrot.slane %v14839_v5, %v14729_v41  ;;  %v8102_v12 = vrot.slane %v14839_v5, %v14731_v44  ;;  %v8153_v59 = vrot.slane %v14839_v5, %v14733_v15  ;;  %v8204_v31 = vrot.slane %v14839_v5, %v14735_v45 }
 0xe32   : >> { %v8255_v27 = vrot.slane %v14839_v5, %v14737_v8  ;;  %v8060_v25 = vmul.f32 %v8043_v40, %v14633_v22  ;;  %v8061_v4 = vmul.f32 %v8047_v49, %v14638_v16  ;;  %v8196_v44 = vrot.slane %v14818_v13, %v14735_v45 }
 0xe33   : >> { %v8062_v61 = vmul.f32 %v8051_v0, %v14641_v32  ;;  %v8113_v9 = vmul.f32 %v8102_v12, %v8082_v14  ;;  %v8164_v6 = vmul.f32 %v8153_v59, %v8133_v2  ;;  %v8306_v56 = vrot.slane %v14839_v5, %v14739_v42  ;;  %v14873_v14 = vpop.eup %9687 }
 0xe34   : >> { %v8111_v22 = vmul.f32 %v8094_v39, %v14744_v58  ;;  %v8112_v16 = vmul.f32 %v8098_v33, %v14747_v10  ;;  %v8215_v29 = vmul.f32 %v8204_v31, %v8184_v48  ;;  %v8266_v15 = vmul.f32 %v8255_v27, %v8235_v35  ;;  %v9690_v2 = vpop.eup %9689 }
 0xe35   : >> { %v8118_v54 = vadd.f32 %v8113_v9, %v8062_v61  ;;  %v8162_v32 = vmul.f32 %v8145_v37, %v14755_v36  ;;  %v8163_v23 = vmul.f32 %v8149_v51, %v14761_v1  ;;  %v8247_v45 = vrot.slane %v14818_v13, %v14737_v8  ;;  %v9692_v48 = vpop.eup %9691 }
 0xe36   : >> { %v8116_v26 = vadd.f32 %v8111_v22, %v8060_v25  ;;  %v8117_v20 = vadd.f32 %v8112_v16, %v8061_v4  ;;  %v8251_v58 = vrot.slane %v14829_v50, %v14737_v8  ;;  %v8298_v10 = vrot.slane %v14818_v13, %v14739_v42  ;;  %v9694_v49 = vpop.eup %9693 }
 0xe37   : >> { %v8169_v3 = vadd.f32 %v8164_v6, %v8118_v54  ;;  %v8302_v36 = vrot.slane %v14829_v50, %v14739_v42  ;;  %v8213_v40 = vmul.f32 %v8196_v44, %v14773_v24  ;;  %v8214_v1 = vmul.f32 %v8200_v11, %v14778_v38 }
 0xe38   : >> { %v8167_v35 = vadd.f32 %v8162_v32, %v8116_v26  ;;  %v8168_v53 = vadd.f32 %v8163_v23, %v8117_v20  ;;  %v8317_v33 = vmul.f32 %v8306_v56, %v8286_v62  ;;  %v8264_v37 = vmul.f32 %v8247_v45, %v14786_v17 }
 0xe39   : >> { %v8220_v39 = vadd.f32 %v8215_v29, %v8169_v3  ;;  %v8349_v8 = vrot.slane %v14818_v13, %v14741_v30  ;;  %v8265_v59 = vmul.f32 %v8251_v58, %v14791_v47  ;;  %v8353_v42 = vrot.slane %v14829_v50, %v14741_v30 }
 0xe3a   : >> { %v8218_v0 = vadd.f32 %v8213_v40, %v8167_v35  ;;  %v8219_v12 = vadd.f32 %v8214_v1, %v8168_v53  ;;  %v8315_v24 = vmul.f32 %v8298_v10, %v14797_v34  ;;  %v8316_v38 = vmul.f32 %v8302_v36, %v14802_v18 }
 0xe3b   : >> { %v8271_v31 = vadd.f32 %v8266_v15, %v8220_v39  ;;  %v8357_v62 = vrot.slane %v14839_v5, %v14741_v30  ;;  %v8400_v25 = vrot.slane %v14818_v13, %v14763_v52  ;;  %v8404_v4 = vrot.slane %v14829_v50, %v14763_v52 }
 0xe3c   : >> { %v8269_v27 = vadd.f32 %v8264_v37, %v8218_v0  ;;  %v8270_v17 = vadd.f32 %v8265_v59, %v8219_v12  ;;  %v8366_v51 = vmul.f32 %v8349_v8, %v14807_v46  ;;  %v8408_v34 = vrot.slane %v14839_v5, %v14763_v52 }
 0xe3d   : >> { %v8322_v47 = vadd.f32 %v8317_v33, %v8271_v31  ;;  %v8368_v61 = vmul.f32 %v8357_v62, %v14813_v57  ;;  %v8367_v30 = vmul.f32 %v8353_v42, %v14810_v28  ;;  %v8451_v44 = vrot.slane %v9690_v2, %v14729_v41  ;;  %v15373_v33 = vld [vmem:[#allocation97_spill] sm:$0xff] }
 0xe3e   : >> { %v8320_v18 = vadd.f32 %v8315_v24, %v8269_v27  ;;  %v8321_v9 = vadd.f32 %v8316_v38, %v8270_v17  ;;  %v8455_v6 = vrot.slane %v9692_v48, %v14729_v41  ;;  %v8478_v56 = vadd.f32 %v9690_v2, %v14818_v13  ;;  %v15371_v13 = vld [vmem:[#allocation99_spill] sm:$0xff] }
 0xe3f   : >> { %v8373_v11 = vadd.f32 %v8368_v61, %v8322_v47  ;;  %v8485_v22 = vadd.f32 %v9692_v48, %v14829_v50  ;;  %v8417_v57 = vmul.f32 %v8400_v25, %v14816_v60  ;;  %v8418_v54 = vmul.f32 %v8404_v4, %v14821_v19  ;;  %v15376_v4 = vld [vmem:[#allocation94_spill] sm:$0xff] }
 0xe40   : >> { %v8371_v16 = vadd.f32 %v8366_v51, %v8320_v18  ;;  %v8372_v46 = vadd.f32 %v8367_v30, %v8321_v9  ;;  %v8419_v52 = vmul.f32 %v8408_v34, %v14824_v43  ;;  %v8468_v29 = vmul.f32 %v8451_v44, %v14827_v63  ;;  %v15372_v43 = vld [vmem:[#allocation98_spill] sm:$0xff] }
 0xe41   : >> { %v8479_v28 = vrot.slane %v8478_v56, 4  ;;  %v8486_v15 = vrot.slane %v8485_v22, 4  ;;  %v8469_v20 = vmul.f32 %v8455_v6, %v14834_v55  ;;  %v8516_v23 = vmul.f32 %v15371_v13, %v14873_v14 }
 0xe42   : >> { %v8422_v32 = vadd.f32 %v8417_v57, %v8371_v16  ;;  %v8423_v26 = vadd.f32 %v8418_v54, %v8372_v46  ;;  %v8424_v50 = vadd.f32 %v8419_v52, %v8373_v11  ;;  %v8459_v60 = vrot.slane %v9694_v49, %v14729_v41 }
 0xe43   : >> { %v8480_v45 = vadd.f32 %v8479_v28, %v8478_v56  ;;  %v8487_v2 = vadd.f32 %v8486_v15, %v8485_v22  ;;  %v8517_v58 = vmul.f32 %v15372_v43, %v14873_v14  ;;  %v8492_v63 = vadd.f32 %v9694_v49, %v14839_v5  ;;  %v15374_v49 = vld [vmem:[#allocation96_spill] sm:$0xff] }
 0xe44   : >> { %v8473_v3 = vadd.f32 %v8468_v29, %v8422_v32  ;;  %v8474_v19 = vadd.f32 %v8469_v20, %v8423_v26  ;;  %v8470_v48 = vmul.f32 %v8459_v60, %v14837_v7  ;;  %v8518_v41 = vmul.f32 %v15373_v33, %v14873_v14  ;;  %v15375_v7 = vld [vmem:[#allocation95_spill] sm:$0xff] }
 0xe45   : >> { %v8481_v10 = vrot.slane %v8480_v45, 2  ;;  %v8488_v36 = vrot.slane %v8487_v2, 2  ;;  %v8493_v53 = vrot.slane %v8492_v63, 4  ;;  %v8526_v31 = vmul.f32 %v15374_v49, %v14873_v14 }
 0xe46   : >> { %v8521_v55 = vadd.f32 %v8516_v23, %v8473_v3   ;;  %v8522_v35 = vadd.f32 %v8517_v58, %v8474_v19   ;;  %v8475_v39 = vadd.f32 %v8470_v48, %v8424_v50  ;;  %v8527_v24 = vmul.f32 %v15375_v7, %v14873_v14 }
 0xe47   : >> { %v8482_v40 = vadd.f32 %v8481_v10, %v8480_v45  ;;  %v8489_v1 = vadd.f32 %v8488_v36, %v8487_v2  ;;  %v8494_v37 = vadd.f32 %v8493_v53, %v8492_v63  ;;  %v8528_v47 = vmul.f32 %v15376_v4, %v14873_v14 }
 0xe48   : >> { %v8523_v12 = vadd.f32 %v8518_v41, %v8475_v39   ;;  %v15381_v32 = vmov %v8522_v35  ;;  %v15383_v46 = vmov %v14721_v21 }
 0xe49   : >> { %v8483_v8 = vrot.slane %v8482_v40, 1  ;;  %v8490_v0 = vrot.slane %v8489_v1, 1  ;;  %v8495_v59 = vrot.slane %v8494_v37, 2 }
 0xe4b   : >> { %v8484_v42 = vadd.f32 %v8483_v8, %v8482_v40  ;;  %v8491_v5 = vadd.f32 %v8490_v0, %v8489_v1  ;;  %v8496_v38 = vadd.f32 %v8495_v59, %v8494_v37  ;;  %v15380_v40 = vmov %v8523_v12 }
 0xe4c   : >> { %v15382_v1 = vmov %v8521_v55 }
 0xe4d   : >> { %v8531_v62 = vadd.f32 %v8526_v31, %v8484_v42   ;;  %v8532_v27 = vadd.f32 %v8527_v24, %v8491_v5   ;;  %v8497_v17 = vrot.slane %v8496_v38, 1  ;;  %4475 = sbr.rel (!%p4473_p6) target bundleno = 1760 (0x6e0), region = 153 }
 0xe4f   : >> { %v8498_v25 = vadd.f32 %v8497_v17, %v8496_v38  ;;  %v15378_v50 = vmov %v8532_v27  ;;  %v15379_v31 = vmov %v8531_v62  ;;  %v8536_v14 = vadd.f32 (%p4473_p6), 1e-08, %v8531_v62 }
 0xe50   : > { %v8537_v61 = vadd.f32 (%p4473_p6), 1e-08, %v8532_v27 }
 0xe51   : >> { %v8533_v51 = vadd.f32 %v8528_v47, %v8498_v25   ;;  %9695 = vrcp.f32 (%p4473_p6), %v8536_v14 }
 0xe52   : > { %9697 = vrcp.f32 (%p4473_p6), %v8537_v61 }
 0xe53   : >> { %v15377_v6 = vmov %v8533_v51  ;;  %v8538_v34 = vadd.f32 (%p4473_p6), 1e-08, %v8533_v51 }
 0xe55   : > { %9699 = vrcp.f32 %v8538_v34 }
 0xe5b   : > { %v9696_v18 = vpop.eup %9695 }
 0xe5c   : > { %v9698_v9 = vpop.eup %9697  ;;  %v8542_v30 = vmul.f32 %v9696_v18, %v8521_v55 }
 0xe5d   : > { %v8543_v11 = vmul.f32 %v9698_v9, %v8522_v35 }
 0xe5f   : > { %v9700_v44 = vpop.eup %9699  ;;  %v8547_v22 = vcombine.low %v8542_v30, %v8543_v11 }
 0xe60   : > { %v8544_v56 = vmul.f32 %v9700_v44, %v8523_v12 }
 0xe61   : > { %8549 = vst [vmem:[%s10010_s14] sm:$0x77] %v8547_v22 }
 0xe62   : > { %8550 = vst [vmem:[%s10010_s14 + $0x8] sm:$0x7] %v8544_v56 }
 0xe63 PF: > { %s21_s17 = sadd.s32 1, %s9799_s17  }
 0xe64   : > { %p18_p7 = scmp.ge.s32.totalorder %s21_s17, 4  }
 0xe66   :  { %20 = sbr.rel (!%p18_p7) target bundleno = 1 (0x1), region = 164 }

</bundles_post_ra>
